<compile_context>
chip_gen: v7x
topology: tpu7x:2x2x1
jax: 0.10.0
libtpu: 0.0.40
codegen_flags: <defaults>
</compile_context>

<pallas_src>
import jax
import jax.numpy as jnp
from jax import lax
from jax.experimental import pallas as pl
from jax.experimental.pallas import tpu as pltpu

EPS = 1e-3        # BN eps from norm_cfg
POOL = 7          # AvgPool2d(7, 1, 3), count_include_pad=True
KSIZE = 11        # h_kernel_size == v_kernel_size == 11
RP = POOL // 2    # 3
RK = KSIZE // 2   # 5
WPL = 8           # left W-halo (8 -> sublane-aligned interior stores)

# Rows of the packed per-channel parameter table (NPVEC, C):
_WH0 = 0                  # rows 0..10  : h_conv depthwise taps
_WV0 = KSIZE              # rows 11..21 : v_conv depthwise taps
_BH = 2 * KSIZE           # 22 : h_conv bias
_BV = 2 * KSIZE + 1       # 23 : v_conv bias
_T1 = 2 * KSIZE + 2       # 24 : conv1 folded-BN shift (scale folded into wmat[0])
_T2 = 2 * KSIZE + 3       # 25 : conv2 folded-BN shift (scale folded into wmat[1])
NPVEC = 2 * KSIZE + 4


def _sigmoid(x, *, approx):
    # 1 / (1 + exp(-x)) with the reciprocal on the EUP slot (not a VPU divide).
    return pl.reciprocal(1.0 + jnp.exp(-x), approx=approx)


def caa_kernel(x_ref, pvec_ref, wmat_ref, o_ref, pp_ref, ph_ref, hp_ref, vp_ref):
    H, W, C = x_ref.shape[1:]
    PPW = WPL + W + RP      # pool scratch width
    HPW = WPL + W + RK      # h_conv scratch width

    # ---- AvgPool2d(7, stride=1, pad=3), count_include_pad=True (/49 always).
    # Separable box filter over a zero halo-padded copy of x.
    # Zero only the halo strips; the interior is overwritten by the x store.
    pp_ref[pl.ds(0, RP), :, :] = jnp.zeros((RP, PPW, C), jnp.float32)        # top rows
    pp_ref[pl.ds(RP + H, RP), :, :] = jnp.zeros((RP, PPW, C), jnp.float32)   # bottom rows
    pp_ref[pl.ds(RP, H), pl.ds(0, WPL), :] = jnp.zeros((H, WPL, C), jnp.float32)      # left cols
    pp_ref[pl.ds(RP, H), pl.ds(WPL + W, RP), :] = jnp.zeros((H, RP, C), jnp.float32)  # right cols
    pp_ref[pl.ds(RP, H), pl.ds(WPL, W), :] = x_ref[0]

    acc = pp_ref[pl.ds(0, H), :, :]
    for k in range(1, POOL):                                    # H taps (free row offsets)
        acc = acc + pp_ref[pl.ds(k, H), :, :]
    ph_ref[...] = acc
    pooled = ph_ref[:, pl.ds(WPL - RP, W), :]
    for k in range(1, POOL):                                    # W taps (sublane offsets)
        pooled = pooled + ph_ref[:, pl.ds(WPL - RP + k, W), :]
    pooled = pooled * (1.0 / float(POOL * POOL))

    # ---- conv1: 1x1 conv (no bias) + folded BN (scale pre-folded into W) + SiLU
    y = jnp.dot(pooled.reshape(H * W, C), wmat_ref[0],
                preferred_element_type=jnp.float32)
    y = y + pvec_ref[_T1:_T1 + 1, :]
    y = y * _sigmoid(y, approx=True)
    y = y.reshape(H, W, C)

    # ---- h_conv: depthwise (1, 11), pad (0, 5), bias -----------------------
    hp_ref[:, pl.ds(0, WPL), :] = jnp.zeros((H, WPL, C), jnp.float32)        # left cols
    hp_ref[:, pl.ds(WPL + W, RK), :] = jnp.zeros((H, RK, C), jnp.float32)    # right cols
    hp_ref[:, pl.ds(WPL, W), :] = y
    z = hp_ref[:, pl.ds(WPL - RK, W), :] * pvec_ref[_WH0:_WH0 + 1, :]
    for k in range(1, KSIZE):
        z = z + (hp_ref[:, pl.ds(WPL - RK + k, W), :]
                 * pvec_ref[_WH0 + k:_WH0 + k + 1, :])
    z = z + pvec_ref[_BH:_BH + 1, :]

    # ---- v_conv: depthwise (11, 1), pad (5, 0), bias -----------------------
    zero_rows = jnp.zeros((RK, W, C), jnp.float32)
    vp_ref[pl.ds(0, RK), :, :] = zero_rows             # top halo
    vp_ref[pl.ds(RK + H, RK), :, :] = zero_rows        # bottom halo
    vp_ref[pl.ds(RK, H), :, :] = z
    u = vp_ref[pl.ds(0, H), :, :] * pvec_ref[_WV0:_WV0 + 1, :]
    for k in range(1, KSIZE):                                   # H taps (free row offsets)
        u = u + (vp_ref[pl.ds(k, H), :, :]
                 * pvec_ref[_WV0 + k:_WV0 + k + 1, :])
    u = u + pvec_ref[_BV:_BV + 1, :]

    # ---- conv2: 1x1 conv (no bias) + folded BN (scale pre-folded into W) + SiLU
    v = jnp.dot(u.reshape(H * W, C), wmat_ref[1],
                preferred_element_type=jnp.float32)
    v = v + pvec_ref[_T2:_T2 + 1, :]
    v = v * _sigmoid(v, approx=True)

    # ---- attention factor, modulate input ----------------------------------
    attn = _sigmoid(v, approx=False).reshape(H, W, C)
    o_ref[0] = x_ref[0] * attn


def caa_pallas(x_nhwc, pvec, wmat):
    N, H, W, C = x_nhwc.shape
    grid_spec = pltpu.PrefetchScalarGridSpec(
        num_scalar_prefetch=0,
        grid=(N,),
        in_specs=[
            pl.BlockSpec((1, H, W, C), lambda n: (n, 0, 0, 0)),
            pl.BlockSpec((NPVEC, C), lambda n: (0, 0)),
            pl.BlockSpec((2, C, C), lambda n: (0, 0, 0)),
        ],
        out_specs=pl.BlockSpec((1, H, W, C), lambda n: (n, 0, 0, 0)),
        scratch_shapes=[
            pltpu.VMEM((H + 2 * RP, WPL + W + RP, C), jnp.float32),  # pool src (H+6, W+11, C)
            pltpu.VMEM((H, WPL + W + RP, C), jnp.float32),           # pool H-sum
            pltpu.VMEM((H, WPL + W + RK, C), jnp.float32),           # h_conv src (H, W+13, C)
            pltpu.VMEM((H + 2 * RK, W, C), jnp.float32),             # v_conv src (H+10, W, C)
        ],
    )
    return pl.pallas_call(
        caa_kernel,
        out_shape=jax.ShapeDtypeStruct((N, H, W, C), jnp.float32),
        grid_spec=grid_spec,
        compiler_params=pltpu.CompilerParams(
            dimension_semantics=("parallel",)),   # batch steps independent -> megacore on v7x
    )(x_nhwc, pvec, wmat)


# ------------------------- pure-JAX reference (NCHW) -------------------------
def _conv2d(x, w, b=None, padding=((0, 0), (0, 0)), groups=1):
    dn = lax.conv_dimension_numbers(x.shape, w.shape, ('NCHW', 'OIHW', 'NCHW'))
    y = lax.conv_general_dilated(x, w, (1, 1), padding,
                                 dimension_numbers=dn,
                                 feature_group_count=groups)
    if b is not None:
        y = y + b[None, :, None, None]
    return y


def _bn(x, g, b, m, v):
    return ((x - m[None, :, None, None]) / jnp.sqrt(v + EPS)[None, :, None, None]
            * g[None, :, None, None] + b[None, :, None, None])


def _silu(x):
    return x * jax.nn.sigmoid(x)


def caa_ref(x, P):
    C = x.shape[1]
    p = lax.reduce_window(x, 0.0, lax.add, (1, 1, POOL, POOL), (1, 1, 1, 1),
                          ((0, 0), (0, 0), (3, 3), (3, 3))) / float(POOL * POOL)
    y = _silu(_bn(_conv2d(p, P['w1']), P['g1'], P['b1'], P['m1'], P['v1']))
    y = _conv2d(y, P['wh'], P['bh'], padding=((0, 0), (5, 5)), groups=C)
    y = _conv2d(y, P['wv'], P['bv'], padding=((5, 5), (0, 0)), groups=C)
    y = _silu(_bn(_conv2d(y, P['w2']), P['g2'], P['b2'], P['m2'], P['v2']))
    return x * jax.nn.sigmoid(y)


if __name__ == "__main__":
    N, C, H, W = 2, 32, 16, 16
    key = jax.random.PRNGKey(0)
    ks = jax.random.split(key, 16)

    x = jax.random.normal(ks[0], (N, C, H, W), jnp.float32)

    P = dict(
        w1=0.2 * jax.random.normal(ks[1], (C, C, 1, 1), jnp.float32),
        g1=1.0 + 0.1 * jax.random.normal(ks[2], (C,), jnp.float32),
        b1=0.1 * jax.random.normal(ks[3], (C,), jnp.float32),
        m1=0.1 * jax.random.normal(ks[4], (C,), jnp.float32),
        v1=jax.random.uniform(ks[5], (C,), jnp.float32, 0.5, 1.5),
        wh=0.2 * jax.random.normal(ks[6], (C, 1, 1, KSIZE), jnp.float32),
        bh=0.1 * jax.random.normal(ks[7], (C,), jnp.float32),
        wv=0.2 * jax.random.normal(ks[8], (C, 1, KSIZE, 1), jnp.float32),
        bv=0.1 * jax.random.normal(ks[9], (C,), jnp.float32),
        w2=0.2 * jax.random.normal(ks[10], (C, C, 1, 1), jnp.float32),
        g2=1.0 + 0.1 * jax.random.normal(ks[11], (C,), jnp.float32),
        b2=0.1 * jax.random.normal(ks[12], (C,), jnp.float32),
        m2=0.1 * jax.random.normal(ks[13], (C,), jnp.float32),
        v2=jax.random.uniform(ks[14], (C,), jnp.float32, 0.5, 1.5),
    )

    # Kernel-side parameter packing: fold BN (inference) into scale/shift;
    # the per-output-channel scale is pre-multiplied into the 1x1 weight
    # matrices, leaving only the shift in the per-channel table.
    def fold_bn(g, b, m, v):
        s = g / jnp.sqrt(v + EPS)
        return s, b - m * s

    s1, t1 = fold_bn(P['g1'], P['b1'], P['m1'], P['v1'])
    s2, t2 = fold_bn(P['g2'], P['b2'], P['m2'], P['v2'])

    pvec = jnp.concatenate([
        P['wh'].reshape(C, KSIZE).T,          # rows 0..10  : wh[k, c]
        P['wv'].reshape(C, KSIZE).T,          # rows 11..21 : wv[k, c]
        P['bh'][None, :], P['bv'][None, :],   # rows 22, 23
        t1[None, :], t2[None, :],             # rows 24, 25
    ], axis=0).astype(jnp.float32)            # (NPVEC, C)
    assert pvec.shape == (NPVEC, C)

    wmat = jnp.stack([
        P['w1'].reshape(C, C).T * s1[None, :],   # (C_in, C_out), BN scale folded
        P['w2'].reshape(C, C).T * s2[None, :],
    ]).astype(jnp.float32)                       # (2, C, C)

    x_nhwc = jnp.transpose(x, (0, 2, 3, 1))
    out_nhwc = jax.block_until_ready(caa_pallas(x_nhwc, pvec, wmat))
    out = jnp.transpose(out_nhwc, (0, 3, 1, 2))

    ref = caa_ref(x, P)
    err = float(jnp.max(jnp.abs(out - ref)))
    assert err < 1e-3, f"max abs error too large: {err}"
    print("KERNEL_OK")
</pallas_src>

<mosaic_0001>
module attributes {stable_mosaic.version = 11 : i64} {
  func.func @caa_kernel(%arg0: i32, %arg1: memref<1x16x16x32xf32, #tpu.memory_space<vmem>>, %arg2: memref<26x32xf32, #tpu.memory_space<vmem>>, %arg3: memref<2x32x32xf32, #tpu.memory_space<vmem>>, %arg4: memref<1x16x16x32xf32, #tpu.memory_space<vmem>>, %arg5: memref<22x27x32xf32, #tpu.memory_space<vmem>>, %arg6: memref<16x27x32xf32, #tpu.memory_space<vmem>>, %arg7: memref<16x29x32xf32, #tpu.memory_space<vmem>>, %arg8: memref<26x16x32xf32, #tpu.memory_space<vmem>>) attributes {dimension_semantics = [#tpu.dimension_semantics<parallel>], iteration_bounds = array<i64: 2>, scalar_prefetch = 0 : i64, scratch_operands = 4 : i64, tpu.core_type = #tpu.core_type<tc>, window_params = [{transform_indices = @transform_0, window_bounds = array<i64: 1, 16, 16, 32>}, {pipeline_mode = #tpu.pipeline_mode<synchronous>, transform_indices = @transform_1, window_bounds = array<i64: 26, 32>}, {pipeline_mode = #tpu.pipeline_mode<synchronous>, transform_indices = @transform_2, window_bounds = array<i64: 2, 32, 32>}, {transform_indices = @transform_3, window_bounds = array<i64: 1, 16, 16, 32>}]} {
    %cst = arith.constant 0.000000e+00 : f32
    %0 = vector.broadcast %cst : f32 to vector<3x27x32xf32>
    %c0 = arith.constant 0 : index
    %c0_0 = arith.constant 0 : index
    %c0_1 = arith.constant 0 : index
    %1 = vector.load %arg5[%c0, %c0_0, %c0_1] : memref<22x27x32xf32, #tpu.memory_space<vmem>>, vector<3x27x32xf32>
    tpu.vector_store %arg5[%c0, %c0_0, %c0_1], %0 {strides = array<i32>} : memref<22x27x32xf32, #tpu.memory_space<vmem>>, vector<3x27x32xf32>,
    %cst_2 = arith.constant 0.000000e+00 : f32
    %2 = vector.broadcast %cst_2 : f32 to vector<3x27x32xf32>
    %c19 = arith.constant 19 : index
    %c0_3 = arith.constant 0 : index
    %c0_4 = arith.constant 0 : index
    %3 = vector.load %arg5[%c19, %c0_3, %c0_4] : memref<22x27x32xf32, #tpu.memory_space<vmem>>, vector<3x27x32xf32>
    tpu.vector_store %arg5[%c19, %c0_3, %c0_4], %2 {strides = array<i32>} : memref<22x27x32xf32, #tpu.memory_space<vmem>>, vector<3x27x32xf32>,
    %cst_5 = arith.constant 0.000000e+00 : f32
    %4 = vector.broadcast %cst_5 : f32 to vector<16x8x32xf32>
    %c3 = arith.constant 3 : index
    %c0_6 = arith.constant 0 : index
    %c0_7 = arith.constant 0 : index
    %5 = vector.load %arg5[%c3, %c0_6, %c0_7] : memref<22x27x32xf32, #tpu.memory_space<vmem>>, vector<16x8x32xf32>
    tpu.vector_store %arg5[%c3, %c0_6, %c0_7], %4 {strides = array<i32>} : memref<22x27x32xf32, #tpu.memory_space<vmem>>, vector<16x8x32xf32>,
    %cst_8 = arith.constant 0.000000e+00 : f32
    %6 = vector.broadcast %cst_8 : f32 to vector<16x3x32xf32>
    %c3_9 = arith.constant 3 : index
    %c24 = arith.constant 24 : index
    %c0_10 = arith.constant 0 : index
    %7 = vector.load %arg5[%c3_9, %c24, %c0_10] : memref<22x27x32xf32, #tpu.memory_space<vmem>>, vector<16x3x32xf32>
    tpu.vector_store %arg5[%c3_9, %c24, %c0_10], %6 {strides = array<i32>} : memref<22x27x32xf32, #tpu.memory_space<vmem>>, vector<16x3x32xf32>,
    %c0_11 = arith.constant 0 : index
    %c0_12 = arith.constant 0 : index
    %c0_13 = arith.constant 0 : index
    %c0_14 = arith.constant 0 : index
    %8 = vector.load %arg1[%c0_11, %c0_12, %c0_13, %c0_14] : memref<1x16x16x32xf32, #tpu.memory_space<vmem>>, vector<1x16x16x32xf32>
    %9 = vector.shape_cast %8 : vector<1x16x16x32xf32> to vector<16x16x32xf32>
    %c3_15 = arith.constant 3 : index
    %c8 = arith.constant 8 : index
    %c0_16 = arith.constant 0 : index
    %10 = vector.load %arg5[%c3_15, %c8, %c0_16] : memref<22x27x32xf32, #tpu.memory_space<vmem>>, vector<16x16x32xf32>
    tpu.vector_store %arg5[%c3_15, %c8, %c0_16], %9 {strides = array<i32>} : memref<22x27x32xf32, #tpu.memory_space<vmem>>, vector<16x16x32xf32>,
    %c0_17 = arith.constant 0 : index
    %c0_18 = arith.constant 0 : index
    %c0_19 = arith.constant 0 : index
    %11 = vector.load %arg5[%c0_17, %c0_18, %c0_19] : memref<22x27x32xf32, #tpu.memory_space<vmem>>, vector<16x27x32xf32>
    %c1 = arith.constant 1 : index
    %c0_20 = arith.constant 0 : index
    %c0_21 = arith.constant 0 : index
    %12 = vector.load %arg5[%c1, %c0_20, %c0_21] : memref<22x27x32xf32, #tpu.memory_space<vmem>>, vector<16x27x32xf32>
    %13 = arith.addf %11, %12 : vector<16x27x32xf32>
    %c2 = arith.constant 2 : index
    %c0_22 = arith.constant 0 : index
    %c0_23 = arith.constant 0 : index
    %14 = vector.load %arg5[%c2, %c0_22, %c0_23] : memref<22x27x32xf32, #tpu.memory_space<vmem>>, vector<16x27x32xf32>
    %15 = arith.addf %13, %14 : vector<16x27x32xf32>
    %c3_24 = arith.constant 3 : index
    %c0_25 = arith.constant 0 : index
    %c0_26 = arith.constant 0 : index
    %16 = vector.load %arg5[%c3_24, %c0_25, %c0_26] : memref<22x27x32xf32, #tpu.memory_space<vmem>>, vector<16x27x32xf32>
    %17 = arith.addf %15, %16 : vector<16x27x32xf32>
    %c4 = arith.constant 4 : index
    %c0_27 = arith.constant 0 : index
    %c0_28 = arith.constant 0 : index
    %18 = vector.load %arg5[%c4, %c0_27, %c0_28] : memref<22x27x32xf32, #tpu.memory_space<vmem>>, vector<16x27x32xf32>
    %19 = arith.addf %17, %18 : vector<16x27x32xf32>
    %c5 = arith.constant 5 : index
    %c0_29 = arith.constant 0 : index
    %c0_30 = arith.constant 0 : index
    %20 = vector.load %arg5[%c5, %c0_29, %c0_30] : memref<22x27x32xf32, #tpu.memory_space<vmem>>, vector<16x27x32xf32>
    %21 = arith.addf %19, %20 : vector<16x27x32xf32>
    %c6 = arith.constant 6 : index
    %c0_31 = arith.constant 0 : index
    %c0_32 = arith.constant 0 : index
    %22 = vector.load %arg5[%c6, %c0_31, %c0_32] : memref<22x27x32xf32, #tpu.memory_space<vmem>>, vector<16x27x32xf32>
    %23 = arith.addf %21, %22 : vector<16x27x32xf32>
    %c0_33 = arith.constant 0 : index
    %c0_34 = arith.constant 0 : index
    %c0_35 = arith.constant 0 : index
    %24 = vector.load %arg6[%c0_33, %c0_34, %c0_35] : memref<16x27x32xf32, #tpu.memory_space<vmem>>, vector<16x27x32xf32>
    tpu.vector_store %arg6[%c0_33, %c0_34, %c0_35], %23 {strides = array<i32>} : memref<16x27x32xf32, #tpu.memory_space<vmem>>, vector<16x27x32xf32>,
    %c0_36 = arith.constant 0 : index
    %c5_37 = arith.constant 5 : index
    %c0_38 = arith.constant 0 : index
    %25 = vector.load %arg6[%c0_36, %c5_37, %c0_38] : memref<16x27x32xf32, #tpu.memory_space<vmem>>, vector<16x16x32xf32>
    %c0_39 = arith.constant 0 : index
    %c6_40 = arith.constant 6 : index
    %c0_41 = arith.constant 0 : index
    %26 = vector.load %arg6[%c0_39, %c6_40, %c0_41] : memref<16x27x32xf32, #tpu.memory_space<vmem>>, vector<16x16x32xf32>
    %27 = arith.addf %25, %26 : vector<16x16x32xf32>
    %c0_42 = arith.constant 0 : index
    %c7 = arith.constant 7 : index
    %c0_43 = arith.constant 0 : index
    %28 = vector.load %arg6[%c0_42, %c7, %c0_43] : memref<16x27x32xf32, #tpu.memory_space<vmem>>, vector<16x16x32xf32>
    %29 = arith.addf %27, %28 : vector<16x16x32xf32>
    %c0_44 = arith.constant 0 : index
    %c8_45 = arith.constant 8 : index
    %c0_46 = arith.constant 0 : index
    %30 = vector.load %arg6[%c0_44, %c8_45, %c0_46] : memref<16x27x32xf32, #tpu.memory_space<vmem>>, vector<16x16x32xf32>
    %31 = arith.addf %29, %30 : vector<16x16x32xf32>
    %c0_47 = arith.constant 0 : index
    %c9 = arith.constant 9 : index
    %c0_48 = arith.constant 0 : index
    %32 = vector.load %arg6[%c0_47, %c9, %c0_48] : memref<16x27x32xf32, #tpu.memory_space<vmem>>, vector<16x16x32xf32>
    %33 = arith.addf %31, %32 : vector<16x16x32xf32>
    %c0_49 = arith.constant 0 : index
    %c10 = arith.constant 10 : index
    %c0_50 = arith.constant 0 : index
    %34 = vector.load %arg6[%c0_49, %c10, %c0_50] : memref<16x27x32xf32, #tpu.memory_space<vmem>>, vector<16x16x32xf32>
    %35 = arith.addf %33, %34 : vector<16x16x32xf32>
    %c0_51 = arith.constant 0 : index
    %c11 = arith.constant 11 : index
    %c0_52 = arith.constant 0 : index
    %36 = vector.load %arg6[%c0_51, %c11, %c0_52] : memref<16x27x32xf32, #tpu.memory_space<vmem>>, vector<16x16x32xf32>
    %37 = arith.addf %35, %36 : vector<16x16x32xf32>
    %cst_53 = arith.constant 0.0204081628 : f32
    %38 = vector.broadcast %cst_53 : f32 to vector<16x16x32xf32>
    %39 = arith.mulf %37, %38 : vector<16x16x32xf32>
    %40 = vector.shape_cast %39 : vector<16x16x32xf32> to vector<256x32xf32>
    %c0_54 = arith.constant 0 : index
    %c0_55 = arith.constant 0 : index
    %c0_56 = arith.constant 0 : index
    %41 = vector.load %arg3[%c0_54, %c0_55, %c0_56] : memref<2x32x32xf32, #tpu.memory_space<vmem>>, vector<1x32x32xf32>
    %42 = vector.shape_cast %41 : vector<1x32x32xf32> to vector<32x32xf32>
    %cst_57 = arith.constant dense<0.000000e+00> : vector<256x32xf32>
    %43 = tpu.matmul %40, %42, %cst_57 {dimension_numbers = #tpu.dot_dimension_numbers<[1], [0], [0], [1], [0, 0, 1, 1], [], []>} : vector<256x32xf32>, vector<32x32xf32>, vector<256x32xf32> -> vector<256x32xf32>
    %c24_58 = arith.constant 24 : index
    %c0_59 = arith.constant 0 : index
    %44 = vector.load %arg2[%c24_58, %c0_59] : memref<26x32xf32, #tpu.memory_space<vmem>>, vector<1x32xf32>
    %45 = vector.broadcast %44 : vector<1x32xf32> to vector<256x32xf32>
    %46 = arith.addf %43, %45 : vector<256x32xf32>
    %cst_60 = arith.constant 0.000000e+00 : f32
    %47 = vector.broadcast %cst_60 : f32 to vector<256x32xf32>
    %48 = arith.subf %47, %46 : vector<256x32xf32>
    %49 = math.exp %48 : vector<256x32xf32>
    %cst_61 = arith.constant 1.000000e+00 : f32
    %50 = vector.broadcast %cst_61 : f32 to vector<256x32xf32>
    %51 = arith.addf %50, %49 : vector<256x32xf32>
    %52 = tpu.reciprocal %51 {approx = true} : vector<256x32xf32> -> vector<256x32xf32>
    %53 = arith.mulf %46, %52 : vector<256x32xf32>
    %54 = vector.shape_cast %53 : vector<256x32xf32> to vector<16x16x32xf32>
    %cst_62 = arith.constant 0.000000e+00 : f32
    %55 = vector.broadcast %cst_62 : f32 to vector<16x8x32xf32>
    %c0_63 = arith.constant 0 : index
    %c0_64 = arith.constant 0 : index
    %c0_65 = arith.constant 0 : index
    %56 = vector.load %arg7[%c0_63, %c0_64, %c0_65] : memref<16x29x32xf32, #tpu.memory_space<vmem>>, vector<16x8x32xf32>
    tpu.vector_store %arg7[%c0_63, %c0_64, %c0_65], %55 {strides = array<i32>} : memref<16x29x32xf32, #tpu.memory_space<vmem>>, vector<16x8x32xf32>,
    %cst_66 = arith.constant 0.000000e+00 : f32
    %57 = vector.broadcast %cst_66 : f32 to vector<16x5x32xf32>
    %c0_67 = arith.constant 0 : index
    %c24_68 = arith.constant 24 : index
    %c0_69 = arith.constant 0 : index
    %58 = vector.load %arg7[%c0_67, %c24_68, %c0_69] : memref<16x29x32xf32, #tpu.memory_space<vmem>>, vector<16x5x32xf32>
    tpu.vector_store %arg7[%c0_67, %c24_68, %c0_69], %57 {strides = array<i32>} : memref<16x29x32xf32, #tpu.memory_space<vmem>>, vector<16x5x32xf32>,
    %c0_70 = arith.constant 0 : index
    %c8_71 = arith.constant 8 : index
    %c0_72 = arith.constant 0 : index
    %59 = vector.load %arg7[%c0_70, %c8_71, %c0_72] : memref<16x29x32xf32, #tpu.memory_space<vmem>>, vector<16x16x32xf32>
    tpu.vector_store %arg7[%c0_70, %c8_71, %c0_72], %54 {strides = array<i32>} : memref<16x29x32xf32, #tpu.memory_space<vmem>>, vector<16x16x32xf32>,
    %c0_73 = arith.constant 0 : index
    %c3_74 = arith.constant 3 : index
    %c0_75 = arith.constant 0 : index
    %60 = vector.load %arg7[%c0_73, %c3_74, %c0_75] : memref<16x29x32xf32, #tpu.memory_space<vmem>>, vector<16x16x32xf32>
    %c0_76 = arith.constant 0 : index
    %c0_77 = arith.constant 0 : index
    %61 = vector.load %arg2[%c0_76, %c0_77] : memref<26x32xf32, #tpu.memory_space<vmem>>, vector<1x32xf32>
    %62 = vector.shape_cast %61 : vector<1x32xf32> to vector<1x1x32xf32>
    %63 = vector.broadcast %62 : vector<1x1x32xf32> to vector<16x16x32xf32>
    %64 = arith.mulf %60, %63 : vector<16x16x32xf32>
    %c0_78 = arith.constant 0 : index
    %c4_79 = arith.constant 4 : index
    %c0_80 = arith.constant 0 : index
    %65 = vector.load %arg7[%c0_78, %c4_79, %c0_80] : memref<16x29x32xf32, #tpu.memory_space<vmem>>, vector<16x16x32xf32>
    %c1_81 = arith.constant 1 : index
    %c0_82 = arith.constant 0 : index
    %66 = vector.load %arg2[%c1_81, %c0_82] : memref<26x32xf32, #tpu.memory_space<vmem>>, vector<1x32xf32>
    %67 = vector.shape_cast %66 : vector<1x32xf32> to vector<1x1x32xf32>
    %68 = vector.broadcast %67 : vector<1x1x32xf32> to vector<16x16x32xf32>
    %69 = arith.mulf %65, %68 : vector<16x16x32xf32>
    %70 = arith.addf %64, %69 : vector<16x16x32xf32>
    %c0_83 = arith.constant 0 : index
    %c5_84 = arith.constant 5 : index
    %c0_85 = arith.constant 0 : index
    %71 = vector.load %arg7[%c0_83, %c5_84, %c0_85] : memref<16x29x32xf32, #tpu.memory_space<vmem>>, vector<16x16x32xf32>
    %c2_86 = arith.constant 2 : index
    %c0_87 = arith.constant 0 : index
    %72 = vector.load %arg2[%c2_86, %c0_87] : memref<26x32xf32, #tpu.memory_space<vmem>>, vector<1x32xf32>
    %73 = vector.shape_cast %72 : vector<1x32xf32> to vector<1x1x32xf32>
    %74 = vector.broadcast %73 : vector<1x1x32xf32> to vector<16x16x32xf32>
    %75 = arith.mulf %71, %74 : vector<16x16x32xf32>
    %76 = arith.addf %70, %75 : vector<16x16x32xf32>
    %c0_88 = arith.constant 0 : index
    %c6_89 = arith.constant 6 : index
    %c0_90 = arith.constant 0 : index
    %77 = vector.load %arg7[%c0_88, %c6_89, %c0_90] : memref<16x29x32xf32, #tpu.memory_space<vmem>>, vector<16x16x32xf32>
    %c3_91 = arith.constant 3 : index
    %c0_92 = arith.constant 0 : index
    %78 = vector.load %arg2[%c3_91, %c0_92] : memref<26x32xf32, #tpu.memory_space<vmem>>, vector<1x32xf32>
    %79 = vector.shape_cast %78 : vector<1x32xf32> to vector<1x1x32xf32>
    %80 = vector.broadcast %79 : vector<1x1x32xf32> to vector<16x16x32xf32>
    %81 = arith.mulf %77, %80 : vector<16x16x32xf32>
    %82 = arith.addf %76, %81 : vector<16x16x32xf32>
    %c0_93 = arith.constant 0 : index
    %c7_94 = arith.constant 7 : index
    %c0_95 = arith.constant 0 : index
    %83 = vector.load %arg7[%c0_93, %c7_94, %c0_95] : memref<16x29x32xf32, #tpu.memory_space<vmem>>, vector<16x16x32xf32>
    %c4_96 = arith.constant 4 : index
    %c0_97 = arith.constant 0 : index
    %84 = vector.load %arg2[%c4_96, %c0_97] : memref<26x32xf32, #tpu.memory_space<vmem>>, vector<1x32xf32>
    %85 = vector.shape_cast %84 : vector<1x32xf32> to vector<1x1x32xf32>
    %86 = vector.broadcast %85 : vector<1x1x32xf32> to vector<16x16x32xf32>
    %87 = arith.mulf %83, %86 : vector<16x16x32xf32>
    %88 = arith.addf %82, %87 : vector<16x16x32xf32>
    %c0_98 = arith.constant 0 : index
    %c8_99 = arith.constant 8 : index
    %c0_100 = arith.constant 0 : index
    %89 = vector.load %arg7[%c0_98, %c8_99, %c0_100] : memref<16x29x32xf32, #tpu.memory_space<vmem>>, vector<16x16x32xf32>
    %c5_101 = arith.constant 5 : index
    %c0_102 = arith.constant 0 : index
    %90 = vector.load %arg2[%c5_101, %c0_102] : memref<26x32xf32, #tpu.memory_space<vmem>>, vector<1x32xf32>
    %91 = vector.shape_cast %90 : vector<1x32xf32> to vector<1x1x32xf32>
    %92 = vector.broadcast %91 : vector<1x1x32xf32> to vector<16x16x32xf32>
    %93 = arith.mulf %89, %92 : vector<16x16x32xf32>
    %94 = arith.addf %88, %93 : vector<16x16x32xf32>
    %c0_103 = arith.constant 0 : index
    %c9_104 = arith.constant 9 : index
    %c0_105 = arith.constant 0 : index
    %95 = vector.load %arg7[%c0_103, %c9_104, %c0_105] : memref<16x29x32xf32, #tpu.memory_space<vmem>>, vector<16x16x32xf32>
    %c6_106 = arith.constant 6 : index
    %c0_107 = arith.constant 0 : index
    %96 = vector.load %arg2[%c6_106, %c0_107] : memref<26x32xf32, #tpu.memory_space<vmem>>, vector<1x32xf32>
    %97 = vector.shape_cast %96 : vector<1x32xf32> to vector<1x1x32xf32>
    %98 = vector.broadcast %97 : vector<1x1x32xf32> to vector<16x16x32xf32>
    %99 = arith.mulf %95, %98 : vector<16x16x32xf32>
    %100 = arith.addf %94, %99 : vector<16x16x32xf32>
    %c0_108 = arith.constant 0 : index
    %c10_109 = arith.constant 10 : index
    %c0_110 = arith.constant 0 : index
    %101 = vector.load %arg7[%c0_108, %c10_109, %c0_110] : memref<16x29x32xf32, #tpu.memory_space<vmem>>, vector<16x16x32xf32>
    %c7_111 = arith.constant 7 : index
    %c0_112 = arith.constant 0 : index
    %102 = vector.load %arg2[%c7_111, %c0_112] : memref<26x32xf32, #tpu.memory_space<vmem>>, vector<1x32xf32>
    %103 = vector.shape_cast %102 : vector<1x32xf32> to vector<1x1x32xf32>
    %104 = vector.broadcast %103 : vector<1x1x32xf32> to vector<16x16x32xf32>
    %105 = arith.mulf %101, %104 : vector<16x16x32xf32>
    %106 = arith.addf %100, %105 : vector<16x16x32xf32>
    %c0_113 = arith.constant 0 : index
    %c11_114 = arith.constant 11 : index
    %c0_115 = arith.constant 0 : index
    %107 = vector.load %arg7[%c0_113, %c11_114, %c0_115] : memref<16x29x32xf32, #tpu.memory_space<vmem>>, vector<16x16x32xf32>
    %c8_116 = arith.constant 8 : index
    %c0_117 = arith.constant 0 : index
    %108 = vector.load %arg2[%c8_116, %c0_117] : memref<26x32xf32, #tpu.memory_space<vmem>>, vector<1x32xf32>
    %109 = vector.shape_cast %108 : vector<1x32xf32> to vector<1x1x32xf32>
    %110 = vector.broadcast %109 : vector<1x1x32xf32> to vector<16x16x32xf32>
    %111 = arith.mulf %107, %110 : vector<16x16x32xf32>
    %112 = arith.addf %106, %111 : vector<16x16x32xf32>
    %c0_118 = arith.constant 0 : index
    %c12 = arith.constant 12 : index
    %c0_119 = arith.constant 0 : index
    %113 = vector.load %arg7[%c0_118, %c12, %c0_119] : memref<16x29x32xf32, #tpu.memory_space<vmem>>, vector<16x16x32xf32>
    %c9_120 = arith.constant 9 : index
    %c0_121 = arith.constant 0 : index
    %114 = vector.load %arg2[%c9_120, %c0_121] : memref<26x32xf32, #tpu.memory_space<vmem>>, vector<1x32xf32>
    %115 = vector.shape_cast %114 : vector<1x32xf32> to vector<1x1x32xf32>
    %116 = vector.broadcast %115 : vector<1x1x32xf32> to vector<16x16x32xf32>
    %117 = arith.mulf %113, %116 : vector<16x16x32xf32>
    %118 = arith.addf %112, %117 : vector<16x16x32xf32>
    %c0_122 = arith.constant 0 : index
    %c13 = arith.constant 13 : index
    %c0_123 = arith.constant 0 : index
    %119 = vector.load %arg7[%c0_122, %c13, %c0_123] : memref<16x29x32xf32, #tpu.memory_space<vmem>>, vector<16x16x32xf32>
    %c10_124 = arith.constant 10 : index
    %c0_125 = arith.constant 0 : index
    %120 = vector.load %arg2[%c10_124, %c0_125] : memref<26x32xf32, #tpu.memory_space<vmem>>, vector<1x32xf32>
    %121 = vector.shape_cast %120 : vector<1x32xf32> to vector<1x1x32xf32>
    %122 = vector.broadcast %121 : vector<1x1x32xf32> to vector<16x16x32xf32>
    %123 = arith.mulf %119, %122 : vector<16x16x32xf32>
    %124 = arith.addf %118, %123 : vector<16x16x32xf32>
    %c22 = arith.constant 22 : index
    %c0_126 = arith.constant 0 : index
    %125 = vector.load %arg2[%c22, %c0_126] : memref<26x32xf32, #tpu.memory_space<vmem>>, vector<1x32xf32>
    %126 = vector.shape_cast %125 : vector<1x32xf32> to vector<1x1x32xf32>
    %127 = vector.broadcast %126 : vector<1x1x32xf32> to vector<16x16x32xf32>
    %128 = arith.addf %124, %127 : vector<16x16x32xf32>
    %cst_127 = arith.constant 0.000000e+00 : f32
    %129 = vector.broadcast %cst_127 : f32 to vector<5x16x32xf32>
    %c0_128 = arith.constant 0 : index
    %c0_129 = arith.constant 0 : index
    %c0_130 = arith.constant 0 : index
    %130 = vector.load %arg8[%c0_128, %c0_129, %c0_130] : memref<26x16x32xf32, #tpu.memory_space<vmem>>, vector<5x16x32xf32>
    tpu.vector_store %arg8[%c0_128, %c0_129, %c0_130], %129 {strides = array<i32>} : memref<26x16x32xf32, #tpu.memory_space<vmem>>, vector<5x16x32xf32>,
    %c21 = arith.constant 21 : index
    %c0_131 = arith.constant 0 : index
    %c0_132 = arith.constant 0 : index
    %131 = vector.load %arg8[%c21, %c0_131, %c0_132] : memref<26x16x32xf32, #tpu.memory_space<vmem>>, vector<5x16x32xf32>
    tpu.vector_store %arg8[%c21, %c0_131, %c0_132], %129 {strides = array<i32>} : memref<26x16x32xf32, #tpu.memory_space<vmem>>, vector<5x16x32xf32>,
    %c5_133 = arith.constant 5 : index
    %c0_134 = arith.constant 0 : index
    %c0_135 = arith.constant 0 : index
    %132 = vector.load %arg8[%c5_133, %c0_134, %c0_135] : memref<26x16x32xf32, #tpu.memory_space<vmem>>, vector<16x16x32xf32>
    tpu.vector_store %arg8[%c5_133, %c0_134, %c0_135], %128 {strides = array<i32>} : memref<26x16x32xf32, #tpu.memory_space<vmem>>, vector<16x16x32xf32>,
    %c0_136 = arith.constant 0 : index
    %c0_137 = arith.constant 0 : index
    %c0_138 = arith.constant 0 : index
    %133 = vector.load %arg8[%c0_136, %c0_137, %c0_138] : memref<26x16x32xf32, #tpu.memory_space<vmem>>, vector<16x16x32xf32>
    %c11_139 = arith.constant 11 : index
    %c0_140 = arith.constant 0 : index
    %134 = vector.load %arg2[%c11_139, %c0_140] : memref<26x32xf32, #tpu.memory_space<vmem>>, vector<1x32xf32>
    %135 = vector.shape_cast %134 : vector<1x32xf32> to vector<1x1x32xf32>
    %136 = vector.broadcast %135 : vector<1x1x32xf32> to vector<16x16x32xf32>
    %137 = arith.mulf %133, %136 : vector<16x16x32xf32>
    %c1_141 = arith.constant 1 : index
    %c0_142 = arith.constant 0 : index
    %c0_143 = arith.constant 0 : index
    %138 = vector.load %arg8[%c1_141, %c0_142, %c0_143] : memref<26x16x32xf32, #tpu.memory_space<vmem>>, vector<16x16x32xf32>
    %c12_144 = arith.constant 12 : index
    %c0_145 = arith.constant 0 : index
    %139 = vector.load %arg2[%c12_144, %c0_145] : memref<26x32xf32, #tpu.memory_space<vmem>>, vector<1x32xf32>
    %140 = vector.shape_cast %139 : vector<1x32xf32> to vector<1x1x32xf32>
    %141 = vector.broadcast %140 : vector<1x1x32xf32> to vector<16x16x32xf32>
    %142 = arith.mulf %138, %141 : vector<16x16x32xf32>
    %143 = arith.addf %137, %142 : vector<16x16x32xf32>
    %c2_146 = arith.constant 2 : index
    %c0_147 = arith.constant 0 : index
    %c0_148 = arith.constant 0 : index
    %144 = vector.load %arg8[%c2_146, %c0_147, %c0_148] : memref<26x16x32xf32, #tpu.memory_space<vmem>>, vector<16x16x32xf32>
    %c13_149 = arith.constant 13 : index
    %c0_150 = arith.constant 0 : index
    %145 = vector.load %arg2[%c13_149, %c0_150] : memref<26x32xf32, #tpu.memory_space<vmem>>, vector<1x32xf32>
    %146 = vector.shape_cast %145 : vector<1x32xf32> to vector<1x1x32xf32>
    %147 = vector.broadcast %146 : vector<1x1x32xf32> to vector<16x16x32xf32>
    %148 = arith.mulf %144, %147 : vector<16x16x32xf32>
    %149 = arith.addf %143, %148 : vector<16x16x32xf32>
    %c3_151 = arith.constant 3 : index
    %c0_152 = arith.constant 0 : index
    %c0_153 = arith.constant 0 : index
    %150 = vector.load %arg8[%c3_151, %c0_152, %c0_153] : memref<26x16x32xf32, #tpu.memory_space<vmem>>, vector<16x16x32xf32>
    %c14 = arith.constant 14 : index
    %c0_154 = arith.constant 0 : index
    %151 = vector.load %arg2[%c14, %c0_154] : memref<26x32xf32, #tpu.memory_space<vmem>>, vector<1x32xf32>
    %152 = vector.shape_cast %151 : vector<1x32xf32> to vector<1x1x32xf32>
    %153 = vector.broadcast %152 : vector<1x1x32xf32> to vector<16x16x32xf32>
    %154 = arith.mulf %150, %153 : vector<16x16x32xf32>
    %155 = arith.addf %149, %154 : vector<16x16x32xf32>
    %c4_155 = arith.constant 4 : index
    %c0_156 = arith.constant 0 : index
    %c0_157 = arith.constant 0 : index
    %156 = vector.load %arg8[%c4_155, %c0_156, %c0_157] : memref<26x16x32xf32, #tpu.memory_space<vmem>>, vector<16x16x32xf32>
    %c15 = arith.constant 15 : index
    %c0_158 = arith.constant 0 : index
    %157 = vector.load %arg2[%c15, %c0_158] : memref<26x32xf32, #tpu.memory_space<vmem>>, vector<1x32xf32>
    %158 = vector.shape_cast %157 : vector<1x32xf32> to vector<1x1x32xf32>
    %159 = vector.broadcast %158 : vector<1x1x32xf32> to vector<16x16x32xf32>
    %160 = arith.mulf %156, %159 : vector<16x16x32xf32>
    %161 = arith.addf %155, %160 : vector<16x16x32xf32>
    %c5_159 = arith.constant 5 : index
    %c0_160 = arith.constant 0 : index
    %c0_161 = arith.constant 0 : index
    %162 = vector.load %arg8[%c5_159, %c0_160, %c0_161] : memref<26x16x32xf32, #tpu.memory_space<vmem>>, vector<16x16x32xf32>
    %c16 = arith.constant 16 : index
    %c0_162 = arith.constant 0 : index
    %163 = vector.load %arg2[%c16, %c0_162] : memref<26x32xf32, #tpu.memory_space<vmem>>, vector<1x32xf32>
    %164 = vector.shape_cast %163 : vector<1x32xf32> to vector<1x1x32xf32>
    %165 = vector.broadcast %164 : vector<1x1x32xf32> to vector<16x16x32xf32>
    %166 = arith.mulf %162, %165 : vector<16x16x32xf32>
    %167 = arith.addf %161, %166 : vector<16x16x32xf32>
    %c6_163 = arith.constant 6 : index
    %c0_164 = arith.constant 0 : index
    %c0_165 = arith.constant 0 : index
    %168 = vector.load %arg8[%c6_163, %c0_164, %c0_165] : memref<26x16x32xf32, #tpu.memory_space<vmem>>, vector<16x16x32xf32>
    %c17 = arith.constant 17 : index
    %c0_166 = arith.constant 0 : index
    %169 = vector.load %arg2[%c17, %c0_166] : memref<26x32xf32, #tpu.memory_space<vmem>>, vector<1x32xf32>
    %170 = vector.shape_cast %169 : vector<1x32xf32> to vector<1x1x32xf32>
    %171 = vector.broadcast %170 : vector<1x1x32xf32> to vector<16x16x32xf32>
    %172 = arith.mulf %168, %171 : vector<16x16x32xf32>
    %173 = arith.addf %167, %172 : vector<16x16x32xf32>
    %c7_167 = arith.constant 7 : index
    %c0_168 = arith.constant 0 : index
    %c0_169 = arith.constant 0 : index
    %174 = vector.load %arg8[%c7_167, %c0_168, %c0_169] : memref<26x16x32xf32, #tpu.memory_space<vmem>>, vector<16x16x32xf32>
    %c18 = arith.constant 18 : index
    %c0_170 = arith.constant 0 : index
    %175 = vector.load %arg2[%c18, %c0_170] : memref<26x32xf32, #tpu.memory_space<vmem>>, vector<1x32xf32>
    %176 = vector.shape_cast %175 : vector<1x32xf32> to vector<1x1x32xf32>
    %177 = vector.broadcast %176 : vector<1x1x32xf32> to vector<16x16x32xf32>
    %178 = arith.mulf %174, %177 : vector<16x16x32xf32>
    %179 = arith.addf %173, %178 : vector<16x16x32xf32>
    %c8_171 = arith.constant 8 : index
    %c0_172 = arith.constant 0 : index
    %c0_173 = arith.constant 0 : index
    %180 = vector.load %arg8[%c8_171, %c0_172, %c0_173] : memref<26x16x32xf32, #tpu.memory_space<vmem>>, vector<16x16x32xf32>
    %c19_174 = arith.constant 19 : index
    %c0_175 = arith.constant 0 : index
    %181 = vector.load %arg2[%c19_174, %c0_175] : memref<26x32xf32, #tpu.memory_space<vmem>>, vector<1x32xf32>
    %182 = vector.shape_cast %181 : vector<1x32xf32> to vector<1x1x32xf32>
    %183 = vector.broadcast %182 : vector<1x1x32xf32> to vector<16x16x32xf32>
    %184 = arith.mulf %180, %183 : vector<16x16x32xf32>
    %185 = arith.addf %179, %184 : vector<16x16x32xf32>
    %c9_176 = arith.constant 9 : index
    %c0_177 = arith.constant 0 : index
    %c0_178 = arith.constant 0 : index
    %186 = vector.load %arg8[%c9_176, %c0_177, %c0_178] : memref<26x16x32xf32, #tpu.memory_space<vmem>>, vector<16x16x32xf32>
    %c20 = arith.constant 20 : index
    %c0_179 = arith.constant 0 : index
    %187 = vector.load %arg2[%c20, %c0_179] : memref<26x32xf32, #tpu.memory_space<vmem>>, vector<1x32xf32>
    %188 = vector.shape_cast %187 : vector<1x32xf32> to vector<1x1x32xf32>
    %189 = vector.broadcast %188 : vector<1x1x32xf32> to vector<16x16x32xf32>
    %190 = arith.mulf %186, %189 : vector<16x16x32xf32>
    %191 = arith.addf %185, %190 : vector<16x16x32xf32>
    %c10_180 = arith.constant 10 : index
    %c0_181 = arith.constant 0 : index
    %c0_182 = arith.constant 0 : index
    %192 = vector.load %arg8[%c10_180, %c0_181, %c0_182] : memref<26x16x32xf32, #tpu.memory_space<vmem>>, vector<16x16x32xf32>
    %c21_183 = arith.constant 21 : index
    %c0_184 = arith.constant 0 : index
    %193 = vector.load %arg2[%c21_183, %c0_184] : memref<26x32xf32, #tpu.memory_space<vmem>>, vector<1x32xf32>
    %194 = vector.shape_cast %193 : vector<1x32xf32> to vector<1x1x32xf32>
    %195 = vector.broadcast %194 : vector<1x1x32xf32> to vector<16x16x32xf32>
    %196 = arith.mulf %192, %195 : vector<16x16x32xf32>
    %197 = arith.addf %191, %196 : vector<16x16x32xf32>
    %c23 = arith.constant 23 : index
    %c0_185 = arith.constant 0 : index
    %198 = vector.load %arg2[%c23, %c0_185] : memref<26x32xf32, #tpu.memory_space<vmem>>, vector<1x32xf32>
    %199 = vector.shape_cast %198 : vector<1x32xf32> to vector<1x1x32xf32>
    %200 = vector.broadcast %199 : vector<1x1x32xf32> to vector<16x16x32xf32>
    %201 = arith.addf %197, %200 : vector<16x16x32xf32>
    %202 = vector.shape_cast %201 : vector<16x16x32xf32> to vector<256x32xf32>
    %c1_186 = arith.constant 1 : index
    %c0_187 = arith.constant 0 : index
    %c0_188 = arith.constant 0 : index
    %203 = vector.load %arg3[%c1_186, %c0_187, %c0_188] : memref<2x32x32xf32, #tpu.memory_space<vmem>>, vector<1x32x32xf32>
    %204 = vector.shape_cast %203 : vector<1x32x32xf32> to vector<32x32xf32>
    %cst_189 = arith.constant dense<0.000000e+00> : vector<256x32xf32>
    %205 = tpu.matmul %202, %204, %cst_189 {dimension_numbers = #tpu.dot_dimension_numbers<[1], [0], [0], [1], [0, 0, 1, 1], [], []>} : vector<256x32xf32>, vector<32x32xf32>, vector<256x32xf32> -> vector<256x32xf32>
    %c25 = arith.constant 25 : index
    %c0_190 = arith.constant 0 : index
    %206 = vector.load %arg2[%c25, %c0_190] : memref<26x32xf32, #tpu.memory_space<vmem>>, vector<1x32xf32>
    %207 = vector.broadcast %206 : vector<1x32xf32> to vector<256x32xf32>
    %208 = arith.addf %205, %207 : vector<256x32xf32>
    %cst_191 = arith.constant 0.000000e+00 : f32
    %209 = vector.broadcast %cst_191 : f32 to vector<256x32xf32>
    %210 = arith.subf %209, %208 : vector<256x32xf32>
    %211 = math.exp %210 : vector<256x32xf32>
    %cst_192 = arith.constant 1.000000e+00 : f32
    %212 = vector.broadcast %cst_192 : f32 to vector<256x32xf32>
    %213 = arith.addf %212, %211 : vector<256x32xf32>
    %214 = tpu.reciprocal %213 {approx = true} : vector<256x32xf32> -> vector<256x32xf32>
    %215 = arith.mulf %208, %214 : vector<256x32xf32>
    %cst_193 = arith.constant 0.000000e+00 : f32
    %216 = vector.broadcast %cst_193 : f32 to vector<256x32xf32>
    %217 = arith.subf %216, %215 : vector<256x32xf32>
    %218 = math.exp %217 : vector<256x32xf32>
    %cst_194 = arith.constant 1.000000e+00 : f32
    %219 = vector.broadcast %cst_194 : f32 to vector<256x32xf32>
    %220 = arith.addf %219, %218 : vector<256x32xf32>
    %221 = tpu.reciprocal %220 : vector<256x32xf32> -> vector<256x32xf32>
    %222 = vector.shape_cast %221 : vector<256x32xf32> to vector<16x16x32xf32>
    %c0_195 = arith.constant 0 : index
    %c0_196 = arith.constant 0 : index
    %c0_197 = arith.constant 0 : index
    %c0_198 = arith.constant 0 : index
    %223 = vector.load %arg1[%c0_195, %c0_196, %c0_197, %c0_198] : memref<1x16x16x32xf32, #tpu.memory_space<vmem>>, vector<1x16x16x32xf32>
    %224 = vector.shape_cast %223 : vector<1x16x16x32xf32> to vector<16x16x32xf32>
    %225 = arith.mulf %224, %222 : vector<16x16x32xf32>
    %c0_199 = arith.constant 0 : index
    %c0_200 = arith.constant 0 : index
    %c0_201 = arith.constant 0 : index
    %c0_202 = arith.constant 0 : index
    %226 = vector.load %arg4[%c0_199, %c0_200, %c0_201, %c0_202] : memref<1x16x16x32xf32, #tpu.memory_space<vmem>>, vector<1x16x16x32xf32>
    %227 = vector.shape_cast %226 : vector<1x16x16x32xf32> to vector<16x16x32xf32>
    %228 = vector.shape_cast %225 : vector<16x16x32xf32> to vector<1x16x16x32xf32>
    tpu.vector_store %arg4[%c0_199, %c0_200, %c0_201, %c0_202], %228 {strides = array<i32>} : memref<1x16x16x32xf32, #tpu.memory_space<vmem>>, vector<1x16x16x32xf32>,
    return
  }
  func.func @transform_0(%arg0: i32) -> (i32, i32, i32, i32) {
    %c0_i32 = arith.constant 0 : i32
    %c0_i32_0 = arith.constant 0 : i32
    %c0_i32_1 = arith.constant 0 : i32
    %c0_i32_2 = arith.constant 0 : i32
    return %arg0, %c0_i32, %c0_i32_0, %c0_i32_1 : i32, i32, i32, i32
  }
  func.func @transform_1(%arg0: i32) -> (i32, i32) {
    %c0_i32 = arith.constant 0 : i32
    %c0_i32_0 = arith.constant 0 : i32
    %c0_i32_1 = arith.constant 0 : i32
    return %c0_i32, %c0_i32_0 : i32, i32
  }
  func.func @transform_2(%arg0: i32) -> (i32, i32, i32) {
    %c0_i32 = arith.constant 0 : i32
    %c0_i32_0 = arith.constant 0 : i32
    %c0_i32_1 = arith.constant 0 : i32
    %c0_i32_2 = arith.constant 0 : i32
    return %c0_i32, %c0_i32_0, %c0_i32_1 : i32, i32, i32
  }
  func.func @transform_3(%arg0: i32) -> (i32, i32, i32, i32) {
    %c0_i32 = arith.constant 0 : i32
    %c0_i32_0 = arith.constant 0 : i32
    %c0_i32_1 = arith.constant 0 : i32
    %c0_i32_2 = arith.constant 0 : i32
    return %arg0, %c0_i32, %c0_i32_0, %c0_i32_1 : i32, i32, i32, i32
  }
}

</mosaic_0001>

<bundles_post_ra>
// kernel: tpu_custom_call.1
= control target key start
LH: loop header
LB: loop body
LE: loop exit
PB: predicated region body
PF: predicated region fallthrough
CT: control target
= control target key end

     0   :  { %8 = vsyncpa [#allocation7], 0  ;;  %s9976_s0 = inlined_call_operand.hbm [shape: f32[2,16,16,32], index: 0, kind: input, shape index: {}]   ;;  %s9977_s1 = inlined_call_operand.hbm [shape: f32[26,32], index: 1, kind: input, shape index: {}]   ;;  %s9978_s2 = inlined_call_operand.hbm [shape: f32[2,32,32], index: 2, kind: input, shape index: {}]   ;;  %s9979_s3 = inlined_call_operand.hbm [shape: f32[2,16,16,32], index: 3, kind: output, shape index: {}]  }
   0x1   :  { %10 = vsyncpa [#allocation7 + $0x1], 0 }
   0x2   :  { %11 = vsyncpa [#allocation10], 0 }
   0x3   :  { %12 = vsyncpa [#allocation8], 0 }
   0x4   :  { %14 = vsyncpa [#allocation8 + $0x1], 0  ;;  %s6422_s12 = smov 0   ;;  %s6424_s13 = smov 0  }
   0x5   :  { %s6426_s14 = smov 0   ;;  %s6428_s15 = smov 0  }
   0x6 LB: > { %s6443_s16 = sadd.s32 4294967295, %s6391_s15   ;;  %s5410_s17 = sadd.s32 4294967294, %s6391_s15   ;;  %s6391_s15 = sphi %s6428_s15, %s10289_s15   ;;  %s6387_s14 = sphi %s6426_s14, %s10288_s14   ;;  %s6383_s13 = sphi %s6424_s13, %s10287_s13   ;;  %s6379_s12 = sphi %s6422_s12, %s10286_s12  }
   0x7   : > { %p40_p0 = scmp.ne.s32.totalorder %s6383_s13, %s6379_s12  ;;  %p9980_p1 = scmp.eq.s32.totalorder %s6443_s16, 0 }
   0x8   : > { %p112_p3 = scmp.eq.s32.totalorder %s5410_s17, 1  ;;  %p5411_p5 = scmp.ge.s32.totalorder %s6391_s15, 1 }
   0x9   : > { %p6452_p4 = por %p9980_p1, %p40_p0  ;;  %p119_p7 = scmp.lt.s32.totalorder %s6391_s15, 3 }
   0xa   : > { %p6457_p6 = por %p112_p3, %p40_p0  ;;  %s6393_s21 = smov [#allocation9]  }
   0xb   : > { %s10078_s18 = scalar_select %p6452_p4, 1, 0 }
   0xc   : > { %s10079_s19 = scalar_select %p6457_p6, 1, 0 }
   0xd   : > { %p6462_p8 = pnand %p5411_p5, %p119_p7  ;;  %s131_s22 = sshll.u32 %s6393_s21, 4  ;;  %s6466_s22 = int_to_ptr.vmem [resolvable:$true] %s131_s22 }
   0xe   : > { %s6394_s24 = smov [#allocation11]   ;;  %s6235_s28 = scalar_lea.hbm %s9977_s1, 512 }
   0xf   : > { %p5732_p9 = pneg %p6462_p8  ;;  %s144_s25 = sshll.u32 %s6394_s24, 4  ;;  %s6477_s25 = int_to_ptr.vmem [resolvable:$true] %s144_s25 }
  0x10   : > { %p6236_p12 = scmp.ne.s32.totalorder %s9977_s1, %s6235_s28  ;;  %p6242_p5 = scmp.lt.u32.totalorder %s6235_s28, %s9977_s1 }
  0x11   : > { %p6473_p11 = pnand %p5732_p9, %p9980_p1 }
  0x13   : > { %p6237_p13 = pneg %p6473_p11 }
  0x15   : > { %p6238_p0 = pnand %p6237_p13, %p6236_p12 }
  0x17   : > { %p6239_p3 = pneg %p6238_p0 }
  0x19   : > { %p6244_p7 = pnand %p6242_p5, %p6239_p3 }
  0x1b   : > { %6247 = shalt.err (!%p6244_p7)
}
  0x1c   : > { %s6248_s6 = scalar_lea.vmem %s6466_s22, 512  ;;  %p6256_p2 = scmp.lt.s32.totalorder %s6466_s22, %s6466_s22 }
  0x1d   : > { %p6249_p9 = scmp.ne.s32.totalorder %s6466_s22, %s6248_s6  ;;  %p6257_p12 = scmp.lt.s32.totalorder %s6248_s6, %s6248_s6 }
  0x1f   : > { %p6251_p10 = pnand %p6249_p9, %p6237_p13  ;;  %p6258_p0 = por %p6257_p12, %p6256_p2 }
  0x21   : > { %p6252_p1 = pneg %p6251_p10 }
  0x23   : > { %p6259_p6 = pnand %p6258_p0, %p6252_p1 }
  0x25   : > { %6262 = shalt.err (!%p6259_p6)
}
  0x26   : > { %s6395_s7 = smov 128   ;;  %s6396_s8 = smov 8  }
  0x27   : > { %5735 = dma.hbm_to_vmem [thread:$0]  (!%p6473_p11), %s9977_s1, 512, %s6466_s22, [#allocation10], %s6395_s7, %s6395_s7, %s6396_s8  }
  0x28   : > { %s6263_s21 = scalar_lea.hbm %s9978_s2, 1024 }
  0x29   : > { %p6264_p1 = scmp.ne.s32.totalorder %s9978_s2, %s6263_s21  ;;  %p6270_p10 = scmp.lt.u32.totalorder %s6263_s21, %s9978_s2 }
  0x2b   : > { %p6266_p2 = pnand %p6264_p1, %p6237_p13 }
  0x2d   : > { %p6267_p6 = pneg %p6266_p2 }
  0x2f   : > { %p6272_p3 = pnand %p6270_p10, %p6267_p6 }
  0x31   : > { %6275 = shalt.err (!%p6272_p3)
}
  0x32   : > { %s6276_s22 = scalar_lea.vmem %s6477_s25, 1024  ;;  %p6284_p12 = scmp.lt.s32.totalorder %s6477_s25, %s6477_s25 }
  0x33   : > { %p6277_p5 = scmp.ne.s32.totalorder %s6477_s25, %s6276_s22  ;;  %p6285_p0 = scmp.lt.s32.totalorder %s6276_s22, %s6276_s22 }
  0x35   : > { %p6279_p7 = pnand %p6277_p5, %p6237_p13  ;;  %p6286_p1 = por %p6285_p0, %p6284_p12 }
  0x37   : > { %p6280_p9 = pneg %p6279_p7 }
  0x39   : > { %p6287_p2 = pnand %p6286_p1, %p6280_p9 }
  0x3b   : > { %6290 = shalt.err (!%p6287_p2)
}
  0x3c   : > { %5738 = dma.hbm_to_vmem [thread:$0]  (!%p6473_p11), %s9978_s2, 1024, %s6477_s25, [#allocation10], %s6395_s7, %s6395_s7, %s6396_s8  }
  0x3d   : > { %s6538_s23 = sadd.s32 1, %s6391_s15   ;;  %s27_s4 = sadd.s32 1, %s6387_s14 }
  0x3e   : > { %s24_s5 = ssub.s32 %s6391_s15, %s6538_s23  ;;  %p34_p13 = scmp.ne.s32.totalorder %s6387_s14, %s6383_s13 }
  0x3f   : > { %p25_p6 = scmp.eq.s32.totalorder %s24_s5, 0  ;;  %p35_p10 = scmp.eq.s32.totalorder %s6391_s15, 0 }
  0x40   : > { %p10082_p3 = scmp.eq.s32.totalorder %s6443_s16, 1  ;;  %p5749_p7 = scmp.lt.s32.totalorder %s6391_s15, 2 }
  0x41   : > { %s6554_s9 = scalar_select %p25_p6, %s6387_s14, %s27_s4  }
  0x42   : > { %p6548_p5 = por %p10082_p3, %p34_p13  ;;  %p36_p9 = por %p35_p10, %p34_p13 }
  0x43   : > { %s158_s10 = sand.u32 1, %s6387_s14   ;;  %s5518_s25 = sshll.u32 %s6391_s15, 12 }
  0x44   : > { %s10083_s6 = scalar_select %p6548_p5, 1, 0 }
  0x45   : > { %s5415_s11 = sshll.u32 %s158_s10, 8  ;;  %s6561_s24 = scalar_lea.hbm %s9976_s0, %s5518_s25 }
  0x46   : > { %s162_s26 = scalar_lea.vmem [#allocation6], %s5415_s11  ;;  %p6565_p11 = pnand %p5749_p7, %p36_p9 }
  0x47   : > { %s169_s27 = sshll.u32 %s162_s26, 4  ;;  %s6569_s22 = scalar_lea.sflag [#allocation7], %s158_s10  ;;  %s6563_s27 = int_to_ptr.vmem [resolvable:$true] %s169_s27 }
  0x48   : > { %s6291_s29 = scalar_lea.hbm %s6561_s24, 4096  ;;  %p6293_p0 = pneg %p6565_p11 }
  0x49   : > { %p6292_p12 = scmp.ne.s32.totalorder %s6561_s24, %s6291_s29  ;;  %s6296_s5 = scalar_lea.hbm %s9976_s0, 8192 }
  0x4a   : > { %p6297_p13 = scmp.lt.u32.totalorder %s6561_s24, %s9976_s0  ;;  %p6298_p6 = scmp.lt.u32.totalorder %s6296_s5, %s6291_s29 }
  0x4b   : > { %p6294_p1 = pnand %p6293_p0, %p6292_p12  ;;  %p6300_p3 = scmp.lt.u32.totalorder %s6291_s29, %s6561_s24 }
  0x4c   : > { %p6299_p10 = por %p6298_p6, %p6297_p13 }
  0x4d   : > { %p6295_p2 = pneg %p6294_p1 }
  0x4e   : > { %p6301_p7 = por %p6300_p3, %p6299_p10 }
  0x50   : > { %p6302_p9 = pnand %p6301_p7, %p6295_p2 }
  0x52   : > { %6305 = shalt.err (!%p6302_p9)
}
  0x53   : > { %s6306_s10 = scalar_lea.vmem %s6563_s27, 4096  ;;  %s6397_s17 = smov [#allocation6]  }
  0x54   : > { %p6307_p12 = scmp.ne.s32.totalorder %s6563_s27, %s6306_s10  ;;  %s6311_s21 = sshll.u32 %s6397_s17, 4  ;;  %s6312_s21 = int_to_ptr.vmem [resolvable:$false] %s6311_s21 }
  0x55   : > { %s6313_s26 = scalar_lea.vmem %s6312_s21, 8192  ;;  %p6314_p4 = scmp.lt.s32.totalorder %s6563_s27, %s6312_s21 }
  0x56   : > { %p6309_p1 = pnand %p6307_p12, %p6293_p0  ;;  %p6315_p13 = scmp.lt.s32.totalorder %s6313_s26, %s6306_s10 }
  0x58   : > { %p6310_p5 = pneg %p6309_p1  ;;  %p6316_p6 = por %p6315_p13, %p6314_p4 }
  0x5a   : > { %p6317_p10 = pnand %p6316_p6, %p6310_p5 }
  0x5c   : > { %6320 = shalt.err (!%p6317_p10)
}
  0x5d   : > { %5742 = dma.hbm_to_vmem [thread:$0]  (!%p6565_p11), %s6561_s24, 4096, %s6563_s27, %s6569_s22, %s6395_s7, %s6395_s7, %s6396_s8  }
  0x5e   : > { %181 = sbr.rel (%p6462_p8) target bundleno = 1166 (0x48e), region = 32 }
  0x65   : > { %s6603_s29 = sand.u32 1, %s6383_s13   ;;  %p10085_p4 = scmp.ne.s32.totalorder %s10078_s18, 0 }
  0x66   : > { %s5419_s30 = sshll.u32 %s6603_s29, 8  ;;  %s184_s4 = scalar_lea.sflag [#allocation7], %s6603_s29 }
  0x67   : > { %s6609_s28 = scalar_lea.vmem [#allocation6], %s5419_s30 }
  0x68   : > { %6366 = dma.done.wait (%p10085_p4), %s184_s4, 4096  }
  0x69   : > { %6368 = vsyncadd (%p10085_p4), %s184_s4, 4294963200  ;;  %p10086_p5 = scmp.eq.s32.totalorder %s6443_s16, 0 }
  0x6b   : > { %6370 = dma.done.wait (%p10086_p5), [#allocation10], 1536   ;;  %p10087_p8 = pmov %p10086_p5 }
  0x6c   : > { %vm218_vm0 = vcmask 261120   ;;  %vm222_vm1 = vcmask 256000   ;;  %v6398_v0 = vmov 0.0   ;;  %v1691_v1 = vld [vmem:[#allocation11] sm:$0xff]  ;;  %v1692_v2 = vld [vmem:[#allocation11 + $0x8] sm:$0xff]  ;;  %v1693_v3 = vld [vmem:[#allocation11 + $0x10] sm:$0xff] }
  0x6d   : > { %6372 = vsyncadd (%p10087_p8), [#allocation10], 4294965760  ;;  %219 = vst.msk [vmem:[#allocation2] sm:$0xff] %vm218_vm0, %v6398_v0  ;;  %v5704_v4 = vpack.c.bf16 %v1692_v2, %v1691_v1  ;;  %v1694_v5 = vld [vmem:[#allocation11 + $0x18] sm:$0xff]  ;;  %v278_v6 = vld [vmem:[%s6609_s28] sm:$0xff]  ;;  %vm2229_vm2 = vcmask 258048  }
  0x6e   : > { %220 = vst.msk [vmem:[#allocation2 + $0x8] sm:$0xff] %vm218_vm0, %v6398_v0  ;;  %221 = vst.msk [vmem:[#allocation2 + $0x10] sm:$0xff] %vm218_vm0, %v6398_v0  ;;  %v279_v7 = vld [vmem:[%s6609_s28 + $0x8] sm:$0xff]  ;;  %v5708_v8 = vpack.c.bf16 %v1694_v5, %v1693_v3  ;;  %v280_v9 = vld [vmem:[%s6609_s28 + $0x10] sm:$0xff]  ;;  %s9713_s18 = scalar_lea.vmem [#allocation12], %s5419_s30  ;;  %s5519_s20 = sshll.u32 %s6443_s16, 12 }
  0x6f   : > { %224 = vst.msk [vmem:[#allocation2 + $0x20] sm:$0xff] %vm218_vm0, %v6398_v0  ;;  %225 = vst.msk [vmem:[#allocation2 + $0x28] sm:$0xff] %vm218_vm0, %v6398_v0  ;;  %v281_v10 = vld [vmem:[%s6609_s28 + $0x18] sm:$0xff]  ;;  %v282_v11 = vld [vmem:[%s6609_s28 + $0x20] sm:$0xff]  ;;  %5705 = vmatprep.subr.bf16.mxu0 %v5704_v4  ;;  %s5318_s7 = sshll.u32 %s9713_s18, 4  ;;  %s9926_s27 = scalar_lea.hbm %s9979_s3, %s5519_s20  ;;  %s9928_s7 = int_to_ptr.vmem [resolvable:$true] %s5318_s7 }
  0x70   : > { %226 = vst.msk [vmem:[#allocation2 + $0x30] sm:$0xff] %vm218_vm0, %v6398_v0  ;;  %228 = vst.msk [vmem:[#allocation2 + $0x40] sm:$0xff] %vm218_vm0, %v6398_v0  ;;  %v283_v12 = vld [vmem:[%s6609_s28 + $0x28] sm:$0xff]  ;;  %v284_v13 = vld [vmem:[%s6609_s28 + $0x30] sm:$0xff]  ;;  %5707 = vmatpush3.bf16.msra.mxu0 %v5704_v4  ;;  %s5305_s16 = scalar_lea.sflag [#allocation8], %s6603_s29  ;;  %s6321_s22 = scalar_lea.vmem %s9928_s7, 4096 }
  0x71   : > { %229 = vst.msk [vmem:[#allocation2 + $0x48] sm:$0xff] %vm218_vm0, %v6398_v0  ;;  %230 = vst.msk [vmem:[#allocation2 + $0x50] sm:$0xff] %vm218_vm0, %v6398_v0  ;;  %v285_v14 = vld [vmem:[%s6609_s28 + $0x38] sm:$0xff]  ;;  %5709 = vmatprep.subr.bf16.mxu0 %v5708_v8  ;;  %p6322_p11 = scmp.ne.s32.totalorder %s9928_s7, %s6321_s22  ;;  %p10283_p0 = scmp.ne.s32.totalorder %s10083_s6, 0 }
  0x72   : > { %246 = vst.msk [vmem:[#allocation2 + $0x60] sm:$0xff] %vm218_vm0, %v6398_v0  ;;  %247 = vst.msk [vmem:[#allocation2 + $0x80] sm:$0xff] %vm218_vm0, %v6398_v0  ;;  %s6399_s5 = smov [#allocation12]  }
  0x73   : > { %248 = vst.msk [vmem:[#allocation2 + $0xa0] sm:$0xff] %vm218_vm0, %v6398_v0  ;;  %249 = vst.msk [vmem:[#allocation2 + $0xc0] sm:$0xff] %vm218_vm0, %v6398_v0  ;;  %p6323_p2 = pnand %p6322_p11, %p10283_p0  ;;  %s6325_s11 = sshll.u32 %s6399_s5, 4  ;;  %s6326_s11 = int_to_ptr.vmem [resolvable:$false] %s6325_s11 }
  0x74   : > { %233 = vst.msk [vmem:[#allocation2 + $0x260] sm:$0xff] %vm218_vm0, %v6398_v0  ;;  %234 = vst.msk [vmem:[#allocation2 + $0x268] sm:$0xff] %vm218_vm0, %v6398_v0  ;;  %v342_v15 = vld [vmem:[#allocation2] sm:$0xff]  ;;  %5711 = vmatpush3.bf16.msra.mxu0 %v5708_v8  ;;  %s6327_s25 = scalar_lea.vmem %s6326_s11, 8192  ;;  %p6328_p7 = scmp.lt.s32.totalorder %s9928_s7, %s6326_s11 }
  0x75   : > { %235 = vst.msk [vmem:[#allocation2 + $0x270] sm:$0xff] %vm218_vm0, %v6398_v0  ;;  %237 = vst.msk [vmem:[#allocation2 + $0x280] sm:$0xff] %vm218_vm0, %v6398_v0  ;;  %v343_v16 = vld [vmem:[#allocation2 + $0x8] sm:$0xff]  ;;  %v344_v17 = vld [vmem:[#allocation2 + $0x10] sm:$0xff]  ;;  %p6324_p3 = pneg %p6323_p2  ;;  %p6329_p9 = scmp.lt.s32.totalorder %s6327_s25, %s6321_s22 }
  0x76   : > { %238 = vst.msk [vmem:[#allocation2 + $0x288] sm:$0xff] %vm218_vm0, %v6398_v0  ;;  %239 = vst.msk [vmem:[#allocation2 + $0x290] sm:$0xff] %vm218_vm0, %v6398_v0  ;;  %v407_v18 = vld [vmem:[#allocation2 + $0x20] sm:$0xff]  ;;  %v408_v19 = vld [vmem:[#allocation2 + $0x28] sm:$0xff] }
  0x77   : > { %241 = vst.msk [vmem:[#allocation2 + $0x2a0] sm:$0xff] %vm218_vm0, %v6398_v0  ;;  %242 = vst.msk [vmem:[#allocation2 + $0x2a8] sm:$0xff] %vm218_vm0, %v6398_v0  ;;  %v409_v20 = vld [vmem:[#allocation2 + $0x30] sm:$0xff]  ;;  %v471_v21 = vadd.f32 %v407_v18, %v342_v15  ;;  %v472_v22 = vadd.f32 %v408_v19, %v343_v16  ;;  %v536_v24 = vld [vmem:[#allocation2 + $0x40] sm:$0xff]  ;;  %p6330_p12 = por %p6329_p9, %p6328_p7 }
  0x78   : > { %243 = vst.msk [vmem:[#allocation2 + $0x2b0] sm:$0xff] %vm218_vm0, %v6398_v0  ;;  %250 = vst.msk [vmem:[#allocation2 + $0xe0] sm:$0xff] %vm218_vm0, %v6398_v0  ;;  %v473_v23 = vadd.f32 %v409_v20, %v344_v17  ;;  %v537_v25 = vld [vmem:[#allocation2 + $0x48] sm:$0xff]  ;;  %v538_v26 = vld [vmem:[#allocation2 + $0x50] sm:$0xff]  ;;  %v475_v29 = vadd.f32 %v536_v24, %v407_v18 }
  0x79   : > { %251 = vst.msk [vmem:[#allocation2 + $0x100] sm:$0xff] %vm218_vm0, %v6398_v0  ;;  %252 = vst.msk [vmem:[#allocation2 + $0x120] sm:$0xff] %vm218_vm0, %v6398_v0  ;;  %v664_v27 = vld [vmem:[#allocation2 + $0x60] sm:$0xff]  ;;  %v476_v30 = vadd.f32 %v537_v25, %v408_v19  ;;  %v477_v31 = vadd.f32 %v538_v26, %v409_v20  ;;  %v600_v32 = vadd.f32 %v536_v24, %v471_v21  ;;  %p6331_p1 = pnand %p6330_p12, %p6324_p3 }
  0x7a   : > { %253 = vst.msk [vmem:[#allocation2 + $0x140] sm:$0xff] %vm218_vm0, %v6398_v0  ;;  %254 = vst.msk [vmem:[#allocation2 + $0x160] sm:$0xff] %vm218_vm0, %v6398_v0  ;;  %v6819_v28 = vld [vmem:[#allocation2 + $0x80] sm:$0xff]  ;;  %v601_v33 = vadd.f32 %v537_v25, %v472_v22  ;;  %v602_v34 = vadd.f32 %v538_v26, %v473_v23  ;;  %v6823_v38 = vadd.f32 %v664_v27, %v536_v24 }
  0x7b   : > { %255 = vst.msk [vmem:[#allocation2 + $0x180] sm:$0xff] %vm218_vm0, %v6398_v0  ;;  %256 = vst.msk [vmem:[#allocation2 + $0x1a0] sm:$0xff] %vm218_vm0, %v6398_v0  ;;  %v6821_v35 = vld [vmem:[#allocation2 + $0xa0] sm:$0xff]  ;;  %v604_v43 = vadd.f32 %v664_v27, %v475_v29  ;;  %v6830_v44 = vadd.f32 %v6819_v28, %v664_v27  ;;  %v728_v46 = vadd.f32 %v664_v27, %v600_v32 }
  0x7c   : > { %257 = vst.msk [vmem:[#allocation2 + $0x1c0] sm:$0xff] %vm218_vm0, %v6398_v0  ;;  %258 = vst.msk [vmem:[#allocation2 + $0x1e0] sm:$0xff] %vm218_vm0, %v6398_v0  ;;  %v6834_v45 = vadd.f32 %v6821_v35, %v6819_v28  ;;  %v6847_v54 = vld [vmem:[#allocation2 + $0xc0] sm:$0xff] }
  0x7d   : > { %259 = vst.msk [vmem:[#allocation2 + $0x200] sm:$0xff] %vm218_vm0, %v6398_v0  ;;  %260 = vst.msk [vmem:[#allocation2 + $0x220] sm:$0xff] %vm218_vm0, %v6398_v0  ;;  %v732_v58 = vadd.f32 %v6819_v28, %v604_v43  ;;  %v857_v60 = vadd.f32 %v6819_v28, %v728_v46 }
  0x7e   : > { %261 = vst.msk [vmem:[#allocation2 + $0x240] sm:$0xff] %vm218_vm0, %v6398_v0  ;;  %2213 = vst.msk [vmem:[#allocation4] sm:$0xff] %vm218_vm0, %v6398_v0 }
  0x7f   : > { %2214 = vst.msk [vmem:[#allocation4 + $0x20] sm:$0xff] %vm218_vm0, %v6398_v0  ;;  %2215 = vst.msk [vmem:[#allocation4 + $0x40] sm:$0xff] %vm218_vm0, %v6398_v0  ;;  %v6871_v15 = vld [vmem:[#allocation2 + $0xe0] sm:$0xff] }
  0x80   : > { %2216 = vst.msk [vmem:[#allocation4 + $0x60] sm:$0xff] %vm218_vm0, %v6398_v0  ;;  %2217 = vst.msk [vmem:[#allocation4 + $0x80] sm:$0xff] %vm218_vm0, %v6398_v0 }
  0x81   : > { %2218 = vst.msk [vmem:[#allocation4 + $0xa0] sm:$0xff] %vm218_vm0, %v6398_v0  ;;  %2219 = vst.msk [vmem:[#allocation4 + $0xc0] sm:$0xff] %vm218_vm0, %v6398_v0 }
  0x82   : > { %2220 = vst.msk [vmem:[#allocation4 + $0xe0] sm:$0xff] %vm218_vm0, %v6398_v0  ;;  %2221 = vst.msk [vmem:[#allocation4 + $0x100] sm:$0xff] %vm218_vm0, %v6398_v0 }
  0x83   : > { %2222 = vst.msk [vmem:[#allocation4 + $0x120] sm:$0xff] %vm218_vm0, %v6398_v0  ;;  %2223 = vst.msk [vmem:[#allocation4 + $0x140] sm:$0xff] %vm218_vm0, %v6398_v0 }
  0x84   : > { %2224 = vst.msk [vmem:[#allocation4 + $0x160] sm:$0xff] %vm218_vm0, %v6398_v0  ;;  %2225 = vst.msk [vmem:[#allocation4 + $0x180] sm:$0xff] %vm218_vm0, %v6398_v0 }
  0x85   : > { %2226 = vst.msk [vmem:[#allocation4 + $0x1a0] sm:$0xff] %vm218_vm0, %v6398_v0  ;;  %2227 = vst.msk [vmem:[#allocation4 + $0x1c0] sm:$0xff] %vm218_vm0, %v6398_v0 }
  0x86   : > { %2228 = vst.msk [vmem:[#allocation4 + $0x1e0] sm:$0xff] %vm218_vm0, %v6398_v0  ;;  %3346 = vst.msk [vmem:[#allocation5] sm:$0xff] %vm218_vm0, %v6398_v0 }
  0x87   : > { %3347 = vst.msk [vmem:[#allocation5 + $0x8] sm:$0xff] %vm218_vm0, %v6398_v0  ;;  %3348 = vst.msk [vmem:[#allocation5 + $0x10] sm:$0xff] %vm218_vm0, %v6398_v0 }
  0x88   : > { %3349 = vst.msk [vmem:[#allocation5 + $0x18] sm:$0xff] %vm218_vm0, %v6398_v0  ;;  %3350 = vst.msk [vmem:[#allocation5 + $0x20] sm:$0xff] %vm218_vm0, %v6398_v0 }
  0x89   : > { %3351 = vst.msk [vmem:[#allocation5 + $0x28] sm:$0xff] %vm218_vm0, %v6398_v0  ;;  %3352 = vst.msk [vmem:[#allocation5 + $0x30] sm:$0xff] %vm218_vm0, %v6398_v0 }
  0x8a   : > { %3353 = vst.msk [vmem:[#allocation5 + $0x38] sm:$0xff] %vm218_vm0, %v6398_v0  ;;  %3354 = vst.msk [vmem:[#allocation5 + $0x40] sm:$0xff] %vm218_vm0, %v6398_v0 }
  0x8b   : > { %3355 = vst.msk [vmem:[#allocation5 + $0x48] sm:$0xff] %vm218_vm0, %v6398_v0  ;;  %3357 = vst.msk [vmem:[#allocation5 + $0x150] sm:$0xff] %vm218_vm0, %v6398_v0 }
  0x8c   : > { %3358 = vst.msk [vmem:[#allocation5 + $0x158] sm:$0xff] %vm218_vm0, %v6398_v0  ;;  %3359 = vst.msk [vmem:[#allocation5 + $0x160] sm:$0xff] %vm218_vm0, %v6398_v0 }
  0x8d   : > { %3360 = vst.msk [vmem:[#allocation5 + $0x168] sm:$0xff] %vm218_vm0, %v6398_v0  ;;  %3361 = vst.msk [vmem:[#allocation5 + $0x170] sm:$0xff] %vm218_vm0, %v6398_v0 }
  0x8e   : > { %3362 = vst.msk [vmem:[#allocation5 + $0x178] sm:$0xff] %vm218_vm0, %v6398_v0  ;;  %3363 = vst.msk [vmem:[#allocation5 + $0x180] sm:$0xff] %vm218_vm0, %v6398_v0 }
  0x8f   : > { %3364 = vst.msk [vmem:[#allocation5 + $0x188] sm:$0xff] %vm218_vm0, %v6398_v0  ;;  %3365 = vst.msk [vmem:[#allocation5 + $0x190] sm:$0xff] %vm218_vm0, %v6398_v0 }
  0x90   : > { %3366 = vst.msk [vmem:[#allocation5 + $0x198] sm:$0xff] %vm218_vm0, %v6398_v0  ;;  %310 = vst.msk [vmem:[#allocation2 + $0x68] sm:$0xff] %vm218_vm0, %v278_v6  ;;  %v286_v6 = vld [vmem:[%s6609_s28 + $0x40] sm:$0xff] }
  0x91   : > { %223 = vst.msk [vmem:[#allocation2 + $0x18] sm:$0x7] %vm222_vm1, %v6398_v0  ;;  %227 = vst.msk [vmem:[#allocation2 + $0x38] sm:$0x7] %vm222_vm1, %v6398_v0 }
  0x92   : > { %231 = vst.msk [vmem:[#allocation2 + $0x58] sm:$0x7] %vm222_vm1, %v6398_v0  ;;  %262 = vst.msk [vmem:[#allocation2 + $0x78] sm:$0x7] %vm222_vm1, %v6398_v0 }
  0x93   : > { %263 = vst.msk [vmem:[#allocation2 + $0x98] sm:$0x7] %vm222_vm1, %v6398_v0  ;;  %264 = vst.msk [vmem:[#allocation2 + $0xb8] sm:$0x7] %vm222_vm1, %v6398_v0 }
  0x94   : > { %265 = vst.msk [vmem:[#allocation2 + $0xd8] sm:$0x7] %vm222_vm1, %v6398_v0  ;;  %236 = vst.msk [vmem:[#allocation2 + $0x278] sm:$0x7] %vm222_vm1, %v6398_v0 }
  0x95   : > { %240 = vst.msk [vmem:[#allocation2 + $0x298] sm:$0x7] %vm222_vm1, %v6398_v0  ;;  %244 = vst.msk [vmem:[#allocation2 + $0x2b8] sm:$0x7] %vm222_vm1, %v6398_v0 }
  0x96   : > { %266 = vst.msk [vmem:[#allocation2 + $0xf8] sm:$0x7] %vm222_vm1, %v6398_v0  ;;  %267 = vst.msk [vmem:[#allocation2 + $0x118] sm:$0x7] %vm222_vm1, %v6398_v0 }
  0x97   : > { %268 = vst.msk [vmem:[#allocation2 + $0x138] sm:$0x7] %vm222_vm1, %v6398_v0  ;;  %269 = vst.msk [vmem:[#allocation2 + $0x158] sm:$0x7] %vm222_vm1, %v6398_v0  ;;  %v6825_v39 = vld [vmem:[#allocation2 + $0x68] sm:$0xff] }
  0x98   : > { %270 = vst.msk [vmem:[#allocation2 + $0x178] sm:$0x7] %vm222_vm1, %v6398_v0  ;;  %271 = vst.msk [vmem:[#allocation2 + $0x198] sm:$0x7] %vm222_vm1, %v6398_v0  ;;  %v345_v36 = vld [vmem:[#allocation2 + $0x18] sm:$0x7]  ;;  %v729_v47 = vadd.f32 %v6825_v39, %v601_v33  ;;  %v605_v51 = vadd.f32 %v6825_v39, %v476_v30  ;;  %v480_v59 = vadd.f32 %v6825_v39, %v537_v25 }
  0x99   : > { %272 = vst.msk [vmem:[#allocation2 + $0x1b8] sm:$0x7] %vm222_vm1, %v6398_v0  ;;  %273 = vst.msk [vmem:[#allocation2 + $0x1d8] sm:$0x7] %vm222_vm1, %v6398_v0  ;;  %v410_v37 = vld [vmem:[#allocation2 + $0x38] sm:$0x7] }
  0x9a   : > { %274 = vst.msk [vmem:[#allocation2 + $0x1f8] sm:$0x7] %vm222_vm1, %v6398_v0  ;;  %275 = vst.msk [vmem:[#allocation2 + $0x218] sm:$0x7] %vm222_vm1, %v6398_v0  ;;  %v474_v41 = vadd.f32 %v410_v37, %v345_v36  ;;  %v539_v42 = vld [vmem:[#allocation2 + $0x58] sm:$0x7] }
  0x9b   : > { %276 = vst.msk [vmem:[#allocation2 + $0x238] sm:$0x7] %vm222_vm1, %v6398_v0  ;;  %277 = vst.msk [vmem:[#allocation2 + $0x258] sm:$0x7] %vm222_vm1, %v6398_v0  ;;  %v667_v1 = vld [vmem:[#allocation2 + $0x78] sm:$0x7] }
  0x9c   : > { %311 = vst.msk [vmem:[#allocation2 + $0x70] sm:$0xff] %vm218_vm0, %v279_v7  ;;  %312 = vst.msk [vmem:[#allocation2 + $0x88] sm:$0xff] %vm218_vm0, %v280_v9  ;;  %v603_v56 = vadd.f32 %v539_v42, %v474_v41  ;;  %v796_v2 = vld [vmem:[#allocation2 + $0x98] sm:$0x7]  ;;  %v287_v7 = vld [vmem:[%s6609_s28 + $0x48] sm:$0xff]  ;;  %v861_v9 = vadd.f32 %v6821_v35, %v732_v58  ;;  %v608_v42 = vadd.f32 %v6819_v28, %v6823_v38 }
  0x9d   : > { %313 = vst.msk [vmem:[#allocation2 + $0x90] sm:$0xff] %vm218_vm0, %v281_v10  ;;  %314 = vst.msk [vmem:[#allocation2 + $0xa8] sm:$0xff] %vm218_vm0, %v282_v11  ;;  %v925_v5 = vld [vmem:[#allocation2 + $0xb8] sm:$0x7]  ;;  %v986_v11 = vadd.f32 %v6821_v35, %v857_v60  ;;  %v288_v30 = vld [vmem:[%s6609_s28 + $0x50] sm:$0xff] }
  0x9e   : > { %315 = vst.msk [vmem:[#allocation2 + $0xb0] sm:$0xff] %vm218_vm0, %v283_v12  ;;  %316 = vst.msk [vmem:[#allocation2 + $0xc8] sm:$0xff] %vm218_vm0, %v284_v13  ;;  %v731_v4 = vadd.f32 %v667_v1, %v603_v56  ;;  %v349_v16 = vld [vmem:[#allocation2 + $0x38] sm:$0x7]  ;;  %v990_v20 = vadd.f32 %v6847_v54, %v861_v9  ;;  %v736_v38 = vadd.f32 %v6821_v35, %v608_v42  ;;  %v290_v1 = vld [vmem:[%s6609_s28 + $0x60] sm:$0xff] }
  0x9f   : > { %317 = vst.msk [vmem:[#allocation2 + $0xd0] sm:$0xff] %vm218_vm0, %v285_v14  ;;  %318 = vst.msk [vmem:[#allocation2 + $0xe8] sm:$0xff] %vm218_vm0, %v286_v6  ;;  %v414_v17 = vld [vmem:[#allocation2 + $0x58] sm:$0x7]  ;;  %v1115_v23 = vadd.f32 %v6847_v54, %v986_v11 }
  0xa0   : > { %319 = vst.msk [vmem:[#allocation2 + $0xf0] sm:$0xff] %vm218_vm0, %v287_v7  ;;  %v860_v18 = vadd.f32 %v796_v2, %v731_v4  ;;  %v478_v21 = vadd.f32 %v414_v17, %v349_v16  ;;  %v543_v22 = vld [vmem:[#allocation2 + $0x78] sm:$0x7]  ;;  %v1119_v33 = vadd.f32 %v6871_v15, %v990_v20  ;;  %320 = vst.msk [vmem:[#allocation2 + $0x108] sm:$0xff] %vm218_vm0, %v288_v30  ;;  %v291_v2 = vld [vmem:[%s6609_s28 + $0x68] sm:$0xff] }
  0xa1   : > { %v671_v29 = vld [vmem:[#allocation2 + $0x98] sm:$0x7]  ;;  %1179 = vst.msk [vmem:[#allocation3] sm:$0xff] %vm218_vm0, %v1115_v23  ;;  %322 = vst.msk [vmem:[#allocation2 + $0x128] sm:$0xff] %vm218_vm0, %v290_v1 }
  0xa2   : > { %v289_v36 = vld [vmem:[%s6609_s28 + $0x58] sm:$0xff]  ;;  %1183 = vst.msk [vmem:[#allocation3 + $0x20] sm:$0xff] %vm218_vm0, %v1119_v33  ;;  %323 = vst.msk [vmem:[#allocation2 + $0x130] sm:$0xff] %vm218_vm0, %v291_v2 }
  0xa3   : > { %v6827_v40 = vld [vmem:[#allocation2 + $0x70] sm:$0xff]  ;;  %v6838_v49 = vld [vmem:[#allocation2 + $0x88] sm:$0xff]  ;;  %v353_v37 = vld [vmem:[#allocation2 + $0x58] sm:$0x7]  ;;  %321 = vst.msk [vmem:[#allocation2 + $0x110] sm:$0xff] %vm218_vm0, %v289_v36 }
  0xa4   : > { %v730_v48 = vadd.f32 %v6827_v40, %v602_v34  ;;  %v6840_v50 = vld [vmem:[#allocation2 + $0x90] sm:$0xff]  ;;  %v6843_v52 = vld [vmem:[#allocation2 + $0xa8] sm:$0xff]  ;;  %v606_v57 = vadd.f32 %v6827_v40, %v477_v31  ;;  %v858_v61 = vadd.f32 %v6838_v49, %v729_v47  ;;  %v733_v3 = vadd.f32 %v6838_v49, %v605_v51  ;;  %v800_v41 = vld [vmem:[#allocation2 + $0xb8] sm:$0x7]  ;;  %2230 = vst.msk [vmem:[#allocation4 + $0x18] sm:$0x1f] %vm2229_vm2, %v6398_v0 }
  0xa5   : > { %v6845_v53 = vld [vmem:[#allocation2 + $0xb0] sm:$0xff]  ;;  %v6849_v55 = vld [vmem:[#allocation2 + $0xc8] sm:$0xff]  ;;  %v481_v10 = vadd.f32 %v6827_v40, %v538_v26  ;;  %v1054_v26 = vld [vmem:[#allocation2 + $0xd8] sm:$0x7]  ;;  %v989_v31 = vadd.f32 %v925_v5, %v860_v18  ;;  %v607_v34 = vadd.f32 %v543_v22, %v478_v21  ;;  %v609_v43 = vadd.f32 %v6838_v49, %v480_v59  ;;  %2231 = vst.msk [vmem:[#allocation4 + $0x38] sm:$0x1f] %vm2229_vm2, %v6398_v0 }
  0xa6   : > { %v859_v62 = vadd.f32 %v6840_v50, %v730_v48  ;;  %v6857_v63 = vld [vmem:[#allocation2 + $0xd0] sm:$0xff]  ;;  %v734_v8 = vadd.f32 %v6840_v50, %v606_v57  ;;  %v987_v12 = vadd.f32 %v6843_v52, %v858_v61  ;;  %v862_v14 = vadd.f32 %v6843_v52, %v733_v3  ;;  %v418_v47 = vld [vmem:[#allocation2 + $0x78] sm:$0x7]  ;;  %v6905_v3 = vld [vmem:[#allocation2 + $0xe8] sm:$0xff]  ;;  %2232 = vst.msk [vmem:[#allocation4 + $0x58] sm:$0x1f] %vm2229_vm2, %v6398_v0 }
  0xa7   : > { %v610_v46 = vadd.f32 %v6840_v50, %v481_v10  ;;  %v547_v48 = vld [vmem:[#allocation2 + $0x98] sm:$0x7]  ;;  %v484_v51 = vadd.f32 %v6838_v49, %v6825_v39  ;;  %v1118_v56 = vadd.f32 %v1054_v26, %v989_v31  ;;  %v735_v57 = vadd.f32 %v671_v29, %v607_v34  ;;  %v6907_v4 = vld [vmem:[#allocation2 + $0xf0] sm:$0xff]  ;;  %2233 = vst.msk [vmem:[#allocation4 + $0x78] sm:$0x1f] %vm2229_vm2, %v6398_v0 }
  0xa8   : > { %v988_v13 = vadd.f32 %v6845_v53, %v859_v62  ;;  %v863_v19 = vadd.f32 %v6845_v53, %v734_v8  ;;  %v1116_v24 = vadd.f32 %v6849_v55, %v987_v12  ;;  %v991_v27 = vadd.f32 %v6849_v55, %v862_v14  ;;  %v929_v58 = vld [vmem:[#allocation2 + $0xd8] sm:$0x7]  ;;  %v6917_v12 = vld [vmem:[#allocation2 + $0x100] sm:$0xff]  ;;  %v292_v29 = vld [vmem:[%s6609_s28 + $0x70] sm:$0xff]  ;;  %2234 = vst.msk [vmem:[#allocation4 + $0x98] sm:$0x1f] %vm2229_vm2, %v6398_v0 }
  0xa9   : > { %v482_v60 = vadd.f32 %v418_v47, %v353_v37  ;;  %v485_v28 = vadd.f32 %v6840_v50, %v6827_v40  ;;  %v737_v59 = vadd.f32 %v6843_v52, %v609_v43  ;;  %v738_v61 = vadd.f32 %v6845_v53, %v610_v46  ;;  %v675_v62 = vld [vmem:[#allocation2 + $0xb8] sm:$0x7]  ;;  %1182 = vst.msk [vmem:[#allocation3 + $0x18] sm:$0x7] %vm222_vm1, %v1118_v56 }
  0xaa   : > { %v1117_v25 = vadd.f32 %v6857_v63, %v988_v13  ;;  %v992_v32 = vadd.f32 %v6857_v63, %v863_v19  ;;  %1180 = vst.msk [vmem:[#allocation3 + $0x8] sm:$0xff] %vm218_vm0, %v1116_v24  ;;  %v612_v39 = vadd.f32 %v6821_v35, %v6830_v44  ;;  %v864_v5 = vadd.f32 %v800_v41, %v735_v57  ;;  %v1058_v9 = vld [vmem:[#allocation2 + $0xf8] sm:$0x7]  ;;  %v6925_v24 = vld [vmem:[#allocation2 + $0x108] sm:$0xff] }
  0xab   : > { %v611_v40 = vadd.f32 %v547_v48, %v482_v60  ;;  %v613_v6 = vadd.f32 %v6843_v52, %v484_v51  ;;  %v614_v7 = vadd.f32 %v6845_v53, %v485_v28  ;;  %v1120_v8 = vadd.f32 %v6905_v3, %v991_v27  ;;  %v804_v13 = vld [vmem:[#allocation2 + $0xd8] sm:$0x7]  ;;  %324 = vst.msk [vmem:[#allocation2 + $0x148] sm:$0xff] %vm218_vm0, %v292_v29  ;;  %v6938_v48 = vld [vmem:[#allocation2 + $0x120] sm:$0xff] }
  0xac   : > { %1181 = vst.msk [vmem:[#allocation3 + $0x10] sm:$0xff] %vm218_vm0, %v1117_v25  ;;  %v1121_v44 = vadd.f32 %v6907_v4, %v992_v32  ;;  %v865_v10 = vadd.f32 %v6847_v54, %v736_v38  ;;  %v866_v11 = vadd.f32 %v6849_v55, %v737_v59  ;;  %v993_v14 = vadd.f32 %v929_v58, %v864_v5  ;;  %v933_v18 = vld [vmem:[#allocation2 + $0xf8] sm:$0x7] }
  0xad   : > { %v867_v16 = vadd.f32 %v6857_v63, %v738_v61  ;;  %v739_v17 = vadd.f32 %v675_v62, %v611_v40  ;;  %v740_v19 = vadd.f32 %v6847_v54, %v612_v39  ;;  %v357_v20 = vld [vmem:[#allocation2 + $0x78] sm:$0x7]  ;;  %1184 = vst.msk [vmem:[#allocation3 + $0x28] sm:$0xff] %vm218_vm0, %v1120_v8  ;;  %v741_v26 = vadd.f32 %v6849_v55, %v613_v6 }
  0xae   : > { %v422_v21 = vld [vmem:[#allocation2 + $0x98] sm:$0x7]  ;;  %1185 = vst.msk [vmem:[#allocation3 + $0x30] sm:$0xff] %vm218_vm0, %v1121_v44  ;;  %v994_v22 = vadd.f32 %v6871_v15, %v865_v10  ;;  %v995_v23 = vadd.f32 %v6905_v3, %v866_v11  ;;  %v742_v27 = vadd.f32 %v6857_v63, %v614_v7  ;;  %v1122_v34 = vadd.f32 %v1058_v9, %v993_v14  ;;  %v6948_v44 = vld [vmem:[#allocation2 + $0x110] sm:$0xff] }
  0xaf   : > { %v1062_v25 = vld [vmem:[#allocation2 + $0x118] sm:$0x7]  ;;  %v996_v36 = vadd.f32 %v6907_v4, %v867_v16  ;;  %v868_v37 = vadd.f32 %v804_v13, %v739_v17  ;;  %v869_v41 = vadd.f32 %v6871_v15, %v740_v19  ;;  %v870_v47 = vadd.f32 %v6905_v3, %v741_v26  ;;  %2235 = vst.msk [vmem:[#allocation4 + $0xb8] sm:$0x1f] %vm2229_vm2, %v6398_v0 }
  0xb0   : > { %v293_v30 = vld [vmem:[%s6609_s28 + $0x78] sm:$0xff]  ;;  %v1123_v43 = vadd.f32 %v6917_v12, %v994_v22  ;;  %v1124_v46 = vadd.f32 %v6925_v24, %v995_v23  ;;  %1186 = vst.msk [vmem:[#allocation3 + $0x38] sm:$0x7] %vm222_vm1, %v1122_v34  ;;  %v871_v38 = vadd.f32 %v6907_v4, %v742_v27  ;;  %v486_v61 = vadd.f32 %v422_v21, %v357_v20  ;;  %v6955_v20 = vld [vmem:[#allocation2 + $0x128] sm:$0xff] }
  0xb1   : > { %v1243_v31 = vld [vmem:[#allocation3 + $0x5] sm:$0xff]  ;;  %325 = vst.msk [vmem:[#allocation2 + $0x150] sm:$0xff] %vm218_vm0, %v293_v30  ;;  %v551_v51 = vld [vmem:[#allocation2 + $0xb8] sm:$0x7]  ;;  %v997_v28 = vadd.f32 %v933_v18, %v868_v37  ;;  %v998_v59 = vadd.f32 %v6917_v12, %v869_v41  ;;  %v999_v5 = vadd.f32 %v6925_v24, %v870_v47  ;;  %v488_v6 = vadd.f32 %v6843_v52, %v6838_v49  ;;  %v6957_v49 = vld [vmem:[#allocation2 + $0x130] sm:$0xff] }
  0xb2   : > { %v1275_v32 = vld [vmem:[#allocation3 + $0x6] sm:$0xff]  ;;  %v679_v56 = vld [vmem:[#allocation2 + $0xd8] sm:$0x7]  ;;  %1187 = vst.msk [vmem:[#allocation3 + $0x40] sm:$0xff] %vm218_vm0, %v1123_v43  ;;  %1188 = vst.msk [vmem:[#allocation3 + $0x48] sm:$0xff] %vm218_vm0, %v1124_v46  ;;  %v615_v11 = vadd.f32 %v551_v51, %v486_v61  ;;  %v489_v13 = vadd.f32 %v6845_v53, %v6840_v50  ;;  %v1125_v18 = vadd.f32 %v6948_v44, %v996_v36 }
  0xb3   : > { %v1339_v33 = vld [vmem:[#allocation3 + $0x7] sm:$0xff]  ;;  %v1307_v42 = vadd.f32 %v1275_v32, %v1243_v31  ;;  %v1340_v39 = vld [vmem:[#allocation3 + $0xf] sm:$0xff]  ;;  %v808_v40 = vld [vmem:[#allocation2 + $0xf8] sm:$0x7]  ;;  %v1126_v9 = vadd.f32 %v1062_v25, %v997_v28  ;;  %v1127_v10 = vadd.f32 %v6938_v48, %v998_v59  ;;  %v1000_v19 = vadd.f32 %v6948_v44, %v871_v38  ;;  %2236 = vst.msk [vmem:[#allocation4 + $0xd8] sm:$0x1f] %vm2229_vm2, %v6398_v0 }
  0xb4   : > { %v1403_v57 = vld [vmem:[#allocation3 + $0x8] sm:$0xff]  ;;  %v1404_v8 = vld [vmem:[#allocation3 + $0x10] sm:$0xff]  ;;  %v937_v21 = vld [vmem:[#allocation2 + $0x118] sm:$0x7]  ;;  %v1128_v26 = vadd.f32 %v6955_v20, %v999_v5  ;;  %v743_v50 = vadd.f32 %v679_v56, %v615_v11  ;;  %v616_v27 = vadd.f32 %v6847_v54, %v6834_v45  ;;  %v617_v29 = vadd.f32 %v6849_v55, %v488_v6  ;;  %1189 = vst.msk [vmem:[#allocation3 + $0x50] sm:$0xff] %vm218_vm0, %v1125_v18 }
  0xb5   : > { %v1244_v58 = vld [vmem:[#allocation3 + $0xd] sm:$0xff]  ;;  %v1371_v62 = vadd.f32 %v1339_v33, %v1307_v42  ;;  %v1245_v22 = vld [vmem:[#allocation3 + $0x25] sm:$0xff]  ;;  %1190 = vst.msk [vmem:[#allocation3 + $0x58] sm:$0x7] %vm222_vm1, %v1126_v9  ;;  %v1129_v36 = vadd.f32 %v6957_v49, %v1000_v19  ;;  %v1066_v37 = vld [vmem:[#allocation2 + $0x138] sm:$0x7]  ;;  %v618_v45 = vadd.f32 %v6857_v63, %v489_v13 }
  0xb6   : > { %v1276_v60 = vld [vmem:[#allocation3 + $0xe] sm:$0xff]  ;;  %v1277_v23 = vld [vmem:[#allocation3 + $0x26] sm:$0xff]  ;;  %1191 = vst.msk [vmem:[#allocation3 + $0x60] sm:$0xff] %vm218_vm0, %v1127_v10  ;;  %1192 = vst.msk [vmem:[#allocation3 + $0x68] sm:$0xff] %vm218_vm0, %v1128_v26  ;;  %v872_v46 = vadd.f32 %v808_v40, %v743_v50  ;;  %v744_v47 = vadd.f32 %v6871_v15, %v616_v27  ;;  %v745_v51 = vadd.f32 %v6905_v3, %v617_v29 }
  0xb7   : > { %v1467_v1 = vld [vmem:[#allocation3 + $0x9] sm:$0xff]  ;;  %v1308_v2 = vadd.f32 %v1276_v60, %v1244_v58  ;;  %v1435_v14 = vadd.f32 %v1403_v57, %v1371_v62  ;;  %v1468_v17 = vld [vmem:[#allocation3 + $0x11] sm:$0xff]  ;;  %v1309_v34 = vadd.f32 %v1277_v23, %v1245_v22  ;;  %1193 = vst.msk [vmem:[#allocation3 + $0x70] sm:$0xff] %vm218_vm0, %v1129_v36  ;;  %v6972_v59 = vld [vmem:[#allocation2 + $0x140] sm:$0xff] }
  0xb8   : > { %v1531_v7 = vld [vmem:[#allocation3 + $0xa] sm:$0xff]  ;;  %v1532_v33 = vld [vmem:[#allocation3 + $0x12] sm:$0xff]  ;;  %v873_v5 = vadd.f32 %v6917_v12, %v744_v47  ;;  %v874_v40 = vadd.f32 %v6925_v24, %v745_v51  ;;  %2237 = vst.msk [vmem:[#allocation4 + $0xf8] sm:$0x1f] %vm2229_vm2, %v6398_v0  ;;  %2238 = vst.msk [vmem:[#allocation4 + $0x118] sm:$0x1f] %vm2229_vm2, %v6398_v0 }
  0xb9   : > { %v1372_v16 = vadd.f32 %v1340_v39, %v1308_v2  ;;  %v1341_v25 = vld [vmem:[#allocation3 + $0x27] sm:$0xff]  ;;  %v1499_v30 = vadd.f32 %v1467_v1, %v1435_v14  ;;  %v1596_v58 = vld [vmem:[#allocation3 + $0x13] sm:$0xff]  ;;  %v1001_v2 = vadd.f32 %v937_v21, %v872_v46  ;;  %v746_v39 = vadd.f32 %v6907_v4, %v618_v45  ;;  %2239 = vst.msk [vmem:[#allocation4 + $0x138] sm:$0x1f] %vm2229_vm2, %v6398_v0 }
  0xba   : > { %v1595_v31 = vld [vmem:[#allocation3 + $0xb] sm:$0xff]  ;;  %v1373_v60 = vadd.f32 %v1341_v25, %v1309_v34  ;;  %v1002_v22 = vadd.f32 %v6938_v48, %v873_v5  ;;  %v361_v23 = vld [vmem:[#allocation2 + $0x98] sm:$0x7]  ;;  %v1003_v36 = vadd.f32 %v6955_v20, %v874_v40  ;;  %2240 = vst.msk [vmem:[#allocation4 + $0x158] sm:$0x1f] %vm2229_vm2, %v6398_v0 }
  0xbb   : > { %v1436_v32 = vadd.f32 %v1404_v8, %v1372_v16  ;;  %v1405_v41 = vld [vmem:[#allocation3 + $0x28] sm:$0xff]  ;;  %v1563_v56 = vadd.f32 %v1531_v7, %v1499_v30  ;;  %v1406_v62 = vld [vmem:[#allocation3 + $0x30] sm:$0xff]  ;;  %v1130_v19 = vadd.f32 %v1066_v37, %v1001_v2  ;;  %v875_v21 = vadd.f32 %v6948_v44, %v746_v39  ;;  %2241 = vst.msk [vmem:[#allocation4 + $0x178] sm:$0x1f] %vm2229_vm2, %v6398_v0 }
  0xbc   : > { %v1246_v42 = vld [vmem:[#allocation3 + $0x2d] sm:$0xff]  ;;  %v1247_v1 = vld [vmem:[#allocation3 + $0x45] sm:$0xff]  ;;  %v1437_v8 = vadd.f32 %v1405_v41, %v1373_v60  ;;  %v1131_v41 = vadd.f32 %v6972_v59, %v1002_v22  ;;  %2242 = vst.msk [vmem:[#allocation4 + $0x198] sm:$0x1f] %vm2229_vm2, %v6398_v0  ;;  %2243 = vst.msk [vmem:[#allocation4 + $0x1b8] sm:$0x1f] %vm2229_vm2, %v6398_v0 }
  0xbd   : > { %v1278_v43 = vld [vmem:[#allocation3 + $0x2e] sm:$0xff]  ;;  %v1500_v57 = vadd.f32 %v1468_v17, %v1436_v32  ;;  %v1627_v6 = vadd.f32 %v1595_v31, %v1563_v56  ;;  %v1279_v11 = vld [vmem:[#allocation3 + $0x46] sm:$0xff]  ;;  %v426_v31 = vld [vmem:[#allocation2 + $0xb8] sm:$0x7]  ;;  %1194 = vst.msk [vmem:[#allocation3 + $0x78] sm:$0x7] %vm222_vm1, %v1130_v19  ;;  %v1004_v37 = vadd.f32 %v6957_v49, %v875_v21 }
  0xbe   : > { %v1310_v28 = vadd.f32 %v1278_v43, %v1246_v42  ;;  %v1342_v38 = vld [vmem:[#allocation3 + $0x2f] sm:$0xff]  ;;  %v1343_v13 = vld [vmem:[#allocation3 + $0x47] sm:$0xff]  ;;  %v1311_v17 = vadd.f32 %v1279_v11, %v1247_v1  ;;  %v555_v42 = vld [vmem:[#allocation2 + $0xd8] sm:$0x7]  ;;  %1195 = vst.msk [vmem:[#allocation3 + $0x80] sm:$0xff] %vm218_vm0, %v1131_v41 }
  0xbf   : > { %v1469_v61 = vld [vmem:[#allocation3 + $0x29] sm:$0xff]  ;;  %v1564_v7 = vadd.f32 %v1532_v33, %v1500_v57  ;;  %v1470_v16 = vld [vmem:[#allocation3 + $0x31] sm:$0xff]  ;;  %v1659_v25 = vmul.f32 0.020408163, %v1627_v6  ;;  %v490_v57 = vadd.f32 %v426_v31, %v361_v23  ;;  %2244 = vst.msk [vmem:[#allocation4 + $0x1d8] sm:$0x1f] %vm2229_vm2, %v6398_v0 }
  0xc0   : > { %v1533_v9 = vld [vmem:[#allocation3 + $0x2a] sm:$0xff]  ;;  %v1374_v10 = vadd.f32 %v1342_v38, %v1310_v28  ;;  %v1501_v50 = vadd.f32 %v1469_v61, %v1437_v8  ;;  %v1534_v32 = vld [vmem:[#allocation3 + $0x32] sm:$0xff]  ;;  %v1375_v33 = vadd.f32 %v1343_v13, %v1311_v17  ;;  %2245 = vst.msk [vmem:[#allocation4 + $0x1f8] sm:$0x1f] %vm2229_vm2, %v6398_v0 }
  0xc1   : > { %v1597_v14 = vld [vmem:[#allocation3 + $0x2b] sm:$0xff]  ;;  %v1628_v26 = vadd.f32 %v1596_v58, %v1564_v7  ;;  %5600 = vmatprep.mubr.msk.f32.mxu0 %vm218_vm0, %v1659_v25  ;;  %v1598_v58 = vld [vmem:[#allocation3 + $0x33] sm:$0xff]  ;;  %v619_v6 = vadd.f32 %v555_v42, %v490_v57  ;;  %v491_v7 = vadd.f32 %v6847_v54, %v6821_v35  ;;  %v493_v35 = vadd.f32 %v6857_v63, %v6845_v53 }
  0xc2   : > { %v1407_v18 = vld [vmem:[#allocation3 + $0x48] sm:$0xff]  ;;  %v1438_v27 = vadd.f32 %v1406_v62, %v1374_v10  ;;  %v6981_v30 = vld [vmem:[#allocation2 + $0x150] sm:$0xff]  ;;  %v1565_v46 = vadd.f32 %v1533_v9, %v1501_v50 }
  0xc3   : > { %v6979_v29 = vld [vmem:[#allocation2 + $0x148] sm:$0xff]  ;;  %v1660_v43 = vmul.f32 0.020408163, %v1628_v26  ;;  %v1439_v60 = vadd.f32 %v1407_v18, %v1375_v33  ;;  %v1133_v62 = vadd.f32 %v6981_v30, %v1004_v37  ;;  %v1408_v39 = vld [vmem:[#allocation3 + $0x50] sm:$0xff]  ;;  %v620_v54 = vadd.f32 %v6871_v15, %v491_v7 }
  0xc4   : > { %v1471_v34 = vld [vmem:[#allocation3 + $0x49] sm:$0xff]  ;;  %v1502_v45 = vadd.f32 %v1470_v16, %v1438_v27  ;;  %v1132_v61 = vadd.f32 %v6979_v29, %v1003_v36  ;;  %v1629_v1 = vadd.f32 %v1597_v14, %v1565_v46  ;;  %v492_v14 = vadd.f32 %v6849_v55, %v6843_v52  ;;  %v1472_v18 = vld [vmem:[#allocation3 + $0x51] sm:$0xff] }
  0xc5   : > { %v1248_v47 = vld [vmem:[#allocation3 + $0x4d] sm:$0xff]  ;;  %5601 = vmatmul.mubr.msk.f32.vlgmr.msra.gmra.mrb[0].mxu0 %vm218_vm0, %v1660_v43  ;;  %v1249_v5 = vld [vmem:[#allocation3 + $0x65] sm:$0xff]  ;;  %v1503_v8 = vadd.f32 %v1471_v34, %v1439_v60  ;;  %1197 = vst.msk [vmem:[#allocation3 + $0x90] sm:$0xff] %vm218_vm0, %v1133_v62  ;;  %v622_v53 = vadd.f32 %v6907_v4, %v493_v35  ;;  %v748_v63 = vadd.f32 %v6917_v12, %v620_v54  ;;  %v683_v43 = vld [vmem:[#allocation2 + $0xf8] sm:$0x7] }
  0xc6   : > { %v1280_v51 = vld [vmem:[#allocation3 + $0x4e] sm:$0xff]  ;;  %v1566_v2 = vadd.f32 %v1534_v32, %v1502_v45  ;;  %v1281_v40 = vld [vmem:[#allocation3 + $0x66] sm:$0xff]  ;;  %1196 = vst.msk [vmem:[#allocation3 + $0x88] sm:$0xff] %vm218_vm0, %v1132_v61  ;;  %v1661_v16 = vmul.f32 0.020408163, %v1629_v1  ;;  %v621_v31 = vadd.f32 %v6905_v3, %v492_v14  ;;  %v747_v57 = vadd.f32 %v683_v43, %v619_v6 }
  0xc7   : > { %v1344_v56 = vld [vmem:[#allocation3 + $0x4f] sm:$0xff]  ;;  %v1312_v38 = vadd.f32 %v1280_v51, %v1248_v47  ;;  %v1313_v11 = vadd.f32 %v1281_v40, %v1249_v5  ;;  %v1345_v13 = vld [vmem:[#allocation3 + $0x67] sm:$0xff]  ;;  %v812_v46 = vld [vmem:[#allocation2 + $0x118] sm:$0x7] }
  0xc8   : > { %v1535_v28 = vld [vmem:[#allocation3 + $0x4a] sm:$0xff]  ;;  %v1630_v17 = vadd.f32 %v1598_v58, %v1566_v2  ;;  %v1536_v25 = vld [vmem:[#allocation3 + $0x52] sm:$0xff]  ;;  %5603 = vmatprep.mubr.msk.f32.mxu0 %vm218_vm0, %v1661_v16  ;;  %v749_v45 = vadd.f32 %v6925_v24, %v621_v31  ;;  %v294_v58 = vld [vmem:[%s6609_s28 + $0x80] sm:$0xff] }
  0xc9   : > { %v1599_v9 = vld [vmem:[#allocation3 + $0x4b] sm:$0xff]  ;;  %v1376_v10 = vadd.f32 %v1344_v56, %v1312_v38  ;;  %v1567_v22 = vadd.f32 %v1535_v28, %v1503_v8  ;;  %v1377_v26 = vadd.f32 %v1345_v13, %v1313_v11  ;;  %v1600_v55 = vld [vmem:[#allocation3 + $0x53] sm:$0xff]  ;;  %v750_v28 = vadd.f32 %v6948_v44, %v622_v53  ;;  %326 = vst.msk [vmem:[#allocation2 + $0x168] sm:$0xff] %vm218_vm0, %v294_v58  ;;  %v7014_v40 = vld [vmem:[#allocation2 + $0x160] sm:$0xff] }
  0xca   : > { %v1409_v19 = vld [vmem:[#allocation3 + $0x68] sm:$0xff]  ;;  %v1662_v52 = vmul.f32 0.020408163, %v1630_v17  ;;  %v1410_v42 = vld [vmem:[#allocation3 + $0x70] sm:$0xff]  ;;  %v877_v38 = vadd.f32 %v6938_v48, %v748_v63  ;;  %v878_v5 = vadd.f32 %v6955_v20, %v749_v45  ;;  %v876_v11 = vadd.f32 %v812_v46, %v747_v57  ;;  %v365_v54 = vld [vmem:[#allocation2 + $0xb8] sm:$0x7] }
  0xcb   : > { %v1250_v21 = vld [vmem:[#allocation3 + $0x6d] sm:$0xff]  ;;  %v1440_v23 = vadd.f32 %v1408_v39, %v1376_v10  ;;  %v1631_v36 = vadd.f32 %v1599_v9, %v1567_v22  ;;  %v1441_v41 = vadd.f32 %v1409_v19, %v1377_v26  ;;  %v941_v39 = vld [vmem:[#allocation2 + $0x138] sm:$0x7]  ;;  %v879_v13 = vadd.f32 %v6957_v49, %v750_v28 }
  0xcc   : > { %v1282_v50 = vld [vmem:[#allocation3 + $0x6e] sm:$0xff]  ;;  %5604 = vmatmul.mubr.msk.f32.gmra.mrb[2].mxu0 %vm218_vm0, %v1662_v52  ;;  %v1006_v14 = vadd.f32 %v6972_v59, %v877_v38  ;;  %v1007_v35 = vadd.f32 %v6979_v29, %v878_v5  ;;  %v430_v63 = vld [vmem:[#allocation2 + $0xd8] sm:$0x7]  ;;  %v499_v45 = vadd.f32 %v6917_v12, %v6871_v15 }
  0xcd   : > { %v1346_v27 = vld [vmem:[#allocation3 + $0x6f] sm:$0xff]  ;;  %v1314_v34 = vadd.f32 %v1282_v50, %v1250_v21  ;;  %v1504_v37 = vadd.f32 %v1472_v18, %v1440_v23  ;;  %v1663_v61 = vmul.f32 0.020408163, %v1631_v36  ;;  %v1251_v8 = vld [vmem:[#allocation3 + $0x85] sm:$0xff]  ;;  %v1070_v21 = vld [vmem:[#allocation2 + $0x158] sm:$0x7]  ;;  %v494_v43 = vadd.f32 %v430_v63, %v365_v54 }
  0xce   : > { %v1473_v32 = vld [vmem:[#allocation3 + $0x69] sm:$0xff]  ;;  %v1474_v56 = vld [vmem:[#allocation3 + $0x71] sm:$0xff]  ;;  %v1135_v31 = vadd.f32 %v7014_v40, %v1006_v14 }
  0xcf   : > { %v1537_v33 = vld [vmem:[#allocation3 + $0x6a] sm:$0xff]  ;;  %v1378_v51 = vadd.f32 %v1346_v27, %v1314_v34  ;;  %v1568_v62 = vadd.f32 %v1536_v25, %v1504_v37  ;;  %v1505_v1 = vadd.f32 %v1473_v32, %v1441_v41  ;;  %v1538_v2 = vld [vmem:[#allocation3 + $0x72] sm:$0xff]  ;;  %5606 = vmatprep.mubr.msk.f32.mxu0 %vm218_vm0, %v1663_v61  ;;  %v1005_v25 = vadd.f32 %v941_v39, %v876_v11 }
  0xd0   : > { %v1601_v47 = vld [vmem:[#allocation3 + $0x6b] sm:$0xff]  ;;  %v1602_v18 = vld [vmem:[#allocation3 + $0x73] sm:$0xff]  ;;  %v1008_v27 = vadd.f32 %v6981_v30, %v879_v13  ;;  %1199 = vst.msk [vmem:[#allocation3 + $0xa0] sm:$0xff] %vm218_vm0, %v1135_v31  ;;  %v628_v39 = vadd.f32 %v6938_v48, %v499_v45 }
  0xd1   : > { %v295_v60 = vld [vmem:[%s6609_s28 + $0x88] sm:$0xff]  ;;  %v296_v6 = vld [vmem:[%s6609_s28 + $0x90] sm:$0xff]  ;;  %v1442_v7 = vadd.f32 %v1410_v42, %v1378_v51  ;;  %v1632_v16 = vadd.f32 %v1600_v55, %v1568_v62  ;;  %v1569_v17 = vadd.f32 %v1537_v33, %v1505_v1  ;;  %v1134_v41 = vadd.f32 %v1070_v21, %v1005_v25  ;;  %v559_v46 = vld [vmem:[#allocation2 + $0xf8] sm:$0x7] }
  0xd2   : > { %327 = vst.msk [vmem:[#allocation2 + $0x170] sm:$0xff] %vm218_vm0, %v295_v60  ;;  %v1283_v9 = vld [vmem:[#allocation3 + $0x86] sm:$0xff]  ;;  %328 = vst.msk [vmem:[#allocation2 + $0x188] sm:$0xff] %vm218_vm0, %v296_v6  ;;  %v1284_v50 = vld [vmem:[#allocation3 + $0x8e] sm:$0xff]  ;;  %v500_v60 = vadd.f32 %v6925_v24, %v6905_v3  ;;  %v623_v62 = vadd.f32 %v559_v46, %v494_v43 }
  0xd3   : > { %v1347_v10 = vld [vmem:[#allocation3 + $0x87] sm:$0xff]  ;;  %v1315_v19 = vadd.f32 %v1283_v9, %v1251_v8  ;;  %v1506_v22 = vadd.f32 %v1474_v56, %v1442_v7  ;;  %v1664_v52 = vmul.f32 0.020408163, %v1632_v16  ;;  %v1633_v32 = vadd.f32 %v1601_v47, %v1569_v17  ;;  %v1348_v53 = vld [vmem:[#allocation3 + $0x8f] sm:$0xff]  ;;  %v687_v57 = vld [vmem:[#allocation2 + $0x118] sm:$0x7] }
  0xd4   : > { %v1411_v23 = vld [vmem:[#allocation3 + $0x88] sm:$0xff]  ;;  %v1412_v42 = vld [vmem:[#allocation3 + $0x90] sm:$0xff]  ;;  %v816_v58 = vld [vmem:[#allocation2 + $0x138] sm:$0x7]  ;;  %1198 = vst.msk [vmem:[#allocation3 + $0x98] sm:$0x7] %vm222_vm1, %v1134_v41  ;;  %v751_v16 = vadd.f32 %v687_v57, %v623_v62  ;;  %v629_v25 = vadd.f32 %v6955_v20, %v500_v60 }
  0xd5   : > { %v1252_v26 = vld [vmem:[#allocation3 + $0x8d] sm:$0xff]  ;;  %v1379_v34 = vadd.f32 %v1347_v10, %v1315_v19  ;;  %v1570_v36 = vadd.f32 %v1538_v2, %v1506_v22  ;;  %5607 = vmatmul.mubr.msk.f32.gmra.mrb[4].mxu0 %vm218_vm0, %v1664_v52  ;;  %v1665_v47 = vmul.f32 0.020408163, %v1633_v32  ;;  %v297_v1 = vld [vmem:[%s6609_s28 + $0x98] sm:$0xff]  ;;  %v501_v2 = vadd.f32 %v6948_v44, %v6907_v4  ;;  %v366_v9 = vld [vmem:[#allocation2 + $0xc0] sm:$0xff] }
  0xd6   : > { %v1475_v55 = vld [vmem:[#allocation3 + $0x89] sm:$0xff]  ;;  %v1316_v33 = vadd.f32 %v1284_v50, %v1252_v26  ;;  %329 = vst.msk [vmem:[#allocation2 + $0x190] sm:$0xff] %vm218_vm0, %v297_v1  ;;  %v495_v17 = vadd.f32 %v6871_v15, %v366_v9  ;;  %v369_v19 = vld [vmem:[#allocation2 + $0xd8] sm:$0x7]  ;;  %v880_v15 = vadd.f32 %v816_v58, %v751_v16 }
  0xd7   : > { %v1539_v37 = vld [vmem:[#allocation3 + $0x8a] sm:$0xff]  ;;  %v1443_v51 = vadd.f32 %v1411_v23, %v1379_v34  ;;  %v1634_v28 = vadd.f32 %v1602_v18, %v1570_v36  ;;  %5609 = vmatprep.mubr.msk.f32.mxu0 %vm218_vm0, %v1665_v47  ;;  %v434_v22 = vld [vmem:[#allocation2 + $0xf8] sm:$0x7]  ;;  %v630_v26 = vadd.f32 %v6957_v49, %v501_v2  ;;  %v298_v34 = vld [vmem:[%s6609_s28 + $0xa0] sm:$0xff] }
  0xd8   : > { %v1380_v56 = vadd.f32 %v1348_v53, %v1316_v33  ;;  %v7031_v38 = vld [vmem:[#allocation2 + $0x168] sm:$0xff]  ;;  %v368_v11 = vld [vmem:[#allocation2 + $0xd0] sm:$0xff]  ;;  %v563_v23 = vld [vmem:[#allocation2 + $0x118] sm:$0x7]  ;;  %v757_v33 = vadd.f32 %v6979_v29, %v629_v25  ;;  %330 = vst.msk [vmem:[#allocation2 + $0x1a8] sm:$0xff] %vm218_vm0, %v298_v34 }
  0xd9   : > { %v7033_v61 = vld [vmem:[#allocation2 + $0x170] sm:$0xff]  ;;  %v1507_v5 = vadd.f32 %v1475_v55, %v1443_v51  ;;  %v1136_v7 = vadd.f32 %v7031_v38, %v1007_v35  ;;  %v367_v10 = vld [vmem:[#allocation2 + $0xc8] sm:$0xff]  ;;  %v1666_v13 = vmul.f32 0.020408163, %v1634_v28  ;;  %v945_v35 = vld [vmem:[#allocation2 + $0x158] sm:$0x7]  ;;  %v497_v54 = vadd.f32 %v6907_v4, %v368_v11 }
  0xda   : > { %v1444_v6 = vadd.f32 %v1412_v42, %v1380_v56  ;;  %v1137_v8 = vadd.f32 %v7033_v61, %v1008_v27  ;;  %v1603_v14 = vld [vmem:[#allocation3 + $0x8b] sm:$0xff]  ;;  %v496_v18 = vadd.f32 %v6905_v3, %v367_v10  ;;  %v624_v3 = vadd.f32 %v6917_v12, %v495_v17  ;;  %v1074_v52 = vld [vmem:[#allocation2 + $0x178] sm:$0x7]  ;;  %v7063_v47 = vld [vmem:[#allocation2 + $0x180] sm:$0xff] }
  0xdb   : > { %v1571_v21 = vadd.f32 %v1539_v37, %v1507_v5  ;;  %1200 = vst.msk [vmem:[#allocation3 + $0xa8] sm:$0xff] %vm218_vm0, %v1136_v7  ;;  %5610 = vmatmul.mubr.msk.f32.gmra.mrb[6].mxu0 %vm218_vm0, %v1666_v13  ;;  %v498_v27 = vadd.f32 %v434_v22, %v369_v19  ;;  %v626_v32 = vadd.f32 %v6948_v44, %v497_v54  ;;  %v299_v4 = vld [vmem:[%s6609_s28 + $0xa8] sm:$0xff]  ;;  %v691_v41 = vld [vmem:[#allocation2 + $0x138] sm:$0x7]  ;;  %v7077_v10 = vld [vmem:[#allocation2 + $0x1a0] sm:$0xff] }
  0xdc   : > { %1201 = vst.msk [vmem:[#allocation3 + $0xb0] sm:$0xff] %vm218_vm0, %v1137_v8  ;;  %v625_v50 = vadd.f32 %v6925_v24, %v496_v18  ;;  %v756_v55 = vadd.f32 %v6972_v59, %v628_v39  ;;  %v1009_v53 = vadd.f32 %v945_v35, %v880_v15  ;;  %v752_v63 = vadd.f32 %v6938_v48, %v624_v3  ;;  %v1476_v43 = vld [vmem:[#allocation3 + $0x91] sm:$0xff]  ;;  %v7069_v62 = vld [vmem:[#allocation2 + $0x188] sm:$0xff] }
  0xdd   : > { %v1635_v31 = vadd.f32 %v1603_v14, %v1571_v21  ;;  %v627_v37 = vadd.f32 %v563_v23, %v498_v27  ;;  %331 = vst.msk [vmem:[#allocation2 + $0x1b0] sm:$0xff] %vm218_vm0, %v299_v4  ;;  %v1540_v46 = vld [vmem:[#allocation3 + $0x92] sm:$0xff]  ;;  %v754_v45 = vadd.f32 %v6957_v49, %v626_v32  ;;  %v758_v51 = vadd.f32 %v6981_v30, %v630_v26 }
  0xde   : > { %v753_v36 = vadd.f32 %v6955_v20, %v625_v50  ;;  %v885_v56 = vadd.f32 %v7014_v40, %v756_v55  ;;  %v1508_v57 = vadd.f32 %v1476_v43, %v1444_v6  ;;  %v1138_v58 = vadd.f32 %v1074_v52, %v1009_v53  ;;  %v820_v1 = vld [vmem:[#allocation2 + $0x158] sm:$0x7]  ;;  %v7073_v7 = vld [vmem:[#allocation2 + $0x190] sm:$0xff] }
  0xdf   : > { %v1667_v42 = vmul.f32 0.020408163, %v1635_v31  ;;  %v881_v60 = vadd.f32 %v6972_v59, %v752_v63  ;;  %v949_v2 = vld [vmem:[#allocation2 + $0x178] sm:$0x7]  ;;  %v883_v5 = vadd.f32 %v6981_v30, %v754_v45  ;;  %v755_v8 = vadd.f32 %v691_v41, %v627_v37  ;;  %v300_v11 = vld [vmem:[%s6609_s28 + $0xb0] sm:$0xff]  ;;  %v7091_v41 = vld [vmem:[#allocation2 + $0x1a8] sm:$0xff] }
  0xe0   : > { %v882_v28 = vadd.f32 %v6979_v29, %v753_v36  ;;  %v1604_v39 = vld [vmem:[#allocation3 + $0x93] sm:$0xff]  ;;  %v886_v9 = vadd.f32 %v7031_v38, %v757_v33  ;;  %v887_v6 = vadd.f32 %v7033_v61, %v758_v51  ;;  %v1572_v13 = vadd.f32 %v1540_v46, %v1508_v57  ;;  %1202 = vst.msk [vmem:[#allocation3 + $0xb8] sm:$0x7] %vm222_vm1, %v1138_v58 }
  0xe1   : > { %5612 = vmatprep.mubr.msk.f32.mxu0 %vm218_vm0, %v1667_v42  ;;  %v1010_v18 = vadd.f32 %v7014_v40, %v881_v60  ;;  %v1078_v21 = vld [vmem:[#allocation2 + $0x198] sm:$0x7]  ;;  %v1014_v35 = vadd.f32 %v7063_v47, %v885_v56  ;;  %332 = vst.msk [vmem:[#allocation2 + $0x1c8] sm:$0xff] %vm218_vm0, %v300_v11  ;;  %v1012_v22 = vadd.f32 %v7033_v61, %v883_v5 }
  0xe2   : > { %v1253_v14 = vld [vmem:[#allocation3 + $0xa5] sm:$0xff]  ;;  %v1011_v19 = vadd.f32 %v7031_v38, %v882_v28  ;;  %v884_v23 = vadd.f32 %v820_v1, %v755_v8  ;;  %v1015_v25 = vadd.f32 %v7069_v62, %v886_v9  ;;  %v373_v26 = vld [vmem:[#allocation2 + $0xf8] sm:$0x7]  ;;  %v1636_v50 = vadd.f32 %v1604_v39, %v1572_v13 }
  0xe3   : > { %v1285_v16 = vld [vmem:[#allocation3 + $0xa6] sm:$0xff]  ;;  %v438_v15 = vld [vmem:[#allocation2 + $0x118] sm:$0x7]  ;;  %v1286_v52 = vld [vmem:[#allocation3 + $0xae] sm:$0xff]  ;;  %v1139_v32 = vadd.f32 %v7063_v47, %v1010_v18  ;;  %v1016_v4 = vadd.f32 %v7073_v7, %v887_v6  ;;  %v1141_v36 = vadd.f32 %v7073_v7, %v1012_v22  ;;  %v1143_v45 = vadd.f32 %v7077_v10, %v1014_v35 }
  0xe4   : > { %v1349_v17 = vld [vmem:[#allocation3 + $0xa7] sm:$0xff]  ;;  %v1317_v54 = vadd.f32 %v1285_v16, %v1253_v14  ;;  %v567_v3 = vld [vmem:[#allocation2 + $0x138] sm:$0x7]  ;;  %v1140_v34 = vadd.f32 %v7069_v62, %v1011_v19  ;;  %v1350_v63 = vld [vmem:[#allocation3 + $0xaf] sm:$0xff]  ;;  %v1013_v37 = vadd.f32 %v949_v2, %v884_v23  ;;  %v1668_v42 = vmul.f32 0.020408163, %v1636_v50 }
  0xe5   : > { %v1413_v27 = vld [vmem:[#allocation3 + $0xa8] sm:$0xff]  ;;  %v1414_v43 = vld [vmem:[#allocation3 + $0xb0] sm:$0xff]  ;;  %1203 = vst.msk [vmem:[#allocation3 + $0xc0] sm:$0xff] %vm218_vm0, %v1139_v32  ;;  %v1144_v51 = vadd.f32 %v7091_v41, %v1015_v25  ;;  %v502_v56 = vadd.f32 %v438_v15, %v373_v26  ;;  %v301_v57 = vld [vmem:[%s6609_s28 + $0xb8] sm:$0xff]  ;;  %v503_v6 = vadd.f32 %v6938_v48, %v6917_v12  ;;  %v504_v11 = vadd.f32 %v6955_v20, %v6925_v24 }
  0xe6   : > { %v1254_v31 = vld [vmem:[#allocation3 + $0xad] sm:$0xff]  ;;  %v1381_v55 = vadd.f32 %v1349_v17, %v1317_v54  ;;  %1204 = vst.msk [vmem:[#allocation3 + $0xc8] sm:$0xff] %vm218_vm0, %v1140_v34  ;;  %1205 = vst.msk [vmem:[#allocation3 + $0xd0] sm:$0xff] %vm218_vm0, %v1141_v36  ;;  %v1142_v28 = vadd.f32 %v1078_v21, %v1013_v37  ;;  %v695_v2 = vld [vmem:[#allocation2 + $0x158] sm:$0x7]  ;;  %5613 = vmatmul.mubr.msk.f32.gmra.mrb[8].mxu0 %vm218_vm0, %v1668_v42  ;;  %v505_v13 = vadd.f32 %v6957_v49, %v6948_v44 }
  0xe7   : > { %v1477_v33 = vld [vmem:[#allocation3 + $0xa9] sm:$0xff]  ;;  %v1318_v53 = vadd.f32 %v1286_v52, %v1254_v31  ;;  %333 = vst.msk [vmem:[#allocation2 + $0x1d0] sm:$0xff] %vm218_vm0, %v301_v57  ;;  %v377_v39 = vld [vmem:[#allocation2 + $0x118] sm:$0x7]  ;;  %1207 = vst.msk [vmem:[#allocation3 + $0xe0] sm:$0xff] %vm218_vm0, %v1143_v45  ;;  %v631_v9 = vadd.f32 %v567_v3, %v502_v56  ;;  %v7116_v12 = vadd.f32 %v6972_v59, %v6938_v48 }
  0xe8   : > { %v7095_v46 = vld [vmem:[#allocation2 + $0x1b0] sm:$0xff]  ;;  %v1445_v58 = vadd.f32 %v1413_v27, %v1381_v55  ;;  %v442_v5 = vld [vmem:[#allocation2 + $0x138] sm:$0x7]  ;;  %1208 = vst.msk [vmem:[#allocation3 + $0xe8] sm:$0xff] %vm218_vm0, %v1144_v51  ;;  %v632_v44 = vadd.f32 %v6972_v59, %v503_v6  ;;  %v633_v22 = vadd.f32 %v6979_v29, %v504_v11  ;;  %v634_v23 = vadd.f32 %v6981_v30, %v505_v13  ;;  %v302_v26 = vld [vmem:[%s6609_s28 + $0xc0] sm:$0xff] }
  0xe9   : > { %v1382_v60 = vadd.f32 %v1350_v63, %v1318_v53  ;;  %v1145_v1 = vadd.f32 %v7095_v46, %v1016_v4  ;;  %v1541_v8 = vld [vmem:[#allocation3 + $0xaa] sm:$0xff]  ;;  %v571_v14 = vld [vmem:[#allocation2 + $0x158] sm:$0x7]  ;;  %1206 = vst.msk [vmem:[#allocation3 + $0xd8] sm:$0x7] %vm222_vm1, %v1142_v28  ;;  %v506_v35 = vadd.f32 %v442_v5, %v377_v39  ;;  %v759_v54 = vadd.f32 %v695_v2, %v631_v9 }
  0xea   : > { %v1509_v16 = vadd.f32 %v1477_v33, %v1445_v58  ;;  %v1605_v17 = vld [vmem:[#allocation3 + $0xab] sm:$0xff]  ;;  %v824_v21 = vld [vmem:[#allocation2 + $0x178] sm:$0x7]  ;;  %334 = vst.msk [vmem:[#allocation2 + $0x1e8] sm:$0xff] %vm218_vm0, %v302_v26  ;;  %v508_v48 = vadd.f32 %v6979_v29, %v6955_v20  ;;  %v760_v4 = vadd.f32 %v7014_v40, %v632_v44  ;;  %v761_v55 = vadd.f32 %v7031_v38, %v633_v22 }
  0xeb   : > { %v1446_v18 = vadd.f32 %v1414_v43, %v1382_v60  ;;  %v1478_v19 = vld [vmem:[#allocation3 + $0xb1] sm:$0xff]  ;;  %1209 = vst.msk [vmem:[#allocation3 + $0xf0] sm:$0xff] %vm218_vm0, %v1145_v1  ;;  %v635_v27 = vadd.f32 %v571_v14, %v506_v35  ;;  %v303_v31 = vld [vmem:[%s6609_s28 + $0xc8] sm:$0xff]  ;;  %v888_v32 = vadd.f32 %v824_v21, %v759_v54  ;;  %v762_v33 = vadd.f32 %v7033_v61, %v634_v23  ;;  %v7134_v60 = vld [vmem:[#allocation2 + $0x1c0] sm:$0xff] }
  0xec   : > { %v1542_v24 = vld [vmem:[#allocation3 + $0xb2] sm:$0xff]  ;;  %v1573_v15 = vadd.f32 %v1541_v8, %v1509_v16  ;;  %335 = vst.msk [vmem:[#allocation2 + $0x1f0] sm:$0xff] %vm218_vm0, %v303_v31  ;;  %v509_v20 = vadd.f32 %v6981_v30, %v6957_v49  ;;  %v889_v57 = vadd.f32 %v7063_v47, %v760_v4  ;;  %v890_v58 = vadd.f32 %v7069_v62, %v761_v55  ;;  %v7136_v28 = vld [vmem:[#allocation2 + $0x1c8] sm:$0xff] }
  0xed   : > { %v699_v25 = vld [vmem:[#allocation2 + $0x178] sm:$0x7]  ;;  %v1510_v3 = vadd.f32 %v1478_v19, %v1446_v18  ;;  %v1255_v37 = vld [vmem:[#allocation3 + $0xc5] sm:$0xff]  ;;  %v1256_v8 = vld [vmem:[#allocation3 + $0xcd] sm:$0xff]  ;;  %v891_v6 = vadd.f32 %v7073_v7, %v762_v33 }
  0xee   : > { %v953_v50 = vld [vmem:[#allocation2 + $0x198] sm:$0x7]  ;;  %v1637_v63 = vadd.f32 %v1605_v17, %v1573_v15  ;;  %v1287_v42 = vld [vmem:[#allocation3 + $0xc6] sm:$0xff]  ;;  %v763_v45 = vadd.f32 %v699_v25, %v635_v27  ;;  %v1288_v9 = vld [vmem:[#allocation3 + $0xce] sm:$0xff]  ;;  %v1018_v17 = vadd.f32 %v7077_v10, %v889_v57  ;;  %v1019_v44 = vadd.f32 %v7091_v41, %v890_v58 }
  0xef   : > { %v1606_v52 = vld [vmem:[#allocation3 + $0xb3] sm:$0xff]  ;;  %v1574_v36 = vadd.f32 %v1542_v24, %v1510_v3  ;;  %v1351_v43 = vld [vmem:[#allocation3 + $0xc7] sm:$0xff]  ;;  %v1319_v51 = vadd.f32 %v1287_v42, %v1255_v37  ;;  %v1017_v56 = vadd.f32 %v953_v50, %v888_v32  ;;  %v1320_v13 = vadd.f32 %v1288_v9, %v1256_v8 }
  0xf0   : > { %v1082_v34 = vld [vmem:[#allocation2 + $0x1b8] sm:$0x7]  ;;  %v1669_v2 = vmul.f32 0.020408163, %v1637_v63  ;;  %v1415_v5 = vld [vmem:[#allocation3 + $0xc8] sm:$0xff]  ;;  %v1416_v24 = vld [vmem:[#allocation3 + $0xd0] sm:$0xff]  ;;  %v1020_v22 = vadd.f32 %v7095_v46, %v891_v6  ;;  %v1147_v50 = vadd.f32 %v7134_v60, %v1018_v17  ;;  %v636_v27 = vadd.f32 %v7014_v40, %v7116_v12 }
  0xf1   : > { %v828_v53 = vld [vmem:[#allocation2 + $0x198] sm:$0x7]  ;;  %v1638_v39 = vadd.f32 %v1606_v52, %v1574_v36  ;;  %v1383_v49 = vadd.f32 %v1351_v43, %v1319_v51  ;;  %v1352_v14 = vld [vmem:[#allocation3 + $0xcf] sm:$0xff]  ;;  %v1146_v16 = vadd.f32 %v1082_v34, %v1017_v56  ;;  %v1257_v54 = vld [vmem:[#allocation3 + $0xe5] sm:$0xff]  ;;  %v1148_v55 = vadd.f32 %v7136_v28, %v1019_v44 }
  0xf2   : > { %v957_v1 = vld [vmem:[#allocation2 + $0x1b8] sm:$0x7]  ;;  %v892_v11 = vadd.f32 %v828_v53, %v763_v45  ;;  %5615 = vmatprep.mubr.msk.f32.mxu0 %vm218_vm0, %v1669_v2  ;;  %v1479_v35 = vld [vmem:[#allocation3 + $0xc9] sm:$0xff]  ;;  %v1384_v26 = vadd.f32 %v1352_v14, %v1320_v13  ;;  %v637_v53 = vadd.f32 %v7031_v38, %v508_v48  ;;  %1211 = vst.msk [vmem:[#allocation3 + $0x100] sm:$0xff] %vm218_vm0, %v1147_v50 }
  0xf3   : > { %v1086_v18 = vld [vmem:[#allocation2 + $0x1d8] sm:$0x7]  ;;  %v1670_v21 = vmul.f32 0.020408163, %v1638_v39  ;;  %v1447_v25 = vadd.f32 %v1415_v5, %v1383_v49  ;;  %v1289_v15 = vld [vmem:[#allocation3 + $0xe6] sm:$0xff]  ;;  %v1290_v43 = vld [vmem:[#allocation3 + $0xee] sm:$0xff]  ;;  %v638_v12 = vadd.f32 %v7033_v61, %v509_v20  ;;  %v764_v51 = vadd.f32 %v7063_v47, %v636_v27 }
  0xf4   : > { %v381_v19 = vld [vmem:[#allocation2 + $0x138] sm:$0x7]  ;;  %v1021_v23 = vadd.f32 %v957_v1, %v892_v11  ;;  %v1353_v3 = vld [vmem:[#allocation3 + $0xe7] sm:$0xff]  ;;  %1210 = vst.msk [vmem:[#allocation3 + $0xf8] sm:$0x7] %vm222_vm1, %v1146_v16  ;;  %v1321_v34 = vadd.f32 %v1289_v15, %v1257_v54  ;;  %v1448_v37 = vadd.f32 %v1416_v24, %v1384_v26  ;;  %v1354_v45 = vld [vmem:[#allocation3 + $0xef] sm:$0xff]  ;;  %v765_v48 = vadd.f32 %v7069_v62, %v637_v53 }
  0xf5   : > { %v446_v31 = vld [vmem:[#allocation2 + $0x158] sm:$0x7]  ;;  %5616 = vmatmul.mubr.msk.f32.gmra.mrb[10].mxu0 %vm218_vm0, %v1670_v21  ;;  %v1543_v52 = vld [vmem:[#allocation3 + $0xca] sm:$0xff]  ;;  %v1511_v36 = vadd.f32 %v1479_v35, %v1447_v25  ;;  %1212 = vst.msk [vmem:[#allocation3 + $0x108] sm:$0xff] %vm218_vm0, %v1148_v55  ;;  %v766_v11 = vadd.f32 %v7073_v7, %v638_v12  ;;  %v893_v17 = vadd.f32 %v7077_v10, %v764_v51 }
  0xf6   : > { %v1480_v32 = vld [vmem:[#allocation3 + $0xd1] sm:$0xff]  ;;  %v1417_v4 = vld [vmem:[#allocation3 + $0xe8] sm:$0xff]  ;;  %v1150_v33 = vadd.f32 %v1086_v18, %v1021_v23  ;;  %v1385_v58 = vadd.f32 %v1353_v3, %v1321_v34  ;;  %v510_v39 = vadd.f32 %v446_v31, %v381_v19  ;;  %v894_v18 = vadd.f32 %v7091_v41, %v765_v48 }
  0xf7   : > { %v575_v63 = vld [vmem:[#allocation2 + $0x178] sm:$0x7]  ;;  %v1258_v42 = vld [vmem:[#allocation3 + $0xed] sm:$0xff]  ;;  %v1575_v5 = vadd.f32 %v1543_v52, %v1511_v36  ;;  %v1512_v8 = vadd.f32 %v1480_v32, %v1448_v37  ;;  %v895_v44 = vadd.f32 %v7095_v46, %v766_v11  ;;  %v1022_v50 = vadd.f32 %v7134_v60, %v893_v17 }
  0xf8   : > { %v1607_v56 = vld [vmem:[#allocation3 + $0xcb] sm:$0xff]  ;;  %v1322_v1 = vadd.f32 %v1290_v43, %v1258_v42  ;;  %1214 = vst.msk [vmem:[#allocation3 + $0x118] sm:$0x7] %vm222_vm1, %v1150_v33  ;;  %v703_v49 = vld [vmem:[#allocation2 + $0x198] sm:$0x7]  ;;  %v1449_v14 = vadd.f32 %v1417_v4, %v1385_v58  ;;  %v639_v25 = vadd.f32 %v575_v63, %v510_v39  ;;  %v1023_v27 = vadd.f32 %v7136_v28, %v894_v18 }
  0xf9   : > { %v1544_v57 = vld [vmem:[#allocation3 + $0xd2] sm:$0xff]  ;;  %v1481_v20 = vld [vmem:[#allocation3 + $0xe9] sm:$0xff]  ;;  %v1639_v24 = vadd.f32 %v1607_v56, %v1575_v5  ;;  %v512_v11 = vadd.f32 %v7031_v38, %v6979_v29 }
  0xfa   : > { %v7153_v2 = vld [vmem:[#allocation2 + $0x1d0] sm:$0xff]  ;;  %v1386_v16 = vadd.f32 %v1354_v45, %v1322_v1  ;;  %v305_v35 = vld [vmem:[%s6609_s28 + $0xd8] sm:$0xff]  ;;  %v1576_v19 = vadd.f32 %v1544_v57, %v1512_v8  ;;  %v7168_v23 = vld [vmem:[#allocation2 + $0x1e8] sm:$0xff]  ;;  %v1513_v26 = vadd.f32 %v1481_v20, %v1449_v14  ;;  %v767_v53 = vadd.f32 %v703_v49, %v639_v25 }
  0xfb   : > { %v1418_v9 = vld [vmem:[#allocation3 + $0xf0] sm:$0xff]  ;;  %v1149_v6 = vadd.f32 %v7153_v2, %v1020_v22  ;;  %v7166_v22 = vld [vmem:[#allocation2 + $0x1e0] sm:$0xff]  ;;  %337 = vst.msk [vmem:[#allocation2 + $0x210] sm:$0xff] %vm218_vm0, %v305_v35  ;;  %v832_v52 = vld [vmem:[#allocation2 + $0x1b8] sm:$0x7]  ;;  %v1024_v33 = vadd.f32 %v7153_v2, %v895_v44  ;;  %v1152_v45 = vadd.f32 %v7168_v23, %v1023_v27  ;;  %v511_v8 = vadd.f32 %v7014_v40, %v6972_v59 }
  0xfc   : > { %v1608_v13 = vld [vmem:[#allocation3 + $0xd3] sm:$0xff]  ;;  %v1545_v54 = vld [vmem:[#allocation3 + $0xea] sm:$0xff]  ;;  %v1450_v15 = vadd.f32 %v1418_v9, %v1386_v16  ;;  %v1671_v32 = vmul.f32 0.020408163, %v1639_v24  ;;  %v1151_v43 = vadd.f32 %v7166_v22, %v1022_v50  ;;  %v896_v5 = vadd.f32 %v832_v52, %v767_v53 }
  0xfd   : > { %v304_v21 = vld [vmem:[%s6609_s28 + $0xd0] sm:$0xff]  ;;  %1213 = vst.msk [vmem:[#allocation3 + $0x110] sm:$0xff] %vm218_vm0, %v1149_v6  ;;  %v1640_v34 = vadd.f32 %v1608_v13, %v1576_v19  ;;  %v961_v63 = vld [vmem:[#allocation2 + $0x1d8] sm:$0x7]  ;;  %v1577_v36 = vadd.f32 %v1545_v54, %v1513_v26  ;;  %v1259_v58 = vld [vmem:[#allocation3 + $0x105] sm:$0xff]  ;;  %v513_v59 = vadd.f32 %v7033_v61, %v6981_v30  ;;  %v640_v18 = vadd.f32 %v7063_v47, %v511_v8 }
  0xfe   : > { %336 = vst.msk [vmem:[#allocation2 + $0x208] sm:$0xff] %vm218_vm0, %v304_v21  ;;  %v1482_v3 = vld [vmem:[#allocation3 + $0xf1] sm:$0xff]  ;;  %5618 = vmatprep.mubr.msk.f32.mxu0 %vm218_vm0, %v1671_v32  ;;  %v1291_v1 = vld [vmem:[#allocation3 + $0x106] sm:$0xff]  ;;  %1215 = vst.msk [vmem:[#allocation3 + $0x120] sm:$0xff] %vm218_vm0, %v1151_v43  ;;  %v1025_v17 = vadd.f32 %v961_v63, %v896_v5  ;;  %v641_v54 = vadd.f32 %v7069_v62, %v512_v11 }
  0xff   : > { %v7174_v31 = vld [vmem:[#allocation2 + $0x1f0] sm:$0xff]  ;;  %v1514_v37 = vadd.f32 %v1482_v3, %v1450_v15  ;;  %v1090_v12 = vld [vmem:[#allocation2 + $0x1f8] sm:$0x7]  ;;  %v1672_v57 = vmul.f32 0.020408163, %v1640_v34  ;;  %v1355_v48 = vld [vmem:[#allocation3 + $0x107] sm:$0xff]  ;;  %v1323_v6 = vadd.f32 %v1291_v1, %v1259_v58  ;;  %v642_v30 = vadd.f32 %v7073_v7, %v513_v59 }
 0x100   : > { %v1609_v4 = vld [vmem:[#allocation3 + $0xeb] sm:$0xff]  ;;  %v1610_v42 = vld [vmem:[#allocation3 + $0xf3] sm:$0xff]  ;;  %v1153_v39 = vadd.f32 %v7174_v31, %v1024_v33  ;;  %1216 = vst.msk [vmem:[#allocation3 + $0x128] sm:$0xff] %vm218_vm0, %v1152_v45  ;;  %v306_v13 = vld [vmem:[%s6609_s28 + $0xe0] sm:$0xff]  ;;  %v1154_v3 = vadd.f32 %v1090_v12, %v1025_v17  ;;  %v768_v50 = vadd.f32 %v7077_v10, %v640_v18  ;;  %v515_v45 = vadd.f32 %v7063_v47, %v7014_v40 }
 0x101   : > { %v1546_v55 = vld [vmem:[#allocation3 + $0xf2] sm:$0xff]  ;;  %v1641_v20 = vadd.f32 %v1609_v4, %v1577_v36  ;;  %v307_v14 = vld [vmem:[%s6609_s28 + $0xe8] sm:$0xff]  ;;  %5619 = vmatmul.mubr.msk.f32.gmra.mrb[12].mxu0 %vm218_vm0, %v1672_v57  ;;  %338 = vst.msk [vmem:[#allocation2 + $0x228] sm:$0xff] %vm218_vm0, %v306_v13  ;;  %v1387_v24 = vadd.f32 %v1355_v48, %v1323_v6  ;;  %v769_v4 = vadd.f32 %v7091_v41, %v641_v54 }
 0x102   : > { %v385_v51 = vld [vmem:[#allocation2 + $0x158] sm:$0x7]  ;;  %v1578_v9 = vadd.f32 %v1546_v55, %v1514_v37  ;;  %v1419_v16 = vld [vmem:[#allocation3 + $0x108] sm:$0xff]  ;;  %1217 = vst.msk [vmem:[#allocation3 + $0x130] sm:$0xff] %vm218_vm0, %v1153_v39  ;;  %339 = vst.msk [vmem:[#allocation2 + $0x230] sm:$0xff] %vm218_vm0, %v307_v14  ;;  %v770_v36 = vadd.f32 %v7095_v46, %v642_v30  ;;  %v897_v37 = vadd.f32 %v7134_v60, %v768_v50 }
 0x103   : > { %v450_v56 = vld [vmem:[#allocation2 + $0x178] sm:$0x7]  ;;  %v1673_v29 = vmul.f32 0.020408163, %v1641_v20  ;;  %v1451_v32 = vadd.f32 %v1419_v16, %v1387_v24  ;;  %v7201_v55 = vld [vmem:[#allocation2 + $0x200] sm:$0xff]  ;;  %v898_v58 = vadd.f32 %v7136_v28, %v769_v4  ;;  %v516_v48 = vadd.f32 %v7069_v62, %v7031_v38  ;;  %v7219_v38 = vld [vmem:[#allocation2 + $0x210] sm:$0xff] }
 0x104   : > { %v579_v49 = vld [vmem:[#allocation2 + $0x198] sm:$0x7]  ;;  %v514_v21 = vadd.f32 %v450_v56, %v385_v51  ;;  %v1642_v35 = vadd.f32 %v1610_v42, %v1578_v9  ;;  %v1483_v19 = vld [vmem:[#allocation3 + $0x109] sm:$0xff]  ;;  %1218 = vst.msk [vmem:[#allocation3 + $0x138] sm:$0x7] %vm222_vm1, %v1154_v3  ;;  %v899_v20 = vadd.f32 %v7153_v2, %v770_v36  ;;  %v1026_v9 = vadd.f32 %v7166_v22, %v897_v37 }
 0x105   : > { %v707_v44 = vld [vmem:[#allocation2 + $0x1b8] sm:$0x7]  ;;  %v1260_v25 = vld [vmem:[#allocation3 + $0x10d] sm:$0xff]  ;;  %5621 = vmatprep.mubr.msk.f32.mxu0 %vm218_vm0, %v1673_v29  ;;  %v1515_v12 = vadd.f32 %v1483_v19, %v1451_v32  ;;  %v517_v6 = vadd.f32 %v7073_v7, %v7033_v61  ;;  %v1027_v16 = vadd.f32 %v7168_v23, %v898_v58  ;;  %v644_v61 = vadd.f32 %v7077_v10, %v515_v45 }
 0x106   : > { %v1292_v26 = vld [vmem:[#allocation3 + $0x10e] sm:$0xff]  ;;  %v643_v27 = vadd.f32 %v579_v49, %v514_v21  ;;  %v1674_v52 = vmul.f32 0.020408163, %v1642_v35  ;;  %v836_v33 = vld [vmem:[#allocation2 + $0x1d8] sm:$0x7]  ;;  %v1028_v29 = vadd.f32 %v7174_v31, %v899_v20  ;;  %v1155_v35 = vadd.f32 %v7201_v55, %v1026_v9 }
 0x107   : > { %v1356_v15 = vld [vmem:[#allocation3 + $0x10f] sm:$0xff]  ;;  %v1324_v34 = vadd.f32 %v1292_v26, %v1260_v25  ;;  %v965_v43 = vld [vmem:[#allocation2 + $0x1f8] sm:$0x7]  ;;  %v1261_v39 = vld [vmem:[#allocation3 + $0x125] sm:$0xff]  ;;  %v645_v4 = vadd.f32 %v7091_v41, %v516_v48  ;;  %v646_v45 = vadd.f32 %v7095_v46, %v517_v6 }
 0x108   : > { %v1547_v53 = vld [vmem:[#allocation3 + $0x10a] sm:$0xff]  ;;  %v771_v42 = vadd.f32 %v707_v44, %v643_v27  ;;  %5622 = vmatmul.mubr.msk.f32.gmra.mrb[14].mxu0 %vm218_vm0, %v1674_v52  ;;  %v1094_v1 = vld [vmem:[#allocation2 + $0x218] sm:$0x7]  ;;  %v1157_v32 = vadd.f32 %v7219_v38, %v1028_v29  ;;  %1219 = vst.msk [vmem:[#allocation3 + $0x140] sm:$0xff] %vm218_vm0, %v1155_v35 }
 0x109   : > { %v1420_v63 = vld [vmem:[#allocation3 + $0x110] sm:$0xff]  ;;  %v1388_v56 = vadd.f32 %v1356_v15, %v1324_v34  ;;  %v1293_v5 = vld [vmem:[#allocation3 + $0x126] sm:$0xff]  ;;  %v1579_v11 = vadd.f32 %v1547_v53, %v1515_v12  ;;  %v389_v15 = vld [vmem:[#allocation2 + $0x178] sm:$0x7]  ;;  %v772_v12 = vadd.f32 %v7134_v60, %v644_v61 }
 0x10a   : > { %v1611_v51 = vld [vmem:[#allocation3 + $0x10b] sm:$0xff]  ;;  %v900_v40 = vadd.f32 %v836_v33, %v771_v42  ;;  %v1325_v14 = vadd.f32 %v1293_v5, %v1261_v39  ;;  %v454_v3 = vld [vmem:[#allocation2 + $0x198] sm:$0x7]  ;;  %1221 = vst.msk [vmem:[#allocation3 + $0x150] sm:$0xff] %vm218_vm0, %v1157_v32 }
 0x10b   : > { %v1484_v57 = vld [vmem:[#allocation3 + $0x111] sm:$0xff]  ;;  %v1357_v8 = vld [vmem:[#allocation3 + $0x127] sm:$0xff]  ;;  %v1452_v49 = vadd.f32 %v1420_v63, %v1388_v56  ;;  %v1643_v19 = vadd.f32 %v1611_v51, %v1579_v11  ;;  %v773_v51 = vadd.f32 %v7136_v28, %v645_v4  ;;  %v518_v56 = vadd.f32 %v454_v3, %v389_v15 }
 0x10c   : > { %v1548_v13 = vld [vmem:[#allocation3 + $0x112] sm:$0xff]  ;;  %v7217_v17 = vld [vmem:[#allocation2 + $0x208] sm:$0xff]  ;;  %v1029_v24 = vadd.f32 %v965_v43, %v900_v40  ;;  %v1389_v44 = vadd.f32 %v1357_v8, %v1325_v14  ;;  %v519_v8 = vadd.f32 %v7077_v10, %v7063_v47  ;;  %v774_v40 = vadd.f32 %v7153_v2, %v646_v45 }
 0x10d   : > { %v1421_v59 = vld [vmem:[#allocation3 + $0x128] sm:$0xff]  ;;  %v1516_v54 = vadd.f32 %v1484_v57, %v1452_v49  ;;  %v1612_v30 = vld [vmem:[#allocation3 + $0x113] sm:$0xff]  ;;  %v1156_v52 = vadd.f32 %v7217_v17, %v1027_v16  ;;  %v1675_v33 = vmul.f32 0.020408163, %v1643_v19  ;;  %v901_v6 = vadd.f32 %v7166_v22, %v772_v12 }
 0x10e   : > { %v1262_v18 = vld [vmem:[#allocation3 + $0x12d] sm:$0xff]  ;;  %v1158_v34 = vadd.f32 %v1094_v1, %v1029_v24  ;;  %v1453_v63 = vadd.f32 %v1421_v59, %v1389_v44  ;;  %v583_v42 = vld [vmem:[#allocation2 + $0x1b8] sm:$0x7]  ;;  %v902_v11 = vadd.f32 %v7168_v23, %v773_v51  ;;  %v7244_v59 = vld [vmem:[#allocation2 + $0x220] sm:$0xff]  ;;  %v520_v47 = vadd.f32 %v7091_v41, %v7069_v62 }
 0x10f   : > { %v1294_v21 = vld [vmem:[#allocation3 + $0x12e] sm:$0xff]  ;;  %v1580_v53 = vadd.f32 %v1548_v13, %v1516_v54  ;;  %1220 = vst.msk [vmem:[#allocation3 + $0x148] sm:$0xff] %vm218_vm0, %v1156_v52  ;;  %v309_v58 = vld [vmem:[%s6609_s28 + $0xf8] sm:$0xff]  ;;  %5624 = vmatprep.mubr.msk.f32.mxu0 %vm218_vm0, %v1675_v33  ;;  %v647_v49 = vadd.f32 %v583_v42, %v518_v56  ;;  %v903_v35 = vadd.f32 %v7174_v31, %v774_v40 }
 0x110   : > { %v1326_v25 = vadd.f32 %v1294_v21, %v1262_v18  ;;  %v1358_v26 = vld [vmem:[#allocation3 + $0x12f] sm:$0xff]  ;;  %1222 = vst.msk [vmem:[#allocation3 + $0x158] sm:$0x7] %vm222_vm1, %v1158_v34  ;;  %v711_v5 = vld [vmem:[#allocation2 + $0x1d8] sm:$0x7]  ;;  %v1030_v24 = vadd.f32 %v7201_v55, %v901_v6  ;;  %v1031_v61 = vadd.f32 %v7217_v17, %v902_v11  ;;  %v521_v15 = vadd.f32 %v7095_v46, %v7073_v7  ;;  %v7273_v11 = vld [vmem:[#allocation2 + $0x240] sm:$0xff] }
 0x111   : > { %v1485_v50 = vld [vmem:[#allocation3 + $0x129] sm:$0xff]  ;;  %v1486_v43 = vld [vmem:[#allocation3 + $0x131] sm:$0xff]  ;;  %v1644_v1 = vadd.f32 %v1612_v30, %v1580_v53  ;;  %341 = vst.msk [vmem:[#allocation2 + $0x250] sm:$0xff] %vm218_vm0, %v309_v58  ;;  %v775_v19 = vadd.f32 %v711_v5, %v647_v49  ;;  %v648_v62 = vadd.f32 %v7134_v60, %v519_v8  ;;  %v1032_v3 = vadd.f32 %v7219_v38, %v903_v35 }
 0x112   : > { %v1422_v27 = vld [vmem:[#allocation3 + $0x130] sm:$0xff]  ;;  %v1390_v37 = vadd.f32 %v1358_v26, %v1326_v25  ;;  %v1517_v48 = vadd.f32 %v1485_v50, %v1453_v63  ;;  %v7246_v18 = vld [vmem:[#allocation2 + $0x228] sm:$0xff]  ;;  %v840_v21 = vld [vmem:[#allocation2 + $0x1f8] sm:$0x7]  ;;  %v1159_v30 = vadd.f32 %v7244_v59, %v1030_v24  ;;  %v650_v7 = vadd.f32 %v7153_v2, %v521_v15 }
 0x113   : > { %v1549_v36 = vld [vmem:[#allocation3 + $0x12a] sm:$0xff]  ;;  %v1550_v9 = vld [vmem:[#allocation3 + $0x132] sm:$0xff]  ;;  %v1676_v13 = vmul.f32 0.020408163, %v1644_v1  ;;  %v1160_v50 = vadd.f32 %v7246_v18, %v1031_v61  ;;  %v776_v12 = vadd.f32 %v7166_v22, %v648_v62  ;;  %v523_v35 = vadd.f32 %v7134_v60, %v7077_v10 }
 0x114   : > { %v308_v57 = vld [vmem:[%s6609_s28 + $0xf0] sm:$0xff]  ;;  %v1454_v39 = vadd.f32 %v1422_v27, %v1390_v37  ;;  %v1581_v14 = vadd.f32 %v1549_v36, %v1517_v48  ;;  %v969_v26 = vld [vmem:[#allocation2 + $0x218] sm:$0x7]  ;;  %v904_v27 = vadd.f32 %v840_v21, %v775_v19  ;;  %v649_v37 = vadd.f32 %v7136_v28, %v520_v47  ;;  %1223 = vst.msk [vmem:[#allocation3 + $0x160] sm:$0xff] %vm218_vm0, %v1159_v30 }
 0x115   : > { %340 = vst.msk [vmem:[#allocation2 + $0x248] sm:$0xff] %vm218_vm0, %v308_v57  ;;  %v1613_v20 = vld [vmem:[#allocation3 + $0x12b] sm:$0xff]  ;;  %v1614_v29 = vld [vmem:[#allocation3 + $0x133] sm:$0xff]  ;;  %5625 = vmatmul.mubr.msk.f32.gmra.mrb[16].mxu0 %vm218_vm0, %v1676_v13  ;;  %1224 = vst.msk [vmem:[#allocation3 + $0x168] sm:$0xff] %vm218_vm0, %v1160_v50  ;;  %v905_v6 = vadd.f32 %v7201_v55, %v776_v12  ;;  %v524_v15 = vadd.f32 %v7136_v28, %v7091_v41 }
 0x116   : > { %v1518_v16 = vadd.f32 %v1486_v43, %v1454_v39  ;;  %v1645_v54 = vadd.f32 %v1613_v20, %v1581_v14  ;;  %v7254_v25 = vld [vmem:[#allocation2 + $0x230] sm:$0xff]  ;;  %v1098_v52 = vld [vmem:[#allocation2 + $0x238] sm:$0x7]  ;;  %v1263_v53 = vld [vmem:[#allocation3 + $0x145] sm:$0xff]  ;;  %v1033_v45 = vadd.f32 %v969_v26, %v904_v27  ;;  %v777_v48 = vadd.f32 %v7168_v23, %v649_v37 }
 0x117   : > { %v393_v32 = vld [vmem:[#allocation2 + $0x198] sm:$0x7]  ;;  %v1295_v63 = vld [vmem:[#allocation3 + $0x146] sm:$0xff]  ;;  %v1161_v43 = vadd.f32 %v7254_v25, %v1032_v3  ;;  %v1296_v1 = vld [vmem:[#allocation3 + $0x14e] sm:$0xff]  ;;  %v778_v39 = vadd.f32 %v7174_v31, %v650_v7  ;;  %v1034_v19 = vadd.f32 %v7244_v59, %v905_v6  ;;  %v525_v27 = vadd.f32 %v7153_v2, %v7095_v46 }
 0x118   : > { %v1582_v44 = vadd.f32 %v1550_v9, %v1518_v16  ;;  %v458_v34 = vld [vmem:[#allocation2 + $0x1b8] sm:$0x7]  ;;  %v1677_v4 = vmul.f32 0.020408163, %v1645_v54  ;;  %v1359_v36 = vld [vmem:[#allocation3 + $0x147] sm:$0xff]  ;;  %v1327_v42 = vadd.f32 %v1295_v63, %v1263_v53  ;;  %v1360_v9 = vld [vmem:[#allocation3 + $0x14f] sm:$0xff]  ;;  %v1162_v40 = vadd.f32 %v1098_v52, %v1033_v45 }
 0x119   : > { %v587_v51 = vld [vmem:[#allocation2 + $0x1d8] sm:$0x7]  ;;  %v1423_v57 = vld [vmem:[#allocation3 + $0x148] sm:$0xff]  ;;  %v522_v5 = vadd.f32 %v458_v34, %v393_v32  ;;  %1225 = vst.msk [vmem:[#allocation3 + $0x170] sm:$0xff] %vm218_vm0, %v1161_v43  ;;  %v1424_v14 = vld [vmem:[#allocation3 + $0x150] sm:$0xff]  ;;  %v906_v16 = vadd.f32 %v7217_v17, %v777_v48  ;;  %v907_v21 = vadd.f32 %v7219_v38, %v778_v39  ;;  %v1163_v53 = vadd.f32 %v7273_v11, %v1034_v19 }
 0x11a   : > { %v1646_v33 = vadd.f32 %v1614_v29, %v1582_v44  ;;  %5627 = vmatprep.mubr.msk.f32.mxu0 %vm218_vm0, %v1677_v4  ;;  %v1264_v58 = vld [vmem:[#allocation3 + $0x14d] sm:$0xff]  ;;  %v1391_v8 = vadd.f32 %v1359_v36, %v1327_v42  ;;  %v715_v49 = vld [vmem:[#allocation2 + $0x1f8] sm:$0x7]  ;;  %1226 = vst.msk [vmem:[#allocation3 + $0x178] sm:$0x7] %vm222_vm1, %v1162_v40  ;;  %v652_v63 = vadd.f32 %v7166_v22, %v523_v35  ;;  %v7306_v19 = vld [vmem:[#allocation2 + $0x260] sm:$0xff] }
 0x11b   : > { %v1328_v20 = vadd.f32 %v1296_v1, %v1264_v58  ;;  %v1487_v13 = vld [vmem:[#allocation3 + $0x149] sm:$0xff]  ;;  %v651_v47 = vadd.f32 %v587_v51, %v522_v5  ;;  %v844_v29 = vld [vmem:[#allocation2 + $0x218] sm:$0x7]  ;;  %v1035_v30 = vadd.f32 %v7246_v18, %v906_v16  ;;  %v1036_v10 = vadd.f32 %v7254_v25, %v907_v21  ;;  %1227 = vst.msk [vmem:[#allocation3 + $0x180] sm:$0xff] %vm218_vm0, %v1163_v53 }
 0x11c   : > { %v1678_v56 = vmul.f32 0.020408163, %v1646_v33  ;;  %v1455_v24 = vadd.f32 %v1423_v57, %v1391_v8  ;;  %v7282_v54 = vld [vmem:[#allocation2 + $0x248] sm:$0xff]  ;;  %v7284_v44 = vld [vmem:[#allocation2 + $0x250] sm:$0xff]  ;;  %v973_v26 = vld [vmem:[#allocation2 + $0x238] sm:$0x7]  ;;  %v653_v46 = vadd.f32 %v7168_v23, %v524_v15  ;;  %v654_v58 = vadd.f32 %v7174_v31, %v525_v27 }
 0x11d   : > { %v1392_v61 = vadd.f32 %v1360_v9, %v1328_v20  ;;  %v1551_v62 = vld [vmem:[#allocation3 + $0x14a] sm:$0xff]  ;;  %v779_v50 = vadd.f32 %v715_v49, %v651_v47  ;;  %v397_v52 = vld [vmem:[#allocation2 + $0x1b8] sm:$0x7]  ;;  %v1164_v42 = vadd.f32 %v7282_v54, %v1035_v30  ;;  %v1165_v43 = vadd.f32 %v7284_v44, %v1036_v10 }
 0x11e   : > { %5628 = vmatmul.mubr.msk.f32.gmra.mrb[18].mxu0 %vm218_vm0, %v1678_v56  ;;  %v1488_v3 = vld [vmem:[#allocation3 + $0x151] sm:$0xff]  ;;  %v1519_v32 = vadd.f32 %v1487_v13, %v1455_v24  ;;  %v1265_v36 = vld [vmem:[#allocation3 + $0x165] sm:$0xff]  ;;  %v780_v5 = vadd.f32 %v7201_v55, %v652_v63  ;;  %v781_v8 = vadd.f32 %v7217_v17, %v653_v46  ;;  %v782_v21 = vadd.f32 %v7219_v38, %v654_v58 }
 0x11f   : > { %v1615_v34 = vld [vmem:[#allocation3 + $0x14b] sm:$0xff]  ;;  %v1456_v4 = vadd.f32 %v1424_v14, %v1392_v61  ;;  %v462_v41 = vld [vmem:[#allocation2 + $0x1d8] sm:$0x7]  ;;  %v908_v45 = vadd.f32 %v844_v29, %v779_v50  ;;  %1228 = vst.msk [vmem:[#allocation3 + $0x188] sm:$0xff] %vm218_vm0, %v1164_v42  ;;  %1229 = vst.msk [vmem:[#allocation3 + $0x190] sm:$0xff] %vm218_vm0, %v1165_v43  ;;  %v527_v42 = vadd.f32 %v7166_v22, %v7134_v60 }
 0x120   : > { %v1552_v33 = vld [vmem:[#allocation3 + $0x152] sm:$0xff]  ;;  %v1297_v37 = vld [vmem:[#allocation3 + $0x166] sm:$0xff]  ;;  %v1583_v12 = vadd.f32 %v1551_v62, %v1519_v32  ;;  %v526_v20 = vadd.f32 %v462_v41, %v397_v52  ;;  %v909_v24 = vadd.f32 %v7244_v59, %v780_v5  ;;  %v910_v61 = vadd.f32 %v7246_v18, %v781_v8 }
 0x121   : > { %v1361_v7 = vld [vmem:[#allocation3 + $0x167] sm:$0xff]  ;;  %v1520_v51 = vadd.f32 %v1488_v3, %v1456_v4  ;;  %v1329_v56 = vadd.f32 %v1297_v37, %v1265_v36  ;;  %v1102_v57 = vld [vmem:[#allocation2 + $0x258] sm:$0x7]  ;;  %v1037_v39 = vadd.f32 %v973_v26, %v908_v45  ;;  %v1362_v16 = vld [vmem:[#allocation3 + $0x16f] sm:$0xff]  ;;  %v911_v30 = vadd.f32 %v7254_v25, %v782_v21 }
 0x122   : > { %v1616_v1 = vld [vmem:[#allocation3 + $0x153] sm:$0xff]  ;;  %v1425_v48 = vld [vmem:[#allocation3 + $0x168] sm:$0xff]  ;;  %v1647_v40 = vadd.f32 %v1615_v34, %v1583_v12  ;;  %v1038_v32 = vadd.f32 %v7273_v11, %v909_v24  ;;  %v1039_v34 = vadd.f32 %v7282_v54, %v910_v61  ;;  %v528_v60 = vadd.f32 %v7168_v23, %v7136_v28 }
 0x123   : > { %v591_v9 = vld [vmem:[#allocation2 + $0x1f8] sm:$0x7]  ;;  %v1584_v6 = vadd.f32 %v1552_v33, %v1520_v51  ;;  %v1393_v49 = vadd.f32 %v1361_v7, %v1329_v56  ;;  %v1266_v13 = vld [vmem:[#allocation3 + $0x16d] sm:$0xff]  ;;  %v1166_v35 = vadd.f32 %v1102_v57, %v1037_v39  ;;  %v1040_v37 = vadd.f32 %v7284_v44, %v911_v30 }
 0x124   : > { %v1298_v14 = vld [vmem:[#allocation3 + $0x16e] sm:$0xff]  ;;  %v1679_v26 = vmul.f32 0.020408163, %v1647_v40  ;;  %v719_v50 = vld [vmem:[#allocation2 + $0x218] sm:$0x7]  ;;  %v655_v33 = vadd.f32 %v591_v9, %v526_v20  ;;  %v1167_v51 = vadd.f32 %v7306_v19, %v1038_v32  ;;  %v529_v20 = vadd.f32 %v7174_v31, %v7153_v2 }
 0x125   : > { %v1489_v47 = vld [vmem:[#allocation3 + $0x169] sm:$0xff]  ;;  %v1330_v29 = vadd.f32 %v1298_v14, %v1266_v13  ;;  %v1648_v15 = vadd.f32 %v1616_v1, %v1584_v6  ;;  %v1457_v62 = vadd.f32 %v1425_v48, %v1393_v49  ;;  %1230 = vst.msk [vmem:[#allocation3 + $0x198] sm:$0x7] %vm222_vm1, %v1166_v35  ;;  %v848_v53 = vld [vmem:[#allocation2 + $0x238] sm:$0x7]  ;;  %v656_v14 = vadd.f32 %v7201_v55, %v527_v42 }
 0x126   : > { %v1426_v3 = vld [vmem:[#allocation3 + $0x170] sm:$0xff]  ;;  %v7309_v10 = vld [vmem:[#allocation2 + $0x268] sm:$0xff]  ;;  %5630 = vmatprep.mubr.msk.f32.mxu0 %vm218_vm0, %v1679_v26  ;;  %v977_v7 = vld [vmem:[#allocation2 + $0x258] sm:$0x7]  ;;  %v783_v57 = vadd.f32 %v719_v50, %v655_v33  ;;  %1231 = vst.msk [vmem:[#allocation3 + $0x1a0] sm:$0xff] %vm218_vm0, %v1167_v51  ;;  %v657_v28 = vadd.f32 %v7217_v17, %v528_v60  ;;  %v658_v2 = vadd.f32 %v7219_v38, %v529_v20 }
 0x127   : > { %v1553_v27 = vld [vmem:[#allocation3 + $0x16a] sm:$0xff]  ;;  %v1394_v52 = vadd.f32 %v1362_v16, %v1330_v29  ;;  %v1680_v63 = vmul.f32 0.020408163, %v1648_v15  ;;  %v1521_v41 = vadd.f32 %v1489_v47, %v1457_v62  ;;  %v401_v43 = vld [vmem:[#allocation2 + $0x1d8] sm:$0x7]  ;;  %v1168_v56 = vadd.f32 %v7309_v10, %v1039_v34 }
 0x128   : > { %v7314_v4 = vld [vmem:[#allocation2 + $0x270] sm:$0xff]  ;;  %v466_v58 = vld [vmem:[#allocation2 + $0x1f8] sm:$0x7]  ;;  %v1267_v48 = vld [vmem:[#allocation3 + $0x185] sm:$0xff]  ;;  %v912_v49 = vadd.f32 %v848_v53, %v783_v57  ;;  %v785_v32 = vadd.f32 %v7246_v18, %v657_v28  ;;  %v786_v34 = vadd.f32 %v7254_v25, %v658_v2 }
 0x129   : > { %v1490_v36 = vld [vmem:[#allocation3 + $0x171] sm:$0xff]  ;;  %v1458_v46 = vadd.f32 %v1426_v3, %v1394_v52  ;;  %5631 = vmatmul.mubr.msk.f32.gmra.mrb[20].mxu0 %vm218_vm0, %v1680_v63  ;;  %v1585_v1 = vadd.f32 %v1553_v27, %v1521_v41  ;;  %v1299_v39 = vld [vmem:[#allocation3 + $0x186] sm:$0xff]  ;;  %v1169_v8 = vadd.f32 %v7314_v4, %v1040_v37  ;;  %1232 = vst.msk [vmem:[#allocation3 + $0x1a8] sm:$0xff] %vm218_vm0, %v1168_v56 }
 0x12a   : > { %v1617_v45 = vld [vmem:[#allocation3 + $0x16b] sm:$0xff]  ;;  %v1618_v40 = vld [vmem:[#allocation3 + $0x173] sm:$0xff]  ;;  %v1331_v6 = vadd.f32 %v1299_v39, %v1267_v48  ;;  %v530_v35 = vadd.f32 %v466_v58, %v401_v43  ;;  %v1041_v62 = vadd.f32 %v977_v7, %v912_v49  ;;  %v784_v52 = vadd.f32 %v7244_v59, %v656_v14 }
 0x12b   : > { %v1554_v12 = vld [vmem:[#allocation3 + $0x172] sm:$0xff]  ;;  %v1363_v5 = vld [vmem:[#allocation3 + $0x187] sm:$0xff]  ;;  %v1522_v9 = vadd.f32 %v1490_v36, %v1458_v46  ;;  %v1649_v16 = vadd.f32 %v1617_v45, %v1585_v1  ;;  %1233 = vst.msk [vmem:[#allocation3 + $0x1b0] sm:$0xff] %vm218_vm0, %v1169_v8  ;;  %v914_v46 = vadd.f32 %v7282_v54, %v785_v32  ;;  %v531_v8 = vadd.f32 %v7201_v55, %v7166_v22 }
 0x12c   : > { %v1106_v13 = vld [vmem:[#allocation2 + $0x278] sm:$0x7]  ;;  %v1427_v21 = vld [vmem:[#allocation3 + $0x188] sm:$0xff]  ;;  %v1395_v61 = vadd.f32 %v1363_v5, %v1331_v6  ;;  %v1428_v27 = vld [vmem:[#allocation3 + $0x190] sm:$0xff]  ;;  %v913_v45 = vadd.f32 %v7273_v11, %v784_v52  ;;  %v532_v22 = vadd.f32 %v7217_v17, %v7168_v23  ;;  %v533_v17 = vadd.f32 %v7219_v38, %v7174_v31 }
 0x12d   : > { %v1268_v47 = vld [vmem:[#allocation3 + $0x18d] sm:$0xff]  ;;  %v1586_v24 = vadd.f32 %v1554_v12, %v1522_v9  ;;  %v595_v3 = vld [vmem:[#allocation2 + $0x218] sm:$0x7]  ;;  %v1681_v30 = vmul.f32 0.020408163, %v1649_v16  ;;  %v1170_v41 = vadd.f32 %v1106_v13, %v1041_v62  ;;  %v7337_v36 = vld [vmem:[#allocation2 + $0x280] sm:$0xff]  ;;  %v915_v12 = vadd.f32 %v7284_v44, %v786_v34 }
 0x12e   : > { %v1300_v29 = vld [vmem:[#allocation3 + $0x18e] sm:$0xff]  ;;  %v1459_v53 = vadd.f32 %v1427_v21, %v1395_v61  ;;  %v723_v42 = vld [vmem:[#allocation2 + $0x238] sm:$0x7]  ;;  %v659_v56 = vadd.f32 %v595_v3, %v530_v35  ;;  %v1043_v6 = vadd.f32 %v7309_v10, %v914_v46 }
 0x12f   : > { %v1332_v26 = vadd.f32 %v1300_v29, %v1268_v47  ;;  %v1364_v15 = vld [vmem:[#allocation3 + $0x18f] sm:$0xff]  ;;  %v1650_v33 = vadd.f32 %v1618_v40, %v1586_v24  ;;  %5633 = vmatprep.mubr.msk.f32.mxu0 %vm218_vm0, %v1681_v30  ;;  %1234 = vst.msk [vmem:[#allocation3 + $0x1b8] sm:$0x7] %vm222_vm1, %v1170_v41  ;;  %v852_v5 = vld [vmem:[#allocation2 + $0x258] sm:$0x7]  ;;  %v1042_v40 = vadd.f32 %v7306_v19, %v913_v45 }
 0x130   : > { %v1491_v50 = vld [vmem:[#allocation3 + $0x189] sm:$0xff]  ;;  %v1492_v43 = vld [vmem:[#allocation3 + $0x191] sm:$0xff]  ;;  %v1044_v49 = vadd.f32 %v7314_v4, %v915_v12  ;;  %v787_v13 = vadd.f32 %v723_v42, %v659_v56  ;;  %v662_v56 = vadd.f32 %v7254_v25, %v533_v17 }
 0x131   : > { %v1396_v63 = vadd.f32 %v1364_v15, %v1332_v26  ;;  %v7339_v37 = vld [vmem:[#allocation2 + $0x288] sm:$0xff]  ;;  %v7345_v51 = vld [vmem:[#allocation2 + $0x290] sm:$0xff]  ;;  %v1682_v57 = vmul.f32 0.020408163, %v1650_v33  ;;  %v1523_v58 = vadd.f32 %v1491_v50, %v1459_v53  ;;  %v981_v29 = vld [vmem:[#allocation2 + $0x278] sm:$0x7]  ;;  %v1171_v35 = vadd.f32 %v7337_v36, %v1042_v40 }
 0x132   : > { %v1555_v7 = vld [vmem:[#allocation3 + $0x18a] sm:$0xff]  ;;  %v1556_v39 = vld [vmem:[#allocation3 + $0x192] sm:$0xff]  ;;  %v1172_v24 = vadd.f32 %v7339_v37, %v1043_v6  ;;  %v1173_v61 = vadd.f32 %v7345_v51, %v1044_v49  ;;  %v916_v26 = vadd.f32 %v852_v5, %v787_v13  ;;  %v660_v33 = vadd.f32 %v7244_v59, %v531_v8 }
 0x133   : > { %v1619_v1 = vld [vmem:[#allocation3 + $0x18b] sm:$0xff]  ;;  %v1460_v48 = vadd.f32 %v1428_v27, %v1396_v63  ;;  %5634 = vmatmul.mubr.msk.f32.gmra.mrb[22].mxu0 %vm218_vm0, %v1682_v57  ;;  %v1587_v14 = vadd.f32 %v1555_v7, %v1523_v58  ;;  %v1620_v21 = vld [vmem:[#allocation3 + $0x193] sm:$0xff]  ;;  %1235 = vst.msk [vmem:[#allocation3 + $0x1c0] sm:$0xff] %vm218_vm0, %v1171_v35  ;;  %v661_v53 = vadd.f32 %v7246_v18, %v532_v22 }
 0x134   : > { %v1269_v60 = vld [vmem:[#allocation3 + $0x1a5] sm:$0xff]  ;;  %v1270_v28 = vld [vmem:[#allocation3 + $0x1ad] sm:$0xff]  ;;  %v1110_v27 = vld [vmem:[#allocation2 + $0x298] sm:$0x7]  ;;  %1236 = vst.msk [vmem:[#allocation3 + $0x1c8] sm:$0xff] %vm218_vm0, %v1172_v24  ;;  %v1045_v23 = vadd.f32 %v981_v29, %v916_v26  ;;  %v788_v57 = vadd.f32 %v7273_v11, %v660_v33  ;;  %v790_v5 = vadd.f32 %v7284_v44, %v662_v56 }
 0x135   : > { %v1301_v20 = vld [vmem:[#allocation3 + $0x1a6] sm:$0xff]  ;;  %v1524_v16 = vadd.f32 %v1492_v43, %v1460_v48  ;;  %v1302_v2 = vld [vmem:[#allocation3 + $0x1ae] sm:$0xff]  ;;  %v1651_v15 = vadd.f32 %v1619_v1, %v1587_v14  ;;  %v405_v52 = vld [vmem:[#allocation2 + $0x1f8] sm:$0x7]  ;;  %1237 = vst.msk [vmem:[#allocation3 + $0x1d0] sm:$0xff] %vm218_vm0, %v1173_v61  ;;  %v789_v58 = vadd.f32 %v7282_v54, %v661_v53 }
 0x136   : > { %v1365_v9 = vld [vmem:[#allocation3 + $0x1a7] sm:$0xff]  ;;  %v1333_v47 = vadd.f32 %v1301_v20, %v1269_v60  ;;  %v1334_v30 = vadd.f32 %v1302_v2, %v1270_v28  ;;  %v1366_v50 = vld [vmem:[#allocation3 + $0x1af] sm:$0xff]  ;;  %v470_v63 = vld [vmem:[#allocation2 + $0x218] sm:$0x7]  ;;  %v1174_v12 = vadd.f32 %v1110_v27, %v1045_v23  ;;  %v917_v8 = vadd.f32 %v7306_v19, %v788_v57 }
 0x137   : > { %v1429_v55 = vld [vmem:[#allocation3 + $0x1a8] sm:$0xff]  ;;  %v1588_v62 = vadd.f32 %v1556_v39, %v1524_v16  ;;  %v1430_v34 = vld [vmem:[#allocation3 + $0x1b0] sm:$0xff]  ;;  %v1683_v41 = vmul.f32 0.020408163, %v1651_v15  ;;  %v599_v1 = vld [vmem:[#allocation2 + $0x238] sm:$0x7]  ;;  %v534_v18 = vadd.f32 %v470_v63, %v405_v52  ;;  %v918_v25 = vadd.f32 %v7309_v10, %v789_v58 }
 0x138   : > { %v1397_v3 = vadd.f32 %v1365_v9, %v1333_v47  ;;  %v1493_v32 = vld [vmem:[#allocation3 + $0x1a9] sm:$0xff]  ;;  %v1398_v43 = vadd.f32 %v1366_v50, %v1334_v30  ;;  %v1494_v46 = vld [vmem:[#allocation3 + $0x1b1] sm:$0xff]  ;;  %1238 = vst.msk [vmem:[#allocation3 + $0x1d8] sm:$0x7] %vm222_vm1, %v1174_v12  ;;  %v1111_v20 = vld [vmem:[#allocation2 + $0x2a0] sm:$0xff]  ;;  %v919_v49 = vadd.f32 %v7314_v4, %v790_v5  ;;  %v1046_v13 = vadd.f32 %v7337_v36, %v917_v8 }
 0x139   : > { %v1652_v42 = vadd.f32 %v1620_v21, %v1588_v62  ;;  %v1557_v45 = vld [vmem:[#allocation3 + $0x1aa] sm:$0xff]  ;;  %5636 = vmatprep.mubr.msk.f32.mxu0 %vm218_vm0, %v1683_v41  ;;  %v1558_v39 = vld [vmem:[#allocation3 + $0x1b2] sm:$0xff]  ;;  %v663_v40 = vadd.f32 %v599_v1, %v534_v18  ;;  %v1047_v14 = vadd.f32 %v7339_v37, %v918_v25 }
 0x13a   : > { %v1461_v7 = vadd.f32 %v1429_v55, %v1397_v3  ;;  %v1462_v59 = vadd.f32 %v1430_v34, %v1398_v43  ;;  %v1621_v48 = vld [vmem:[#allocation3 + $0x1ab] sm:$0xff]  ;;  %v727_v11 = vld [vmem:[#allocation2 + $0x258] sm:$0x7]  ;;  %v1048_v28 = vadd.f32 %v7345_v51, %v919_v49  ;;  %v1175_v2 = vadd.f32 %v1111_v20, %v1046_v13 }
 0x13b   : > { %v1684_v31 = vmul.f32 0.020408163, %v1652_v42  ;;  %v1112_v9 = vld [vmem:[#allocation2 + $0x2a8] sm:$0xff]  ;;  %v1622_v6 = vld [vmem:[#allocation3 + $0x1b3] sm:$0xff]  ;;  %v791_v22 = vadd.f32 %v727_v11, %v663_v40 }
 0x13c   : > { %v1525_v38 = vadd.f32 %v1493_v32, %v1461_v7  ;;  %v1526_v60 = vadd.f32 %v1494_v46, %v1462_v59  ;;  %v1113_v44 = vld [vmem:[#allocation2 + $0x2b0] sm:$0xff]  ;;  %v856_v16 = vld [vmem:[#allocation2 + $0x278] sm:$0x7]  ;;  %v1271_v10 = vld [vmem:[#allocation3 + $0x1c5] sm:$0xff]  ;;  %v1176_v35 = vadd.f32 %v1112_v9, %v1047_v14  ;;  %1239 = vst.msk [vmem:[#allocation3 + $0x1e0] sm:$0xff] %vm218_vm0, %v1175_v2 }
 0x13d   : > { %5637 = vmatmul.mubr.msk.f32.gmra.mrb[24].mxu0 %vm218_vm0, %v1684_v31  ;;  %v1303_v47 = vld [vmem:[#allocation3 + $0x1c6] sm:$0xff]  ;;  %v985_v24 = vld [vmem:[#allocation2 + $0x298] sm:$0x7]  ;;  %v1304_v15 = vld [vmem:[#allocation3 + $0x1ce] sm:$0xff]  ;;  %v920_v37 = vadd.f32 %v856_v16, %v791_v22  ;;  %v1177_v50 = vadd.f32 %v1113_v44, %v1048_v28 }
 0x13e   : > { %v1589_v54 = vadd.f32 %v1557_v45, %v1525_v38  ;;  %v1590_v21 = vadd.f32 %v1558_v39, %v1526_v60  ;;  %v1367_v29 = vld [vmem:[#allocation3 + $0x1c7] sm:$0xff]  ;;  %v1335_v55 = vadd.f32 %v1303_v47, %v1271_v10  ;;  %v1368_v30 = vld [vmem:[#allocation3 + $0x1cf] sm:$0xff]  ;;  %1240 = vst.msk [vmem:[#allocation3 + $0x1e8] sm:$0xff] %vm218_vm0, %v1176_v35  ;;  %v1114_v27 = vld [vmem:[#allocation2 + $0x2b8] sm:$0x7] }
 0x13f   : > { %v1431_v26 = vld [vmem:[#allocation3 + $0x1c8] sm:$0xff]  ;;  %v1432_v32 = vld [vmem:[#allocation3 + $0x1d0] sm:$0xff]  ;;  %v1049_v34 = vadd.f32 %v985_v24, %v920_v37  ;;  %1241 = vst.msk [vmem:[#allocation3 + $0x1f0] sm:$0xff] %vm218_vm0, %v1177_v50  ;;  %v7421_v28 = vld [vmem:[#allocation9 + $0x18] ss:$0 sm:$0xff] }
 0x140   : > { %v1653_v19 = vadd.f32 %v1621_v48, %v1589_v54  ;;  %v1654_v4 = vadd.f32 %v1622_v6, %v1590_v21  ;;  %v1272_v36 = vld [vmem:[#allocation3 + $0x1cd] sm:$0xff]  ;;  %v1399_v62 = vadd.f32 %v1367_v29, %v1335_v55 }
 0x141   : > { %v1336_v3 = vadd.f32 %v1304_v15, %v1272_v36  ;;  %v1495_v52 = vld [vmem:[#allocation3 + $0x1c9] sm:$0xff]  ;;  %v1496_v53 = vld [vmem:[#allocation3 + $0x1d1] sm:$0xff]  ;;  %v1178_v63 = vadd.f32 %v1114_v27, %v1049_v34 }
 0x142   : > { %v1685_v61 = vmul.f32 0.020408163, %v1653_v19  ;;  %v1686_v51 = vmul.f32 0.020408163, %v1654_v4  ;;  %v1463_v23 = vadd.f32 %v1431_v26, %v1399_v62  ;;  %v1559_v33 = vld [vmem:[#allocation3 + $0x1ca] sm:$0xff]  ;;  %v1560_v43 = vld [vmem:[#allocation3 + $0x1d2] sm:$0xff] }
 0x143   : > { %v1400_v17 = vadd.f32 %v1368_v30, %v1336_v3  ;;  %v1623_v7 = vld [vmem:[#allocation3 + $0x1cb] sm:$0xff]  ;;  %1242 = vst.msk [vmem:[#allocation3 + $0x1f8] sm:$0x7] %vm222_vm1, %v1178_v63  ;;  %v1624_v12 = vld [vmem:[#allocation3 + $0x1d3] sm:$0xff] }
 0x144   : > { %5639 = vmatprep.mubr.msk.f32.mxu0 %vm218_vm0, %v1685_v61  ;;  %v1527_v41 = vadd.f32 %v1495_v52, %v1463_v23 }
 0x145   : > { %5640 = vmatmul.mubr.msk.f32.gmra.mrb[26].mxu0 %vm218_vm0, %v1686_v51  ;;  %v1464_v42 = vadd.f32 %v1432_v32, %v1400_v17  ;;  %v1273_v56 = vld [vmem:[#allocation3 + $0x1e5] sm:$0xff] }
 0x146   : > { %v1591_v45 = vadd.f32 %v1559_v33, %v1527_v41  ;;  %v1305_v57 = vld [vmem:[#allocation3 + $0x1e6] sm:$0xff]  ;;  %v1306_v8 = vld [vmem:[#allocation3 + $0x1ee] sm:$0xff] }
 0x147   : > { %v1528_v46 = vadd.f32 %v1496_v53, %v1464_v42  ;;  %v1369_v58 = vld [vmem:[#allocation3 + $0x1e7] sm:$0xff]  ;;  %v1337_v38 = vadd.f32 %v1305_v57, %v1273_v56  ;;  %v1370_v25 = vld [vmem:[#allocation3 + $0x1ef] sm:$0xff] }
 0x148   : > { %v1655_v1 = vadd.f32 %v1623_v7, %v1591_v45  ;;  %v1433_v59 = vld [vmem:[#allocation3 + $0x1e8] sm:$0xff]  ;;  %v1434_v20 = vld [vmem:[#allocation3 + $0x1f0] sm:$0xff] }
 0x149   : > { %v1592_v31 = vadd.f32 %v1560_v43, %v1528_v46  ;;  %v1401_v39 = vadd.f32 %v1369_v58, %v1337_v38  ;;  %v1274_v5 = vld [vmem:[#allocation3 + $0x1ed] sm:$0xff] }
 0x14a   : > { %v1687_v18 = vmul.f32 0.020408163, %v1655_v1  ;;  %v1497_v11 = vld [vmem:[#allocation3 + $0x1e9] sm:$0xff]  ;;  %v1338_v54 = vadd.f32 %v1306_v8, %v1274_v5  ;;  %v1498_v49 = vld [vmem:[#allocation3 + $0x1f1] sm:$0xff] }
 0x14b   : > { %v1656_v48 = vadd.f32 %v1624_v12, %v1592_v31  ;;  %v1465_v60 = vadd.f32 %v1433_v59, %v1401_v39  ;;  %v1561_v9 = vld [vmem:[#allocation3 + $0x1ea] sm:$0xff]  ;;  %v1562_v16 = vld [vmem:[#allocation3 + $0x1f2] sm:$0xff] }
 0x14c   : > { %5642 = vmatprep.mubr.msk.f32.mxu0 %vm218_vm0, %v1687_v18  ;;  %v1402_v40 = vadd.f32 %v1370_v25, %v1338_v54  ;;  %v1625_v13 = vld [vmem:[#allocation3 + $0x1eb] sm:$0xff]  ;;  %v1626_v10 = vld [vmem:[#allocation3 + $0x1f3] sm:$0xff] }
 0x14d   : > { %v1688_v0 = vmul.f32 0.020408163, %v1656_v48  ;;  %v1529_v6 = vadd.f32 %v1497_v11, %v1465_v60 }
 0x14e   : > { %v1466_v14 = vadd.f32 %v1434_v20, %v1402_v40 }
 0x14f   : > { %5643 = vmatmul.mubr.msk.f32.gmra.mrb[28].mxu0 %vm218_vm0, %v1688_v0  ;;  %v1593_v44 = vadd.f32 %v1561_v9, %v1529_v6 }
 0x150   : > { %v1530_v19 = vadd.f32 %v1498_v49, %v1466_v14 }
 0x151   : > { %v1657_v21 = vadd.f32 %v1625_v13, %v1593_v44 }
 0x152   : > { %v1594_v47 = vadd.f32 %v1562_v16, %v1530_v19 }
 0x153   : > { %v1689_v29 = vmul.f32 0.020408163, %v1657_v21 }
 0x154   : > { %v1658_v22 = vadd.f32 %v1626_v10, %v1594_v47 }
 0x155   : > { %5645 = vmatprep.mubr.msk.f32.mxu0 %vm218_vm0, %v1689_v29 }
 0x156   : > { %v1690_v55 = vmul.f32 0.020408163, %v1658_v22  ;;  %v7456_v22 = vld [vmem:[#allocation9 + $0x5] ss:$0 sm:$0xff] }
 0x158   : > { %5646 = vmatmul.mubr.msk.f32.gmra.mrb[30].mxu0 %vm218_vm0, %v1690_v55  ;;  %v7458_v55 = vld [vmem:[#allocation9 + $0x6] ss:$0 sm:$0xff] }
 0x198   : > { %v5602_v2 = vpop.f32.mrb[0].mxu0 }
 0x199   : > { %v1868_v35 = vadd.f32 %v5602_v2, %v7421_v28  ;;  %v1862_v24 = vpop.f32.mrb[1].mxu0 }
 0x19a   : > { %v1863_v61 = vadd.f32 %v7421_v28, %v1862_v24  ;;  %v7461_v24 = vld [vmem:[#allocation9 + $0x7] ss:$0 sm:$0xff] }
 0x19b   : > { %v2022_v4 = vsub.f32 0.0, %v1868_v35 }
 0x19c   : > { %v2021_v26 = vsub.f32 0.0, %v1863_v61 }
 0x19d   : > { %v2055_v36 = vmul.f32 1.442695, %v2022_v4  ;;  %v7465_v4 = vld [vmem:[#allocation9] ss:$0 sm:$0xff] }
 0x19e   : > { %v2053_v15 = vmul.f32 1.442695, %v2021_v26  ;;  %10090 = vst [vmem:[#allocation18_spill] sm:$0xff] %v7465_v4  ;;  %v7467_v26 = vld [vmem:[#allocation9 + $0x1] ss:$0 sm:$0xff] }
 0x19f   : > { %v5605_v37 = vpop.f32.mrb[2].mxu0  ;;  %5792 = vpow2.f32 %v2055_v36  ;;  %10091 = vst [vmem:[#allocation19_spill] sm:$0xff] %v7467_v26 }
 0x1a0   : > { %v1878_v62 = vadd.f32 %v5605_v37, %v7421_v28  ;;  %v1872_v3 = vpop.f32.mrb[3].mxu0  ;;  %5794 = vpow2.f32 %v2053_v15 }
 0x1a1   : > { %v7427_v30 = vadd.f32 %v7421_v28, %v1872_v3  ;;  %v7472_v3 = vld [vmem:[#allocation9 + $0xa] ss:$0 sm:$0xff] }
 0x1a2   : > { %v2024_v50 = vsub.f32 0.0, %v1878_v62  ;;  %10092 = vst [vmem:[#allocation20_spill] sm:$0xff] %v7472_v3 }
 0x1a3   : > { %v2023_v27 = vsub.f32 0.0, %v7427_v30 }
 0x1a4   : > { %v2059_v51 = vmul.f32 1.442695, %v2024_v50 }
 0x1a5   : > { %v2057_v52 = vmul.f32 1.442695, %v2023_v27 }
 0x1a6   : > { %5796 = vpow2.f32 %v2059_v51 }
 0x1a7   : > { %5798 = vpow2.f32 %v2057_v52 }
 0x1a8   : > { %v5608_v32 = vpop.f32.mrb[4].mxu0 }
 0x1a9   : > { %v7431_v34 = vadd.f32 %v5608_v32, %v7421_v28  ;;  %v1882_v23 = vpop.f32.mrb[5].mxu0  ;;  %v5793_v53 = vpop.eup %5792 }
 0x1aa   : > { %v7434_v17 = vadd.f32 %v7421_v28, %v1882_v23  ;;  %v5795_v41 = vpop.eup %5794  ;;  %v2118_v42 = vadd.f32 1.0, %v5793_v53 }
 0x1ab   : > { %v2026_v33 = vsub.f32 0.0, %v7431_v34  ;;  %v2117_v45 = vadd.f32 1.0, %v5795_v41  ;;  %v7480_v41 = vld [vmem:[#allocation9 + $0x3] ss:$0 sm:$0xff] }
 0x1ac   : > { %v2025_v63 = vsub.f32 0.0, %v7434_v17  ;;  %5800 = vrcp.f32 %v2118_v42  ;;  %10094 = vst [vmem:[#allocation22_spill] sm:$0xff] %v7480_v41 }
 0x1ad   : > { %v2063_v7 = vmul.f32 1.442695, %v2026_v33  ;;  %5802 = vrcp.f32 %v2117_v45 }
 0x1ae   : > { %v5611_v43 = vpop.f32.mrb[6].mxu0  ;;  %v2061_v46 = vmul.f32 1.442695, %v2025_v63 }
 0x1af   : > { %v7439_v12 = vadd.f32 %v5611_v43, %v7421_v28  ;;  %v1892_v56 = vpop.f32.mrb[7].mxu0  ;;  %5804 = vpow2.f32 %v2063_v7 }
 0x1b0   : > { %v7442_v57 = vadd.f32 %v7421_v28, %v1892_v56  ;;  %v5797_v31 = vpop.eup %5796  ;;  %5806 = vpow2.f32 %v2061_v46 }
 0x1b1   : > { %v2028_v58 = vsub.f32 0.0, %v7439_v12  ;;  %v5799_v59 = vpop.eup %5798  ;;  %v2120_v18 = vadd.f32 1.0, %v5797_v31 }
 0x1b2   : > { %v2027_v1 = vsub.f32 0.0, %v7442_v57  ;;  %v2119_v39 = vadd.f32 1.0, %v5799_v59 }
 0x1b3   : > { %v2067_v38 = vmul.f32 1.442695, %v2028_v58 }
 0x1b4   : > { %v2065_v48 = vmul.f32 1.442695, %v2027_v1 }
 0x1b5   : > { %5808 = vpow2.f32 %v2067_v38 }
 0x1b6   : > { %5810 = vrcp.f32 %v2120_v18  ;;  %v5801_v5 = vpop.eup %5800 }
 0x1b7   : > { %5812 = vrcp.f32 %v2119_v39  ;;  %v5803_v25 = vpop.eup %5802  ;;  %v2182_v11 = vmul.f32 %v5801_v5, %v1868_v35  ;;  %v7497_v39 = vld [vmem:[#allocation9 + $0x4] ss:$0 sm:$0xff] }
 0x1b8   : > { %5814 = vpow2.f32 %v2065_v48  ;;  %v2181_v20 = vmul.f32 %v5803_v25, %v1863_v61  ;;  %v7463_v61 = vld [vmem:[#allocation9 + $0x8] ss:$0 sm:$0xff] }
 0x1b9   : > { %v5614_v8 = vpop.f32.mrb[8].mxu0  ;;  %v5805_v60 = vpop.eup %5804  ;;  %2247 = vst.msk [vmem:[#allocation4 + $0x10] sm:$0xff] %vm218_vm0, %v2182_v11 }
 0x1ba   : > { %v7447_v54 = vadd.f32 %v5614_v8, %v7421_v28  ;;  %v1902_v0 = vpop.f32.mrb[9].mxu0  ;;  %v5807_v40 = vpop.eup %5806  ;;  %2246 = vst.msk [vmem:[#allocation4 + $0x8] sm:$0xff] %vm218_vm0, %v2181_v20  ;;  %v2122_v49 = vadd.f32 1.0, %v5805_v60 }
 0x1bb   : > { %v7450_v9 = vadd.f32 %v7421_v28, %v1902_v0  ;;  %v2121_v44 = vadd.f32 1.0, %v5807_v40 }
 0x1bc   : > { %10088 = vst [vmem:[#allocation16_spill] sm:$0xff] %v7447_v54  ;;  %v2030_v6 = vsub.f32 0.0, %v7447_v54  ;;  %5816 = vrcp.f32 %v2122_v49 }
 0x1bd   : > { %10089 = vst [vmem:[#allocation17_spill] sm:$0xff] %v7450_v9  ;;  %v2029_v13 = vsub.f32 0.0, %v7450_v9  ;;  %5818 = vrcp.f32 %v2121_v44 }
 0x1be   : > { %v2071_v19 = vmul.f32 1.442695, %v2030_v6 }
 0x1bf   : > { %v5809_v14 = vpop.eup %5808  ;;  %v2069_v35 = vmul.f32 1.442695, %v2029_v13 }
 0x1c0   : > { %v5811_v16 = vpop.eup %5810  ;;  %v2124_v47 = vadd.f32 1.0, %v5809_v14  ;;  %v2752_v36 = vld [vmem:[#allocation4 + $0x10] sm:$0xff]  ;;  %5820 = vpow2.f32 %v2071_v19 }
 0x1c1   : > { %v5813_v21 = vpop.eup %5812  ;;  %v2184_v10 = vmul.f32 %v5811_v16, %v1878_v62  ;;  %v2853_v15 = vld [vmem:[#allocation4 + $0x11] sm:$0xff]  ;;  %v7470_v62 = vld [vmem:[#allocation9 + $0x9] ss:$0 sm:$0xff]  ;;  %v7478_v23 = vmul.f32 %v7456_v22, %v2752_v36 }
 0x1c2   : > { %v5815_v29 = vpop.eup %5814  ;;  %v2183_v2 = vmul.f32 %v5813_v21, %v7427_v30  ;;  %v2954_v37 = vld [vmem:[#allocation4 + $0x12] sm:$0xff]  ;;  %v7474_v30 = vld [vmem:[#allocation9 + $0x2] ss:$0 sm:$0xff]  ;;  %5822 = vrcp.f32 %v2124_v47  ;;  %v2278_v33 = vld [vmem:[#allocation4 + $0x3] sm:$0xff]  ;;  %v7485_v7 = vmul.f32 %v7458_v55, %v2853_v15 }
 0x1c3   : > { %2249 = vst.msk [vmem:[#allocation4 + $0x30] sm:$0xff] %vm218_vm0, %v2184_v10  ;;  %10093 = vst [vmem:[#allocation21_spill] sm:$0xff] %v7474_v30  ;;  %v2123_v50 = vadd.f32 1.0, %v5815_v29  ;;  %v3054_v27 = vld [vmem:[#allocation4 + $0x13] sm:$0xff]  ;;  %v2279_v53 = vld [vmem:[#allocation4 + $0xb] sm:$0xff]  ;;  %5824 = vpow2.f32 %v2069_v35  ;;  %v2315_v43 = vmul.f32 %v7465_v4, %v2278_v33  ;;  %v7491_v31 = vmul.f32 %v7461_v24, %v2954_v37 }
 0x1c4   : > { %2248 = vst.msk [vmem:[#allocation4 + $0x28] sm:$0xff] %vm218_vm0, %v2183_v2  ;;  %v3139_v51 = vld [vmem:[#allocation4 + $0x14] sm:$0xff]  ;;  %v2347_v63 = vld [vmem:[#allocation4 + $0x4] sm:$0xff]  ;;  %v2316_v45 = vmul.f32 %v7465_v4, %v2279_v53  ;;  %v2348_v46 = vld [vmem:[#allocation4 + $0xc] sm:$0xff]  ;;  %v7494_v38 = vmul.f32 %v7463_v61, %v3054_v27  ;;  %v7508_v14 = vmul.f32 %v7463_v61, %v2279_v53 }
 0x1c5   : > { %v3224_v52 = vld [vmem:[#allocation4 + $0x15] sm:$0xff]  ;;  %v2384_v56 = vmul.f32 %v7467_v26, %v2347_v63  ;;  %v2448_v58 = vld [vmem:[#allocation4 + $0x5] sm:$0xff]  ;;  %v2449_v1 = vld [vmem:[#allocation4 + $0xd] sm:$0xff]  ;;  %v2385_v59 = vmul.f32 %v7467_v26, %v2348_v46  ;;  %5826 = vrcp.f32 %v2123_v50  ;;  %v7500_v5 = vmul.f32 %v7470_v62, %v3139_v51 }
 0x1c6   : > { %v2549_v18 = vld [vmem:[#allocation4 + $0x6] sm:$0xff]  ;;  %v2550_v48 = vld [vmem:[#allocation4 + $0xe] sm:$0xff]  ;;  %v7503_v8 = vmul.f32 %v7472_v3, %v3224_v52  ;;  %v2485_v11 = vmul.f32 %v7474_v30, %v2448_v58  ;;  %v2486_v6 = vmul.f32 %v7474_v30, %v2449_v1  ;;  %v7516_v10 = vmul.f32 %v7470_v62, %v2348_v46  ;;  %v5817_v29 = vpop.eup %5816 }
 0x1c7   : > { %v2416_v25 = vadd.f32 %v2384_v56, %v2315_v43  ;;  %v2650_v0 = vld [vmem:[#allocation4 + $0x7] sm:$0xff]  ;;  %v2651_v60 = vld [vmem:[#allocation4 + $0xf] sm:$0xff]  ;;  %v2417_v40 = vadd.f32 %v2385_v59, %v2316_v45  ;;  %v2586_v19 = vmul.f32 %v7480_v41, %v2549_v18  ;;  %v2587_v21 = vmul.f32 %v7480_v41, %v2550_v48  ;;  %v5819_v51 = vpop.eup %5818 }
 0x1c8   : > { %v5617_v32 = vpop.f32.mrb[10].mxu0  ;;  %v2751_v20 = vld [vmem:[#allocation4 + $0x8] sm:$0xff]  ;;  %v2687_v35 = vmul.f32 %v7497_v39, %v2650_v0  ;;  %v2688_v36 = vmul.f32 %v7497_v39, %v2651_v60 }
 0x1c9   : > { %v7482_v42 = vpop.f32.mrb[11].mxu0  ;;  %v2852_v49 = vld [vmem:[#allocation4 + $0x9] sm:$0xff]  ;;  %v7511_v44 = vadd.f32 %v5617_v32, %v7421_v28  ;;  %v2517_v16 = vadd.f32 %v2485_v11, %v2416_v25  ;;  %v2518_v2 = vadd.f32 %v2486_v6, %v2417_v40  ;;  %v2788_v15 = vmul.f32 %v7456_v22, %v2751_v20 }
 0x1ca   : > { %v2953_v13 = vld [vmem:[#allocation4 + $0xa] sm:$0xff]  ;;  %v2889_v32 = vmul.f32 %v7458_v55, %v2852_v49  ;;  %v7528_v46 = vpop.eup %5820  ;;  %v2956_v58 = vld [vmem:[#allocation4 + $0x32] sm:$0xff]  ;;  %v7538_v20 = vmul.f32 %v7472_v3, %v2449_v1 }
 0x1cb   : > { %10095 = vst [vmem:[#allocation23_spill] sm:$0xff] %v7511_v44  ;;  %v2754_v47 = vld [vmem:[#allocation4 + $0x30] sm:$0xff]  ;;  %v2280_v50 = vld [vmem:[#allocation4 + $0x23] sm:$0xff]  ;;  %v2618_v52 = vadd.f32 %v2586_v19, %v2517_v16  ;;  %v2990_v33 = vmul.f32 %v7461_v24, %v2953_v13  ;;  %v2619_v56 = vadd.f32 %v2587_v21, %v2518_v2 }
 0x1cc   : > { %v2855_v37 = vld [vmem:[#allocation4 + $0x31] sm:$0xff]  ;;  %v2317_v53 = vmul.f32 %v7465_v4, %v2280_v50  ;;  %v2349_v63 = vld [vmem:[#allocation4 + $0x24] sm:$0xff]  ;;  %v5823_v0 = vpop.eup %5822  ;;  %v2791_v40 = vmul.f32 %v7456_v22, %v2754_v47 }
 0x1cd   : > { %v7521_v27 = vld [vmem:[#allocation4 + $0x2b] sm:$0xff]  ;;  %v2386_v18 = vmul.f32 %v7467_v26, %v2349_v63  ;;  %v2719_v60 = vadd.f32 %v2687_v35, %v2618_v52  ;;  %v5825_v13 = vpop.eup %5824  ;;  %v2720_v16 = vadd.f32 %v2688_v36, %v2619_v56  ;;  %v3055_v19 = vld [vmem:[#allocation4 + $0x33] sm:$0xff]  ;;  %v2892_v1 = vmul.f32 %v7458_v55, %v2855_v37 }
 0x1ce   : > { %v7526_v43 = vld [vmem:[#allocation4 + $0x2c] sm:$0xff]  ;;  %v2318_v59 = vmul.f32 %v7465_v4, %v7521_v27  ;;  %v2993_v52 = vmul.f32 %v7461_v24, %v2956_v58 }
 0x1cf   : > { %v2450_v45 = vld [vmem:[#allocation4 + $0x25] sm:$0xff]  ;;  %v2387_v48 = vmul.f32 %v7467_v26, %v7526_v43  ;;  %v7535_v25 = vld [vmem:[#allocation4 + $0x2d] sm:$0xff]  ;;  %v2418_v21 = vadd.f32 %v2386_v18, %v2317_v53  ;;  %v2820_v35 = vadd.f32 %v2788_v15, %v2719_v60  ;;  %v5827_v4 = vpop.eup %5826  ;;  %v2821_v36 = vadd.f32 %v7478_v23, %v2720_v16 }
 0x1d0   : > { %10096 = vst [vmem:[#allocation24_spill] sm:$0xff] %v7535_v25  ;;  %v2551_v11 = vld [vmem:[#allocation4 + $0x26] sm:$0xff]  ;;  %v2487_v6 = vmul.f32 %v7474_v30, %v2450_v45  ;;  %v2552_v49 = vld [vmem:[#allocation4 + $0x2e] sm:$0xff]  ;;  %v2488_v50 = vmul.f32 %v7474_v30, %v7535_v25 }
 0x1d1   : > { %v2419_v2 = vadd.f32 %v2387_v48, %v2318_v59  ;;  %v2652_v63 = vld [vmem:[#allocation4 + $0x27] sm:$0xff]  ;;  %v2653_v9 = vld [vmem:[#allocation4 + $0x2f] sm:$0xff]  ;;  %v2588_v47 = vmul.f32 %v7480_v41, %v2551_v11  ;;  %v2589_v59 = vmul.f32 %v7480_v41, %v2552_v49  ;;  %v2921_v18 = vadd.f32 %v2889_v32, %v2820_v35 }
 0x1d2   : > { %v2753_v45 = vld [vmem:[#allocation4 + $0x28] sm:$0xff]  ;;  %v2519_v53 = vadd.f32 %v2487_v6, %v2418_v21  ;;  %v3078_v48 = vmul.f32 %v7463_v61, %v3055_v19  ;;  %v2689_v15 = vmul.f32 %v7497_v39, %v2652_v63  ;;  %v2690_v37 = vmul.f32 %v7497_v39, %v2653_v9  ;;  %v3140_v60 = vld [vmem:[#allocation4 + $0x34] sm:$0xff] }
 0x1d3   : > { %v2520_v56 = vadd.f32 %v2488_v50, %v2419_v2  ;;  %v2922_v58 = vadd.f32 %v7485_v7, %v2821_v36  ;;  %v2790_v25 = vmul.f32 %v7456_v22, %v2753_v45  ;;  %v2854_v3 = vld [vmem:[#allocation4 + $0x29] sm:$0xff]  ;;  %v3022_v23 = vadd.f32 %v2990_v33, %v2921_v18  ;;  %v3225_v45 = vld [vmem:[#allocation4 + $0x35] sm:$0xff] }
 0x1d4   : > { %v5620_v54 = vpop.f32.mrb[12].mxu0  ;;  %v2620_v11 = vadd.f32 %v2588_v47, %v2519_v53  ;;  %v2186_v6 = vmul.f32 %v5817_v29, %v7431_v34  ;;  %v2185_v49 = vmul.f32 %v5819_v51, %v7434_v17  ;;  %v2188_v32 = vmul.f32 %v5823_v0, %v7439_v12  ;;  %v2955_v2 = vld [vmem:[#allocation4 + $0x2a] sm:$0xff] }
 0x1d5   : > { %v1922_v26 = vpop.f32.mrb[13].mxu0  ;;  %v2621_v30 = vadd.f32 %v2589_v59, %v2520_v56  ;;  %v3023_v19 = vadd.f32 %v7491_v31, %v2922_v58  ;;  %v2187_v7 = vmul.f32 %v5827_v4, %v7442_v57  ;;  %v3107_v63 = vadd.f32 %v7508_v14, %v3022_v23 }
 0x1d6   : > { %v2721_v21 = vadd.f32 %v2689_v15, %v2620_v11  ;;  %v3163_v33 = vmul.f32 %v7470_v62, %v3140_v60  ;;  %v2891_v34 = vmul.f32 %v7458_v55, %v2854_v3  ;;  %2251 = vst.msk [vmem:[#allocation4 + $0x50] sm:$0xff] %vm218_vm0, %v2186_v6  ;;  %2250 = vst.msk [vmem:[#allocation4 + $0x48] sm:$0xff] %vm218_vm0, %v2185_v49  ;;  %v2032_v17 = vsub.f32 0.0, %v7511_v44  ;;  %v10101_v49 = vld [vmem:[#allocation18_spill] sm:$0xff] }
 0x1d7   : > { %v2722_v9 = vadd.f32 %v2690_v37, %v2621_v30  ;;  %2253 = vst.msk [vmem:[#allocation4 + $0x70] sm:$0xff] %vm218_vm0, %v2188_v32  ;;  %v3108_v12 = vadd.f32 %v7494_v38, %v3023_v19  ;;  %2252 = vst.msk [vmem:[#allocation4 + $0x68] sm:$0xff] %vm218_vm0, %v2187_v7  ;;  %v7572_v4 = vadd.f32 %v7421_v28, %v7482_v42  ;;  %v2126_v14 = vadd.f32 1.0, %v7528_v46  ;;  %v7581_v38 = vld [vmem:[#allocation9 + $0x16] ss:$0 sm:$0xff]  ;;  %v10100_v59 = vld [vmem:[#allocation24_spill] sm:$0xff] }
 0x1d8   : > { %v2822_v30 = vadd.f32 %v2790_v25, %v2721_v21  ;;  %v3192_v3 = vadd.f32 %v7516_v10, %v3107_v63  ;;  %v2992_v31 = vmul.f32 %v7461_v24, %v2955_v2  ;;  %v7578_v29 = vadd.f32 %v5620_v54, %v7421_v28 }
 0x1d9   : > { %v2823_v57 = vadd.f32 %v2791_v40, %v2722_v9  ;;  %10097 = vst [vmem:[#allocation25_spill] sm:$0xff] %v7572_v4  ;;  %v3193_v51 = vadd.f32 %v7500_v5, %v3108_v12  ;;  %v2125_v40 = vadd.f32 1.0, %v5825_v13  ;;  %v3077_v42 = vmul.f32 %v7463_v61, %v7521_v27  ;;  %v10102_v9 = vld [vmem:[#allocation19_spill] sm:$0xff] }
 0x1da   : > { %10098 = vst [vmem:[#allocation26_spill] sm:$0xff] %v7578_v29  ;;  %v2923_v25 = vadd.f32 %v2891_v34, %v2822_v30  ;;  %v3277_v35 = vadd.f32 %v7538_v20, %v3192_v3  ;;  %v2075_v10 = vmul.f32 1.442695, %v2032_v17  ;;  %v2031_v47 = vsub.f32 0.0, %v7572_v4 }
 0x1db   : > { %v5623_v16 = vpop.f32.mrb[14].mxu0  ;;  %v2924_v0 = vadd.f32 %v2892_v1, %v2823_v57  ;;  %v3278_v46 = vadd.f32 %v7503_v8, %v3193_v51  ;;  %v2034_v5 = vsub.f32 0.0, %v7578_v29  ;;  %v3162_v13 = vmul.f32 %v7470_v62, %v7526_v43  ;;  %v10099_v8 = vld [vmem:[#allocation20_spill] sm:$0xff] }
 0x1dc   : > { %v7559_v50 = vpop.f32.mrb[15].mxu0  ;;  %v3024_v54 = vadd.f32 %v2992_v31, %v2923_v25  ;;  %v3314_v53 = vadd.f32 %v7581_v38, %v3277_v35  ;;  %5828 = vrcp.f32 %v2126_v14  ;;  %v7593_v20 = vadd.f32 %v7421_v28, %v1922_v26  ;;  %v10103_v35 = vld [vmem:[#allocation21_spill] sm:$0xff] }
 0x1dd   : > { %v3025_v36 = vadd.f32 %v2993_v52, %v2924_v0  ;;  %v3315_v27 = vadd.f32 %v7581_v38, %v3278_v46  ;;  %5830 = vrcp.f32 %v2125_v40  ;;  %v3248_v52 = vmul.f32 %v10099_v8, %v3225_v45  ;;  %v2756_v15 = vld [vmem:[#allocation4 + $0x50] sm:$0xff]  ;;  %v2282_v60 = vld [vmem:[#allocation4 + $0x43] sm:$0xff] }
 0x1de   : > { %v3109_v1 = vadd.f32 %v3077_v42, %v3024_v54  ;;  %3368 = vst.msk [vmem:[#allocation5 + $0x50] sm:$0xff] %vm218_vm0, %v3314_v53  ;;  %v3247_v18 = vmul.f32 %v10099_v8, %v10100_v59  ;;  %v2857_v37 = vld [vmem:[#allocation4 + $0x51] sm:$0xff]  ;;  %5832 = vpow2.f32 %v2075_v10  ;;  %v2073_v43 = vmul.f32 1.442695, %v2031_v47  ;;  %v2351_v23 = vld [vmem:[#allocation4 + $0x44] sm:$0xff] }
 0x1df   : > { %v3110_v56 = vadd.f32 %v3078_v48, %v3025_v36  ;;  %3369 = vst.msk [vmem:[#allocation5 + $0x58] sm:$0xff] %vm218_vm0, %v3315_v27  ;;  %v2283_v11 = vld [vmem:[#allocation4 + $0x4b] sm:$0xff]  ;;  %v7601_v48 = vmul.f32 1.442695, %v2034_v5  ;;  %v7604_v6 = vadd.f32 %v5623_v16, %v7421_v28  ;;  %v2319_v32 = vmul.f32 %v10101_v49, %v2282_v60  ;;  %v3056_v57 = vld [vmem:[#allocation4 + $0x53] sm:$0xff] }
 0x1e0   : > { %v3194_v26 = vadd.f32 %v3162_v13, %v3109_v1  ;;  %v2320_v19 = vmul.f32 %v10101_v49, %v2283_v11  ;;  %v2352_v21 = vld [vmem:[#allocation4 + $0x4c] sm:$0xff]  ;;  %v2388_v2 = vmul.f32 %v10102_v9, %v2351_v23  ;;  %v7615_v30 = vmul.f32 %v7456_v22, %v2756_v15  ;;  %v3141_v25 = vld [vmem:[#allocation4 + $0x54] sm:$0xff] }
 0x1e1   : > { %v3195_v58 = vadd.f32 %v3163_v33, %v3110_v56  ;;  %v2452_v7 = vld [vmem:[#allocation4 + $0x45] sm:$0xff]  ;;  %v7609_v63 = vld [vmem:[#allocation4 + $0x4d] sm:$0xff]  ;;  %v2389_v3 = vmul.f32 %v10102_v9, %v2352_v21  ;;  %v7621_v51 = vmul.f32 %v7458_v55, %v2857_v37  ;;  %v3226_v0 = vld [vmem:[#allocation4 + $0x55] sm:$0xff]  ;;  %5834 = vpow2.f32 %v2073_v43 }
 0x1e2   : > { %v3279_v17 = vadd.f32 %v3247_v18, %v3194_v26  ;;  %v2958_v16 = vld [vmem:[#allocation4 + $0x52] sm:$0xff]  ;;  %v2553_v31 = vld [vmem:[#allocation4 + $0x46] sm:$0xff]  ;;  %v2420_v40 = vadd.f32 %v2388_v2, %v2319_v32  ;;  %v2489_v42 = vmul.f32 %v10103_v35, %v2452_v7  ;;  %v2490_v54 = vmul.f32 %v10103_v35, %v7609_v63 }
 0x1e3   : > { %v3280_v12 = vadd.f32 %v3248_v52, %v3195_v58  ;;  %v2554_v10 = vld [vmem:[#allocation4 + $0x4e] sm:$0xff]  ;;  %v2421_v45 = vadd.f32 %v2389_v3, %v2320_v19  ;;  %v7629_v13 = vmul.f32 %v7461_v24, %v2958_v16  ;;  %v7632_v27 = vmul.f32 %v7463_v61, %v3056_v57  ;;  %v2284_v26 = vld [vmem:[#allocation4 + $0x63] sm:$0xff] }
 0x1e4   : > { %v3316_v47 = vadd.f32 %v7581_v38, %v3279_v17  ;;  %v2654_v36 = vld [vmem:[#allocation4 + $0x47] sm:$0xff]  ;;  %v2655_v5 = vld [vmem:[#allocation4 + $0x4f] sm:$0xff]  ;;  %v2521_v1 = vadd.f32 %v2489_v42, %v2420_v40  ;;  %v2590_v56 = vmul.f32 %v7480_v41, %v2553_v31  ;;  %v7638_v18 = vmul.f32 %v7470_v62, %v3141_v25 }
 0x1e5   : > { %v3317_v46 = vadd.f32 %v7581_v38, %v3280_v12  ;;  %v2755_v53 = vld [vmem:[#allocation4 + $0x48] sm:$0xff]  ;;  %v7641_v15 = vmul.f32 %v10099_v8, %v3226_v0  ;;  %v2522_v37 = vadd.f32 %v2490_v54, %v2421_v45  ;;  %v2591_v43 = vmul.f32 %v7480_v41, %v2554_v10  ;;  %v2758_v0 = vld [vmem:[#allocation4 + $0x70] sm:$0xff] }
 0x1e6   : > { %v2856_v52 = vld [vmem:[#allocation4 + $0x49] sm:$0xff]  ;;  %3370 = vst.msk [vmem:[#allocation5 + $0x60] sm:$0xff] %vm218_vm0, %v3316_v47  ;;  %v5829_v60 = vpop.eup %5828  ;;  %v2622_v23 = vadd.f32 %v2590_v56, %v2521_v1  ;;  %v2691_v32 = vmul.f32 %v7497_v39, %v2654_v36  ;;  %v2692_v19 = vmul.f32 %v7497_v39, %v2655_v5  ;;  %v2792_v2 = vmul.f32 %v7456_v22, %v2755_v53  ;;  %v2859_v40 = vld [vmem:[#allocation4 + $0x71] sm:$0xff] }
 0x1e7   : > { %v2957_v59 = vld [vmem:[#allocation4 + $0x4a] sm:$0xff]  ;;  %3371 = vst.msk [vmem:[#allocation5 + $0x68] sm:$0xff] %vm218_vm0, %v3317_v46  ;;  %v5831_v16 = vpop.eup %5830  ;;  %v2623_v57 = vadd.f32 %v2591_v43, %v2522_v37  ;;  %v2893_v3 = vmul.f32 %v7458_v55, %v2856_v52  ;;  %v3079_v25 = vmul.f32 %v7463_v61, %v2283_v11  ;;  %v3164_v45 = vmul.f32 %v7470_v62, %v2352_v21  ;;  %v2960_v1 = vld [vmem:[#allocation4 + $0x72] sm:$0xff] }
 0x1e8   : > { %v7612_v34 = vpop.f32.mrb[16].mxu0  ;;  %v7644_v58 = vld [vmem:[#allocation4 + $0x6b] sm:$0xff]  ;;  %v2994_v31 = vmul.f32 %v7461_v24, %v2957_v59  ;;  %v5833_v47 = vpop.eup %5832  ;;  %v2723_v46 = vadd.f32 %v2691_v32, %v2622_v23  ;;  %v2321_v54 = vmul.f32 %v10101_v49, %v2284_v26  ;;  %v3249_v11 = vmul.f32 %v10099_v8, %v7609_v63 }
 0x1e9   : > { %v7618_v14 = vpop.f32.mrb[17].mxu0  ;;  %v2353_v7 = vld [vmem:[#allocation4 + $0x64] sm:$0xff]  ;;  %v7649_v17 = vld [vmem:[#allocation4 + $0x6c] sm:$0xff]  ;;  %v2322_v36 = vmul.f32 %v10101_v49, %v7644_v58  ;;  %v2724_v53 = vadd.f32 %v2692_v19, %v2623_v57  ;;  %v2795_v43 = vmul.f32 %v7456_v22, %v2758_v0  ;;  %v2896_v26 = vmul.f32 %v7458_v55, %v2859_v40 }
 0x1ea   : > { %v2454_v42 = vld [vmem:[#allocation4 + $0x65] sm:$0xff]  ;;  %v7662_v5 = vld [vmem:[#allocation4 + $0x6d] sm:$0xff]  ;;  %v2390_v56 = vmul.f32 %v10102_v9, %v2353_v7  ;;  %v2391_v52 = vmul.f32 %v10102_v9, %v7649_v17  ;;  %v2824_v21 = vadd.f32 %v2792_v2, %v2723_v46  ;;  %v2997_v2 = vmul.f32 %v7461_v24, %v2960_v1 }
 0x1eb   : > { %v2555_v59 = vld [vmem:[#allocation4 + $0x66] sm:$0xff]  ;;  %v2556_v37 = vld [vmem:[#allocation4 + $0x6e] sm:$0xff]  ;;  %v2491_v23 = vmul.f32 %v10103_v35, %v2454_v42  ;;  %v2825_v19 = vadd.f32 %v7615_v30, %v2724_v53  ;;  %v2492_v7 = vmul.f32 %v10103_v35, %v7662_v5  ;;  %v5835_v44 = vpop.eup %5834  ;;  %5836 = vpow2.f32 %v7601_v48 }
 0x1ec   : > { %v2656_v32 = vld [vmem:[#allocation4 + $0x67] sm:$0xff]  ;;  %v2422_v57 = vadd.f32 %v2390_v56, %v2321_v54  ;;  %v2423_v63 = vadd.f32 %v2391_v52, %v2322_v36  ;;  %v2657_v33 = vld [vmem:[#allocation4 + $0x6f] sm:$0xff]  ;;  %v2925_v9 = vadd.f32 %v2893_v3, %v2824_v21  ;;  %v2592_v0 = vmul.f32 %v7480_v41, %v2555_v59 }
 0x1ed   : > { %v2757_v29 = vld [vmem:[#allocation4 + $0x68] sm:$0xff]  ;;  %v2593_v40 = vmul.f32 %v7480_v41, %v2556_v37  ;;  %v2926_v42 = vadd.f32 %v7621_v51, %v2825_v19  ;;  %v2693_v54 = vmul.f32 %v7497_v39, %v2656_v32  ;;  %v2694_v53 = vmul.f32 %v7497_v39, %v2657_v33  ;;  %v10104_v35 = vld [vmem:[#allocation16_spill] sm:$0xff]  ;;  %v3057_v32 = vld [vmem:[#allocation4 + $0x73] sm:$0xff] }
 0x1ee   : > { %v2858_v4 = vld [vmem:[#allocation4 + $0x69] sm:$0xff]  ;;  %v2523_v46 = vadd.f32 %v2491_v23, %v2422_v57  ;;  %v2524_v30 = vadd.f32 %v2492_v7, %v2423_v63  ;;  %v3026_v36 = vadd.f32 %v2994_v31, %v2925_v9  ;;  %v2794_v56 = vmul.f32 %v7456_v22, %v2757_v29  ;;  %v3227_v7 = vld [vmem:[#allocation4 + $0x75] sm:$0xff] }
 0x1ef   : > { %v2895_v52 = vmul.f32 %v7458_v55, %v2858_v4  ;;  %v2959_v3 = vld [vmem:[#allocation4 + $0x6a] sm:$0xff]  ;;  %v3027_v1 = vadd.f32 %v7629_v13, %v2926_v42  ;;  %v2190_v37 = vmul.f32 %v5829_v60, %v10104_v35  ;;  %v2128_v19 = vadd.f32 1.0, %v5833_v47 }
 0x1f0   : > { %v2624_v21 = vadd.f32 %v2592_v0, %v2523_v46  ;;  %v2625_v59 = vadd.f32 %v2593_v40, %v2524_v30  ;;  %v3111_v41 = vadd.f32 %v3079_v25, %v3026_v36  ;;  %v10105_v51 = vld [vmem:[#allocation17_spill] sm:$0xff]  ;;  %v2127_v57 = vadd.f32 1.0, %v5835_v44 }
 0x1f1   : > { %v7651_v12 = vpop.f32.mrb[18].mxu0  ;;  %v2189_v23 = vmul.f32 %v5831_v16, %v10105_v51  ;;  %v3112_v9 = vadd.f32 %v7632_v27, %v3027_v1  ;;  %v2996_v29 = vmul.f32 %v7461_v24, %v2959_v3  ;;  %2255 = vst.msk [vmem:[#allocation4 + $0x90] sm:$0xff] %vm218_vm0, %v2190_v37  ;;  %v10106_v35 = vsub.f32 0.0, %v7593_v20 }
 0x1f2   : > { %v7656_v10 = vpop.f32.mrb[19].mxu0  ;;  %v2725_v31 = vadd.f32 %v2693_v54, %v2624_v21  ;;  %v2726_v33 = vadd.f32 %v2694_v53, %v2625_v59  ;;  %v3196_v4 = vadd.f32 %v3164_v45, %v3111_v41  ;;  %v2036_v60 = vsub.f32 0.0, %v7604_v6  ;;  %v3142_v45 = vld [vmem:[#allocation4 + $0x74] sm:$0xff] }
 0x1f3   : > { %2254 = vst.msk [vmem:[#allocation4 + $0x88] sm:$0xff] %vm218_vm0, %v2189_v23  ;;  %v2077_v13 = vmul.f32 1.442695, %v10106_v35  ;;  %v3197_v44 = vadd.f32 %v7638_v18, %v3112_v9  ;;  %5838 = vrcp.f32 %v2128_v19  ;;  %v7697_v41 = vadd.f32 %v7421_v28, %v7559_v50 }
 0x1f4   : > { %v2826_v16 = vadd.f32 %v2794_v56, %v2725_v31  ;;  %v2827_v27 = vadd.f32 %v2795_v43, %v2726_v33  ;;  %v3281_v47 = vadd.f32 %v3249_v11, %v3196_v4  ;;  %5840 = vrcp.f32 %v2127_v57 }
 0x1f5   : > { %v2083_v63 = vmul.f32 1.442695, %v2036_v60  ;;  %5842 = vpow2.f32 %v2077_v13  ;;  %v7703_v18 = vadd.f32 %v7612_v34, %v7421_v28  ;;  %v2035_v43 = vsub.f32 0.0, %v7697_v41  ;;  %v10110_v13 = vld [vmem:[#allocation19_spill] sm:$0xff] }
 0x1f6   : > { %v2927_v0 = vadd.f32 %v2895_v52, %v2826_v16  ;;  %v2928_v40 = vadd.f32 %v2896_v26, %v2827_v27  ;;  %v3318_v11 = vadd.f32 %v7581_v38, %v3281_v47  ;;  %v7709_v50 = vadd.f32 %v7421_v28, %v7618_v14 }
 0x1f7   : > { %10107 = vst [vmem:[#allocation20_spill] sm:$0xff] %v7703_v18  ;;  %5844 = vpow2.f32 %v2083_v63  ;;  %v3082_v42 = vmul.f32 %v7463_v61, %v3057_v32  ;;  %v3081_v26 = vmul.f32 %v7463_v61, %v7644_v58  ;;  %v3167_v34 = vmul.f32 %v7470_v62, %v3142_v45 }
 0x1f8   : > { %10108 = vst [vmem:[#allocation24_spill] sm:$0xff] %v7709_v50  ;;  %v3028_v46 = vadd.f32 %v2996_v29, %v2927_v0  ;;  %v3029_v30 = vadd.f32 %v2997_v2, %v2928_v40  ;;  %3372 = vst.msk [vmem:[#allocation5 + $0x70] sm:$0xff] %vm218_vm0, %v3318_v11  ;;  %v7717_v54 = vmul.f32 %v10099_v8, %v3227_v7  ;;  %v2760_v53 = vld [vmem:[#allocation4 + $0x90] sm:$0xff]  ;;  %v2038_v21 = vsub.f32 0.0, %v7703_v18 }
 0x1f9   : > { %v3166_v36 = vmul.f32 %v7470_v62, %v7649_v17  ;;  %v3251_v14 = vmul.f32 %v10099_v8, %v7662_v5  ;;  %v7724_v56 = vadd.f32 %v7641_v15, %v3197_v44  ;;  %v2861_v58 = vld [vmem:[#allocation4 + $0x91] sm:$0xff]  ;;  %v7729_v23 = vmul.f32 1.442695, %v2035_v43 }
 0x1fa   : > { %v3113_v2 = vadd.f32 %v3081_v26, %v3028_v46  ;;  %v3114_v52 = vadd.f32 %v3082_v42, %v3029_v30  ;;  %v2962_v3 = vld [vmem:[#allocation4 + $0x92] sm:$0xff]  ;;  %v2286_v59 = vld [vmem:[#allocation4 + $0x83] sm:$0xff]  ;;  %v2037_v17 = vsub.f32 0.0, %v7709_v50  ;;  %v7734_v5 = vadd.f32 %v7651_v12, %v7421_v28  ;;  %v5837_v12 = vpop.eup %5836 }
 0x1fb   : > { %10109 = vst [vmem:[#allocation18_spill] sm:$0xff] %v7724_v56  ;;  %v3058_v1 = vld [vmem:[#allocation4 + $0x93] sm:$0xff]  ;;  %v7727_v37 = vld [vmem:[#allocation4 + $0x8b] sm:$0xff]  ;;  %v7738_v15 = vadd.f32 %v7421_v28, %v7656_v10  ;;  %v2323_v57 = vmul.f32 %v10101_v49, %v2286_v59  ;;  %v2797_v35 = vmul.f32 %v7456_v22, %v2760_v53  ;;  %v7752_v10 = vmul.f32 %v7458_v55, %v2861_v58 }
 0x1fc   : > { %v5632_v25 = vpop.f32.mrb[20].mxu0  ;;  %v2355_v51 = vld [vmem:[#allocation4 + $0x84] sm:$0xff]  ;;  %v3198_v19 = vadd.f32 %v3166_v36, %v3113_v2  ;;  %v2324_v9 = vmul.f32 %v10101_v49, %v7727_v37  ;;  %v7743_v31 = vld [vmem:[#allocation4 + $0x8c] sm:$0xff]  ;;  %v7759_v45 = vadd.f32 %v3167_v34, %v3114_v52  ;;  %v7762_v7 = vmul.f32 %v7461_v24, %v2962_v3 }
 0x1fd   : > { %v7699_v48 = vpop.f32.mrb[21].mxu0  ;;  %v2456_v33 = vld [vmem:[#allocation4 + $0x85] sm:$0xff]  ;;  %v7745_v29 = vld [vmem:[#allocation4 + $0x8d] sm:$0xff]  ;;  %v7748_v4 = vadd.f32 %v5632_v25, %v7421_v28  ;;  %v2392_v60 = vmul.f32 %v10110_v13, %v2355_v51  ;;  %v2393_v44 = vmul.f32 %v10110_v13, %v7743_v31  ;;  %v5839_v63 = vpop.eup %5838  ;;  %v7765_v0 = vmul.f32 %v7463_v61, %v3058_v1 }
 0x1fe   : > { %v2557_v16 = vld [vmem:[#allocation4 + $0x86] sm:$0xff]  ;;  %v2558_v27 = vld [vmem:[#allocation4 + $0x8e] sm:$0xff]  ;;  %v3283_v25 = vadd.f32 %v3251_v14, %v3198_v19  ;;  %v5841_v42 = vpop.eup %5840 }
 0x1ff   : > { %v2658_v47 = vld [vmem:[#allocation4 + $0x87] sm:$0xff]  ;;  %v2659_v40 = vld [vmem:[#allocation4 + $0x8f] sm:$0xff]  ;;  %v2424_v46 = vadd.f32 %v2392_v60, %v2323_v57  ;;  %v2425_v30 = vadd.f32 %v2393_v44, %v2324_v9  ;;  %v5843_v2 = vpop.eup %5842  ;;  %v10113_v60 = vld [vmem:[#allocation23_spill] sm:$0xff] }
 0x200   : > { %v2759_v11 = vld [vmem:[#allocation4 + $0x88] sm:$0xff]  ;;  %v3320_v14 = vadd.f32 %v7581_v38, %v3283_v25  ;;  %v10112_v52 = vld [vmem:[#allocation22_spill] sm:$0xff]  ;;  %v2695_v1 = vmul.f32 %v7497_v39, %v2658_v47  ;;  %v2696_v57 = vmul.f32 %v7497_v39, %v2659_v40  ;;  %v2192_v44 = vmul.f32 %v5839_v63, %v10113_v60 }
 0x201   : > { %v10111_v26 = vld [vmem:[#allocation21_spill] sm:$0xff]  ;;  %v2594_v58 = vmul.f32 %v10112_v52, %v2557_v16  ;;  %v2595_v3 = vmul.f32 %v10112_v52, %v2558_v27  ;;  %v5845_v59 = vpop.eup %5844  ;;  %v2796_v9 = vmul.f32 %v7456_v22, %v2759_v11  ;;  %v2130_v16 = vadd.f32 1.0, %v5837_v12 }
 0x202   : > { %v2493_v36 = vmul.f32 %v10111_v26, %v2456_v33  ;;  %v2494_v53 = vmul.f32 %v10111_v26, %v7745_v29  ;;  %v2860_v34 = vld [vmem:[#allocation4 + $0x89] sm:$0xff]  ;;  %3374 = vst.msk [vmem:[#allocation5 + $0x80] sm:$0xff] %vm218_vm0, %v3320_v14  ;;  %v2129_v18 = vadd.f32 1.0, %v5843_v2  ;;  %v2132_v47 = vadd.f32 1.0, %v5845_v59  ;;  %2257 = vst.msk [vmem:[#allocation4 + $0xb0] sm:$0xff] %vm218_vm0, %v2192_v44 }
 0x203   : > { %v2897_v33 = vmul.f32 %v7458_v55, %v2860_v34  ;;  %v10114_v25 = vld [vmem:[#allocation25_spill] sm:$0xff]  ;;  %5846 = vrcp.f32 %v2130_v16  ;;  %v2087_v40 = vmul.f32 1.442695, %v2038_v21  ;;  %v2085_v11 = vmul.f32 1.442695, %v2037_v17  ;;  %v3143_v21 = vld [vmem:[#allocation4 + $0x94] sm:$0xff] }
 0x204   : > { %v2525_v51 = vadd.f32 %v2493_v36, %v2424_v46  ;;  %v2526_v19 = vadd.f32 %v2494_v53, %v2425_v30  ;;  %v2191_v56 = vmul.f32 %v5841_v42, %v10114_v25  ;;  %v2040_v46 = vsub.f32 0.0, %v7734_v5  ;;  %v2961_v53 = vld [vmem:[#allocation4 + $0x8a] sm:$0xff]  ;;  %v3228_v17 = vld [vmem:[#allocation4 + $0x95] sm:$0xff] }
 0x205   : > { %5848 = vrcp.f32 %v2129_v18  ;;  %v2039_v63 = vsub.f32 0.0, %v7738_v15  ;;  %v2042_v34 = vsub.f32 0.0, %v7748_v4  ;;  %v7787_v2 = vadd.f32 %v7421_v28, %v7699_v48 }
 0x206   : > { %v7757_v32 = vpop.f32.mrb[22].mxu0  ;;  %v2626_v50 = vadd.f32 %v2594_v58, %v2525_v51  ;;  %v2627_v27 = vadd.f32 %v2595_v3, %v2526_v19  ;;  %2256 = vst.msk [vmem:[#allocation4 + $0xa8] sm:$0xff] %vm218_vm0, %v2191_v56  ;;  %5850 = vrcp.f32 %v2132_v47  ;;  %v2091_v42 = vmul.f32 1.442695, %v2040_v46 }
 0x207   : > { %v1972_v43 = vpop.f32.mrb[23].mxu0  ;;  %10115 = vst [vmem:[#allocation16_spill] sm:$0xff] %v7787_v2  ;;  %5852 = vpow2.f32 %v7729_v23  ;;  %v2089_v18 = vmul.f32 1.442695, %v2039_v63  ;;  %v2998_v58 = vmul.f32 %v7461_v24, %v2961_v53  ;;  %v2095_v3 = vmul.f32 1.442695, %v2042_v34 }
 0x208   : > { %v2727_v30 = vadd.f32 %v2695_v1, %v2626_v50  ;;  %v2728_v36 = vadd.f32 %v2696_v57, %v2627_v27  ;;  %5854 = vpow2.f32 %v2087_v40  ;;  %v2041_v1 = vsub.f32 0.0, %v7787_v2 }
 0x209   : > { %5856 = vpow2.f32 %v2085_v11  ;;  %v7797_v48 = vadd.f32 %v7757_v32, %v7421_v28  ;;  %v7800_v19 = vmul.f32 %v7470_v62, %v3143_v21  ;;  %v7803_v23 = vmul.f32 %v10099_v8, %v3228_v17  ;;  %v2762_v32 = vld [vmem:[#allocation4 + $0xb0] sm:$0xff] }
 0x20a   : > { %v2828_v14 = vadd.f32 %v2796_v9, %v2727_v30  ;;  %v2829_v50 = vadd.f32 %v2797_v35, %v2728_v36  ;;  %5858 = vpow2.f32 %v2091_v42  ;;  %v7806_v35 = vadd.f32 %v7421_v28, %v1972_v43  ;;  %v2863_v44 = vld [vmem:[#allocation4 + $0xb1] sm:$0xff] }
 0x20b   : > { %10116 = vst [vmem:[#allocation17_spill] sm:$0xff] %v7797_v48  ;;  %10117 = vst [vmem:[#allocation19_spill] sm:$0xff] %v7803_v23  ;;  %v7810_v57 = vadd.f32 %v7717_v54, %v7759_v45  ;;  %v3083_v9 = vmul.f32 %v7463_v61, %v7727_v37  ;;  %5860 = vpow2.f32 %v2089_v18  ;;  %v3168_v60 = vmul.f32 %v7470_v62, %v7743_v31  ;;  %v2964_v25 = vld [vmem:[#allocation4 + $0xb2] sm:$0xff]  ;;  %v7978_v23 = vld [vmem:[#allocation9 + $0x3] ss:$0 sm:$0xff] }
 0x20c   : > { %v2929_v59 = vadd.f32 %v2897_v33, %v2828_v14  ;;  %v2930_v51 = vadd.f32 %v7752_v10, %v2829_v50  ;;  %10118 = vst [vmem:[#allocation21_spill] sm:$0xff] %v7806_v35  ;;  %v3059_v16 = vld [vmem:[#allocation4 + $0xb3] sm:$0xff]  ;;  %5862 = vpow2.f32 %v2095_v3  ;;  %v7817_v28 = vmul.f32 1.442695, %v2041_v1 }
 0x20d   : > { %10119 = vst [vmem:[#allocation22_spill] sm:$0xff] %v7810_v57  ;;  %v3253_v54 = vmul.f32 %v10099_v8, %v7745_v29  ;;  %v2288_v45 = vld [vmem:[#allocation4 + $0xa3] sm:$0xff]  ;;  %v7821_v27 = vld [vmem:[#allocation4 + $0xab] sm:$0xff]  ;;  %v2044_v47 = vsub.f32 0.0, %v7797_v48  ;;  %v5847_v11 = vpop.eup %5846  ;;  %v2043_v42 = vsub.f32 0.0, %v7806_v35  ;;  %v2799_v17 = vmul.f32 %v7456_v22, %v2762_v32  ;;  %v3144_v50 = vld [vmem:[#allocation4 + $0xb4] sm:$0xff] }
 0x20e   : > { %v3030_v10 = vadd.f32 %v2998_v58, %v2929_v59  ;;  %v3031_v33 = vadd.f32 %v7762_v7, %v2930_v51  ;;  %v2357_v37 = vld [vmem:[#allocation4 + $0xa4] sm:$0xff]  ;;  %v7824_v7 = vld [vmem:[#allocation9 + $0x18] ss:$0 sm:$0xff]  ;;  %v2325_v46 = vmul.f32 %v10101_v49, %v2288_v45  ;;  %v2326_v30 = vmul.f32 %v10101_v49, %v7821_v27  ;;  %v7834_v29 = vld [vmem:[#allocation4 + $0xac] sm:$0xff] }
 0x20f   : > { %v2394_v36 = vmul.f32 %v10110_v13, %v2357_v37  ;;  %v2458_v53 = vld [vmem:[#allocation4 + $0xa5] sm:$0xff]  ;;  %v7837_v63 = vld [vmem:[#allocation4 + $0xad] sm:$0xff]  ;;  %v7844_v14 = vmul.f32 %v7458_v55, %v2863_v44  ;;  %v3229_v49 = vld [vmem:[#allocation4 + $0xb5] sm:$0xff]  ;;  %v2395_v18 = vmul.f32 %v10110_v13, %v7834_v29  ;;  %v7850_v59 = vmul.f32 %v7461_v24, %v2964_v25 }
 0x210   : > { %v5638_v12 = vpop.f32.mrb[24].mxu0  ;;  %v3115_v43 = vadd.f32 %v3083_v9, %v3030_v10  ;;  %v2559_v58 = vld [vmem:[#allocation4 + $0xa6] sm:$0xff]  ;;  %v3116_v1 = vadd.f32 %v7765_v0, %v3031_v33  ;;  %v2495_v10 = vmul.f32 %v10111_v26, %v2458_v53  ;;  %v2560_v9 = vld [vmem:[#allocation4 + $0xae] sm:$0xff]  ;;  %v7854_v44 = vmul.f32 %v7463_v61, %v3059_v16 }
 0x211   : > { %v7789_v56 = vpop.f32.mrb[25].mxu0  ;;  %v7827_v31 = vadd.f32 %v7824_v7, %v5638_v12  ;;  %v5849_v12 = vpop.eup %5848  ;;  %v2426_v51 = vadd.f32 %v2394_v36, %v2325_v46  ;;  %v2660_v32 = vld [vmem:[#allocation4 + $0xa7] sm:$0xff]  ;;  %v2496_v13 = vmul.f32 %v10111_v26, %v7837_v63  ;;  %v2661_v45 = vld [vmem:[#allocation4 + $0xaf] sm:$0xff]  ;;  %v7859_v0 = vmul.f32 %v7470_v62, %v3144_v50 }
 0x212   : > { %v3200_v21 = vadd.f32 %v3168_v60, %v3115_v43  ;;  %v5851_v3 = vpop.eup %5850  ;;  %v2427_v43 = vadd.f32 %v2395_v18, %v2326_v30  ;;  %v7862_v24 = vmul.f32 %v10099_v8, %v3229_v49  ;;  %v2596_v25 = vmul.f32 %v10112_v52, %v2559_v58  ;;  %v2761_v26 = vld [vmem:[#allocation4 + $0xa8] sm:$0xff] }
 0x213   : > { %10120 = vst [vmem:[#allocation23_spill] sm:$0xff] %v7827_v31  ;;  %v5853_v60 = vpop.eup %5852  ;;  %v2527_v33 = vadd.f32 %v2495_v10, %v2426_v51  ;;  %v2597_v16 = vmul.f32 %v10112_v52, %v2560_v9  ;;  %v2697_v30 = vmul.f32 %v7497_v39, %v2660_v32  ;;  %v2698_v62 = vmul.f32 %v7497_v39, %v2661_v45  ;;  %v2862_v58 = vld [vmem:[#allocation4 + $0xa9] sm:$0xff] }
 0x214   : > { %v3285_v55 = vadd.f32 %v3253_v54, %v3200_v21  ;;  %v5855_v37 = vpop.eup %5854  ;;  %10121 = vst [vmem:[#allocation25_spill] sm:$0xff] %v7862_v24  ;;  %v2528_v61 = vadd.f32 %v2496_v13, %v2427_v43  ;;  %v10122_v21 = vld [vmem:[#allocation26_spill] sm:$0xff]  ;;  %v2193_v8 = vmul.f32 %v5849_v12, %v7593_v20  ;;  %v2131_v51 = vadd.f32 1.0, %v5853_v60  ;;  %v7880_v60 = vld [vmem:[#allocation9 + $0x6] ss:$0 sm:$0xff] }
 0x215   : > { %v5857_v46 = vpop.eup %5856  ;;  %v2628_v53 = vadd.f32 %v2596_v25, %v2527_v33  ;;  %v2194_v50 = vmul.f32 %v5847_v11, %v10122_v21  ;;  %v2134_v52 = vadd.f32 1.0, %v5855_v37  ;;  %v2798_v32 = vmul.f32 %v7456_v22, %v2761_v26  ;;  %v7883_v37 = vld [vmem:[#allocation9 + $0x7] ss:$0 sm:$0xff] }
 0x216   : > { %v3322_v54 = vadd.f32 %v7581_v38, %v3285_v55  ;;  %v5859_v36 = vpop.eup %5858  ;;  %v2629_v18 = vadd.f32 %v2597_v16, %v2528_v61  ;;  %v2196_v38 = vmul.f32 %v5851_v3, %v7604_v6  ;;  %v2963_v55 = vld [vmem:[#allocation4 + $0xaa] sm:$0xff]  ;;  %2258 = vst.msk [vmem:[#allocation4 + $0xc8] sm:$0xff] %vm218_vm0, %v2193_v8  ;;  %v2133_v39 = vadd.f32 1.0, %v5857_v46 }
 0x217   : > { %v5861_v49 = vpop.eup %5860  ;;  %v2729_v9 = vadd.f32 %v2697_v30, %v2628_v53  ;;  %2259 = vst.msk [vmem:[#allocation4 + $0xd0] sm:$0xff] %vm218_vm0, %v2194_v50  ;;  %v2136_v20 = vadd.f32 1.0, %v5859_v36  ;;  %v7877_v11 = vadd.f32 %v7800_v19, %v3116_v1  ;;  %5864 = vrcp.f32 %v2131_v51  ;;  %v7901_v30 = vld [vmem:[#allocation9 + $0x8] ss:$0 sm:$0xff]  ;;  %v7910_v36 = vld [vmem:[#allocation9 + $0x9] ss:$0 sm:$0xff] }
 0x218   : > { %v7829_v40 = vpop.f32.mrb[26].mxu0  ;;  %3376 = vst.msk [vmem:[#allocation5 + $0x90] sm:$0xff] %vm218_vm0, %v3322_v54  ;;  %v5863_v10 = vpop.eup %5862  ;;  %v2730_v12 = vadd.f32 %v2698_v62, %v2629_v18  ;;  %2261 = vst.msk [vmem:[#allocation4 + $0xf0] sm:$0xff] %vm218_vm0, %v2196_v38  ;;  %v2135_v6 = vadd.f32 1.0, %v5861_v49  ;;  %v2899_v22 = vmul.f32 %v7880_v60, %v2862_v58  ;;  %5866 = vrcp.f32 %v2134_v52  ;;  %v7919_v8 = vld [vmem:[#allocation9 + $0xa] ss:$0 sm:$0xff] }
 0x219   : > { %v7840_v34 = vpop.f32.mrb[27].mxu0  ;;  %10123 = vst [vmem:[#allocation26_spill] sm:$0xff] %v7877_v11  ;;  %v2830_v3 = vadd.f32 %v2798_v32, %v2729_v9  ;;  %v2138_v43 = vadd.f32 1.0, %v5863_v10  ;;  %v3000_v33 = vmul.f32 %v7883_v37, %v2963_v55  ;;  %5868 = vrcp.f32 %v2133_v39  ;;  %v7933_v32 = vld [vmem:[#allocation9] ss:$0 sm:$0xff] }
 0x21a   : > { %v2831_v45 = vadd.f32 %v2799_v17, %v2730_v12  ;;  %v7888_v19 = vadd.f32 %v7824_v7, %v7789_v56  ;;  %5870 = vrcp.f32 %v2136_v20  ;;  %v2046_v46 = vsub.f32 0.0, %v7827_v31  ;;  %v7937_v12 = vld [vmem:[#allocation9 + $0x1] ss:$0 sm:$0xff] }
 0x21b   : > { %v2931_v25 = vadd.f32 %v2899_v22, %v2830_v3  ;;  %v7893_v54 = vadd.f32 %v7824_v7, %v7829_v40  ;;  %5872 = vrcp.f32 %v2135_v6  ;;  %v7899_v16 = vadd.f32 %v7824_v7, %v7840_v34 }
 0x21c   : > { %10124 = vst [vmem:[#allocation27_spill] sm:$0xff] %v7888_v19  ;;  %v2932_v17 = vadd.f32 %v7844_v14, %v2831_v45  ;;  %v2045_v61 = vsub.f32 0.0, %v7888_v19  ;;  %v3085_v26 = vmul.f32 %v7901_v30, %v7821_v27  ;;  %5874 = vrcp.f32 %v2138_v43  ;;  %v7942_v43 = vld [vmem:[#allocation9 + $0x5] ss:$0 sm:$0xff]  ;;  %v7982_v19 = vld [vmem:[#allocation9 + $0x4] ss:$0 sm:$0xff] }
 0x21d   : > { %10125 = vst [vmem:[#allocation28_spill] sm:$0xff] %v7899_v16  ;;  %v3032_v56 = vadd.f32 %v3000_v33, %v2931_v25  ;;  %v7907_v40 = vmul.f32 1.442695, %v2044_v47  ;;  %v3170_v53 = vmul.f32 %v7910_v36, %v7834_v29  ;;  %5876 = vpow2.f32 %v7817_v28  ;;  %v2290_v28 = vld [vmem:[#allocation4 + $0xc3] sm:$0xff]  ;;  %10131 = vst [vmem:[#allocation34_spill] sm:$0xff] %v7982_v19 }
 0x21e   : > { %v3033_v14 = vadd.f32 %v7850_v59, %v2932_v17  ;;  %v2764_v34 = vld [vmem:[#allocation4 + $0xd0] sm:$0xff]  ;;  %v7917_v27 = vmul.f32 1.442695, %v2043_v42  ;;  %v3255_v47 = vmul.f32 %v7919_v8, %v7837_v63  ;;  %v7923_v58 = vmul.f32 1.442695, %v2046_v46  ;;  %v2359_v52 = vld [vmem:[#allocation4 + $0xc4] sm:$0xff] }
 0x21f   : > { %v2865_v62 = vld [vmem:[#allocation4 + $0xd1] sm:$0xff]  ;;  %v3117_v50 = vadd.f32 %v3085_v26, %v3032_v56  ;;  %v7927_v42 = vmul.f32 1.442695, %v2045_v61  ;;  %v2327_v55 = vmul.f32 %v7933_v32, %v2290_v28  ;;  %v2460_v6 = vld [vmem:[#allocation4 + $0xc5] sm:$0xff]  ;;  %5878 = vpow2.f32 %v7907_v40 }
 0x220   : > { %v2966_v21 = vld [vmem:[#allocation4 + $0xd2] sm:$0xff]  ;;  %v3118_v38 = vadd.f32 %v7854_v44, %v3033_v14  ;;  %v2396_v44 = vmul.f32 %v7937_v12, %v2359_v52  ;;  %v7948_v45 = vmul.f32 %v7880_v60, %v2865_v62  ;;  %v2561_v25 = vld [vmem:[#allocation4 + $0xc6] sm:$0xff]  ;;  %v7960_v14 = vld [vmem:[#allocation9 + $0x2] ss:$0 sm:$0xff]  ;;  %v10137_v40 = vsub.f32 0.0, %v7899_v16 }
 0x221   : > { %v3060_v59 = vld [vmem:[#allocation4 + $0xd3] sm:$0xff]  ;;  %v2291_v51 = vld [vmem:[#allocation4 + $0xcb] sm:$0xff]  ;;  %v3202_v63 = vadd.f32 %v3170_v53, %v3117_v50  ;;  %v5865_v22 = vpop.eup %5864  ;;  %v7955_v61 = vmul.f32 %v7883_v37, %v2966_v21  ;;  %v2497_v53 = vmul.f32 %v7960_v14, %v2460_v6 }
 0x222   : > { %v5644_v13 = vpop.f32.mrb[28].mxu0  ;;  %v3145_v49 = vld [vmem:[#allocation4 + $0xd4] sm:$0xff]  ;;  %v2328_v39 = vmul.f32 %v7933_v32, %v2291_v51  ;;  %v2360_v20 = vld [vmem:[#allocation4 + $0xcc] sm:$0xff]  ;;  %v5867_v17 = vpop.eup %5866  ;;  %v7958_v56 = vmul.f32 %v7901_v30, %v3060_v59  ;;  %v2428_v26 = vadd.f32 %v2396_v44, %v2327_v55  ;;  %v7974_v57 = vadd.f32 %v7859_v0, %v3118_v38 }
 0x223   : > { %v2002_v1 = vpop.f32.mrb[29].mxu0  ;;  %v3230_v18 = vld [vmem:[#allocation4 + $0xd5] sm:$0xff]  ;;  %v7931_v9 = vadd.f32 %v7824_v7, %v5644_v13  ;;  %v7940_v3 = vld [vmem:[#allocation4 + $0xcd] sm:$0xff]  ;;  %v7945_v13 = vmul.f32 %v7942_v43, %v2764_v34  ;;  %v2397_v33 = vmul.f32 %v7937_v12, %v2360_v20  ;;  %v5869_v28 = vpop.eup %5868  ;;  %v7964_v52 = vmul.f32 %v7910_v36, %v3145_v49 }
 0x224   : > { %v7952_v46 = vadd.f32 %v7824_v7, %v2002_v1  ;;  %v2562_v34 = vld [vmem:[#allocation4 + $0xce] sm:$0xff]  ;;  %v7967_v1 = vmul.f32 %v7919_v8, %v3230_v18  ;;  %v2498_v59 = vmul.f32 %v7960_v14, %v7940_v3  ;;  %v5871_v6 = vpop.eup %5870  ;;  %10130 = vst [vmem:[#allocation33_spill] sm:$0xff] %v7974_v57  ;;  %v7976_v24 = vadd.f32 %v3255_v47, %v3202_v63 }
 0x225   : > { %10126 = vst [vmem:[#allocation29_spill] sm:$0xff] %v7931_v9  ;;  %v2662_v62 = vld [vmem:[#allocation4 + $0xc7] sm:$0xff]  ;;  %v2663_v50 = vld [vmem:[#allocation4 + $0xcf] sm:$0xff]  ;;  %10128 = vst [vmem:[#allocation31_spill] sm:$0xff] %v7964_v52  ;;  %v2429_v21 = vadd.f32 %v2397_v33, %v2328_v39  ;;  %v2529_v49 = vadd.f32 %v2497_v53, %v2428_v26  ;;  %v2598_v18 = vmul.f32 %v7978_v23, %v2561_v25  ;;  %v5873_v33 = vpop.eup %5872 }
 0x226   : > { %10127 = vst [vmem:[#allocation30_spill] sm:$0xff] %v7952_v46  ;;  %10129 = vst [vmem:[#allocation32_spill] sm:$0xff] %v7967_v1  ;;  %v2763_v10 = vld [vmem:[#allocation4 + $0xc8] sm:$0xff]  ;;  %v2599_v11 = vmul.f32 %v7978_v23, %v2562_v34  ;;  %v2699_v31 = vmul.f32 %v7982_v19, %v2662_v62  ;;  %v2700_v35 = vmul.f32 %v7982_v19, %v2663_v50  ;;  %v5875_v0 = vpop.eup %5874  ;;  %v2867_v57 = vld [vmem:[#allocation4 + $0xf1] sm:$0xff] }
 0x227   : > { %v2864_v55 = vld [vmem:[#allocation4 + $0xc9] sm:$0xff]  ;;  %v2530_v1 = vadd.f32 %v2498_v59, %v2429_v21  ;;  %v2630_v38 = vadd.f32 %v2598_v18, %v2529_v49  ;;  %v2800_v47 = vmul.f32 %v7942_v43, %v2763_v10  ;;  %v5877_v25 = vpop.eup %5876  ;;  %v3087_v21 = vmul.f32 %v7901_v30, %v2291_v51  ;;  %v2968_v48 = vld [vmem:[#allocation4 + $0xf2] sm:$0xff]  ;;  %v10132_v10 = vld [vmem:[#allocation20_spill] sm:$0xff] }
 0x228   : > { %v2965_v44 = vld [vmem:[#allocation4 + $0xca] sm:$0xff]  ;;  %v2901_v63 = vmul.f32 %v7880_v60, %v2864_v55  ;;  %v7991_v34 = vmul.f32 %v7910_v36, %v2360_v20  ;;  %v2195_v62 = vmul.f32 %v5865_v22, %v7697_v41  ;;  %v3061_v49 = vld [vmem:[#allocation4 + $0xf3] sm:$0xff]  ;;  %v2198_v2 = vmul.f32 %v5867_v17, %v10132_v10  ;;  %v10133_v55 = vld [vmem:[#allocation24_spill] sm:$0xff] }
 0x229   : > { %v3002_v26 = vmul.f32 %v7883_v37, %v2965_v44  ;;  %v2631_v53 = vadd.f32 %v2599_v11, %v2530_v1  ;;  %v2766_v59 = vld [vmem:[#allocation4 + $0xf0] sm:$0xff]  ;;  %v2731_v50 = vadd.f32 %v2699_v31, %v2630_v38  ;;  %v2197_v19 = vmul.f32 %v5869_v28, %v10133_v55  ;;  %v4529_v28 = vld [vmem:[#allocation11 + $0x38] sm:$0xff] }
 0x22a   : > { %v3146_v18 = vld [vmem:[#allocation4 + $0xf4] sm:$0xff]  ;;  %v2200_v44 = vmul.f32 %v5871_v6, %v7734_v5  ;;  %2260 = vst.msk [vmem:[#allocation4 + $0xe8] sm:$0xff] %vm218_vm0, %v2195_v62  ;;  %v2199_v51 = vmul.f32 %v5873_v33, %v7738_v15  ;;  %v2202_v20 = vmul.f32 %v5875_v0, %v7748_v4  ;;  %v2137_v52 = vadd.f32 1.0, %v5877_v25  ;;  %2263 = vst.msk [vmem:[#allocation4 + $0x110] sm:$0xff] %vm218_vm0, %v2198_v2  ;;  %v4526_v2 = vld [vmem:[#allocation11 + $0x20] sm:$0xff] }
 0x22b   : > { %v7971_v29 = vpop.f32.mrb[30].mxu0  ;;  %v2732_v11 = vadd.f32 %v2700_v35, %v2631_v53  ;;  %v3231_v1 = vld [vmem:[#allocation4 + $0xf5] sm:$0xff]  ;;  %v2832_v41 = vadd.f32 %v2800_v47, %v2731_v50  ;;  %v3257_v31 = vmul.f32 %v7919_v8, %v7940_v3  ;;  %v8003_v22 = vmul.f32 %v7942_v43, %v2766_v59  ;;  %2262 = vst.msk [vmem:[#allocation4 + $0x108] sm:$0xff] %vm218_vm0, %v2197_v19  ;;  %v4527_v3 = vld [vmem:[#allocation11 + $0x28] sm:$0xff] }
 0x22c   : > { %v2012_v39 = vpop.f32.mrb[31].mxu0  ;;  %v8006_v17 = vmul.f32 %v7880_v60, %v2867_v57  ;;  %2265 = vst.msk [vmem:[#allocation4 + $0x130] sm:$0xff] %vm218_vm0, %v2200_v44  ;;  %v8013_v15 = vmul.f32 %v7883_v37, %v2968_v48  ;;  %v8016_v4 = vmul.f32 %v7901_v30, %v3061_v49  ;;  %v8019_v35 = vmul.f32 %v7910_v36, %v3146_v18 }
 0x22d   : > { %v2833_v5 = vadd.f32 %v7945_v13, %v2732_v11  ;;  %2264 = vst.msk [vmem:[#allocation4 + $0x128] sm:$0xff] %vm218_vm0, %v2199_v51  ;;  %2267 = vst.msk [vmem:[#allocation4 + $0x150] sm:$0xff] %vm218_vm0, %v2202_v20  ;;  %v2933_v57 = vadd.f32 %v2901_v63, %v2832_v41  ;;  %v8024_v19 = vmul.f32 %v7919_v8, %v3231_v1  ;;  %v2050_v48 = vsub.f32 0.0, %v7931_v9  ;;  %v4528_v13 = vld [vmem:[#allocation11 + $0x30] sm:$0xff] }
 0x22e   : > { %5880 = vrcp.f32 %v2137_v52  ;;  %v10135_v33 = vsub.f32 0.0, %v7893_v54  ;;  %v8033_v38 = vadd.f32 %v7824_v7, %v7971_v29  ;;  %v2105_v63 = vmul.f32 1.442695, %v10137_v40 }
 0x22f   : > { %10134 = vst [vmem:[#allocation20_spill] sm:$0xff] %v8024_v19  ;;  %v2934_v6 = vadd.f32 %v7948_v45, %v2833_v5  ;;  %v3034_v47 = vadd.f32 %v3002_v26, %v2933_v57  ;;  %5882 = vpow2.f32 %v7917_v27  ;;  %v2049_v25 = vsub.f32 0.0, %v7952_v46  ;;  %v8046_v27 = vld [vmem:[#allocation9 + $0x16] ss:$0 sm:$0xff] }
 0x230   : > { %v2107_v0 = vmul.f32 1.442695, %v10135_v33  ;;  %10136 = vst [vmem:[#allocation24_spill] sm:$0xff] %v8033_v38  ;;  %v8041_v45 = vadd.f32 %v7824_v7, %v2012_v39  ;;  %v5712_v52 = vpack.c.bf16 %v4527_v3, %v4526_v2  ;;  %v5716_v59 = vpack.c.bf16 %v4529_v28, %v4528_v13 }
 0x231   : > { %v3035_v53 = vadd.f32 %v7955_v61, %v2934_v6  ;;  %v3119_v62 = vadd.f32 %v3087_v21, %v3034_v47  ;;  %v2292_v50 = vld [vmem:[#allocation4 + $0xe3] sm:$0xff]  ;;  %v2293_v49 = vld [vmem:[#allocation4 + $0xeb] sm:$0xff]  ;;  %5884 = vpow2.f32 %v7923_v58  ;;  %v8044_v26 = vmul.f32 1.442695, %v2050_v48 }
 0x232   : > { %10138 = vst [vmem:[#allocation35_spill] sm:$0xff] %v8041_v45  ;;  %v2361_v29 = vld [vmem:[#allocation4 + $0xe4] sm:$0xff]  ;;  %v3324_v18 = vadd.f32 %v8046_v27, %v7976_v24  ;;  %v2329_v61 = vmul.f32 %v7933_v32, %v2292_v50  ;;  %v2330_v7 = vmul.f32 %v7933_v32, %v2293_v49  ;;  %v2362_v39 = vld [vmem:[#allocation4 + $0xec] sm:$0xff]  ;;  %v2052_v44 = vsub.f32 0.0, %v8033_v38  ;;  %5713 = vmatprep.subr.bf16.mxu1 %v5712_v52 }
 0x233   : > { %v2398_v10 = vmul.f32 %v7937_v12, %v2361_v29  ;;  %v2462_v21 = vld [vmem:[#allocation4 + $0xe5] sm:$0xff]  ;;  %v2463_v55 = vld [vmem:[#allocation4 + $0xed] sm:$0xff]  ;;  %v3120_v58 = vadd.f32 %v7958_v56, %v3035_v53  ;;  %v3204_v11 = vadd.f32 %v7991_v34, %v3119_v62  ;;  %v2399_v1 = vmul.f32 %v7937_v12, %v2362_v39  ;;  %5715 = vmatpush3.bf16.msra.mxu1 %v5712_v52 }
 0x234   : > { %v2563_v51 = vld [vmem:[#allocation4 + $0xe6] sm:$0xff]  ;;  %v8057_v24 = vmul.f32 1.442695, %v2049_v25  ;;  %3378 = vst.msk [vmem:[#allocation5 + $0xa0] sm:$0xff] %vm218_vm0, %v3324_v18  ;;  %v2499_v41 = vmul.f32 %v7960_v14, %v2462_v21  ;;  %v2564_v5 = vld [vmem:[#allocation4 + $0xee] sm:$0xff]  ;;  %5886 = vpow2.f32 %v7927_v42  ;;  %5717 = vmatprep.subr.bf16.mxu1 %v5716_v59  ;;  %v2500_v34 = vmul.f32 %v7960_v14, %v2463_v55  ;;  %v8067_v42 = vpop.eup %5878  ;;  %v10141_v25 = vld [vmem:[#allocation31_spill] sm:$0xff] }
 0x235   : > { %v2430_v20 = vadd.f32 %v2398_v10, %v2329_v61  ;;  %v3289_v56 = vadd.f32 %v3257_v31, %v3204_v11  ;;  %v2431_v57 = vadd.f32 %v2399_v1, %v2330_v7  ;;  %v2664_v48 = vld [vmem:[#allocation4 + $0xe7] sm:$0xff]  ;;  %v2665_v3 = vld [vmem:[#allocation4 + $0xef] sm:$0xff]  ;;  %5888 = vpow2.f32 %v2107_v0 }
 0x236   : > { %10139 = vst [vmem:[#allocation36_spill] sm:$0xff] %v8057_v24  ;;  %v2765_v13 = vld [vmem:[#allocation4 + $0xe8] sm:$0xff]  ;;  %v2600_v6 = vmul.f32 %v7978_v23, %v2563_v51  ;;  %5890 = vpow2.f32 %v2105_v63  ;;  %v8065_v40 = vmul.f32 1.442695, %v2052_v44  ;;  %v8070_v53 = vadd.f32 %v10141_v25, %v3120_v58  ;;  %v10143_v63 = vld [vmem:[#allocation34_spill] sm:$0xff] }
 0x237   : > { %v2531_v28 = vadd.f32 %v2499_v41, %v2430_v20  ;;  %v2866_v33 = vld [vmem:[#allocation4 + $0xe9] sm:$0xff]  ;;  %v3326_v31 = vadd.f32 %v8046_v27, %v3289_v56  ;;  %v2532_v52 = vadd.f32 %v2500_v34, %v2431_v57  ;;  %v2601_v62 = vmul.f32 %v7978_v23, %v2564_v5  ;;  %5719 = vmatpush3.bf16.msra.mxu1 %v5716_v59  ;;  %v2869_v41 = vld [vmem:[#allocation4 + $0x111] sm:$0xff] }
 0x238   : > { %v2967_v47 = vld [vmem:[#allocation4 + $0xea] sm:$0xff]  ;;  %10140 = vst [vmem:[#allocation37_spill] sm:$0xff] %v8065_v40  ;;  %10142 = vst [vmem:[#allocation31_spill] sm:$0xff] %v8070_v53  ;;  %v8076_v29 = vpop.eup %5880  ;;  %v2701_v61 = vmul.f32 %v10143_v63, %v2664_v48  ;;  %v2702_v7 = vmul.f32 %v10143_v63, %v2665_v3  ;;  %v2802_v10 = vmul.f32 %v7942_v43, %v2765_v13 }
 0x239   : > { %v2294_v50 = vld [vmem:[#allocation4 + $0x103] sm:$0xff]  ;;  %v8074_v0 = vld [vmem:[#allocation4 + $0x10b] sm:$0xff]  ;;  %v2632_v18 = vadd.f32 %v2600_v6, %v2531_v28  ;;  %v8083_v58 = vpop.eup %5882  ;;  %3380 = vst.msk [vmem:[#allocation5 + $0xb0] sm:$0xff] %vm218_vm0, %v3326_v31  ;;  %v2633_v11 = vadd.f32 %v2601_v62, %v2532_v52  ;;  %v2903_v1 = vmul.f32 %v7880_v60, %v2866_v33  ;;  %v3004_v59 = vmul.f32 %v7883_v37, %v2967_v47  ;;  %v3062_v33 = vld [vmem:[#allocation4 + $0x113] sm:$0xff] }
 0x23a   : > { %v2363_v21 = vld [vmem:[#allocation4 + $0x104] sm:$0xff]  ;;  %v8081_v44 = vld [vmem:[#allocation4 + $0x10c] sm:$0xff]  ;;  %v3089_v51 = vmul.f32 %v7901_v30, %v2293_v49  ;;  %v8090_v57 = vmul.f32 %v7910_v36, %v2362_v39  ;;  %v2331_v34 = vmul.f32 %v7933_v32, %v2294_v50  ;;  %v2332_v48 = vmul.f32 %v7933_v32, %v8074_v0  ;;  %v3147_v47 = vld [vmem:[#allocation4 + $0x114] sm:$0xff] }
 0x23b   : > { %v2768_v20 = vld [vmem:[#allocation4 + $0x110] sm:$0xff]  ;;  %v2464_v5 = vld [vmem:[#allocation4 + $0x105] sm:$0xff]  ;;  %v2733_v56 = vadd.f32 %v2701_v61, %v2632_v18  ;;  %v8095_v13 = vpop.eup %5884  ;;  %v2734_v28 = vadd.f32 %v2702_v7, %v2633_v11  ;;  %v8098_v6 = vmul.f32 %v7919_v8, %v2463_v55  ;;  %v2400_v25 = vmul.f32 %v7937_v12, %v2363_v21 }
 0x23c   : > { %v2465_v3 = vld [vmem:[#allocation4 + $0x10d] sm:$0xff]  ;;  %v2401_v39 = vmul.f32 %v7937_v12, %v8081_v44  ;;  %v2805_v52 = vmul.f32 %v7942_v43, %v2768_v20  ;;  %v8105_v62 = vmul.f32 %v7880_v60, %v2869_v41  ;;  %v2501_v50 = vmul.f32 %v7960_v14, %v2464_v5  ;;  %v3232_v7 = vld [vmem:[#allocation4 + $0x115] sm:$0xff] }
 0x23d   : > { %v2970_v49 = vld [vmem:[#allocation4 + $0x112] sm:$0xff]  ;;  %v2834_v31 = vadd.f32 %v2802_v10, %v2733_v56  ;;  %v2565_v18 = vld [vmem:[#allocation4 + $0x106] sm:$0xff]  ;;  %v2835_v55 = vadd.f32 %v8003_v22, %v2734_v28  ;;  %v2432_v11 = vadd.f32 %v2400_v25, %v2331_v34  ;;  %v2502_v21 = vmul.f32 %v7960_v14, %v2465_v3 }
 0x23e   : > { %v2566_v61 = vld [vmem:[#allocation4 + $0x10e] sm:$0xff]  ;;  %v2433_v2 = vadd.f32 %v2401_v39, %v2332_v48  ;;  %v8110_v53 = vpop.eup %5886  ;;  %v8113_v20 = vmul.f32 %v7883_v37, %v2970_v49  ;;  %v8116_v41 = vmul.f32 %v7901_v30, %v3062_v33  ;;  %v8119_v5 = vmul.f32 %v7910_v36, %v3147_v47 }
 0x23f   : > { %v2666_v19 = vld [vmem:[#allocation4 + $0x107] sm:$0xff]  ;;  %v2935_v10 = vadd.f32 %v2903_v1, %v2834_v31  ;;  %v2667_v56 = vld [vmem:[#allocation4 + $0x10f] sm:$0xff]  ;;  %v8121_v28 = vpop.eup %5888  ;;  %v2533_v34 = vadd.f32 %v2501_v50, %v2432_v11  ;;  %v2602_v25 = vmul.f32 %v7978_v23, %v2565_v18  ;;  %v2603_v39 = vmul.f32 %v7978_v23, %v2566_v61 }
 0x240   : > { %v2767_v22 = vld [vmem:[#allocation4 + $0x108] sm:$0xff]  ;;  %v2534_v48 = vadd.f32 %v2502_v21, %v2433_v2  ;;  %v8125_v49 = vpop.eup %5890  ;;  %v2936_v33 = vadd.f32 %v8006_v17, %v2835_v55  ;;  %v8129_v47 = vmul.f32 %v7919_v8, %v3232_v7  ;;  %v2703_v46 = vmul.f32 %v10143_v63, %v2666_v19  ;;  %v2770_v55 = vld [vmem:[#allocation4 + $0x130] sm:$0xff] }
 0x241   : > { %v2868_v1 = vld [vmem:[#allocation4 + $0x109] sm:$0xff]  ;;  %v3036_v38 = vadd.f32 %v3004_v59, %v2935_v10  ;;  %v2634_v9 = vadd.f32 %v2602_v25, %v2533_v34  ;;  %v2704_v2 = vmul.f32 %v10143_v63, %v2667_v56  ;;  %v2804_v50 = vmul.f32 %v7942_v43, %v2767_v22  ;;  %v2871_v34 = vld [vmem:[#allocation4 + $0x131] sm:$0xff] }
 0x242   : > { %v2969_v31 = vld [vmem:[#allocation4 + $0x10a] sm:$0xff]  ;;  %10144 = vst [vmem:[#allocation34_spill] sm:$0xff] %v8129_v47  ;;  %v2635_v40 = vadd.f32 %v2603_v39, %v2534_v48  ;;  %v2905_v21 = vmul.f32 %v7880_v60, %v2868_v1  ;;  %v3091_v59 = vmul.f32 %v7901_v30, %v8074_v0  ;;  %v3176_v56 = vmul.f32 %v7910_v36, %v8081_v44  ;;  %v2972_v48 = vld [vmem:[#allocation4 + $0x132] sm:$0xff] }
 0x243   : > { %v2296_v18 = vld [vmem:[#allocation4 + $0x123] sm:$0xff]  ;;  %v8134_v61 = vld [vmem:[#allocation4 + $0x12b] sm:$0xff]  ;;  %v3121_v11 = vadd.f32 %v3089_v51, %v3036_v38  ;;  %v3006_v17 = vmul.f32 %v7883_v37, %v2969_v31  ;;  %v2735_v19 = vadd.f32 %v2703_v46, %v2634_v9  ;;  %v3261_v22 = vmul.f32 %v7919_v8, %v2465_v3 }
 0x244   : > { %v2365_v7 = vld [vmem:[#allocation4 + $0x124] sm:$0xff]  ;;  %v2736_v10 = vadd.f32 %v2704_v2, %v2635_v40  ;;  %v2366_v25 = vld [vmem:[#allocation4 + $0x12c] sm:$0xff]  ;;  %v3037_v38 = vadd.f32 %v8013_v15, %v2936_v33  ;;  %v2333_v39 = vmul.f32 %v7933_v32, %v2296_v18  ;;  %v2334_v0 = vmul.f32 %v7933_v32, %v8134_v61 }
 0x245   : > { %v3206_v51 = vadd.f32 %v8090_v57, %v3121_v11  ;;  %v2466_v1 = vld [vmem:[#allocation4 + $0x125] sm:$0xff]  ;;  %v2836_v9 = vadd.f32 %v2804_v50, %v2735_v19  ;;  %v2807_v40 = vmul.f32 %v7942_v43, %v2770_v55  ;;  %v2402_v44 = vmul.f32 %v7937_v12, %v2365_v7  ;;  %v2467_v3 = vld [vmem:[#allocation4 + $0x12d] sm:$0xff] }
 0x246   : > { %v2837_v46 = vadd.f32 %v2805_v52, %v2736_v10  ;;  %v8152_v2 = vmul.f32 %v7880_v60, %v2871_v34  ;;  %v8155_v15 = vmul.f32 %v7883_v37, %v2972_v48  ;;  %v3063_v57 = vld [vmem:[#allocation4 + $0x133] sm:$0xff]  ;;  %v2403_v33 = vmul.f32 %v7937_v12, %v2366_v25  ;;  %v2567_v18 = vld [vmem:[#allocation4 + $0x126] sm:$0xff] }
 0x247   : > { %v3291_v31 = vadd.f32 %v8098_v6, %v3206_v51  ;;  %v2937_v11 = vadd.f32 %v2905_v21, %v2836_v9  ;;  %v3148_v50 = vld [vmem:[#allocation4 + $0x134] sm:$0xff]  ;;  %v2434_v55 = vadd.f32 %v2402_v44, %v2333_v39  ;;  %v2503_v7 = vmul.f32 %v7960_v14, %v2466_v1  ;;  %v2668_v47 = vld [vmem:[#allocation4 + $0x127] sm:$0xff] }
 0x248   : > { %v2938_v52 = vadd.f32 %v8105_v62, %v2837_v46  ;;  %v2568_v19 = vld [vmem:[#allocation4 + $0x12e] sm:$0xff]  ;;  %v3122_v6 = vadd.f32 %v8016_v4, %v3037_v38  ;;  %v2435_v51 = vadd.f32 %v2403_v33, %v2334_v0  ;;  %v2504_v48 = vmul.f32 %v7960_v14, %v2467_v3 }
 0x249   : > { %v3328_v10 = vadd.f32 %v8046_v27, %v3291_v31  ;;  %v3233_v34 = vld [vmem:[#allocation4 + $0x135] sm:$0xff]  ;;  %v3038_v24 = vadd.f32 %v3006_v17, %v2937_v11  ;;  %v8164_v16 = vmul.f32 %v7901_v30, %v3063_v57  ;;  %v2535_v21 = vadd.f32 %v2503_v7, %v2434_v55  ;;  %v2769_v9 = vld [vmem:[#allocation4 + $0x128] sm:$0xff] }
 0x24a   : > { %v2604_v62 = vmul.f32 %v7978_v23, %v2567_v18  ;;  %v2669_v39 = vld [vmem:[#allocation4 + $0x12f] sm:$0xff]  ;;  %v3039_v4 = vadd.f32 %v8113_v20, %v2938_v52  ;;  %v8170_v38 = vmul.f32 %v7910_v36, %v3148_v50  ;;  %v2536_v0 = vadd.f32 %v2504_v48, %v2435_v51 }
 0x24b   : > { %3382 = vst.msk [vmem:[#allocation5 + $0xc0] sm:$0xff] %vm218_vm0, %v3328_v10  ;;  %v2605_v1 = vmul.f32 %v7978_v23, %v2568_v19  ;;  %v2870_v46 = vld [vmem:[#allocation4 + $0x129] sm:$0xff]  ;;  %v3123_v44 = vadd.f32 %v3091_v59, %v3038_v24  ;;  %v8174_v31 = vmul.f32 %v7919_v8, %v3233_v34  ;;  %v2705_v33 = vmul.f32 %v10143_v63, %v2668_v47 }
 0x24c   : > { %v2971_v17 = vld [vmem:[#allocation4 + $0x12a] sm:$0xff]  ;;  %v2636_v57 = vadd.f32 %v2604_v62, %v2535_v21  ;;  %v8178_v18 = vadd.f32 %v8019_v35, %v3122_v6  ;;  %v2706_v20 = vmul.f32 %v10143_v63, %v2669_v39  ;;  %v2806_v52 = vmul.f32 %v7942_v43, %v2769_v9  ;;  %v3400_v21 = vld [vmem:[#allocation5] sm:$0xff] }
 0x24d   : > { %10145 = vst [vmem:[#allocation38_spill] sm:$0xff] %v8174_v31  ;;  %v2637_v11 = vadd.f32 %v2605_v1, %v2536_v0  ;;  %v3208_v50 = vadd.f32 %v3176_v56, %v3123_v44  ;;  %v2907_v7 = vmul.f32 %v7880_v60, %v2870_v46  ;;  %v3008_v24 = vmul.f32 %v7883_v37, %v2971_v17  ;;  %v2772_v6 = vld [vmem:[#allocation4 + $0x150] sm:$0xff]  ;;  %v10147_v56 = vld [vmem:[#allocation16_spill] sm:$0xff]  ;;  %v8193_v62 = vld [vmem:[#allocation9 + $0xb] ss:$0 sm:$0xff] }
 0x24e   : > { %10146 = vst [vmem:[#allocation39_spill] sm:$0xff] %v8178_v18  ;;  %v2737_v55 = vadd.f32 %v2705_v33, %v2636_v57  ;;  %v3124_v59 = vadd.f32 %v8116_v41, %v3039_v4  ;;  %v3093_v47 = vmul.f32 %v7901_v30, %v8134_v61  ;;  %v3178_v35 = vmul.f32 %v7910_v36, %v2366_v25  ;;  %v8198_v25 = vld [vmem:[#allocation5 + $0x10] sm:$0xff]  ;;  %v8211_v17 = vld [vmem:[#allocation5 + $0x20] sm:$0xff] }
 0x24f   : > { %v2738_v19 = vadd.f32 %v2706_v20, %v2637_v11  ;;  %v3293_v10 = vadd.f32 %v3261_v22, %v3208_v50  ;;  %v8189_v51 = vmul.f32 %v7919_v8, %v2467_v3  ;;  %v2201_v48 = vmul.f32 %v8076_v29, %v10147_v56  ;;  %10148 = vst [vmem:[#allocation16_spill] sm:$0xff] %v8198_v25  ;;  %v8200_v22 = vld [vmem:[#allocation9 + $0xc] ss:$0 sm:$0xff]  ;;  %v2873_v29 = vld [vmem:[#allocation4 + $0x151] sm:$0xff]  ;;  %v8228_v50 = vld [vmem:[#allocation9 + $0xe] ss:$0 sm:$0xff] }
 0x250   : > { %v2838_v34 = vadd.f32 %v2806_v52, %v2737_v55  ;;  %v2140_v41 = vadd.f32 1.0, %v8067_v42  ;;  %v2139_v9 = vadd.f32 1.0, %v8083_v58  ;;  %v2142_v61 = vadd.f32 1.0, %v8095_v13  ;;  %v2974_v58 = vld [vmem:[#allocation4 + $0x152] sm:$0xff]  ;;  %10149 = vst [vmem:[#allocation40_spill] sm:$0xff] %v8211_v17  ;;  %10153 = vst [vmem:[#allocation44_spill] sm:$0xff] %v8228_v50 }
 0x251   : > { %v2839_v39 = vadd.f32 %v2807_v40, %v2738_v19  ;;  %v3330_v3 = vadd.f32 %v8046_v27, %v3293_v10  ;;  %v8204_v0 = vmul.f32 %v7942_v43, %v2772_v6  ;;  %2266 = vst.msk [vmem:[#allocation4 + $0x148] sm:$0xff] %vm218_vm0, %v2201_v48  ;;  %v2141_v40 = vadd.f32 1.0, %v8110_v53  ;;  %v3064_v1 = vld [vmem:[#allocation4 + $0x153] sm:$0xff]  ;;  %v8230_v55 = vld [vmem:[#allocation5 + $0x40] sm:$0xff]  ;;  %v8251_v56 = vld [vmem:[#allocation9 + $0x11] ss:$0 sm:$0xff] }
 0x252   : > { %v2939_v4 = vadd.f32 %v2907_v7, %v2838_v34  ;;  %5892 = vrcp.f32 %v2140_v41  ;;  %v2144_v13 = vadd.f32 1.0, %v8121_v28  ;;  %v2143_v46 = vadd.f32 1.0, %v8125_v49  ;;  %v3149_v57 = vld [vmem:[#allocation4 + $0x154] sm:$0xff]  ;;  %10154 = vst [vmem:[#allocation45_spill] sm:$0xff] %v8230_v55  ;;  %v8249_v34 = vld [vmem:[#allocation5 + $0x60] sm:$0xff]  ;;  %10159 = vst [vmem:[#allocation50_spill] sm:$0xff] %v8251_v56 }
 0x253   : > { %v2940_v42 = vadd.f32 %v8152_v2, %v2839_v39  ;;  %3384 = vst.msk [vmem:[#allocation5 + $0xd0] sm:$0xff] %vm218_vm0, %v3330_v3  ;;  %5894 = vrcp.f32 %v2139_v9  ;;  %v3437_v33 = vmul.f32 %v8193_v62, %v3400_v21  ;;  %v3507_v53 = vmul.f32 %v8200_v22, %v8198_v25  ;;  %v8217_v2 = vld [vmem:[#allocation9 + $0xd] ss:$0 sm:$0xff]  ;;  %v8219_v11 = vld [vmem:[#allocation5 + $0x30] sm:$0xff]  ;;  %10158 = vst [vmem:[#allocation49_spill] sm:$0xff] %v8249_v34 }
 0x254   : > { %v3040_v44 = vadd.f32 %v3008_v24, %v2939_v4  ;;  %10150 = vst [vmem:[#allocation41_spill] sm:$0xff] %v8217_v2  ;;  %10151 = vst [vmem:[#allocation42_spill] sm:$0xff] %v8219_v11  ;;  %v8222_v28 = vadd.f32 %v8119_v5, %v3124_v59  ;;  %v8226_v20 = vmul.f32 %v7880_v60, %v2873_v29  ;;  %v3234_v52 = vld [vmem:[#allocation4 + $0x155] sm:$0xff]  ;;  %5896 = vrcp.f32 %v2142_v61  ;;  %v8238_v5 = vld [vmem:[#allocation9 + $0xf] ss:$0 sm:$0xff] }
 0x255   : > { %v3041_v49 = vadd.f32 %v8155_v15, %v2940_v42  ;;  %v8233_v24 = vmul.f32 %v7883_v37, %v2974_v58  ;;  %v8236_v19 = vmul.f32 %v7901_v30, %v3064_v1  ;;  %5898 = vrcp.f32 %v2141_v40  ;;  %10155 = vst [vmem:[#allocation46_spill] sm:$0xff] %v8238_v5  ;;  %v8240_v15 = vld [vmem:[#allocation5 + $0x50] sm:$0xff]  ;;  %v8264_v3 = vld [vmem:[#allocation5 + $0x80] sm:$0xff] }
 0x256   : > { %10152 = vst [vmem:[#allocation43_spill] sm:$0xff] %v8222_v28  ;;  %v3125_v7 = vadd.f32 %v3093_v47, %v3040_v44  ;;  %10156 = vst [vmem:[#allocation47_spill] sm:$0xff] %v8240_v15  ;;  %v8242_v59 = vld [vmem:[#allocation9 + $0x10] ss:$0 sm:$0xff]  ;;  %v8245_v6 = vmul.f32 %v7910_v36, %v3149_v57  ;;  %5900 = vrcp.f32 %v2144_v13  ;;  %v3539_v10 = vadd.f32 %v3507_v53, %v3437_v33  ;;  %v8253_v48 = vld [vmem:[#allocation9 + $0x12] ss:$0 sm:$0xff] }
 0x257   : > { %10157 = vst [vmem:[#allocation48_spill] sm:$0xff] %v8242_v59  ;;  %v3609_v47 = vmul.f32 %v8217_v2, %v8211_v17  ;;  %10160 = vst [vmem:[#allocation51_spill] sm:$0xff] %v8253_v48  ;;  %v8256_v39 = vmul.f32 %v7919_v8, %v3234_v52  ;;  %5902 = vrcp.f32 %v2143_v46  ;;  %v10162_v41 = vsub.f32 0.0, %v8041_v45  ;;  %v8262_v61 = vld [vmem:[#allocation5 + $0x70] sm:$0xff] }
 0x258   : > { %v3210_v21 = vadd.f32 %v3178_v35, %v3125_v7  ;;  %10163 = vst [vmem:[#allocation53_spill] sm:$0xff] %v8262_v61  ;;  %10164 = vst [vmem:[#allocation54_spill] sm:$0xff] %v8264_v3  ;;  %v8266_v4 = vld [vmem:[#allocation9 + $0x13] ss:$0 sm:$0xff]  ;;  %v3126_v29 = vadd.f32 %v8164_v16, %v3041_v49  ;;  %v2298_v40 = vld [vmem:[#allocation4 + $0x143] sm:$0xff]  ;;  %5904 = vpow2.f32 %v8044_v26  ;;  %v3711_v35 = vmul.f32 %v8228_v50, %v8219_v11 }
 0x259   : > { %10161 = vst [vmem:[#allocation52_spill] sm:$0xff] %v8256_v39  ;;  %v8260_v9 = vmul.f32 1.442695, %v10162_v41  ;;  %10165 = vst [vmem:[#allocation55_spill] sm:$0xff] %v8266_v4  ;;  %v2299_v42 = vld [vmem:[#allocation4 + $0x14b] sm:$0xff]  ;;  %v3813_v1 = vmul.f32 %v8238_v5, %v8230_v55  ;;  %v2335_v46 = vmul.f32 %v7933_v32, %v2298_v40  ;;  %v3641_v52 = vadd.f32 %v3609_v47, %v3539_v10 }
 0x25a   : > { %v2367_v58 = vld [vmem:[#allocation4 + $0x144] sm:$0xff]  ;;  %v3295_v13 = vadd.f32 %v8189_v51, %v3210_v21  ;;  %v2336_v44 = vmul.f32 %v7933_v32, %v2299_v42  ;;  %v8277_v57 = vld [vmem:[#allocation4 + $0x14c] sm:$0xff]  ;;  %v8286_v7 = vmul.f32 %v8242_v59, %v8240_v15  ;;  %v8290_v51 = vmul.f32 %v8251_v56, %v8249_v34  ;;  %v8294_v41 = vld [vmem:[#allocation9 + $0x14] ss:$0 sm:$0xff] }
 0x25b   : > { %v2404_v16 = vmul.f32 %v7937_v12, %v2367_v58  ;;  %v2468_v33 = vld [vmem:[#allocation4 + $0x145] sm:$0xff]  ;;  %v8280_v53 = vld [vmem:[#allocation4 + $0x14d] sm:$0xff]  ;;  %v2405_v26 = vmul.f32 %v7937_v12, %v8277_v57  ;;  %10167 = vst [vmem:[#allocation57_spill] sm:$0xff] %v8294_v41  ;;  %v8300_v10 = vmul.f32 %v8253_v48, %v8262_v61  ;;  %v8303_v28 = vadd.f32 %v8170_v38, %v3126_v29  ;;  %v10171_v48 = vld [vmem:[#allocation23_spill] sm:$0xff] }
 0x25c   : > { %v2569_v49 = vld [vmem:[#allocation4 + $0x146] sm:$0xff]  ;;  %v8292_v21 = vld [vmem:[#allocation5 + $0x90] sm:$0xff]  ;;  %v3332_v40 = vadd.f32 %v8046_v27, %v3295_v13  ;;  %v2505_v39 = vmul.f32 %v7960_v14, %v2468_v33  ;;  %v5893_v47 = vpop.eup %5892  ;;  %v2506_v34 = vmul.f32 %v7960_v14, %v8280_v53  ;;  %v8309_v13 = vmul.f32 %v8266_v4, %v8264_v3 }
 0x25d   : > { %10166 = vst [vmem:[#allocation56_spill] sm:$0xff] %v8292_v21  ;;  %v2436_v58 = vadd.f32 %v2404_v16, %v2335_v46  ;;  %v2570_v31 = vld [vmem:[#allocation4 + $0x14e] sm:$0xff]  ;;  %10168 = vst [vmem:[#allocation58_spill] sm:$0xff] %v8303_v28  ;;  %v2437_v18 = vadd.f32 %v2405_v26, %v2336_v44  ;;  %v5895_v46 = vpop.eup %5894  ;;  %v2606_v33 = vmul.f32 %v7978_v23, %v2569_v49 }
 0x25e   : > { %v2670_v15 = vld [vmem:[#allocation4 + $0x147] sm:$0xff]  ;;  %3386 = vst.msk [vmem:[#allocation5 + $0xe0] sm:$0xff] %vm218_vm0, %v3332_v40  ;;  %v2671_v61 = vld [vmem:[#allocation4 + $0x14f] sm:$0xff]  ;;  %v8314_v38 = vmul.f32 %v7901_v30, %v2299_v42  ;;  %v8318_v29 = vmul.f32 %v8294_v41, %v8292_v21  ;;  %v5897_v44 = vpop.eup %5896  ;;  %v2607_v28 = vmul.f32 %v7978_v23, %v2570_v31  ;;  %v3743_v56 = vadd.f32 %v3711_v35, %v3641_v52  ;;  %v10172_v31 = vld [vmem:[#allocation27_spill] sm:$0xff] }
 0x25f   : > { %v2537_v16 = vadd.f32 %v2505_v39, %v2436_v58  ;;  %v2771_v45 = vld [vmem:[#allocation4 + $0x148] sm:$0xff]  ;;  %v2538_v26 = vadd.f32 %v2506_v34, %v2437_v18  ;;  %v5899_v58 = vpop.eup %5898  ;;  %v2707_v4 = vmul.f32 %v10143_v63, %v2670_v15  ;;  %v2206_v42 = vmul.f32 %v5897_v44, %v10171_v48  ;;  %v10174_v52 = vld [vmem:[#allocation26_spill] sm:$0xff] }
 0x260   : > { %v2872_v3 = vld [vmem:[#allocation4 + $0x149] sm:$0xff]  ;;  %v5901_v17 = vpop.eup %5900  ;;  %v2708_v21 = vmul.f32 %v10143_v63, %v2671_v61  ;;  %v2808_v18 = vmul.f32 %v7942_v43, %v2771_v45  ;;  %v3845_v48 = vadd.f32 %v3813_v1, %v3743_v56  ;;  %v10173_v45 = vld [vmem:[#allocation28_spill] sm:$0xff]  ;;  %v8347_v1 = vld [vmem:[#allocation9 + $0x15] ss:$0 sm:$0xff] }
 0x261   : > { %v10169_v55 = vld [vmem:[#allocation17_spill] sm:$0xff]  ;;  %v2638_v49 = vadd.f32 %v2606_v33, %v2537_v16  ;;  %v2639_v25 = vadd.f32 %v2607_v28, %v2538_v26  ;;  %v5903_v34 = vpop.eup %5902  ;;  %2271 = vst.msk [vmem:[#allocation4 + $0x190] sm:$0xff] %vm218_vm0, %v2206_v42  ;;  %v2208_v15 = vmul.f32 %v5901_v17, %v7893_v54  ;;  %v10175_v16 = vld [vmem:[#allocation19_spill] sm:$0xff]  ;;  %v10179_v54 = vld [vmem:[#allocation18_spill] sm:$0xff] }
 0x262   : > { %v2204_v11 = vmul.f32 %v5893_v47, %v10169_v55  ;;  %v10170_v40 = vld [vmem:[#allocation21_spill] sm:$0xff]  ;;  %v2205_v55 = vmul.f32 %v5899_v58, %v10172_v31  ;;  %v5905_v28 = vpop.eup %5904  ;;  %v3286_v33 = vadd.f32 %v10175_v16, %v10174_v52  ;;  %v8345_v56 = vld [vmem:[#allocation5 + $0xa0] sm:$0xff] }
 0x263   : > { %v2203_v39 = vmul.f32 %v5895_v46, %v10170_v40  ;;  %v2739_v47 = vadd.f32 %v2707_v4, %v2638_v49  ;;  %v2909_v46 = vmul.f32 %v7880_v60, %v2872_v3  ;;  %v2740_v35 = vadd.f32 %v2708_v21, %v2639_v25  ;;  %v2973_v61 = vld [vmem:[#allocation4 + $0x14a] sm:$0xff]  ;;  %2273 = vst.msk [vmem:[#allocation4 + $0x1b0] sm:$0xff] %vm218_vm0, %v2208_v15  ;;  %v10178_v3 = vld [vmem:[#allocation36_spill] sm:$0xff] }
 0x264   : > { %2269 = vst.msk [vmem:[#allocation4 + $0x170] sm:$0xff] %vm218_vm0, %v2204_v11  ;;  %2270 = vst.msk [vmem:[#allocation4 + $0x188] sm:$0xff] %vm218_vm0, %v2205_v55  ;;  %v2207_v11 = vmul.f32 %v5903_v34, %v10173_v45  ;;  %v10176_v44 = vld [vmem:[#allocation33_spill] sm:$0xff]  ;;  %v2146_v60 = vadd.f32 1.0, %v5905_v28  ;;  %5906 = vpow2.f32 %v10178_v3  ;;  %v3319_v25 = vadd.f32 %v8046_v27, %v10179_v54  ;;  %v10182_v21 = vld [vmem:[#allocation22_spill] sm:$0xff] }
 0x265   : > { %2268 = vst.msk [vmem:[#allocation4 + $0x168] sm:$0xff] %vm218_vm0, %v2203_v39  ;;  %v10177_v26 = vld [vmem:[#allocation25_spill] sm:$0xff]  ;;  %v2840_v40 = vadd.f32 %v2808_v18, %v2739_v47  ;;  %v2841_v17 = vadd.f32 %v8204_v0, %v2740_v35  ;;  %10180 = vst [vmem:[#allocation17_spill] sm:$0xff] %v8345_v56  ;;  %v3321_v39 = vadd.f32 %v8046_v27, %v10182_v21  ;;  %v8357_v34 = vld [vmem:[#allocation5 + $0x18] sm:$0xff] }
 0x266   : > { %v3288_v4 = vadd.f32 %v10177_v26, %v10176_v44  ;;  %2272 = vst.msk [vmem:[#allocation4 + $0x1a8] sm:$0xff] %vm218_vm0, %v2207_v11  ;;  %10181 = vst [vmem:[#allocation21_spill] sm:$0xff] %v8347_v1  ;;  %v3323_v58 = vadd.f32 %v8046_v27, %v3286_v33  ;;  %v3010_v18 = vmul.f32 %v7883_v37, %v2973_v61  ;;  %v10183_v31 = vld [vmem:[#allocation37_spill] sm:$0xff]  ;;  %v8370_v37 = vld [vmem:[#allocation5 + $0x38] sm:$0xff] }
 0x267   : > { %v2941_v42 = vadd.f32 %v2909_v46, %v2840_v40  ;;  %5908 = vpow2.f32 %v10183_v31  ;;  %v3946_v0 = vadd.f32 %v8286_v7, %v3845_v48  ;;  %3373 = vst.msk [vmem:[#allocation5 + $0x78] sm:$0xff] %vm218_vm0, %v3319_v25  ;;  %v3401_v55 = vld [vmem:[#allocation5 + $0x8] sm:$0xff]  ;;  %10184 = vst [vmem:[#allocation23_spill] sm:$0xff] %v8357_v34  ;;  %v2942_v15 = vadd.f32 %v8226_v20, %v2841_v17  ;;  %v8419_v31 = vld [vmem:[#allocation9 + $0x6] ss:$0 sm:$0xff] }
 0x268   : > { %v3325_v49 = vadd.f32 %v8046_v27, %v3288_v4  ;;  %v8359_v47 = vld [vmem:[#allocation5 + $0x28] sm:$0xff]  ;;  %v3180_v28 = vmul.f32 %v7910_v36, %v8277_v57  ;;  %v3265_v46 = vmul.f32 %v7919_v8, %v8280_v53  ;;  %5910 = vpow2.f32 %v8260_v9  ;;  %3375 = vst.msk [vmem:[#allocation5 + $0x88] sm:$0xff] %vm218_vm0, %v3321_v39  ;;  %3377 = vst.msk [vmem:[#allocation5 + $0x98] sm:$0xff] %vm218_vm0, %v3323_v58  ;;  %v8379_v9 = vld [vmem:[#allocation5 + $0x58] sm:$0xff] }
 0x269   : > { %10185 = vst [vmem:[#allocation27_spill] sm:$0xff] %v8359_v47  ;;  %10186 = vst [vmem:[#allocation28_spill] sm:$0xff] %v8370_v37  ;;  %v8372_v7 = vld [vmem:[#allocation5 + $0x48] sm:$0xff]  ;;  %v3042_v48 = vadd.f32 %v3010_v18, %v2941_v42  ;;  %5912 = vrcp.f32 %v2146_v60  ;;  %v4048_v36 = vadd.f32 %v8290_v51, %v3946_v0  ;;  %v8377_v57 = vmul.f32 %v8347_v1, %v8345_v56 }
 0x26a   : > { %3379 = vst.msk [vmem:[#allocation5 + $0xa8] sm:$0xff] %vm218_vm0, %v3325_v49  ;;  %10187 = vst [vmem:[#allocation26_spill] sm:$0xff] %v8372_v7  ;;  %v3043_v53 = vadd.f32 %v8233_v24, %v2942_v15  ;;  %v8383_v11 = vmul.f32 %v8193_v62, %v3401_v55  ;;  %v8387_v52 = vmul.f32 %v8200_v22, %v8357_v34  ;;  %v8424_v55 = vld [vmem:[#allocation9 + $0x7] ss:$0 sm:$0xff] }
 0x26b   : > { %v2774_v20 = vld [vmem:[#allocation4 + $0x170] sm:$0xff]  ;;  %10188 = vst [vmem:[#allocation19_spill] sm:$0xff] %v8379_v9  ;;  %v8391_v51 = vmul.f32 %v8217_v2, %v8359_v47  ;;  %v3127_v16 = vadd.f32 %v8314_v38, %v3042_v48  ;;  %v8395_v24 = vadd.f32 %v8300_v10, %v4048_v36  ;;  %v8399_v4 = vmul.f32 %v8228_v50, %v8370_v37  ;;  %v2573_v47 = vld [vmem:[#allocation4 + $0x186] sm:$0xff] }
 0x26c   : > { %v2875_v35 = vld [vmem:[#allocation4 + $0x171] sm:$0xff]  ;;  %v2300_v33 = vld [vmem:[#allocation4 + $0x163] sm:$0xff]  ;;  %v8403_v40 = vmul.f32 %v8238_v5, %v8372_v7  ;;  %v8412_v10 = vmul.f32 %v8242_v59, %v8379_v9  ;;  %v3128_v21 = vadd.f32 %v8236_v19, %v3043_v53  ;;  %v8416_v58 = vmul.f32 %v7942_v43, %v2774_v20 }
 0x26d   : > { %v2976_v61 = vld [vmem:[#allocation4 + $0x172] sm:$0xff]  ;;  %v2369_v26 = vld [vmem:[#allocation4 + $0x164] sm:$0xff]  ;;  %v2337_v60 = vmul.f32 %v7933_v32, %v2300_v33  ;;  %v3212_v39 = vadd.f32 %v3180_v28, %v3127_v16  ;;  %v8422_v0 = vmul.f32 %v8419_v31, %v2875_v35 }
 0x26e   : > { %v3065_v45 = vld [vmem:[#allocation4 + $0x173] sm:$0xff]  ;;  %v2301_v44 = vld [vmem:[#allocation4 + $0x16b] sm:$0xff]  ;;  %10189 = vst [vmem:[#allocation33_spill] sm:$0xff] %v8403_v40  ;;  %v2406_v38 = vmul.f32 %v7937_v12, %v2369_v26  ;;  %10190 = vst [vmem:[#allocation25_spill] sm:$0xff] %v8412_v10  ;;  %v8427_v15 = vmul.f32 %v8424_v55, %v2976_v61  ;;  %v8430_v20 = vpop.eup %5906 }
 0x26f   : > { %v2338_v3 = vmul.f32 %v7933_v32, %v2301_v44  ;;  %v2370_v54 = vld [vmem:[#allocation4 + $0x16c] sm:$0xff]  ;;  %v3150_v49 = vld [vmem:[#allocation4 + $0x174] sm:$0xff]  ;;  %v3297_v36 = vadd.f32 %v3265_v46, %v3212_v39  ;;  %v8437_v9 = vld [vmem:[#allocation9 + $0x9] ss:$0 sm:$0xff] }
 0x270   : > { %v2470_v25 = vld [vmem:[#allocation4 + $0x165] sm:$0xff]  ;;  %v8408_v17 = vld [vmem:[#allocation4 + $0x16d] sm:$0xff]  ;;  %v3235_v42 = vld [vmem:[#allocation4 + $0x175] sm:$0xff]  ;;  %v2407_v32 = vmul.f32 %v7937_v12, %v2370_v54  ;;  %v2438_v19 = vadd.f32 %v2406_v38, %v2337_v60  ;;  %v8433_v12 = vmul.f32 %v7901_v30, %v3065_v45  ;;  %v8440_v61 = vmul.f32 %v8437_v9, %v3150_v49 }
 0x271   : > { %v2571_v18 = vld [vmem:[#allocation4 + $0x166] sm:$0xff]  ;;  %v2507_v28 = vmul.f32 %v7960_v14, %v2470_v25  ;;  %v2572_v48 = vld [vmem:[#allocation4 + $0x16e] sm:$0xff]  ;;  %v2508_v35 = vmul.f32 %v7960_v14, %v8408_v17  ;;  %v8443_v60 = vmul.f32 %v7919_v8, %v3235_v42  ;;  %v8449_v14 = vadd.f32 %v8245_v6, %v3128_v21  ;;  %v8489_v59 = vld [vmem:[#allocation9 + $0x5] ss:$0 sm:$0xff] }
 0x272   : > { %v2439_v53 = vadd.f32 %v2407_v32, %v2338_v3  ;;  %v2672_v16 = vld [vmem:[#allocation4 + $0x167] sm:$0xff]  ;;  %v2673_v33 = vld [vmem:[#allocation4 + $0x16f] sm:$0xff]  ;;  %v2608_v46 = vmul.f32 %v7978_v23, %v2571_v18  ;;  %v8446_v3 = vpop.eup %5908  ;;  %v3334_v25 = vadd.f32 %v8046_v27, %v3297_v36  ;;  %v2609_v32 = vmul.f32 %v7978_v23, %v2572_v48 }
 0x273   : > { %v2773_v26 = vld [vmem:[#allocation4 + $0x168] sm:$0xff]  ;;  %10191 = vst [vmem:[#allocation36_spill] sm:$0xff] %v8443_v60  ;;  %v2539_v38 = vadd.f32 %v2507_v28, %v2438_v19  ;;  %10192 = vst [vmem:[#allocation18_spill] sm:$0xff] %v8449_v14  ;;  %v8455_v8 = vpop.eup %5910  ;;  %v2709_v18 = vmul.f32 %v10143_v63, %v2672_v16  ;;  %v2710_v19 = vmul.f32 %v10143_v63, %v2673_v33  ;;  %v2776_v16 = vld [vmem:[#allocation4 + $0x190] sm:$0xff] }
 0x274   : > { %v2874_v30 = vld [vmem:[#allocation4 + $0x169] sm:$0xff]  ;;  %v2540_v39 = vadd.f32 %v2508_v35, %v2439_v53  ;;  %v2810_v28 = vmul.f32 %v7942_v43, %v2773_v26  ;;  %v8462_v21 = vpop.eup %5912  ;;  %3388 = vst.msk [vmem:[#allocation5 + $0xf0] sm:$0xff] %vm218_vm0, %v3334_v25  ;;  %v8467_v53 = vld [vmem:[#allocation9 + $0x8] ss:$0 sm:$0xff]  ;;  %v2877_v63 = vld [vmem:[#allocation4 + $0x191] sm:$0xff]  ;;  %v8471_v26 = vmul.f32 %v8437_v9, %v2370_v54 }
 0x275   : > { %v2975_v45 = vld [vmem:[#allocation4 + $0x16a] sm:$0xff]  ;;  %v2640_v42 = vadd.f32 %v2608_v46, %v2539_v38  ;;  %v2911_v48 = vmul.f32 %v8419_v31, %v2874_v30  ;;  %v3097_v35 = vmul.f32 %v8467_v53, %v2301_v44  ;;  %v8473_v38 = vld [vmem:[#allocation9] ss:$0 sm:$0xff]  ;;  %v8484_v54 = vld [vmem:[#allocation9 + $0x1] ss:$0 sm:$0xff] }
 0x276   : > { %v2302_v49 = vld [vmem:[#allocation4 + $0x183] sm:$0xff]  ;;  %v8453_v7 = vld [vmem:[#allocation4 + $0x18b] sm:$0xff]  ;;  %v2641_v23 = vadd.f32 %v2609_v32, %v2540_v39  ;;  %v3012_v36 = vmul.f32 %v8424_v55, %v2975_v45  ;;  %10193 = vst [vmem:[#allocation22_spill] sm:$0xff] %v8484_v54 }
 0x277   : > { %v2371_v60 = vld [vmem:[#allocation4 + $0x184] sm:$0xff]  ;;  %v8460_v6 = vld [vmem:[#allocation4 + $0x18c] sm:$0xff]  ;;  %v2741_v43 = vadd.f32 %v2709_v18, %v2640_v42  ;;  %v2339_v46 = vmul.f32 %v8473_v38, %v2302_v49  ;;  %v2340_v30 = vmul.f32 %v8473_v38, %v8453_v7  ;;  %v3151_v18 = vld [vmem:[#allocation4 + $0x194] sm:$0xff] }
 0x278   : > { %v2472_v33 = vld [vmem:[#allocation4 + $0x185] sm:$0xff]  ;;  %v2473_v25 = vld [vmem:[#allocation4 + $0x18d] sm:$0xff]  ;;  %v2742_v45 = vadd.f32 %v2710_v19, %v2641_v23  ;;  %v2408_v14 = vmul.f32 %v8484_v54, %v2371_v60  ;;  %v2409_v49 = vmul.f32 %v8484_v54, %v8460_v6  ;;  %v2813_v19 = vmul.f32 %v8489_v59, %v2776_v16  ;;  %v3236_v60 = vld [vmem:[#allocation4 + $0x195] sm:$0xff] }
 0x279   : > { %v8478_v39 = vld [vmem:[#allocation9 + $0xa] ss:$0 sm:$0xff]  ;;  %v2978_v32 = vld [vmem:[#allocation4 + $0x192] sm:$0xff]  ;;  %v2842_v56 = vadd.f32 %v2810_v28, %v2741_v43  ;;  %v8493_v23 = vmul.f32 %v8419_v31, %v2877_v63  ;;  %v8507_v41 = vmul.f32 %v8437_v9, %v3151_v18  ;;  %v8517_v18 = vld [vmem:[#allocation9 + $0x4] ss:$0 sm:$0xff] }
 0x27a   : > { %v8482_v44 = vmul.f32 %v8478_v39, %v8408_v17  ;;  %v3066_v42 = vld [vmem:[#allocation4 + $0x193] sm:$0xff]  ;;  %v8495_v17 = vld [vmem:[#allocation9 + $0x2] ss:$0 sm:$0xff]  ;;  %v2843_v5 = vadd.f32 %v8416_v58, %v2742_v45  ;;  %v2440_v10 = vadd.f32 %v2408_v14, %v2339_v46  ;;  %v2441_v50 = vadd.f32 %v2409_v49, %v2340_v30  ;;  %v2674_v43 = vld [vmem:[#allocation4 + $0x187] sm:$0xff] }
 0x27b   : > { %v2509_v37 = vmul.f32 %v8495_v17, %v2472_v33  ;;  %v2574_v34 = vld [vmem:[#allocation4 + $0x18e] sm:$0xff]  ;;  %v2510_v28 = vmul.f32 %v8495_v17, %v2473_v25  ;;  %v2943_v1 = vadd.f32 %v2911_v48, %v2842_v56  ;;  %v8501_v16 = vmul.f32 %v8424_v55, %v2978_v32  ;;  %10194 = vst [vmem:[#allocation37_spill] sm:$0xff] %v8507_v41  ;;  %v8509_v45 = vld [vmem:[#allocation9 + $0x3] ss:$0 sm:$0xff] }
 0x27c   : > { %v8504_v63 = vmul.f32 %v8467_v53, %v3066_v42  ;;  %v2675_v33 = vld [vmem:[#allocation4 + $0x18f] sm:$0xff]  ;;  %v2610_v14 = vmul.f32 %v8509_v45, %v2573_v47  ;;  %v2611_v46 = vmul.f32 %v8509_v45, %v2574_v34  ;;  %v2944_v30 = vadd.f32 %v8422_v0, %v2843_v5 }
 0x27d   : > { %v2775_v2 = vld [vmem:[#allocation4 + $0x188] sm:$0xff]  ;;  %v2541_v40 = vadd.f32 %v2509_v37, %v2440_v10  ;;  %v2542_v58 = vadd.f32 %v2510_v28, %v2441_v50  ;;  %v3044_v32 = vadd.f32 %v3012_v36, %v2943_v1  ;;  %v8515_v42 = vmul.f32 %v8478_v39, %v3236_v60  ;;  %v2778_v36 = vld [vmem:[#allocation4 + $0x1b0] sm:$0xff] }
 0x27e   : > { %v2876_v56 = vld [vmem:[#allocation4 + $0x189] sm:$0xff]  ;;  %v2711_v49 = vmul.f32 %v8517_v18, %v2674_v43  ;;  %v2712_v10 = vmul.f32 %v8517_v18, %v2675_v33  ;;  %v2812_v47 = vmul.f32 %v8489_v59, %v2775_v2  ;;  %v3099_v0 = vmul.f32 %v8467_v53, %v8453_v7 }
 0x27f   : > { %v2977_v48 = vld [vmem:[#allocation4 + $0x18a] sm:$0xff]  ;;  %10195 = vst [vmem:[#allocation59_spill] sm:$0xff] %v8515_v42  ;;  %v2642_v37 = vadd.f32 %v2610_v14, %v2541_v40  ;;  %v2643_v50 = vadd.f32 %v2611_v46, %v2542_v58  ;;  %v3129_v41 = vadd.f32 %v3097_v35, %v3044_v32  ;;  %v2913_v5 = vmul.f32 %v8419_v31, %v2876_v56  ;;  %v2980_v14 = vld [vmem:[#allocation4 + $0x1b2] sm:$0xff] }
 0x280   : > { %v2304_v28 = vld [vmem:[#allocation4 + $0x1a3] sm:$0xff]  ;;  %v8522_v34 = vld [vmem:[#allocation4 + $0x1ab] sm:$0xff]  ;;  %v3014_v1 = vmul.f32 %v8424_v55, %v2977_v48  ;;  %v3184_v33 = vmul.f32 %v8437_v9, %v8460_v6  ;;  %v3269_v2 = vmul.f32 %v8478_v39, %v2473_v25  ;;  %v3045_v35 = vadd.f32 %v8427_v15, %v2944_v30 }
 0x281   : > { %v2373_v60 = vld [vmem:[#allocation4 + $0x1a4] sm:$0xff]  ;;  %v2743_v43 = vadd.f32 %v2711_v49, %v2642_v37  ;;  %v2744_v40 = vadd.f32 %v2712_v10, %v2643_v50  ;;  %v2879_v58 = vld [vmem:[#allocation4 + $0x1b1] sm:$0xff]  ;;  %v3214_v56 = vadd.f32 %v8471_v26, %v3129_v41  ;;  %v2341_v48 = vmul.f32 %v8473_v38, %v2304_v28 }
 0x282   : > { %v8531_v46 = vld [vmem:[#allocation4 + $0x1ac] sm:$0xff]  ;;  %v2342_v7 = vmul.f32 %v8473_v38, %v8522_v34  ;;  %v2815_v6 = vmul.f32 %v8489_v59, %v2778_v36  ;;  %v2410_v25 = vmul.f32 %v8484_v54, %v2373_v60  ;;  %v2916_v15 = vmul.f32 %v8419_v31, %v2879_v58  ;;  %v3152_v28 = vld [vmem:[#allocation4 + $0x1b4] sm:$0xff] }
 0x283   : > { %v2474_v32 = vld [vmem:[#allocation4 + $0x1a5] sm:$0xff]  ;;  %v2844_v49 = vadd.f32 %v2812_v47, %v2743_v43  ;;  %v2845_v37 = vadd.f32 %v2813_v19, %v2744_v40  ;;  %v3067_v50 = vld [vmem:[#allocation4 + $0x1b3] sm:$0xff]  ;;  %v3299_v42 = vadd.f32 %v8482_v44, %v3214_v56  ;;  %v8545_v41 = vmul.f32 %v8424_v55, %v2980_v14 }
 0x284   : > { %v8540_v10 = vld [vmem:[#allocation4 + $0x1ad] sm:$0xff]  ;;  %v2411_v26 = vmul.f32 %v8484_v54, %v8531_v46  ;;  %v2442_v36 = vadd.f32 %v2410_v25, %v2341_v48  ;;  %v2511_v60 = vmul.f32 %v8495_v17, %v2474_v32  ;;  %v8553_v58 = vmul.f32 %v8467_v53, %v3067_v50 }
 0x285   : > { %v2575_v30 = vld [vmem:[#allocation4 + $0x1a6] sm:$0xff]  ;;  %v2945_v47 = vadd.f32 %v2913_v5, %v2844_v49  ;;  %v2946_v19 = vadd.f32 %v8493_v23, %v2845_v37  ;;  %v2576_v43 = vld [vmem:[#allocation4 + $0x1ae] sm:$0xff]  ;;  %v3336_v44 = vadd.f32 %v8046_v27, %v3299_v42  ;;  %v2512_v56 = vmul.f32 %v8495_v17, %v8540_v10 }
 0x286   : > { %v2676_v40 = vld [vmem:[#allocation4 + $0x1a7] sm:$0xff]  ;;  %v2443_v14 = vadd.f32 %v2411_v26, %v2342_v7  ;;  %v2677_v54 = vld [vmem:[#allocation4 + $0x1af] sm:$0xff]  ;;  %v3130_v5 = vadd.f32 %v8433_v12, %v3045_v35  ;;  %v2543_v23 = vadd.f32 %v2511_v60, %v2442_v36  ;;  %v2612_v48 = vmul.f32 %v8509_v45, %v2575_v30 }
 0x287   : > { %v3046_v49 = vadd.f32 %v3014_v1, %v2945_v47  ;;  %v2777_v37 = vld [vmem:[#allocation4 + $0x1a8] sm:$0xff]  ;;  %3390 = vst.msk [vmem:[#allocation5 + $0x100] sm:$0xff] %vm218_vm0, %v3336_v44  ;;  %v8561_v27 = vmul.f32 %v8437_v9, %v3152_v28  ;;  %v2613_v7 = vmul.f32 %v8509_v45, %v2576_v43  ;;  %v2713_v50 = vmul.f32 %v8517_v18, %v2676_v40 }
 0x288   : > { %v2878_v32 = vld [vmem:[#allocation4 + $0x1a9] sm:$0xff]  ;;  %v2544_v42 = vadd.f32 %v2512_v56, %v2443_v14  ;;  %v3047_v26 = vadd.f32 %v8501_v16, %v2946_v19  ;;  %v2644_v1 = vadd.f32 %v2612_v48, %v2543_v23  ;;  %v2714_v35 = vmul.f32 %v8517_v18, %v2677_v54 }
 0x289   : > { %v2979_v25 = vld [vmem:[#allocation4 + $0x1aa] sm:$0xff]  ;;  %v3131_v12 = vadd.f32 %v3099_v0, %v3046_v49  ;;  %v2814_v47 = vmul.f32 %v8489_v59, %v2777_v37  ;;  %v2915_v36 = vmul.f32 %v8419_v31, %v2878_v32  ;;  %v2145_v40 = vadd.f32 1.0, %v8430_v20  ;;  %v3237_v49 = vld [vmem:[#allocation4 + $0x1b5] sm:$0xff] }
 0x28a   : > { %v2645_v30 = vadd.f32 %v2613_v7, %v2544_v42  ;;  %v10196_v60 = vld [vmem:[#allocation29_spill] sm:$0xff]  ;;  %v2745_v14 = vadd.f32 %v2713_v50, %v2644_v1  ;;  %v3016_v43 = vmul.f32 %v8424_v55, %v2979_v25  ;;  %v2148_v16 = vadd.f32 1.0, %v8446_v3  ;;  %v8582_v37 = vld [vmem:[#allocation9 + $0x16] ss:$0 sm:$0xff]  ;;  %v8609_v7 = vld [vmem:[#allocation5 + $0x98] sm:$0xff] }
 0x28b   : > { %v2210_v28 = vmul.f32 %v8462_v21, %v10196_v60  ;;  %v3216_v44 = vadd.f32 %v3184_v33, %v3131_v12  ;;  %v2147_v54 = vadd.f32 1.0, %v8455_v8  ;;  %v4252_v0 = vadd.f32 %v8309_v13, %v8395_v24  ;;  %10197 = vst [vmem:[#allocation29_spill] sm:$0xff] %v8582_v37  ;;  %v8585_v13 = vld [vmem:[#allocation9 + $0x17] ss:$0 sm:$0xff]  ;;  %v8601_v42 = vld [vmem:[#allocation5 + $0x68] sm:$0xff]  ;;  %10203 = vst [vmem:[#allocation65_spill] sm:$0xff] %v8609_v7 }
 0x28c   : > { %v2746_v56 = vadd.f32 %v2714_v35, %v2645_v30  ;;  %v2846_v23 = vadd.f32 %v2814_v47, %v2745_v14  ;;  %5914 = vrcp.f32 %v2145_v40  ;;  %v3540_v21 = vadd.f32 %v8387_v52, %v8383_v11  ;;  %10200 = vst [vmem:[#allocation62_spill] sm:$0xff] %v8601_v42  ;;  %v8611_v50 = vld [vmem:[#allocation5 + $0xa8] sm:$0xff] }
 0x28d   : > { %2275 = vst.msk [vmem:[#allocation4 + $0x1d0] sm:$0xff] %vm218_vm0, %v2210_v28  ;;  %v3301_v19 = vadd.f32 %v3269_v2, %v3216_v44  ;;  %v3132_v33 = vadd.f32 %v8504_v63, %v3047_v26  ;;  %5916 = vrcp.f32 %v2148_v16  ;;  %v4354_v48 = vadd.f32 %v8318_v29, %v4252_v0  ;;  %10204 = vst [vmem:[#allocation66_spill] sm:$0xff] %v8611_v50  ;;  %v10207_v26 = vld [vmem:[#allocation37_spill] sm:$0xff]  ;;  %v10210_v44 = vld [vmem:[#allocation50_spill] sm:$0xff] }
 0x28e   : > { %v2847_v20 = vadd.f32 %v2815_v6, %v2746_v56  ;;  %v2947_v8 = vadd.f32 %v2915_v36, %v2846_v23  ;;  %5918 = vrcp.f32 %v2147_v54  ;;  %v3642_v24 = vadd.f32 %v8391_v51, %v3540_v21  ;;  %v10209_v47 = vld [vmem:[#allocation33_spill] sm:$0xff]  ;;  %v10212_v56 = vld [vmem:[#allocation55_spill] sm:$0xff]  ;;  %v10213_v54 = vld [vmem:[#allocation42_spill] sm:$0xff] }
 0x28f   : > { %v3338_v3 = vadd.f32 %v8582_v37, %v3301_v19  ;;  %v8589_v2 = vadd.f32 %v8440_v61, %v3130_v5  ;;  %v8592_v11 = vmul.f32 %v8478_v39, %v3237_v49  ;;  %v4456_v63 = vadd.f32 %v8377_v57, %v4354_v48  ;;  %v8603_v61 = vld [vmem:[#allocation5 + $0x78] sm:$0xff]  ;;  %v8605_v5 = vld [vmem:[#allocation5 + $0x88] sm:$0xff] }
 0x290   : > { %v2948_v52 = vadd.f32 %v2916_v15, %v2847_v20  ;;  %v3048_v29 = vadd.f32 %v3016_v43, %v2947_v8  ;;  %v3101_v6 = vmul.f32 %v8467_v53, %v8522_v34  ;;  %v3186_v32 = vmul.f32 %v8437_v9, %v8531_v46  ;;  %10201 = vst [vmem:[#allocation63_spill] sm:$0xff] %v8603_v61  ;;  %v10205_v34 = vld [vmem:[#allocation16_spill] sm:$0xff]  ;;  %v10211_v43 = vld [vmem:[#allocation51_spill] sm:$0xff]  ;;  %v10214_v0 = vld [vmem:[#allocation41_spill] sm:$0xff] }
 0x291   : > { %10198 = vst [vmem:[#allocation60_spill] sm:$0xff] %v8589_v2  ;;  %10199 = vst [vmem:[#allocation61_spill] sm:$0xff] %v8592_v11  ;;  %v3744_v51 = vadd.f32 %v8399_v4, %v3642_v24  ;;  %v4493_v57 = vadd.f32 %v8585_v13, %v4456_v63  ;;  %v3439_v25 = vmul.f32 %v8193_v62, %v10205_v34  ;;  %v10206_v46 = vld [vmem:[#allocation40_spill] sm:$0xff]  ;;  %v10216_v48 = vld [vmem:[#allocation21_spill] sm:$0xff] }
 0x292   : > { %3392 = vst.msk [vmem:[#allocation5 + $0x110] sm:$0xff] %vm218_vm0, %v3338_v3  ;;  %10202 = vst [vmem:[#allocation64_spill] sm:$0xff] %v8605_v5  ;;  %v3049_v15 = vadd.f32 %v8545_v41, %v2948_v52  ;;  %v3509_v4 = vmul.f32 %v8200_v22, %v10206_v46  ;;  %v8618_v12 = vadd.f32 %v10207_v26, %v3132_v33  ;;  %v10215_v33 = vld [vmem:[#allocation57_spill] sm:$0xff]  ;;  %v10229_v2 = vld [vmem:[#allocation31_spill] sm:$0xff] }
 0x293   : > { %v3133_v1 = vadd.f32 %v3101_v6, %v3048_v29  ;;  %v3271_v35 = vmul.f32 %v8478_v39, %v8540_v10  ;;  %v3846_v36 = vadd.f32 %v10209_v47, %v3744_v51  ;;  %5656 = vmatprep.mubr.msk.f32.mxu1 %vm218_vm0, %v4493_v57  ;;  %v4017_v14 = vmul.f32 %v10210_v44, %v8601_v42  ;;  %v10217_v63 = vld [vmem:[#allocation45_spill] sm:$0xff]  ;;  %v10218_v29 = vld [vmem:[#allocation44_spill] sm:$0xff] }
 0x294   : > { %10208 = vst [vmem:[#allocation16_spill] sm:$0xff] %v8618_v12  ;;  %v2780_v41 = vld [vmem:[#allocation4 + $0x1d0] sm:$0xff]  ;;  %v4119_v40 = vmul.f32 %v10211_v43, %v8603_v61  ;;  %v4221_v16 = vmul.f32 %v10212_v56, %v8605_v5  ;;  %v3611_v10 = vmul.f32 %v10214_v0, %v10213_v54  ;;  %v3134_v19 = vadd.f32 %v8553_v58, %v3049_v15  ;;  %v10220_v57 = vld [vmem:[#allocation25_spill] sm:$0xff]  ;;  %v10227_v12 = vld [vmem:[#allocation47_spill] sm:$0xff] }
 0x295   : > { %v2881_v30 = vld [vmem:[#allocation4 + $0x1d1] sm:$0xff]  ;;  %v3218_v49 = vadd.f32 %v3186_v32, %v3133_v1  ;;  %v4323_v20 = vmul.f32 %v10215_v33, %v8609_v7  ;;  %v4425_v3 = vmul.f32 %v10216_v48, %v8611_v50  ;;  %v8638_v8 = vmul.f32 %v8489_v59, %v2780_v41 }
 0x296   : > { %v2982_v60 = vld [vmem:[#allocation4 + $0x1d2] sm:$0xff]  ;;  %v8641_v24 = vmul.f32 %v8419_v31, %v2881_v30  ;;  %v3541_v52 = vadd.f32 %v3509_v4, %v3439_v25  ;;  %v3713_v6 = vmul.f32 %v10218_v29, %v10217_v63  ;;  %v5915_v58 = vpop.eup %5914  ;;  %v3947_v34 = vadd.f32 %v10220_v57, %v3846_v36 }
 0x297   : > { %v3068_v28 = vld [vmem:[#allocation4 + $0x1d3] sm:$0xff]  ;;  %v3303_v32 = vadd.f32 %v3271_v35, %v3218_v49  ;;  %v8646_v51 = vmul.f32 %v8424_v55, %v2982_v60  ;;  %v5917_v26 = vpop.eup %5916  ;;  %v8660_v35 = vadd.f32 %v8561_v27, %v3134_v19 }
 0x298   : > { %v3153_v23 = vld [vmem:[#allocation4 + $0x1d4] sm:$0xff]  ;;  %v8649_v15 = vmul.f32 %v8467_v53, %v3068_v28  ;;  %v3643_v30 = vadd.f32 %v3611_v10, %v3541_v52  ;;  %v5919_v47 = vpop.eup %5918  ;;  %v10225_v28 = vld [vmem:[#allocation24_spill] sm:$0xff]  ;;  %v4049_v11 = vadd.f32 %v4017_v14, %v3947_v34 }
 0x299   : > { %v3238_v21 = vld [vmem:[#allocation4 + $0x1d5] sm:$0xff]  ;;  %v8653_v1 = vmul.f32 %v8437_v9, %v3153_v23  ;;  %10224 = vst [vmem:[#allocation50_spill] sm:$0xff] %v8660_v35  ;;  %v3340_v60 = vadd.f32 %v8582_v37, %v3303_v32  ;;  %v2212_v49 = vmul.f32 %v5917_v26, %v10225_v28 }
 0x29a   : > { %10219 = vst [vmem:[#allocation40_spill] sm:$0xff] %v8649_v15  ;;  %v8656_v41 = vmul.f32 %v8478_v39, %v3238_v21  ;;  %v10223_v25 = vld [vmem:[#allocation30_spill] sm:$0xff]  ;;  %v10226_v36 = vld [vmem:[#allocation35_spill] sm:$0xff]  ;;  %v3745_v57 = vadd.f32 %v3713_v6, %v3643_v30  ;;  %v4151_v27 = vadd.f32 %v4119_v40, %v4049_v11  ;;  %v10234_v6 = vld [vmem:[#allocation28_spill] sm:$0xff] }
 0x29b   : > { %10221 = vst [vmem:[#allocation37_spill] sm:$0xff] %v8653_v1  ;;  %v2209_v4 = vmul.f32 %v5915_v58, %v10223_v25  ;;  %v2211_v23 = vmul.f32 %v5919_v47, %v10226_v36  ;;  %v10228_v21 = vld [vmem:[#allocation46_spill] sm:$0xff]  ;;  %v10230_v58 = vld [vmem:[#allocation32_spill] sm:$0xff]  ;;  %3394 = vst.msk [vmem:[#allocation5 + $0x120] sm:$0xff] %vm218_vm0, %v3340_v60  ;;  %v3612_v26 = vmul.f32 %v10214_v0, %v10234_v6 }
 0x29c   : > { %10222 = vst [vmem:[#allocation33_spill] sm:$0xff] %v8656_v41  ;;  %v3815_v41 = vmul.f32 %v10228_v21, %v10227_v12  ;;  %v3290_v10 = vadd.f32 %v10230_v58, %v10229_v2  ;;  %2277 = vst.msk [vmem:[#allocation4 + $0x1f0] sm:$0xff] %vm218_vm0, %v2212_v49  ;;  %v8672_v19 = vld [vmem:[#allocation5 + $0xb0] sm:$0xff]  ;;  %v10232_v52 = vld [vmem:[#allocation23_spill] sm:$0xff]  ;;  %v4253_v28 = vadd.f32 %v4221_v16, %v4151_v27 }
 0x29d   : > { %2274 = vst.msk [vmem:[#allocation4 + $0x1c8] sm:$0xff] %vm218_vm0, %v2209_v4  ;;  %10231 = vst [vmem:[#allocation51_spill] sm:$0xff] %v8672_v19  ;;  %v3440_v14 = vmul.f32 %v8193_v62, %v10232_v52  ;;  %v10233_v32 = vld [vmem:[#allocation27_spill] sm:$0xff]  ;;  %v10235_v25 = vld [vmem:[#allocation49_spill] sm:$0xff]  ;;  %v8700_v1 = vmul.f32 %v10216_v48, %v8672_v19 }
 0x29e   : > { %v3510_v34 = vmul.f32 %v8200_v22, %v10233_v32  ;;  %2276 = vst.msk [vmem:[#allocation4 + $0x1e8] sm:$0xff] %vm218_vm0, %v2211_v23  ;;  %v10236_v2 = vld [vmem:[#allocation48_spill] sm:$0xff]  ;;  %v10237_v30 = vld [vmem:[#allocation53_spill] sm:$0xff]  ;;  %v10238_v11 = vld [vmem:[#allocation54_spill] sm:$0xff]  ;;  %v3327_v60 = vadd.f32 %v8582_v37, %v3290_v10  ;;  %v3847_v35 = vadd.f32 %v3815_v41, %v3745_v57  ;;  %v4355_v6 = vadd.f32 %v4323_v20, %v4253_v28 }
 0x29f   : > { %v3916_v4 = vmul.f32 %v10236_v2, %v10235_v25  ;;  %v4018_v47 = vmul.f32 %v10210_v44, %v10237_v30  ;;  %v8687_v40 = vmul.f32 %v10211_v43, %v10238_v11  ;;  %v10239_v49 = vld [vmem:[#allocation56_spill] sm:$0xff]  ;;  %v10240_v58 = vld [vmem:[#allocation17_spill] sm:$0xff]  ;;  %v10241_v15 = vld [vmem:[#allocation26_spill] sm:$0xff]  ;;  %v8715_v41 = vmul.f32 %v10210_v44, %v8603_v61 }
 0x2a0   : > { %v8692_v36 = vmul.f32 %v10212_v56, %v10239_v49  ;;  %v8696_v23 = vmul.f32 %v10215_v33, %v10240_v58  ;;  %v3542_v52 = vadd.f32 %v3510_v34, %v3440_v14  ;;  %3381 = vst.msk [vmem:[#allocation5 + $0xb8] sm:$0xff] %vm218_vm0, %v3327_v60  ;;  %v3714_v10 = vmul.f32 %v10218_v29, %v10241_v15  ;;  %v10242_v16 = vld [vmem:[#allocation19_spill] sm:$0xff] }
 0x2a1   : > { %v8707_v27 = vmul.f32 %v10228_v21, %v10242_v16  ;;  %v8711_v58 = vmul.f32 %v10236_v2, %v8601_v42  ;;  %v3948_v57 = vadd.f32 %v3916_v4, %v3847_v35  ;;  %v8719_v14 = vmul.f32 %v10211_v43, %v8605_v5 }
 0x2a2   : > { %v3644_v32 = vadd.f32 %v3612_v26, %v3542_v52  ;;  %v3441_v34 = vmul.f32 %v8193_v62, %v10206_v46  ;;  %v3511_v20 = vmul.f32 %v8200_v22, %v10213_v54  ;;  %v8725_v52 = vadd.f32 %v4425_v3, %v4355_v6  ;;  %v10245_v54 = vld [vmem:[#allocation22_spill] sm:$0xff] }
 0x2a3   : > { %v8729_v61 = vmul.f32 %v10212_v56, %v8609_v7  ;;  %v8733_v35 = vmul.f32 %v10215_v33, %v8611_v50  ;;  %v8737_v43 = vmul.f32 %v10214_v0, %v10217_v63  ;;  %v8742_v5 = vadd.f32 %v4018_v47, %v3948_v57 }
 0x2a4   : > { %v2306_v26 = vld [vmem:[#allocation4 + $0x1c3] sm:$0xff]  ;;  %v2307_v60 = vld [vmem:[#allocation4 + $0x1cb] sm:$0xff]  ;;  %v8745_v50 = vadd.f32 %v3714_v10, %v3644_v32  ;;  %v8749_v0 = vmul.f32 %v10218_v29, %v10227_v12  ;;  %v8753_v63 = vmul.f32 %v10228_v21, %v10235_v25  ;;  %v8756_v16 = vadd.f32 %v3511_v20, %v3441_v34 }
 0x2a5   : > { %v2375_v28 = vld [vmem:[#allocation4 + $0x1c4] sm:$0xff]  ;;  %10243 = vst [vmem:[#allocation55_spill] sm:$0xff] %v8729_v61  ;;  %10244 = vst [vmem:[#allocation42_spill] sm:$0xff] %v8733_v35  ;;  %v2343_v62 = vmul.f32 %v8473_v38, %v2306_v26  ;;  %v2344_v22 = vmul.f32 %v8473_v38, %v2307_v60  ;;  %v2376_v46 = vld [vmem:[#allocation4 + $0x1cc] sm:$0xff]  ;;  %v8760_v32 = vmul.f32 %v10236_v2, %v10237_v30 }
 0x2a6   : > { %v2412_v3 = vmul.f32 %v10245_v54, %v2375_v28  ;;  %v2476_v6 = vld [vmem:[#allocation4 + $0x1c5] sm:$0xff]  ;;  %v2477_v4 = vld [vmem:[#allocation4 + $0x1cd] sm:$0xff]  ;;  %v2413_v56 = vmul.f32 %v10245_v54, %v2376_v46  ;;  %v8764_v21 = vmul.f32 %v8467_v53, %v2307_v60  ;;  %v8768_v25 = vmul.f32 %v10210_v44, %v10238_v11 }
 0x2a7   : > { %v2577_v7 = vld [vmem:[#allocation4 + $0x1c6] sm:$0xff]  ;;  %v2578_v33 = vld [vmem:[#allocation4 + $0x1ce] sm:$0xff]  ;;  %v2513_v28 = vmul.f32 %v8495_v17, %v2476_v6  ;;  %10246 = vst [vmem:[#allocation41_spill] sm:$0xff] %v8760_v32  ;;  %v2514_v12 = vmul.f32 %v8495_v17, %v2477_v4  ;;  %v8773_v2 = vmul.f32 %v8437_v9, %v2376_v46 }
 0x2a8   : > { %v2444_v26 = vadd.f32 %v2412_v3, %v2343_v62  ;;  %v2678_v42 = vld [vmem:[#allocation4 + $0x1c7] sm:$0xff]  ;;  %v2679_v47 = vld [vmem:[#allocation4 + $0x1cf] sm:$0xff]  ;;  %v2445_v10 = vadd.f32 %v2413_v56, %v2344_v22  ;;  %10247 = vst [vmem:[#allocation57_spill] sm:$0xff] %v8768_v25  ;;  %v2614_v34 = vmul.f32 %v8509_v45, %v2577_v7  ;;  %v2615_v20 = vmul.f32 %v8509_v45, %v2578_v33 }
 0x2a9   : > { %v2779_v57 = vld [vmem:[#allocation4 + $0x1c8] sm:$0xff]  ;;  %v2782_v30 = vld [vmem:[#allocation4 + $0x1f0] sm:$0xff]  ;;  %v2715_v3 = vmul.f32 %v8517_v18, %v2678_v42  ;;  %v2716_v6 = vmul.f32 %v8517_v18, %v2679_v47 }
 0x2aa   : > { %v2880_v29 = vld [vmem:[#allocation4 + $0x1c9] sm:$0xff]  ;;  %v2545_v62 = vadd.f32 %v2513_v28, %v2444_v26  ;;  %v2546_v22 = vadd.f32 %v2514_v12, %v2445_v10  ;;  %v2816_v60 = vmul.f32 %v8489_v59, %v2779_v57  ;;  %v2883_v56 = vld [vmem:[#allocation4 + $0x1f1] sm:$0xff] }
 0x2ab   : > { %v2981_v19 = vld [vmem:[#allocation4 + $0x1ca] sm:$0xff]  ;;  %v2917_v7 = vmul.f32 %v8419_v31, %v2880_v29  ;;  %v2984_v12 = vld [vmem:[#allocation4 + $0x1f2] sm:$0xff] }
 0x2ac   : > { %v2308_v15 = vld [vmem:[#allocation4 + $0x1e3] sm:$0xff]  ;;  %v8778_v44 = vld [vmem:[#allocation4 + $0x1eb] sm:$0xff]  ;;  %v2646_v11 = vadd.f32 %v2614_v34, %v2545_v62  ;;  %v3018_v33 = vmul.f32 %v8424_v55, %v2981_v19  ;;  %v2647_v42 = vadd.f32 %v2615_v20, %v2546_v22  ;;  %v3273_v19 = vmul.f32 %v8478_v39, %v2477_v4  ;;  %v3069_v22 = vld [vmem:[#allocation4 + $0x1f3] sm:$0xff] }
 0x2ad   : > { %v2345_v46 = vmul.f32 %v8473_v38, %v2308_v15  ;;  %v2377_v26 = vld [vmem:[#allocation4 + $0x1e4] sm:$0xff]  ;;  %v8783_v28 = vld [vmem:[#allocation4 + $0x1ec] sm:$0xff]  ;;  %v2346_v47 = vmul.f32 %v8473_v38, %v8778_v44  ;;  %v2819_v15 = vmul.f32 %v8489_v59, %v2782_v30  ;;  %v3154_v61 = vld [vmem:[#allocation4 + $0x1f4] sm:$0xff] }
 0x2ae   : > { %v2478_v10 = vld [vmem:[#allocation4 + $0x1e5] sm:$0xff]  ;;  %v2414_v57 = vmul.f32 %v10245_v54, %v2377_v26  ;;  %v2415_v62 = vmul.f32 %v10245_v54, %v8783_v28  ;;  %v2479_v34 = vld [vmem:[#allocation4 + $0x1ed] sm:$0xff]  ;;  %v2747_v25 = vadd.f32 %v2715_v3, %v2646_v11  ;;  %v2748_v20 = vadd.f32 %v2716_v6, %v2647_v42 }
 0x2af   : > { %v2579_v29 = vld [vmem:[#allocation4 + $0x1e6] sm:$0xff]  ;;  %v2515_v35 = vmul.f32 %v8495_v17, %v2478_v10  ;;  %v2580_v32 = vld [vmem:[#allocation4 + $0x1ee] sm:$0xff]  ;;  %v2516_v26 = vmul.f32 %v8495_v17, %v2479_v34  ;;  %v2920_v54 = vmul.f32 %v8419_v31, %v2883_v56  ;;  %v8796_v3 = vmul.f32 %v8424_v55, %v2984_v12 }
 0x2b0   : > { %v2446_v37 = vadd.f32 %v2414_v57, %v2345_v46  ;;  %v2447_v38 = vadd.f32 %v2415_v62, %v2346_v47  ;;  %v2680_v49 = vld [vmem:[#allocation4 + $0x1e7] sm:$0xff]  ;;  %v2848_v48 = vadd.f32 %v2816_v60, %v2747_v25  ;;  %v2616_v4 = vmul.f32 %v8509_v45, %v2579_v29  ;;  %v2681_v30 = vld [vmem:[#allocation4 + $0x1ef] sm:$0xff] }
 0x2b1   : > { %v2781_v11 = vld [vmem:[#allocation4 + $0x1e8] sm:$0xff]  ;;  %v2849_v10 = vadd.f32 %v8638_v8, %v2748_v20  ;;  %v2617_v46 = vmul.f32 %v8509_v45, %v2580_v32  ;;  %v8802_v17 = vmul.f32 %v8467_v53, %v3069_v22  ;;  %v8805_v25 = vmul.f32 %v8437_v9, %v3154_v61  ;;  %v8830_v20 = vld [vmem:[#allocation5 + $0xb8] sm:$0xff] }
 0x2b2   : > { %v2547_v6 = vadd.f32 %v2515_v35, %v2446_v37  ;;  %v2548_v42 = vadd.f32 %v2516_v26, %v2447_v38  ;;  %v2949_v47 = vadd.f32 %v2917_v7, %v2848_v48  ;;  %v2717_v60 = vmul.f32 %v8517_v18, %v2680_v49  ;;  %v2882_v56 = vld [vmem:[#allocation4 + $0x1e9] sm:$0xff]  ;;  %v8842_v38 = vld [vmem:[#allocation9 + $0x12] ss:$0 sm:$0xff] }
 0x2b3   : > { %v2718_v62 = vmul.f32 %v8517_v18, %v2681_v30  ;;  %v2818_v8 = vmul.f32 %v8489_v59, %v2781_v11  ;;  %v2983_v35 = vld [vmem:[#allocation4 + $0x1ea] sm:$0xff]  ;;  %v4494_v45 = vadd.f32 %v8585_v13, %v8725_v52  ;;  %v4152_v48 = vadd.f32 %v8687_v40, %v8742_v5 }
 0x2b4   : > { %v2648_v12 = vadd.f32 %v2616_v4, %v2547_v6  ;;  %v2649_v57 = vadd.f32 %v2617_v46, %v2548_v42  ;;  %v3050_v37 = vadd.f32 %v3018_v33, %v2949_v47  ;;  %v3848_v61 = vadd.f32 %v8707_v27, %v8745_v50  ;;  %v10248_v22 = vld [vmem:[#allocation21_spill] sm:$0xff]  ;;  %v10255_v6 = vld [vmem:[#allocation20_spill] sm:$0xff]  ;;  %v10256_v47 = vld [vmem:[#allocation27_spill] sm:$0xff] }
 0x2b5   : > { %v2950_v49 = vadd.f32 %v8641_v24, %v2849_v10  ;;  %v2919_v29 = vmul.f32 %v8419_v31, %v2882_v56  ;;  %5657 = vmatmul.mubr.msk.f32.vlgmr.msra.gmra.mrb[0].mxu1 %vm218_vm0, %v4494_v45  ;;  %v4254_v59 = vadd.f32 %v8692_v36, %v4152_v48  ;;  %v3645_v5 = vadd.f32 %v8737_v43, %v8756_v16  ;;  %v10252_v4 = vld [vmem:[#allocation41_spill] sm:$0xff]  ;;  %v10254_v10 = vld [vmem:[#allocation39_spill] sm:$0xff]  ;;  %v10259_v45 = vld [vmem:[#allocation28_spill] sm:$0xff] }
 0x2b6   : > { %v2749_v32 = vadd.f32 %v2717_v60, %v2648_v12  ;;  %v2750_v7 = vadd.f32 %v2718_v62, %v2649_v57  ;;  %v3135_v18 = vadd.f32 %v8764_v21, %v3050_v37  ;;  %v3949_v52 = vadd.f32 %v8711_v58, %v3848_v61  ;;  %v8856_v46 = vld [vmem:[#allocation9 + $0xb] ss:$0 sm:$0xff]  ;;  %v3239_v56 = vld [vmem:[#allocation4 + $0x1f5] sm:$0xff]  ;;  %v8864_v37 = vld [vmem:[#allocation5 + $0xc0] sm:$0xff] }
 0x2b7   : > { %v3020_v50 = vmul.f32 %v8424_v55, %v2983_v35  ;;  %v3105_v24 = vmul.f32 %v8467_v53, %v8778_v44  ;;  %v4356_v27 = vadd.f32 %v8696_v23, %v4254_v59  ;;  %v3747_v36 = vadd.f32 %v8749_v0, %v3645_v5  ;;  %v10257_v12 = vld [vmem:[#allocation42_spill] sm:$0xff]  ;;  %v10258_v62 = vld [vmem:[#allocation57_spill] sm:$0xff] }
 0x2b8   : > { %v2850_v40 = vadd.f32 %v2818_v8, %v2749_v32  ;;  %v2851_v33 = vadd.f32 %v2819_v15, %v2750_v7  ;;  %v3220_v31 = vadd.f32 %v8773_v2, %v3135_v18  ;;  %v4051_v21 = vadd.f32 %v8715_v41, %v3949_v52  ;;  %v8866_v35 = vld [vmem:[#allocation9 + $0xc] ss:$0 sm:$0xff]  ;;  %v8870_v61 = vld [vmem:[#allocation9 + $0xd] ss:$0 sm:$0xff]  ;;  %v10261_v7 = vld [vmem:[#allocation40_spill] sm:$0xff] }
 0x2b9   : > { %v3051_v58 = vadd.f32 %v8646_v51, %v2950_v49  ;;  %v3190_v43 = vmul.f32 %v8437_v9, %v8783_v28  ;;  %v3275_v55 = vmul.f32 %v8478_v39, %v2479_v34  ;;  %v4458_v53 = vadd.f32 %v8700_v1, %v4356_v27  ;;  %v10249_v51 = vld [vmem:[#allocation56_spill] sm:$0xff]  ;;  %v10250_v9 = vld [vmem:[#allocation29_spill] sm:$0xff]  ;;  %v10260_v49 = vld [vmem:[#allocation26_spill] sm:$0xff] }
 0x2ba   : > { %v2951_v16 = vadd.f32 %v2919_v29, %v2850_v40  ;;  %v3305_v15 = vadd.f32 %v3273_v19, %v3220_v31  ;;  %v4153_v2 = vadd.f32 %v8719_v14, %v4051_v21  ;;  %v3849_v23 = vadd.f32 %v8753_v63, %v3747_v36  ;;  %v10251_v19 = vld [vmem:[#allocation55_spill] sm:$0xff]  ;;  %v8850_v63 = vld [vmem:[#allocation9 + $0x13] ss:$0 sm:$0xff]  ;;  %v8875_v59 = vld [vmem:[#allocation9 + $0x14] ss:$0 sm:$0xff] }
 0x2bb   : > { %v2952_v41 = vadd.f32 %v2920_v54, %v2851_v33  ;;  %v4427_v0 = vmul.f32 %v10248_v22, %v8830_v20  ;;  %v4122_v26 = vmul.f32 %v8842_v38, %v10249_v51  ;;  %v4495_v34 = vadd.f32 %v8585_v13, %v4458_v53  ;;  %v10253_v54 = vld [vmem:[#allocation17_spill] sm:$0xff]  ;;  %v10262_v52 = vld [vmem:[#allocation51_spill] sm:$0xff] }
 0x2bc   : > { %v3052_v44 = vadd.f32 %v3020_v50, %v2951_v16  ;;  %v3342_v28 = vadd.f32 %v10250_v9, %v3305_v15  ;;  %v4255_v1 = vadd.f32 %v10251_v19, %v4153_v2  ;;  %v3950_v14 = vadd.f32 %v10252_v4, %v3849_v23  ;;  %v8880_v31 = vld [vmem:[#allocation9 + $0xe] ss:$0 sm:$0xff]  ;;  %v10263_v27 = vld [vmem:[#allocation19_spill] sm:$0xff]  ;;  %v8892_v23 = vld [vmem:[#allocation9 + $0xf] ss:$0 sm:$0xff] }
 0x2bd   : > { %v4224_v11 = vmul.f32 %v8850_v63, %v10253_v54  ;;  %v3292_v42 = vadd.f32 %v10255_v6, %v10254_v10  ;;  %v3442_v60 = vmul.f32 %v8856_v46, %v10256_v47  ;;  %5659 = vmatprep.mubr.msk.f32.mxu1 %vm218_vm0, %v4495_v34  ;;  %v3512_v48 = vmul.f32 %v8866_v35, %v10259_v45  ;;  %v10265_v51 = vld [vmem:[#allocation37_spill] sm:$0xff]  ;;  %v8903_v19 = vld [vmem:[#allocation9 + $0x10] ss:$0 sm:$0xff]  ;;  %v10267_v10 = vld [vmem:[#allocation64_spill] sm:$0xff] }
 0x2be   : > { %v3137_v30 = vadd.f32 %v3105_v24, %v3052_v44  ;;  %3396 = vst.msk [vmem:[#allocation5 + $0x130] sm:$0xff] %vm218_vm0, %v3342_v28  ;;  %v4357_v57 = vadd.f32 %v10257_v12, %v4255_v1  ;;  %v4052_v8 = vadd.f32 %v10258_v62, %v3950_v14  ;;  %v3614_v32 = vmul.f32 %v8870_v61, %v10260_v49  ;;  %v10264_v44 = vld [vmem:[#allocation62_spill] sm:$0xff]  ;;  %v10266_v1 = vld [vmem:[#allocation63_spill] sm:$0xff]  ;;  %v8919_v47 = vld [vmem:[#allocation5 + $0x60] sm:$0xff] }
 0x2bf   : > { %v3136_v29 = vadd.f32 %v10261_v7, %v3051_v58  ;;  %v4326_v5 = vmul.f32 %v8875_v59, %v10262_v52  ;;  %v3329_v40 = vadd.f32 %v10250_v9, %v3292_v42  ;;  %v3544_v24 = vadd.f32 %v3512_v48, %v3442_v60  ;;  %v8907_v14 = vld [vmem:[#allocation5 + $0x50] sm:$0xff] }
 0x2c0   : > { %v3222_v18 = vadd.f32 %v3190_v43, %v3137_v30  ;;  %v4459_v33 = vadd.f32 %v4427_v0, %v4357_v57  ;;  %v4154_v50 = vadd.f32 %v4122_v26, %v4052_v8  ;;  %v3716_v21 = vmul.f32 %v8880_v31, %v10263_v27  ;;  %v10268_v57 = vld [vmem:[#allocation65_spill] sm:$0xff]  ;;  %v8929_v7 = vld [vmem:[#allocation5 + $0x70] sm:$0xff] }
 0x2c1   : > { %v8885_v36 = vmul.f32 %v8478_v39, %v3239_v56  ;;  %v3053_v58 = vadd.f32 %v8796_v3, %v2952_v41  ;;  %v4428_v43 = vmul.f32 %v10248_v22, %v8864_v37  ;;  %3383 = vst.msk [vmem:[#allocation5 + $0xc8] sm:$0xff] %vm218_vm0, %v3329_v40  ;;  %v3646_v2 = vadd.f32 %v3614_v32, %v3544_v24  ;;  %v6210_v22 = vld [vmem:[#allocation5 + $0x40] sm:$0xff] }
 0x2c2   : > { %v3307_v16 = vadd.f32 %v3275_v55, %v3222_v18  ;;  %v4496_v15 = vadd.f32 %v8585_v13, %v4459_v33  ;;  %v4256_v53 = vadd.f32 %v4224_v11, %v4154_v50  ;;  %v3818_v0 = vmul.f32 %v8892_v23, %v10264_v44  ;;  %v6209_v55 = vld [vmem:[#allocation5 + $0x30] sm:$0xff]  ;;  %v10270_v18 = vld [vmem:[#allocation43_spill] sm:$0xff] }
 0x2c3   : > { %v8897_v39 = vadd.f32 %v10265_v51, %v3136_v29  ;;  %v3443_v41 = vmul.f32 %v6209_v55, %v8856_v46  ;;  %v3513_v26 = vmul.f32 %v6210_v22, %v8866_v35  ;;  %v3748_v34 = vadd.f32 %v3716_v21, %v3646_v2  ;;  %v8915_v11 = vld [vmem:[#allocation9 + $0x11] ss:$0 sm:$0xff] }
 0x2c4   : > { %v3344_v3 = vadd.f32 %v10250_v9, %v3307_v16  ;;  %5660 = vmatmul.mubr.msk.f32.gmra.mrb[2].mxu1 %vm218_vm0, %v4496_v15  ;;  %v4358_v28 = vadd.f32 %v4326_v5, %v4256_v53  ;;  %v3919_v4 = vmul.f32 %v8903_v19, %v10266_v1  ;;  %v3615_v30 = vmul.f32 %v8907_v14, %v8870_v61  ;;  %v10271_v5 = vld [vmem:[#allocation34_spill] sm:$0xff]  ;;  %v8940_v16 = vld [vmem:[#allocation5 + $0x80] sm:$0xff] }
 0x2c5   : > { %v8912_v54 = vadd.f32 %v8802_v17, %v3053_v58  ;;  %v4021_v6 = vmul.f32 %v8915_v11, %v10267_v10  ;;  %v3545_v42 = vadd.f32 %v3513_v26, %v3443_v41  ;;  %v3717_v60 = vmul.f32 %v8919_v47, %v8880_v31  ;;  %v10269_v17 = vld [vmem:[#allocation66_spill] sm:$0xff]  ;;  %v8958_v26 = vld [vmem:[#allocation5 + $0xa0] sm:$0xff] }
 0x2c6   : > { %3398 = vst.msk [vmem:[#allocation5 + $0x140] sm:$0xff] %vm218_vm0, %v3344_v3  ;;  %v4460_v56 = vadd.f32 %v4428_v43, %v4358_v28  ;;  %v3850_v12 = vadd.f32 %v3818_v0, %v3748_v34  ;;  %v4123_v62 = vmul.f32 %v8842_v38, %v10268_v57  ;;  %v4225_v8 = vmul.f32 %v8850_v63, %v10269_v17  ;;  %v8944_v15 = vld [vmem:[#allocation5 + $0xd0] sm:$0xff] }
 0x2c7   : > { %v4327_v48 = vmul.f32 %v8875_v59, %v8830_v20  ;;  %v3647_v32 = vadd.f32 %v3615_v30, %v3545_v42  ;;  %v3819_v29 = vmul.f32 %v8929_v7, %v8892_v23  ;;  %v3294_v40 = vadd.f32 %v10271_v5, %v10270_v18  ;;  %v8967_v30 = vld [vmem:[#allocation9 + $0x15] ss:$0 sm:$0xff] }
 0x2c8   : > { %v4497_v33 = vadd.f32 %v8585_v13, %v4460_v56  ;;  %v3951_v50 = vadd.f32 %v3919_v4, %v3850_v12  ;;  %v3444_v24 = vmul.f32 %v8856_v46, %v10259_v45  ;;  %v3514_v21 = vmul.f32 %v8866_v35, %v10260_v49  ;;  %v8950_v45 = vld [vmem:[#allocation5 + $0x90] sm:$0xff]  ;;  %v8956_v55 = vld [vmem:[#allocation5 + $0xc8] sm:$0xff] }
 0x2c9   : > { %v3749_v58 = vadd.f32 %v3717_v60, %v3647_v32  ;;  %v3920_v43 = vmul.f32 %v8940_v16, %v8903_v19  ;;  %v3331_v53 = vadd.f32 %v10250_v9, %v3294_v40  ;;  %v3616_v2 = vmul.f32 %v8870_v61, %v10263_v27 }
 0x2ca   : > { %5662 = vmatprep.mubr.msk.f32.mxu1 %vm218_vm0, %v4497_v33  ;;  %v4053_v0 = vadd.f32 %v4021_v6, %v3951_v50  ;;  %v4022_v49 = vmul.f32 %v8950_v45, %v8915_v11  ;;  %v3546_v51 = vadd.f32 %v3514_v21, %v3444_v24  ;;  %v3718_v3 = vmul.f32 %v8880_v31, %v10264_v44 }
 0x2cb   : > { %v3851_v41 = vadd.f32 %v3819_v29, %v3749_v58  ;;  %v4124_v27 = vmul.f32 %v8958_v26, %v8842_v38  ;;  %v4226_v28 = vmul.f32 %v8850_v63, %v10262_v52  ;;  %v4328_v34 = vmul.f32 %v8875_v59, %v8864_v37  ;;  %3385 = vst.msk [vmem:[#allocation5 + $0xd8] sm:$0xff] %vm218_vm0, %v3331_v53 }
 0x2cc   : > { %v4155_v4 = vadd.f32 %v4123_v62, %v4053_v0  ;;  %v4430_v6 = vmul.f32 %v8967_v30, %v8944_v15  ;;  %v3648_v42 = vadd.f32 %v3616_v2, %v3546_v51  ;;  %v3820_v60 = vmul.f32 %v8892_v23, %v10266_v1 }
 0x2cd   : > { %v3952_v56 = vadd.f32 %v3920_v43, %v3851_v41  ;;  %v3445_v12 = vmul.f32 %v6210_v22, %v8856_v46  ;;  %v3515_v32 = vmul.f32 %v8907_v14, %v8866_v35  ;;  %v3617_v29 = vmul.f32 %v8919_v47, %v8870_v61  ;;  %v10272_v41 = vld [vmem:[#allocation58_spill] sm:$0xff] }
 0x2ce   : > { %v4257_v18 = vadd.f32 %v4225_v8, %v4155_v4  ;;  %v4429_v62 = vmul.f32 %v8967_v30, %v8956_v55  ;;  %v3750_v5 = vadd.f32 %v3718_v3, %v3648_v42  ;;  %v3921_v40 = vmul.f32 %v8903_v19, %v10267_v10  ;;  %v10273_v4 = vld [vmem:[#allocation38_spill] sm:$0xff]  ;;  %v6220_v42 = vld [vmem:[#allocation5 + $0x48] sm:$0xff] }
 0x2cf   : > { %v4054_v33 = vadd.f32 %v4022_v49, %v3952_v56  ;;  %v4023_v50 = vmul.f32 %v8915_v11, %v10268_v57  ;;  %v3547_v24 = vadd.f32 %v3515_v32, %v3445_v12  ;;  %v3719_v22 = vmul.f32 %v8929_v7, %v8880_v31  ;;  %v6221_v32 = vld [vmem:[#allocation5 + $0x58] sm:$0xff] }
 0x2d0   : > { %v4359_v21 = vadd.f32 %v4327_v48, %v4257_v18  ;;  %v3852_v58 = vadd.f32 %v3820_v60, %v3750_v5  ;;  %v4125_v8 = vmul.f32 %v8842_v38, %v10269_v17  ;;  %v4227_v43 = vmul.f32 %v8850_v63, %v8830_v20 }
 0x2d1   : > { %v4156_v53 = vadd.f32 %v4124_v27, %v4054_v33  ;;  %v3649_v2 = vadd.f32 %v3617_v29, %v3547_v24  ;;  %v3821_v0 = vmul.f32 %v8940_v16, %v8892_v23  ;;  %v3922_v49 = vmul.f32 %v8950_v45, %v8903_v19 }
 0x2d2   : > { %v4461_v51 = vadd.f32 %v4429_v62, %v4359_v21  ;;  %v3953_v3 = vadd.f32 %v3921_v40, %v3852_v58  ;;  %v3296_v48 = vadd.f32 %v10273_v4, %v10272_v41  ;;  %v3446_v60 = vmul.f32 %v6220_v42, %v8856_v46  ;;  %v9004_v24 = vld [vmem:[#allocation5 + $0xd8] sm:$0xff] }
 0x2d3   : > { %v4258_v56 = vadd.f32 %v4226_v28, %v4156_v53  ;;  %v3751_v12 = vadd.f32 %v3719_v22, %v3649_v2  ;;  %v4024_v27 = vmul.f32 %v8958_v26, %v8915_v11  ;;  %v3516_v29 = vmul.f32 %v6221_v32, %v8866_v35 }
 0x2d4   : > { %v4498_v18 = vadd.f32 %v8585_v13, %v4461_v51  ;;  %v4055_v5 = vadd.f32 %v4023_v50, %v3953_v3  ;;  %v3333_v62 = vadd.f32 %v10250_v9, %v3296_v48  ;;  %v3618_v40 = vmul.f32 %v8870_v61, %v10264_v44 }
 0x2d5   : > { %v4360_v33 = vadd.f32 %v4328_v34, %v4258_v56  ;;  %v3853_v21 = vadd.f32 %v3821_v0, %v3751_v12  ;;  %v3548_v28 = vadd.f32 %v3516_v29, %v3446_v60  ;;  %v3720_v22 = vmul.f32 %v8880_v31, %v10266_v1  ;;  %v9025_v56 = vld [vmem:[#allocation5 + $0xe0] sm:$0xff] }
 0x2d6   : > { %5663 = vmatmul.mubr.msk.f32.gmra.mrb[4].mxu1 %vm218_vm0, %v4498_v18  ;;  %v4157_v58 = vadd.f32 %v4125_v8, %v4055_v5  ;;  %v4329_v53 = vmul.f32 %v8875_v59, %v8956_v55  ;;  %v4126_v50 = vmul.f32 %v8842_v38, %v10262_v52  ;;  %v4228_v2 = vmul.f32 %v8850_v63, %v8864_v37 }
 0x2d7   : > { %3387 = vst.msk [vmem:[#allocation5 + $0xe8] sm:$0xff] %vm218_vm0, %v3333_v62  ;;  %v4462_v34 = vadd.f32 %v4430_v6, %v4360_v33  ;;  %v3954_v0 = vadd.f32 %v3922_v49, %v3853_v21  ;;  %v3650_v51 = vadd.f32 %v3618_v40, %v3548_v28  ;;  %v3822_v3 = vmul.f32 %v8892_v23, %v10267_v10 }
 0x2d8   : > { %v4259_v41 = vadd.f32 %v4227_v43, %v4157_v58  ;;  %v4431_v8 = vmul.f32 %v8967_v30, %v9004_v24  ;;  %v3923_v4 = vmul.f32 %v8903_v19, %v10268_v57  ;;  %v3447_v48 = vmul.f32 %v8907_v14, %v8856_v46 }
 0x2d9   : > { %v4499_v42 = vadd.f32 %v8585_v13, %v4462_v34  ;;  %v4056_v60 = vadd.f32 %v4024_v27, %v3954_v0  ;;  %v3752_v6 = vadd.f32 %v3720_v22, %v3650_v51  ;;  %v3517_v49 = vmul.f32 %v8919_v47, %v8866_v35  ;;  %v10275_v51 = vld [vmem:[#allocation52_spill] sm:$0xff] }
 0x2da   : > { %v4361_v12 = vadd.f32 %v4329_v53, %v4259_v41  ;;  %v4330_v43 = vmul.f32 %v8875_v59, %v8944_v15  ;;  %v4025_v29 = vmul.f32 %v8915_v11, %v10269_v17  ;;  %v3619_v18 = vmul.f32 %v8929_v7, %v8870_v61 }
 0x2db   : > { %5665 = vmatprep.mubr.msk.f32.mxu1 %vm218_vm0, %v4499_v42  ;;  %v4158_v14 = vadd.f32 %v4126_v50, %v4056_v60  ;;  %v3854_v27 = vadd.f32 %v3822_v3, %v3752_v6  ;;  %v3549_v5 = vadd.f32 %v3517_v49, %v3447_v48  ;;  %v3721_v62 = vmul.f32 %v8940_v16, %v8880_v31 }
 0x2dc   : > { %v9040_v40 = vadd.f32 %v8805_v25, %v8912_v54  ;;  %v4463_v33 = vadd.f32 %v4431_v8, %v4361_v12  ;;  %v4432_v21 = vmul.f32 %v8967_v30, %v9025_v56  ;;  %v4127_v28 = vmul.f32 %v8842_v38, %v8830_v20  ;;  %v10274_v54 = vld [vmem:[#allocation18_spill] sm:$0xff] }
 0x2dd   : > { %v4260_v22 = vadd.f32 %v4228_v2, %v4158_v14  ;;  %v3955_v58 = vadd.f32 %v3923_v4, %v3854_v27  ;;  %v3651_v53 = vadd.f32 %v3619_v18, %v3549_v5  ;;  %v3823_v50 = vmul.f32 %v8950_v45, %v8892_v23 }
 0x2de   : > { %v4500_v34 = vadd.f32 %v8585_v13, %v4463_v33  ;;  %v4229_v0 = vmul.f32 %v8850_v63, %v8956_v55  ;;  %v4331_v25 = vmul.f32 %v8875_v59, %v9004_v24  ;;  %v3298_v3 = vadd.f32 %v10275_v51, %v10274_v54  ;;  %v9058_v4 = vld [vmem:[#allocation5 + $0xe8] sm:$0xff] }
 0x2df   : > { %v4362_v41 = vadd.f32 %v4330_v43, %v4260_v22  ;;  %v4057_v8 = vadd.f32 %v4025_v29, %v3955_v58  ;;  %v3753_v48 = vadd.f32 %v3721_v62, %v3651_v53  ;;  %v3924_v2 = vmul.f32 %v8958_v26, %v8903_v19  ;;  %v9078_v22 = vld [vmem:[#allocation5 + $0xf0] sm:$0xff] }
 0x2e0   : > { %5666 = vmatmul.mubr.msk.f32.gmra.mrb[6].mxu1 %vm218_vm0, %v4500_v34  ;;  %v3335_v42 = vadd.f32 %v10250_v9, %v3298_v3  ;;  %v3448_v60 = vmul.f32 %v6221_v32, %v8856_v46  ;;  %v3518_v6 = vmul.f32 %v8866_v35, %v10264_v44  ;;  %v3620_v49 = vmul.f32 %v8870_v61, %v10266_v1 }
 0x2e1   : > { %v4464_v12 = vadd.f32 %v4432_v21, %v4362_v41  ;;  %v4159_v43 = vadd.f32 %v4127_v28, %v4057_v8  ;;  %v3855_v29 = vadd.f32 %v3823_v50, %v3753_v48  ;;  %v4026_v18 = vmul.f32 %v8915_v11, %v10262_v52 }
 0x2e2   : > { %v4128_v14 = vmul.f32 %v8842_v38, %v8864_v37  ;;  %v4230_v27 = vmul.f32 %v8850_v63, %v8944_v15  ;;  %3389 = vst.msk [vmem:[#allocation5 + $0xf8] sm:$0xff] %vm218_vm0, %v3335_v42  ;;  %v3550_v32 = vadd.f32 %v3518_v6, %v3448_v60  ;;  %v3722_v5 = vmul.f32 %v8880_v31, %v10267_v10 }
 0x2e3   : > { %v4501_v62 = vadd.f32 %v8585_v13, %v4464_v12  ;;  %v4261_v33 = vadd.f32 %v4229_v0, %v4159_v43  ;;  %v4433_v21 = vmul.f32 %v8967_v30, %v9058_v4  ;;  %v3956_v28 = vadd.f32 %v3924_v2, %v3855_v29 }
 0x2e4   : > { %v3652_v58 = vadd.f32 %v3620_v49, %v3550_v32  ;;  %v3824_v53 = vmul.f32 %v8892_v23, %v10268_v57  ;;  %v3449_v50 = vmul.f32 %v8919_v47, %v8856_v46  ;;  %v3519_v34 = vmul.f32 %v8929_v7, %v8866_v35  ;;  %v10276_v32 = vld [vmem:[#allocation60_spill] sm:$0xff] }
 0x2e5   : > { %5668 = vmatprep.mubr.msk.f32.mxu1 %vm218_vm0, %v4501_v62  ;;  %v4363_v54 = vadd.f32 %v4331_v25, %v4261_v33  ;;  %v4058_v0 = vadd.f32 %v4026_v18, %v3956_v28  ;;  %v4332_v51 = vmul.f32 %v8875_v59, %v9025_v56  ;;  %v3621_v3 = vmul.f32 %v8940_v16, %v8870_v61 }
 0x2e6   : > { %v3754_v41 = vadd.f32 %v3722_v5, %v3652_v58  ;;  %v3925_v8 = vmul.f32 %v8903_v19, %v10269_v17  ;;  %v3551_v48 = vadd.f32 %v3519_v34, %v3449_v50  ;;  %v3723_v47 = vmul.f32 %v8950_v45, %v8880_v31  ;;  %v10277_v5 = vld [vmem:[#allocation36_spill] sm:$0xff] }
 0x2e7   : > { %v4465_v2 = vadd.f32 %v4433_v21, %v4363_v54  ;;  %v4160_v42 = vadd.f32 %v4128_v14, %v4058_v0  ;;  %v4434_v25 = vmul.f32 %v8967_v30, %v9078_v22  ;;  %v4027_v60 = vmul.f32 %v8915_v11, %v8830_v20 }
 0x2e8   : > { %v3856_v6 = vadd.f32 %v3824_v53, %v3754_v41  ;;  %v4129_v49 = vmul.f32 %v8842_v38, %v8956_v55  ;;  %v3653_v12 = vadd.f32 %v3621_v3, %v3551_v48  ;;  %v3825_v43 = vmul.f32 %v8958_v26, %v8892_v23 }
 0x2e9   : > { %v4502_v29 = vadd.f32 %v8585_v13, %v4465_v2  ;;  %v4262_v18 = vadd.f32 %v4230_v27, %v4160_v42  ;;  %v4231_v14 = vmul.f32 %v8850_v63, %v9004_v24  ;;  %v3300_v62 = vadd.f32 %v10277_v5, %v10276_v32  ;;  %v9113_v50 = vld [vmem:[#allocation5 + $0xf8] sm:$0xff] }
 0x2ea   : > { %v3957_v33 = vadd.f32 %v3925_v8, %v3856_v6  ;;  %v3755_v21 = vadd.f32 %v3723_v47, %v3653_v12  ;;  %v3926_v28 = vmul.f32 %v8903_v19, %v10262_v52  ;;  %v3450_v58 = vmul.f32 %v8856_v46, %v10264_v44  ;;  %v9133_v12 = vld [vmem:[#allocation5 + $0x100] sm:$0xff] }
 0x2eb   : > { %5669 = vmatmul.mubr.msk.f32.gmra.mrb[8].mxu1 %vm218_vm0, %v4502_v29  ;;  %v4364_v53 = vadd.f32 %v4332_v51, %v4262_v18  ;;  %v3337_v27 = vadd.f32 %v10250_v9, %v3300_v62  ;;  %v3520_v34 = vmul.f32 %v8866_v35, %v10266_v1  ;;  %v3622_v54 = vmul.f32 %v8870_v61, %v10267_v10 }
 0x2ec   : > { %v4059_v0 = vadd.f32 %v4027_v60, %v3957_v33  ;;  %v4333_v3 = vmul.f32 %v8875_v59, %v9058_v4  ;;  %v3857_v41 = vadd.f32 %v3825_v43, %v3755_v21  ;;  %v4028_v44 = vmul.f32 %v8915_v11, %v8864_v37 }
 0x2ed   : > { %v4466_v8 = vadd.f32 %v4434_v25, %v4364_v53  ;;  %v4130_v51 = vmul.f32 %v8842_v38, %v8944_v15  ;;  %3391 = vst.msk [vmem:[#allocation5 + $0x108] sm:$0xff] %vm218_vm0, %v3337_v27  ;;  %v3552_v48 = vadd.f32 %v3520_v34, %v3450_v58  ;;  %v3724_v47 = vmul.f32 %v8880_v31, %v10268_v57 }
 0x2ee   : > { %v4161_v2 = vadd.f32 %v4129_v49, %v4059_v0  ;;  %v4435_v42 = vmul.f32 %v8967_v30, %v9113_v50  ;;  %v3958_v60 = vadd.f32 %v3926_v28, %v3857_v41  ;;  %v4232_v6 = vmul.f32 %v8850_v63, %v9025_v56 }
 0x2ef   : > { %v4503_v25 = vadd.f32 %v8585_v13, %v4466_v8  ;;  %v3654_v43 = vadd.f32 %v3622_v54, %v3552_v48  ;;  %v3826_v29 = vmul.f32 %v8892_v23, %v10269_v17  ;;  %v3451_v18 = vmul.f32 %v8929_v7, %v8856_v46  ;;  %v10279_v48 = vld [vmem:[#allocation59_spill] sm:$0xff] }
 0x2f0   : > { %v4263_v32 = vadd.f32 %v4231_v14, %v4161_v2  ;;  %v4060_v49 = vadd.f32 %v4028_v44, %v3958_v60  ;;  %v3521_v5 = vmul.f32 %v8940_v16, %v8866_v35  ;;  %v3623_v62 = vmul.f32 %v8950_v45, %v8870_v61 }
 0x2f1   : > { %5671 = vmatprep.mubr.msk.f32.mxu1 %vm218_vm0, %v4503_v25  ;;  %v4334_v33 = vmul.f32 %v8875_v59, %v9078_v22  ;;  %v4436_v21 = vmul.f32 %v8967_v30, %v9133_v12  ;;  %v3756_v28 = vadd.f32 %v3724_v47, %v3654_v43  ;;  %v3927_v7 = vmul.f32 %v8903_v19, %v8830_v20 }
 0x2f2   : > { %v4365_v14 = vadd.f32 %v4333_v3, %v4263_v32  ;;  %v4162_v58 = vadd.f32 %v4130_v51, %v4060_v49  ;;  %v3553_v53 = vadd.f32 %v3521_v5, %v3451_v18  ;;  %v3725_v16 = vmul.f32 %v8958_v26, %v8880_v31  ;;  %v10278_v51 = vld [vmem:[#allocation16_spill] sm:$0xff] }
 0x2f3   : > { %v3858_v27 = vadd.f32 %v3826_v29, %v3756_v28  ;;  %v4029_v45 = vmul.f32 %v8915_v11, %v8956_v55  ;;  %v4131_v34 = vmul.f32 %v8842_v38, %v9004_v24  ;;  %v4233_v54 = vmul.f32 %v8850_v63, %v9058_v4  ;;  %v9180_v28 = vld [vmem:[#allocation5 + $0x90] sm:$0xff] }
 0x2f4   : > { %v4467_v0 = vadd.f32 %v4435_v42, %v4365_v14  ;;  %v4264_v41 = vadd.f32 %v4232_v6, %v4162_v58  ;;  %v3655_v44 = vadd.f32 %v3623_v62, %v3553_v53  ;;  %v3827_v3 = vmul.f32 %v8892_v23, %v10262_v52  ;;  %v9189_v14 = vld [vmem:[#allocation5 + $0xa0] sm:$0xff] }
 0x2f5   : > { %v3959_v8 = vadd.f32 %v3927_v7, %v3858_v27  ;;  %v3928_v26 = vmul.f32 %v8903_v19, %v8864_v37  ;;  %v3302_v47 = vadd.f32 %v10279_v48, %v10278_v51  ;;  %v3452_v2 = vmul.f32 %v8856_v46, %v10266_v1  ;;  %v9176_v1 = vld [vmem:[#allocation5 + $0x108] sm:$0xff] }
 0x2f6   : > { %v4504_v60 = vadd.f32 %v8585_v13, %v4467_v0  ;;  %v4366_v25 = vadd.f32 %v4334_v33, %v4264_v41  ;;  %v3757_v43 = vadd.f32 %v3725_v16, %v3655_v44  ;;  %v3522_v42 = vmul.f32 %v8866_v35, %v10267_v10  ;;  %v3416_v10 = vld [vmem:[#allocation5 + $0x80] sm:$0xff] }
 0x2f7   : > { %v4061_v6 = vadd.f32 %v4029_v45, %v3959_v8  ;;  %v4030_v29 = vmul.f32 %v8915_v11, %v8944_v15  ;;  %v3339_v18 = vadd.f32 %v10250_v9, %v3302_v47  ;;  %v3624_v32 = vmul.f32 %v8870_v61, %v10268_v57 }
 0x2f8   : > { %5672 = vmatmul.mubr.msk.f32.gmra.mrb[10].mxu1 %vm218_vm0, %v4504_v60  ;;  %v4468_v49 = vadd.f32 %v4436_v21, %v4366_v25  ;;  %v3859_v5 = vadd.f32 %v3827_v3, %v3757_v43  ;;  %v3554_v62 = vadd.f32 %v3522_v42, %v3452_v2  ;;  %v3726_v33 = vmul.f32 %v8880_v31, %v10269_v17  ;;  %v3417_v43 = vld [vmem:[#allocation5 + $0x88] sm:$0xff] }
 0x2f9   : > { %v4163_v7 = vadd.f32 %v4131_v34, %v4061_v6  ;;  %v4335_v9 = vmul.f32 %v8875_v59, %v9113_v50  ;;  %v4132_v57 = vmul.f32 %v8842_v38, %v9025_v56  ;;  %v4234_v21 = vmul.f32 %v8850_v63, %v9078_v22  ;;  %3393 = vst.msk [vmem:[#allocation5 + $0x118] sm:$0xff] %vm218_vm0, %v3339_v18  ;;  %v9196_v34 = vld [vmem:[#allocation5 + $0x110] sm:$0xff] }
 0x2fa   : > { %v4505_v58 = vadd.f32 %v8585_v13, %v4468_v49  ;;  %v3960_v17 = vadd.f32 %v3928_v26, %v3859_v5  ;;  %v3656_v53 = vadd.f32 %v3624_v32, %v3554_v62  ;;  %v3828_v16 = vmul.f32 %v8892_v23, %v8830_v20  ;;  %v9218_v32 = vld [vmem:[#allocation5 + $0x98] sm:$0xff]  ;;  %v10280_v62 = vld [vmem:[#allocation50_spill] sm:$0xff] }
 0x2fb   : > { %v4265_v27 = vadd.f32 %v4233_v54, %v4163_v7  ;;  %v4437_v45 = vmul.f32 %v8967_v30, %v9176_v1  ;;  %v3453_v0 = vmul.f32 %v8856_v46, %v3416_v10  ;;  %v3523_v41 = vmul.f32 %v8866_v35, %v9180_v28  ;;  %v9224_v7 = vld [vmem:[#allocation5 + $0xa8] sm:$0xff] }
 0x2fc   : > { %5674 = vmatprep.mubr.msk.f32.mxu1 %vm218_vm0, %v4505_v58  ;;  %v4062_v44 = vadd.f32 %v4030_v29, %v3960_v17  ;;  %v3758_v13 = vadd.f32 %v3726_v33, %v3656_v53  ;;  %v3929_v3 = vmul.f32 %v8903_v19, %v8956_v55  ;;  %v3625_v54 = vmul.f32 %v8870_v61, %v9189_v14  ;;  %v10281_v33 = vld [vmem:[#allocation61_spill] sm:$0xff] }
 0x2fd   : > { %v4367_v8 = vadd.f32 %v4335_v9, %v4265_v27  ;;  %v4336_v26 = vmul.f32 %v8875_v59, %v9133_v12  ;;  %v3555_v51 = vadd.f32 %v3523_v41, %v3453_v0  ;;  %v3727_v48 = vmul.f32 %v8880_v31, %v10262_v52  ;;  %v9226_v9 = vld [vmem:[#allocation9 + $0x17] ss:$0 sm:$0xff] }
 0x2fe   : > { %v4164_v47 = vadd.f32 %v4132_v57, %v4062_v44  ;;  %v4438_v2 = vmul.f32 %v8967_v30, %v9196_v34  ;;  %v3860_v60 = vadd.f32 %v3828_v16, %v3758_v13  ;;  %v4031_v25 = vmul.f32 %v8915_v11, %v9004_v24 }
 0x2ff   : > { %v4469_v42 = vadd.f32 %v4437_v45, %v4367_v8  ;;  %v4133_v6 = vmul.f32 %v8842_v38, %v9058_v4  ;;  %v3657_v29 = vadd.f32 %v3625_v54, %v3555_v51  ;;  %v3829_v18 = vmul.f32 %v8892_v23, %v8864_v37  ;;  %v9234_v45 = vld [vmem:[#allocation9 + $0x16] ss:$0 sm:$0xff] }
 0x300   : > { %v4266_v52 = vadd.f32 %v4234_v21, %v4164_v47  ;;  %v3961_v49 = vadd.f32 %v3929_v3, %v3860_v60  ;;  %v4235_v5 = vmul.f32 %v8850_v63, %v9113_v50  ;;  %v3304_v10 = vadd.f32 %v10281_v33, %v10280_v62  ;;  %v9232_v27 = vld [vmem:[#allocation5 + $0x118] sm:$0xff]  ;;  %v9249_v47 = vld [vmem:[#allocation5 + $0xb0] sm:$0xff] }
 0x301   : > { %v4506_v57 = vadd.f32 %v9226_v9, %v4469_v42  ;;  %v3759_v58 = vadd.f32 %v3727_v48, %v3657_v29  ;;  %v3930_v17 = vmul.f32 %v8903_v19, %v8944_v15  ;;  %v3454_v53 = vmul.f32 %v8856_v46, %v3417_v43  ;;  %v9258_v29 = vld [vmem:[#allocation5 + $0x120] sm:$0xff] }
 0x302   : > { %v4368_v21 = vadd.f32 %v4336_v26, %v4266_v52  ;;  %v4063_v16 = vadd.f32 %v4031_v25, %v3961_v49  ;;  %v3341_v0 = vadd.f32 %v9234_v45, %v3304_v10  ;;  %v3524_v41 = vmul.f32 %v8866_v35, %v9218_v32 }
 0x303   : > { %5675 = vmatmul.mubr.msk.f32.gmra.mrb[12].mxu1 %vm218_vm0, %v4506_v57  ;;  %v4337_v44 = vmul.f32 %v8875_v59, %v9176_v1  ;;  %v3861_v13 = vadd.f32 %v3829_v18, %v3759_v58  ;;  %v4032_v3 = vmul.f32 %v8915_v11, %v9025_v56  ;;  %v3626_v54 = vmul.f32 %v8870_v61, %v9224_v7 }
 0x304   : > { %v4470_v8 = vadd.f32 %v4438_v2, %v4368_v21  ;;  %v4165_v26 = vadd.f32 %v4133_v6, %v4063_v16  ;;  %3395 = vst.msk [vmem:[#allocation5 + $0x128] sm:$0xff] %vm218_vm0, %v3341_v0  ;;  %v3556_v51 = vadd.f32 %v3524_v41, %v3454_v53  ;;  %v3728_v48 = vmul.f32 %v8880_v31, %v8830_v20 }
 0x305   : > { %v4439_v60 = vmul.f32 %v8967_v30, %v9232_v27  ;;  %v3962_v25 = vadd.f32 %v3930_v17, %v3861_v13  ;;  %v4134_v43 = vmul.f32 %v8842_v38, %v9078_v22  ;;  %v4236_v42 = vmul.f32 %v8850_v63, %v9133_v12 }
 0x306   : > { %v4507_v2 = vadd.f32 %v9226_v9, %v4470_v8  ;;  %v4267_v6 = vadd.f32 %v4235_v5, %v4165_v26  ;;  %v3658_v18 = vadd.f32 %v3626_v54, %v3556_v51  ;;  %v3830_v20 = vmul.f32 %v8892_v23, %v8956_v55  ;;  %v9285_v26 = vld [vmem:[#allocation5 + $0xb8] sm:$0xff] }
 0x307   : > { %v4064_v52 = vadd.f32 %v4032_v3, %v3962_v25  ;;  %v3455_v49 = vmul.f32 %v8856_v46, %v9180_v28  ;;  %v3525_v62 = vmul.f32 %v8866_v35, %v9189_v14  ;;  %v3627_v33 = vmul.f32 %v8870_v61, %v9249_v47 }
 0x308   : > { %5677 = vmatprep.mubr.msk.f32.mxu1 %vm218_vm0, %v4507_v2  ;;  %v4369_v10 = vadd.f32 %v4337_v44, %v4267_v6  ;;  %v4338_v5 = vmul.f32 %v8875_v59, %v9196_v34  ;;  %v3760_v57 = vadd.f32 %v3728_v48, %v3658_v18  ;;  %v3931_v58 = vmul.f32 %v8903_v19, %v9004_v24 }
 0x309   : > { %v4166_v17 = vadd.f32 %v4134_v43, %v4064_v52  ;;  %v4440_v28 = vmul.f32 %v8967_v30, %v9258_v29  ;;  %v3557_v53 = vadd.f32 %v3525_v62, %v3455_v49  ;;  %v3729_v21 = vmul.f32 %v8880_v31, %v8864_v37 }
 0x30a   : > { %v4471_v16 = vadd.f32 %v4439_v60, %v4369_v10  ;;  %v3862_v0 = vadd.f32 %v3830_v20, %v3760_v57  ;;  %v4033_v41 = vmul.f32 %v8915_v11, %v9058_v4  ;;  %v4135_v44 = vmul.f32 %v8842_v38, %v9113_v50  ;;  %v10282_v60 = vld [vmem:[#allocation33_spill] sm:$0xff] }
 0x30b   : > { %v4268_v13 = vadd.f32 %v4236_v42, %v4166_v17  ;;  %v4237_v3 = vmul.f32 %v8850_v63, %v9176_v1  ;;  %v3659_v54 = vadd.f32 %v3627_v33, %v3557_v53  ;;  %v3831_v8 = vmul.f32 %v8892_v23, %v8944_v15  ;;  %v9302_v62 = vld [vmem:[#allocation5 + $0x128] sm:$0xff] }
 0x30c   : > { %v4508_v37 = vadd.f32 %v9226_v9, %v4471_v16  ;;  %v3963_v51 = vadd.f32 %v3931_v58, %v3862_v0  ;;  %v3932_v48 = vmul.f32 %v8903_v19, %v9025_v56  ;;  %v3306_v25 = vadd.f32 %v10282_v60, %v8897_v39 }
 0x30d   : > { %v4370_v43 = vadd.f32 %v4338_v5, %v4268_v13  ;;  %v3761_v42 = vadd.f32 %v3729_v21, %v3659_v54  ;;  %v3456_v2 = vmul.f32 %v8856_v46, %v9218_v32  ;;  %v3526_v6 = vmul.f32 %v8866_v35, %v9224_v7 }
 0x30e   : > { %5678 = vmatmul.mubr.msk.f32.gmra.mrb[14].mxu1 %vm218_vm0, %v4508_v37  ;;  %v4065_v18 = vadd.f32 %v4033_v41, %v3963_v51  ;;  %v4034_v20 = vmul.f32 %v8915_v11, %v9078_v22  ;;  %v3343_v52 = vadd.f32 %v9234_v45, %v3306_v25  ;;  %v3628_v49 = vmul.f32 %v8870_v61, %v9285_v26 }
 0x30f   : > { %v4472_v39 = vadd.f32 %v4440_v28, %v4370_v43  ;;  %v3863_v33 = vadd.f32 %v3831_v8, %v3761_v42  ;;  %v3558_v10 = vadd.f32 %v3526_v6, %v3456_v2  ;;  %v3730_v32 = vmul.f32 %v8880_v31, %v8956_v55  ;;  %v9313_v28 = vld [vmem:[#allocation5 + $0xc0] sm:$0xff] }
 0x310   : > { %v4167_v5 = vadd.f32 %v4135_v44, %v4065_v18  ;;  %v4339_v57 = vmul.f32 %v8875_v59, %v9232_v27  ;;  %v4136_v58 = vmul.f32 %v8842_v38, %v9133_v12  ;;  %v4238_v17 = vmul.f32 %v8850_v63, %v9196_v34  ;;  %3397 = vst.msk [vmem:[#allocation5 + $0x138] sm:$0xff] %vm218_vm0, %v3343_v52  ;;  %v9320_v44 = vld [vmem:[#allocation5 + $0x130] sm:$0xff] }
 0x311   : > { %v4509_v53 = vadd.f32 %v9226_v9, %v4472_v39  ;;  %v3964_v21 = vadd.f32 %v3932_v48, %v3863_v33  ;;  %v3660_v16 = vadd.f32 %v3628_v49, %v3558_v10  ;;  %v3832_v55 = vmul.f32 %v8892_v23, %v9004_v24 }
 0x312   : > { %v4269_v0 = vadd.f32 %v4237_v3, %v4167_v5  ;;  %v4441_v41 = vmul.f32 %v8967_v30, %v9302_v62  ;;  %v3457_v13 = vmul.f32 %v8856_v46, %v9189_v14  ;;  %v3527_v54 = vmul.f32 %v8866_v35, %v9249_v47 }
 0x313   : > { %5680 = vmatprep.mubr.msk.f32.mxu1 %vm218_vm0, %v4509_v53  ;;  %v4066_v8 = vadd.f32 %v4034_v20, %v3964_v21  ;;  %v3762_v37 = vadd.f32 %v3730_v32, %v3660_v16  ;;  %v3933_v51 = vmul.f32 %v8903_v19, %v9058_v4  ;;  %v3629_v3 = vmul.f32 %v8870_v61, %v9313_v28  ;;  %v9347_v32 = vld [vmem:[#allocation5 + $0xc8] sm:$0xff] }
 0x314   : > { %v4371_v48 = vadd.f32 %v4339_v57, %v4269_v0  ;;  %v4340_v60 = vmul.f32 %v8875_v59, %v9258_v29  ;;  %v3559_v25 = vadd.f32 %v3527_v54, %v3457_v13  ;;  %v3731_v14 = vmul.f32 %v8880_v31, %v8944_v15 }
 0x315   : > { %v4168_v43 = vadd.f32 %v4136_v58, %v4066_v8  ;;  %v4442_v42 = vmul.f32 %v8967_v30, %v9320_v44  ;;  %v3864_v2 = vadd.f32 %v3832_v55, %v3762_v37  ;;  %v4035_v6 = vmul.f32 %v8915_v11, %v9113_v50  ;;  %v9369_v37 = vld [vmem:[#allocation5 + $0xd0] sm:$0xff] }
 0x316   : > { %v4473_v18 = vadd.f32 %v4441_v41, %v4371_v48  ;;  %v4137_v20 = vmul.f32 %v8842_v38, %v9176_v1  ;;  %v3661_v52 = vadd.f32 %v3629_v3, %v3559_v25  ;;  %v3833_v49 = vmul.f32 %v8892_v23, %v9025_v56 }
 0x317   : > { %v4270_v39 = vadd.f32 %v4238_v17, %v4168_v43  ;;  %v3965_v33 = vadd.f32 %v3933_v51, %v3864_v2  ;;  %v4239_v15 = vmul.f32 %v8850_v63, %v9232_v27  ;;  %v3308_v10 = vadd.f32 %v8885_v36, %v9040_v40  ;;  %v9354_v16 = vld [vmem:[#allocation5 + $0x138] sm:$0xff]  ;;  %v9378_v43 = vld [vmem:[#allocation5 + $0x140] sm:$0xff] }
 0x318   : > { %v4510_v5 = vadd.f32 %v9226_v9, %v4473_v18  ;;  %v3763_v57 = vadd.f32 %v3731_v14, %v3661_v52  ;;  %v3934_v58 = vmul.f32 %v8903_v19, %v9078_v22  ;;  %v3458_v53 = vmul.f32 %v8856_v46, %v9224_v7 }
 0x319   : > { %v4372_v21 = vadd.f32 %v4340_v60, %v4270_v39  ;;  %v4067_v17 = vadd.f32 %v4035_v6, %v3965_v33  ;;  %v3345_v55 = vadd.f32 %v9234_v45, %v3308_v10  ;;  %v3528_v36 = vmul.f32 %v8866_v35, %v9285_v26 }
 0x31a   : > { %5681 = vmatmul.mubr.msk.f32.gmra.mrb[16].mxu1 %vm218_vm0, %v4510_v5  ;;  %v4341_v40 = vmul.f32 %v8875_v59, %v9302_v62  ;;  %v3865_v0 = vadd.f32 %v3833_v49, %v3763_v57  ;;  %v4036_v41 = vmul.f32 %v8915_v11, %v9133_v12  ;;  %v3630_v7 = vmul.f32 %v8870_v61, %v9347_v32 }
 0x31b   : > { %v4474_v13 = vadd.f32 %v4442_v42, %v4372_v21  ;;  %v4169_v54 = vadd.f32 %v4137_v20, %v4067_v17  ;;  %3399 = vst.msk [vmem:[#allocation5 + $0x148] sm:$0xff] %vm218_vm0, %v3345_v55  ;;  %v3560_v45 = vadd.f32 %v3528_v36, %v3458_v53  ;;  %v3732_v8 = vmul.f32 %v8880_v31, %v9004_v24  ;;  %v9401_v17 = vld [vmem:[#allocation5 + $0xd8] sm:$0xff] }
 0x31c   : > { %v4443_v51 = vmul.f32 %v8967_v30, %v9354_v16  ;;  %v3966_v3 = vadd.f32 %v3934_v58, %v3865_v0  ;;  %v4138_v48 = vmul.f32 %v8842_v38, %v9196_v34  ;;  %v4240_v60 = vmul.f32 %v8850_v63, %v9258_v29 }
 0x31d   : > { %v4511_v25 = vadd.f32 %v9226_v9, %v4474_v13  ;;  %v4271_v14 = vadd.f32 %v4239_v15, %v4169_v54  ;;  %v3662_v42 = vadd.f32 %v3630_v7, %v3560_v45  ;;  %v3834_v24 = vmul.f32 %v8892_v23, %v9058_v4 }
 0x31e   : > { %v4068_v2 = vadd.f32 %v4036_v41, %v3966_v3  ;;  %v3459_v6 = vmul.f32 %v8856_v46, %v9249_v47  ;;  %v3529_v18 = vmul.f32 %v8866_v35, %v9313_v28  ;;  %v3631_v20 = vmul.f32 %v8870_v61, %v9369_v37 }
 0x31f   : > { %5683 = vmatprep.mubr.msk.f32.mxu1 %vm218_vm0, %v4511_v25  ;;  %v4373_v52 = vadd.f32 %v4341_v40, %v4271_v14  ;;  %v4342_v49 = vmul.f32 %v8875_v59, %v9320_v44  ;;  %v3764_v39 = vadd.f32 %v3732_v8, %v3662_v42  ;;  %v3935_v33 = vmul.f32 %v8903_v19, %v9113_v50 }
 0x320   : > { %v4170_v15 = vadd.f32 %v4138_v48, %v4068_v2  ;;  %v4444_v47 = vmul.f32 %v8967_v30, %v9378_v43  ;;  %v3561_v10 = vadd.f32 %v3529_v18, %v3459_v6  ;;  %v3733_v5 = vmul.f32 %v8880_v31, %v9025_v56  ;;  %v9427_v6 = vld [vmem:[#allocation5 + $0xe0] sm:$0xff] }
 0x321   : > { %v4475_v57 = vadd.f32 %v4443_v51, %v4373_v52  ;;  %v3866_v58 = vadd.f32 %v3834_v24, %v3764_v39  ;;  %v4037_v53 = vmul.f32 %v8915_v11, %v9176_v1  ;;  %v4139_v21 = vmul.f32 %v8842_v38, %v9232_v27  ;;  %v9435_v39 = vld [vmem:[#allocation5 + $0x150] sm:$0xff] }
 0x322   : > { %v4272_v55 = vadd.f32 %v4240_v60, %v4170_v15  ;;  %v4241_v36 = vmul.f32 %v8850_v63, %v9302_v62  ;;  %v3663_v40 = vadd.f32 %v3631_v20, %v3561_v10  ;;  %v3835_v0 = vmul.f32 %v8892_v23, %v9078_v22  ;;  %v9412_v45 = vld [vmem:[#allocation5 + $0x148] sm:$0xff] }
 0x323   : > { %v4512_v56 = vadd.f32 %v9226_v9, %v4475_v57  ;;  %v3967_v41 = vadd.f32 %v3935_v33, %v3866_v58  ;;  %v3936_v7 = vmul.f32 %v8903_v19, %v9133_v12  ;;  %v3460_v13 = vmul.f32 %v8856_v46, %v9285_v26 }
 0x324   : > { %v4374_v54 = vadd.f32 %v4342_v49, %v4272_v55  ;;  %v3765_v8 = vadd.f32 %v3733_v5, %v3663_v40  ;;  %v3530_v51 = vmul.f32 %v8866_v35, %v9347_v32  ;;  %v3632_v3 = vmul.f32 %v8870_v61, %v9401_v17 }
 0x325   : > { %5684 = vmatmul.mubr.msk.f32.gmra.mrb[18].mxu1 %vm218_vm0, %v4512_v56  ;;  %v4069_v48 = vadd.f32 %v4037_v53, %v3967_v41  ;;  %v4343_v60 = vmul.f32 %v8875_v59, %v9354_v16  ;;  %v4038_v25 = vmul.f32 %v8915_v11, %v9196_v34  ;;  %v4140_v26 = vmul.f32 %v8842_v38, %v9258_v29  ;;  %v9455_v56 = vld [vmem:[#allocation9 + $0x12] ss:$0 sm:$0xff] }
 0x326   : > { %v4476_v14 = vadd.f32 %v4444_v47, %v4374_v54  ;;  %v3867_v42 = vadd.f32 %v3835_v0, %v3765_v8  ;;  %v3562_v24 = vadd.f32 %v3530_v51, %v3460_v13  ;;  %v3734_v2 = vmul.f32 %v8880_v31, %v9058_v4  ;;  %v9461_v13 = vld [vmem:[#allocation5 + $0xe8] sm:$0xff] }
 0x327   : > { %v4171_v18 = vadd.f32 %v4139_v21, %v4069_v48  ;;  %v4445_v20 = vmul.f32 %v8967_v30, %v9412_v45  ;;  %v4242_v52 = vmul.f32 %v8850_v63, %v9320_v44  ;;  %v4344_v49 = vmul.f32 %v8875_v59, %v9378_v43 }
 0x328   : > { %v4513_v38 = vadd.f32 %v9226_v9, %v4476_v14  ;;  %v3968_v33 = vadd.f32 %v3936_v7, %v3867_v42  ;;  %v3664_v15 = vadd.f32 %v3632_v3, %v3562_v24  ;;  %v3836_v4 = vmul.f32 %v8892_v23, %v9113_v50  ;;  %v9478_v24 = vld [vmem:[#allocation9 + $0xd] ss:$0 sm:$0xff] }
 0x329   : > { %v4273_v47 = vadd.f32 %v4241_v36, %v4171_v18  ;;  %v3461_v10 = vmul.f32 %v8856_v46, %v9313_v28  ;;  %v3531_v5 = vmul.f32 %v8866_v35, %v9369_v37  ;;  %v3633_v57 = vmul.f32 %v8870_v61, %v9427_v6 }
 0x32a   : > { %5686 = vmatprep.mubr.msk.f32.mxu1 %vm218_vm0, %v4513_v38  ;;  %v4070_v58 = vadd.f32 %v4038_v25, %v3968_v33  ;;  %v4446_v53 = vmul.f32 %v8967_v30, %v9435_v39  ;;  %v3766_v21 = vadd.f32 %v3734_v2, %v3664_v15  ;;  %v3937_v55 = vmul.f32 %v8903_v19, %v9176_v1  ;;  %v9469_v25 = vld [vmem:[#allocation9 + $0xb] ss:$0 sm:$0xff] }
 0x32b   : > { %v4375_v36 = vadd.f32 %v4343_v60, %v4273_v47  ;;  %v4039_v46 = vmul.f32 %v8915_v11, %v9232_v27  ;;  %v3563_v28 = vadd.f32 %v3531_v5, %v3461_v10  ;;  %v3735_v40 = vmul.f32 %v8880_v31, %v9078_v22  ;;  %v9467_v60 = vld [vmem:[#allocation5 + $0x158] sm:$0xff]  ;;  %v9493_v5 = vld [vmem:[#allocation5 + $0xf0] sm:$0xff] }
 0x32c   : > { %v4172_v0 = vadd.f32 %v4140_v26, %v4070_v58  ;;  %v3868_v61 = vadd.f32 %v3836_v4, %v3766_v21  ;;  %v4141_v41 = vmul.f32 %v9455_v56, %v9302_v62  ;;  %v4243_v7 = vmul.f32 %v8850_v63, %v9354_v16 }
 0x32d   : > { %v4477_v54 = vadd.f32 %v4445_v20, %v4375_v36  ;;  %v4345_v8 = vmul.f32 %v8875_v59, %v9412_v45  ;;  %v3665_v51 = vadd.f32 %v3633_v57, %v3563_v28  ;;  %v3837_v22 = vmul.f32 %v8892_v23, %v9133_v12  ;;  %v9504_v36 = vld [vmem:[#allocation5 + $0x160] sm:$0xff] }
 0x32e   : > { %v4274_v3 = vadd.f32 %v4242_v52, %v4172_v0  ;;  %v3969_v48 = vadd.f32 %v3937_v55, %v3868_v61  ;;  %v3462_v26 = vmul.f32 %v9469_v25, %v9347_v32  ;;  %v3532_v63 = vmul.f32 %v8866_v35, %v9401_v17  ;;  %v9510_v0 = vld [vmem:[#allocation9 + $0x14] ss:$0 sm:$0xff] }
 0x32f   : > { %v4514_v14 = vadd.f32 %v9226_v9, %v4477_v54  ;;  %v3767_v42 = vadd.f32 %v3735_v40, %v3665_v51  ;;  %v3938_v59 = vmul.f32 %v8903_v19, %v9196_v34  ;;  %v3634_v2 = vmul.f32 %v9478_v24, %v9461_v13  ;;  %v9519_v51 = vld [vmem:[#allocation9 + $0xe] ss:$0 sm:$0xff] }
 0x330   : > { %v4376_v18 = vadd.f32 %v4344_v49, %v4274_v3  ;;  %v4071_v20 = vadd.f32 %v4039_v46, %v3969_v48  ;;  %v3564_v52 = vadd.f32 %v3532_v63, %v3462_v26  ;;  %v3736_v32 = vmul.f32 %v8880_v31, %v9113_v50  ;;  %v9495_v50 = vld [vmem:[#allocation9 + $0x13] ss:$0 sm:$0xff]  ;;  %v9506_v46 = vld [vmem:[#allocation9 + $0xc] ss:$0 sm:$0xff]  ;;  %v9529_v63 = vld [vmem:[#allocation5 + $0xf8] sm:$0xff] }
 0x331   : > { %5687 = vmatmul.mubr.msk.f32.gmra.mrb[20].mxu1 %vm218_vm0, %v4514_v14  ;;  %v4447_v35 = vmul.f32 %v8967_v30, %v9467_v60  ;;  %v3869_v38 = vadd.f32 %v3837_v22, %v3767_v42  ;;  %v4040_v33 = vmul.f32 %v8915_v11, %v9258_v29  ;;  %v4142_v15 = vmul.f32 %v9455_v56, %v9320_v44 }
 0x332   : > { %v4478_v4 = vadd.f32 %v4446_v53, %v4376_v18  ;;  %v4173_v47 = vadd.f32 %v4141_v41, %v4071_v20  ;;  %v3666_v49 = vadd.f32 %v3634_v2, %v3564_v52  ;;  %v3838_v10 = vmul.f32 %v8892_v23, %v9176_v1  ;;  %v9535_v18 = vld [vmem:[#allocation5 + $0x168] sm:$0xff]  ;;  %v9537_v20 = vld [vmem:[#allocation9 + $0x10] ss:$0 sm:$0xff] }
 0x333   : > { %v3970_v31 = vadd.f32 %v3938_v59, %v3869_v38  ;;  %v4244_v57 = vmul.f32 %v9495_v50, %v9378_v43  ;;  %v3939_v58 = vmul.f32 %v8903_v19, %v9232_v27  ;;  %v3463_v21 = vmul.f32 %v9469_v25, %v9369_v37  ;;  %v9531_v59 = vld [vmem:[#allocation9 + $0xf] ss:$0 sm:$0xff] }
 0x334   : > { %v4515_v53 = vadd.f32 %v9226_v9, %v4478_v4  ;;  %v4275_v55 = vadd.f32 %v4243_v7, %v4173_v47  ;;  %v3768_v23 = vadd.f32 %v3736_v32, %v3666_v49  ;;  %v3533_v28 = vmul.f32 %v9506_v46, %v9427_v6 }
 0x335   : > { %v4072_v40 = vadd.f32 %v4040_v33, %v3970_v31  ;;  %v4346_v19 = vmul.f32 %v9510_v0, %v9435_v39  ;;  %v4041_v37 = vmul.f32 %v8915_v11, %v9302_v62  ;;  %v3635_v61 = vmul.f32 %v9478_v24, %v9493_v5 }
 0x336   : > { %5689 = vmatprep.mubr.msk.f32.mxu1 %vm218_vm0, %v4515_v53  ;;  %v4377_v41 = vadd.f32 %v4345_v8, %v4275_v55  ;;  %v3870_v7 = vadd.f32 %v3838_v10, %v3768_v23  ;;  %v3565_v54 = vadd.f32 %v3533_v28, %v3463_v21  ;;  %v3737_v22 = vmul.f32 %v9519_v51, %v9133_v12  ;;  %v9555_v21 = vld [vmem:[#allocation9 + $0x11] ss:$0 sm:$0xff] }
 0x337   : > { %v4174_v3 = vadd.f32 %v4142_v15, %v4072_v40  ;;  %v4448_v48 = vmul.f32 %v8967_v30, %v9504_v36  ;;  %v4143_v11 = vmul.f32 %v9455_v56, %v9354_v16  ;;  %v4245_v26 = vmul.f32 %v9495_v50, %v9412_v45  ;;  %v3600_v40 = vld [vmem:[#allocation5 + $0x100] sm:$0xff] }
 0x338   : > { %v4479_v8 = vadd.f32 %v4447_v35, %v4377_v41  ;;  %v3971_v14 = vadd.f32 %v3939_v58, %v3870_v7  ;;  %v3667_v42 = vadd.f32 %v3635_v61, %v3565_v54  ;;  %v3839_v12 = vmul.f32 %v9531_v59, %v9196_v34  ;;  %v9568_v7 = vld [vmem:[#allocation5 + $0x170] sm:$0xff] }
 0x339   : > { %v4276_v2 = vadd.f32 %v4244_v57, %v4174_v3  ;;  %v3940_v52 = vmul.f32 %v9537_v20, %v9258_v29  ;;  %v3464_v32 = vmul.f32 %v9469_v25, %v9401_v17  ;;  %v3534_v35 = vmul.f32 %v9506_v46, %v9461_v13 }
 0x33a   : > { %v4516_v38 = vadd.f32 %v9226_v9, %v4479_v8  ;;  %v4073_v33 = vadd.f32 %v4041_v37, %v3971_v14  ;;  %v3769_v15 = vadd.f32 %v3737_v22, %v3667_v42  ;;  %v3636_v4 = vmul.f32 %v9478_v24, %v9529_v63 }
 0x33b   : > { %v4378_v47 = vadd.f32 %v4346_v19, %v4276_v2  ;;  %v4347_v49 = vmul.f32 %v9510_v0, %v9467_v60  ;;  %v3566_v10 = vadd.f32 %v3534_v35, %v3464_v32  ;;  %v3738_v31 = vmul.f32 %v9519_v51, %v9176_v1  ;;  %v9582_v32 = vld [vmem:[#allocation9 + $0x15] ss:$0 sm:$0xff] }
 0x33c   : > { %5690 = vmatmul.mubr.msk.f32.gmra.mrb[22].mxu1 %vm218_vm0, %v4516_v38  ;;  %v4175_v17 = vadd.f32 %v4143_v11, %v4073_v33  ;;  %v4449_v57 = vmul.f32 %v8967_v30, %v9535_v18  ;;  %v3871_v58 = vadd.f32 %v3839_v12, %v3769_v15  ;;  %v4042_v53 = vmul.f32 %v9555_v21, %v9320_v44  ;;  %v3601_v33 = vld [vmem:[#allocation5 + $0x108] sm:$0xff] }
 0x33d   : > { %v4480_v55 = vadd.f32 %v4448_v48, %v4378_v47  ;;  %v4144_v23 = vmul.f32 %v9455_v56, %v9378_v43  ;;  %v3668_v28 = vadd.f32 %v3636_v4, %v3566_v10  ;;  %v3840_v1 = vmul.f32 %v9531_v59, %v9232_v27 }
 0x33e   : > { %v4277_v19 = vadd.f32 %v4245_v26, %v4175_v17  ;;  %v3972_v37 = vadd.f32 %v3940_v52, %v3871_v58  ;;  %v4246_v30 = vmul.f32 %v9495_v50, %v9435_v39  ;;  %v3941_v61 = vmul.f32 %v9537_v20, %v9302_v62  ;;  %v9597_v58 = vld [vmem:[#allocation5 + $0x178] sm:$0xff] }
 0x33f   : > { %v4517_v41 = vadd.f32 %v9226_v9, %v4480_v55  ;;  %v3770_v54 = vadd.f32 %v3738_v31, %v3668_v28  ;;  %v3465_v22 = vmul.f32 %v9469_v25, %v9427_v6  ;;  %v3535_v3 = vmul.f32 %v9506_v46, %v9493_v5 }
 0x340   : > { %v4379_v48 = vadd.f32 %v4347_v49, %v4277_v19  ;;  %v4074_v11 = vadd.f32 %v4042_v53, %v3972_v37  ;;  %v4348_v26 = vmul.f32 %v9510_v0, %v9504_v36  ;;  %v3637_v8 = vmul.f32 %v9478_v24, %v3600_v40 }
 0x341   : > { %5692 = vmatprep.mubr.msk.f32.mxu1 %vm218_vm0, %v4517_v41  ;;  %v3872_v14 = vadd.f32 %v3840_v1, %v3770_v54  ;;  %v4043_v42 = vmul.f32 %v9555_v21, %v9354_v16  ;;  %v3567_v12 = vadd.f32 %v3535_v3, %v3465_v22  ;;  %v3739_v6 = vmul.f32 %v9519_v51, %v9196_v34  ;;  %v3602_v41 = vld [vmem:[#allocation5 + $0x110] sm:$0xff] }
 0x342   : > { %v4481_v2 = vadd.f32 %v4449_v57, %v4379_v48  ;;  %v4176_v52 = vadd.f32 %v4144_v23, %v4074_v11  ;;  %v4450_v35 = vmul.f32 %v9582_v32, %v9568_v7  ;;  %v4145_v38 = vmul.f32 %v9455_v56, %v9412_v45 }
 0x343   : > { %v3973_v15 = vadd.f32 %v3941_v61, %v3872_v14  ;;  %v4247_v4 = vmul.f32 %v9495_v50, %v9467_v60  ;;  %v3669_v47 = vadd.f32 %v3637_v8, %v3567_v12  ;;  %v3841_v49 = vmul.f32 %v9531_v59, %v9258_v29 }
 0x344   : > { %v4518_v34 = vadd.f32 %v9226_v9, %v4481_v2  ;;  %v4278_v10 = vadd.f32 %v4246_v30, %v4176_v52  ;;  %v3942_v31 = vmul.f32 %v9537_v20, %v9320_v44  ;;  %v3466_v17 = vmul.f32 %v9469_v25, %v9461_v13 }
 0x345   : > { %v4075_v57 = vadd.f32 %v4043_v42, %v3973_v15  ;;  %v3771_v53 = vadd.f32 %v3739_v6, %v3669_v47  ;;  %v3536_v55 = vmul.f32 %v9506_v46, %v9529_v63  ;;  %v3638_v23 = vmul.f32 %v9478_v24, %v3601_v33 }
 0x346   : > { %5693 = vmatmul.mubr.msk.f32.gmra.mrb[24].mxu1 %vm218_vm0, %v4518_v34  ;;  %v4380_v28 = vadd.f32 %v4348_v26, %v4278_v10  ;;  %v4349_v1 = vmul.f32 %v9510_v0, %v9535_v18  ;;  %v4044_v19 = vmul.f32 %v9555_v21, %v9378_v43  ;;  %v3740_v61 = vmul.f32 %v9519_v51, %v9232_v27 }
 0x347   : > { %v4177_v37 = vadd.f32 %v4145_v38, %v4075_v57  ;;  %v3873_v13 = vadd.f32 %v3841_v49, %v3771_v53  ;;  %v3568_v30 = vadd.f32 %v3536_v55, %v3466_v17  ;;  %v4451_v22 = vmul.f32 %v9582_v32, %v9597_v58 }
 0x348   : > { %v4482_v54 = vadd.f32 %v4450_v35, %v4380_v28  ;;  %v4146_v3 = vmul.f32 %v9455_v56, %v9435_v39  ;;  %v4248_v48 = vmul.f32 %v9495_v50, %v9504_v36  ;;  %v3842_v14 = vmul.f32 %v9531_v59, %v9302_v62  ;;  %v4415_v35 = vld [vmem:[#allocation5 + $0x180] sm:$0xff] }
 0x349   : > { %v4279_v11 = vadd.f32 %v4247_v4, %v4177_v37  ;;  %v3974_v26 = vadd.f32 %v3942_v31, %v3873_v13  ;;  %v3670_v8 = vadd.f32 %v3638_v23, %v3568_v30  ;;  %v3467_v27 = vmul.f32 %v9469_v25, %v9493_v5  ;;  %v3603_v31 = vld [vmem:[#allocation5 + $0x118] sm:$0xff] }
 0x34a   : > { %v4519_v42 = vadd.f32 %v9226_v9, %v4482_v54  ;;  %v3537_v12 = vmul.f32 %v9506_v46, %v3600_v40  ;;  %v3639_v6 = vmul.f32 %v9478_v24, %v3602_v41  ;;  %v3943_v15 = vmul.f32 %v9537_v20, %v9354_v16  ;;  %v4416_v54 = vld [vmem:[#allocation5 + $0x188] sm:$0xff] }
 0x34b   : > { %v4381_v2 = vadd.f32 %v4349_v1, %v4279_v11  ;;  %v4076_v52 = vadd.f32 %v4044_v19, %v3974_v26  ;;  %v3772_v38 = vadd.f32 %v3740_v61, %v3670_v8  ;;  %v4350_v4 = vmul.f32 %v9510_v0, %v9568_v7 }
 0x34c   : > { %5695 = vmatprep.mubr.msk.f32.mxu1 %vm218_vm0, %v4519_v42  ;;  %v3569_v47 = vadd.f32 %v3537_v12, %v3467_v27  ;;  %v3741_v5 = vmul.f32 %v9519_v51, %v9258_v29  ;;  %v4045_v10 = vmul.f32 %v9555_v21, %v9412_v45  ;;  %v4452_v17 = vmul.f32 %v9582_v32, %v4415_v35  ;;  %v4417_v12 = vld [vmem:[#allocation5 + $0x190] sm:$0xff] }
 0x34d   : > { %v4483_v49 = vadd.f32 %v4451_v22, %v4381_v2  ;;  %v4178_v40 = vadd.f32 %v4146_v3, %v4076_v52  ;;  %v3874_v34 = vadd.f32 %v3842_v14, %v3772_v38  ;;  %v4147_v57 = vmul.f32 %v9455_v56, %v9467_v60 }
 0x34e   : > { %v3671_v53 = vadd.f32 %v3639_v6, %v3569_v47  ;;  %v3843_v55 = vmul.f32 %v9531_v59, %v9320_v44  ;;  %v3944_v1 = vmul.f32 %v9537_v20, %v9378_v43  ;;  %v3468_v37 = vmul.f32 %v9469_v25, %v9529_v63 }
 0x34f   : > { %v4520_v23 = vadd.f32 %v9226_v9, %v4483_v49  ;;  %v4280_v28 = vadd.f32 %v4248_v48, %v4178_v40  ;;  %v3975_v29 = vadd.f32 %v3943_v15, %v3874_v34  ;;  %v3538_v13 = vmul.f32 %v9506_v46, %v3601_v33 }
 0x350   : > { %v3773_v19 = vadd.f32 %v3741_v5, %v3671_v53  ;;  %v3640_v30 = vmul.f32 %v9478_v24, %v3603_v31  ;;  %v4249_v44 = vmul.f32 %v9495_v50, %v9535_v18  ;;  %v4046_v43 = vmul.f32 %v9555_v21, %v9435_v39 }
 0x351   : > { %5696 = vmatmul.mubr.msk.f32.gmra.mrb[26].mxu1 %vm218_vm0, %v4520_v23  ;;  %v4382_v61 = vadd.f32 %v4350_v4, %v4280_v28  ;;  %v4077_v41 = vadd.f32 %v4045_v10, %v3975_v29  ;;  %v3570_v3 = vadd.f32 %v3538_v13, %v3468_v37  ;;  %v3742_v25 = vmul.f32 %v9519_v51, %v9302_v62 }
 0x352   : > { %v3875_v22 = vadd.f32 %v3843_v55, %v3773_v19  ;;  %v4351_v24 = vmul.f32 %v9510_v0, %v9597_v58  ;;  %v4148_v48 = vmul.f32 %v9455_v56, %v9504_v36  ;;  %v3844_v26 = vmul.f32 %v9531_v59, %v9354_v16 }
 0x353   : > { %v4484_v63 = vadd.f32 %v4452_v17, %v4382_v61  ;;  %v4179_v46 = vadd.f32 %v4147_v57, %v4077_v41  ;;  %v3672_v11 = vadd.f32 %v3640_v30, %v3570_v3  ;;  %v4453_v14 = vmul.f32 %v9582_v32, %v4416_v54 }
 0x354   : > { %v3976_v33 = vadd.f32 %v3944_v1, %v3875_v22  ;;  %v4250_v62 = vmul.f32 %v9495_v50, %v9568_v7  ;;  %v3945_v27 = vmul.f32 %v9537_v20, %v9412_v45  ;;  %v4352_v16 = vmul.f32 %v9510_v0, %v4415_v35  ;;  %v4418_v35 = vld [vmem:[#allocation5 + $0x198] sm:$0xff] }
 0x355   : > { %v4521_v8 = vadd.f32 %v9226_v9, %v4484_v63  ;;  %v4281_v39 = vadd.f32 %v4249_v44, %v4179_v46  ;;  %v3774_v51 = vadd.f32 %v3742_v25, %v3672_v11  ;;  %v4047_v2 = vmul.f32 %v9555_v21, %v9467_v60 }
 0x356   : > { %v4078_v42 = vadd.f32 %v4046_v43, %v3976_v33  ;;  %v4454_v15 = vmul.f32 %v9582_v32, %v4417_v12  ;;  %v4149_v4 = vmul.f32 %v9455_v56, %v9535_v18  ;;  %v4251_v5 = vmul.f32 %v9495_v50, %v9597_v58  ;;  %v9679_v50 = vld [vmem:[#allocation9 + $0x19] ss:$0 sm:$0xff] }
 0x357   : > { %5698 = vmatprep.mubr.msk.f32.mxu1 %vm218_vm0, %v4521_v8  ;;  %v4383_v36 = vadd.f32 %v4351_v24, %v4281_v39  ;;  %v3876_v59 = vadd.f32 %v3844_v26, %v3774_v51  ;;  %v4353_v21 = vmul.f32 %v9510_v0, %v4416_v54  ;;  %v4455_v10 = vmul.f32 %v9582_v32, %v4418_v35 }
 0x358   : > { %v4180_v6 = vadd.f32 %v4148_v48, %v4078_v42 }
 0x359   : > { %v4485_v52 = vadd.f32 %v4453_v14, %v4383_v36  ;;  %v3977_v7 = vadd.f32 %v3945_v27, %v3876_v59 }
 0x35a   : > { %v4282_v38 = vadd.f32 %v4250_v62, %v4180_v6 }
 0x35b   : > { %v4522_v45 = vadd.f32 %v9226_v9, %v4485_v52  ;;  %v4079_v47 = vadd.f32 %v4047_v2, %v3977_v7 }
 0x35c   : > { %v4384_v20 = vadd.f32 %v4352_v16, %v4282_v38 }
 0x35d   : > { %5699 = vmatmul.mubr.msk.f32.gmra.mrb[28].mxu1 %vm218_vm0, %v4522_v45  ;;  %v4181_v60 = vadd.f32 %v4149_v4, %v4079_v47 }
 0x35e   : > { %v4486_v49 = vadd.f32 %v4454_v15, %v4384_v20 }
 0x35f   : > { %v4283_v34 = vadd.f32 %v4251_v5, %v4181_v60 }
 0x360   : > { %v4523_v40 = vadd.f32 %v9226_v9, %v4486_v49 }
 0x361   : > { %v4385_v56 = vadd.f32 %v4353_v21, %v4283_v34 }
 0x362   : > { %5701 = vmatprep.mubr.msk.f32.mxu1 %vm218_vm0, %v4523_v40 }
 0x363   : > { %v4487_v18 = vadd.f32 %v4455_v10, %v4385_v56 }
 0x365   : > { %v4524_v31 = vadd.f32 %v9226_v9, %v4487_v18 }
 0x367   : > { %5702 = vmatmul.mubr.msk.f32.gmra.mrb[30].mxu1 %vm218_vm0, %v4524_v31 }
 0x388   : > { %v5658_v58 = vpop.f32.mrb[0].mxu1 }
 0x389   : > { %v4703_v17 = vadd.f32 %v5658_v58, %v9679_v50  ;;  %v4697_v57 = vpop.f32.mrb[1].mxu1 }
 0x38a   : > { %v4698_v0 = vadd.f32 %v9679_v50, %v4697_v57 }
 0x38b   : > { %v4857_v53 = vsub.f32 0.0, %v4703_v17 }
 0x38c   : > { %v4856_v55 = vsub.f32 0.0, %v4698_v0 }
 0x38d   : > { %v4890_v23 = vmul.f32 1.442695, %v4857_v53 }
 0x38e   : > { %v4888_v32 = vmul.f32 1.442695, %v4856_v55 }
 0x38f   : > { %5920 = vpow2.f32 %v4890_v23 }
 0x390   : > { %5922 = vpow2.f32 %v4888_v32  ;;  %v5209_v32 = vld [vmem:[%s6609_s28 + $0x8] sm:$0xff] }
 0x397   : > { %v5661_v28 = vpop.f32.mrb[2].mxu1 }
 0x398   : > { %v4713_v29 = vadd.f32 %v5661_v28, %v9679_v50  ;;  %v4707_v9 = vpop.f32.mrb[3].mxu1 }
 0x399   : > { %v4708_v1 = vadd.f32 %v9679_v50, %v4707_v9  ;;  %v5921_v19 = vpop.eup %5920  ;;  %v5208_v9 = vld [vmem:[%s6609_s28] sm:$0xff] }
 0x39a   : > { %v4859_v37 = vsub.f32 0.0, %v4713_v29  ;;  %v5923_v13 = vpop.eup %5922  ;;  %v4953_v30 = vadd.f32 1.0, %v5921_v19 }
 0x39b   : > { %v4858_v61 = vsub.f32 0.0, %v4708_v1  ;;  %v4952_v41 = vadd.f32 1.0, %v5923_v13 }
 0x39c   : > { %v4894_v44 = vmul.f32 1.442695, %v4859_v37  ;;  %5924 = vrcp.f32 %v4953_v30 }
 0x39d   : > { %v4892_v54 = vmul.f32 1.442695, %v4858_v61  ;;  %5926 = vrcp.f32 %v4952_v41 }
 0x39e   : > { %5928 = vpow2.f32 %v4894_v44 }
 0x39f   : > { %5930 = vpow2.f32 %v4892_v54 }
 0x3a6   : > { %v5925_v22 = vpop.eup %5924 }
 0x3a7   : > { %v5927_v43 = vpop.eup %5926  ;;  %v5017_v3 = vmul.f32 %v5925_v22, %v4703_v17 }
 0x3a8   : > { %v5929_v25 = vpop.eup %5928  ;;  %v5016_v63 = vmul.f32 %v5927_v43, %v4698_v0 }
 0x3a9   : > { %v5664_v46 = vpop.f32.mrb[4].mxu1  ;;  %v5931_v24 = vpop.eup %5930  ;;  %v5049_v33 = vsub.f32 0.0, %v5017_v3  ;;  %v4955_v48 = vadd.f32 1.0, %v5929_v25 }
 0x3aa   : > { %v9686_v11 = vadd.f32 %v5664_v46, %v9679_v50  ;;  %v4717_v26 = vpop.f32.mrb[5].mxu1  ;;  %v5048_v8 = vsub.f32 0.0, %v5016_v63  ;;  %v4954_v39 = vadd.f32 1.0, %v5931_v24 }
 0x3ab   : > { %v9689_v14 = vadd.f32 %v9679_v50, %v4717_v26  ;;  %v5082_v42 = vmul.f32 1.442695, %v5049_v33  ;;  %5932 = vrcp.f32 %v4955_v48 }
 0x3ac   : > { %v4861_v62 = vsub.f32 0.0, %v9686_v11  ;;  %v5080_v51 = vmul.f32 1.442695, %v5048_v8  ;;  %5934 = vrcp.f32 %v4954_v39 }
 0x3ad   : > { %v4860_v27 = vsub.f32 0.0, %v9689_v14  ;;  %5936 = vpow2.f32 %v5082_v42 }
 0x3ae   : > { %v4898_v36 = vmul.f32 1.442695, %v4861_v62  ;;  %5938 = vpow2.f32 %v5080_v51 }
 0x3af   : > { %v4896_v12 = vmul.f32 1.442695, %v4860_v27 }
 0x3b0   : > { %5940 = vpow2.f32 %v4898_v36 }
 0x3b1   : > { %5942 = vpow2.f32 %v4896_v12 }
 0x3b3   : > { %v5667_v6 = vpop.f32.mrb[6].mxu1 }
 0x3b4   : > { %v9694_v16 = vadd.f32 %v5667_v6, %v9679_v50  ;;  %v4727_v59 = vpop.f32.mrb[7].mxu1 }
 0x3b5   : > { %v9697_v2 = vadd.f32 %v9679_v50, %v4727_v59  ;;  %v5933_v52 = vpop.eup %5932 }
 0x3b6   : > { %v4863_v38 = vsub.f32 0.0, %v9694_v16  ;;  %v5935_v15 = vpop.eup %5934  ;;  %v5019_v7 = vmul.f32 %v5933_v52, %v4713_v29 }
 0x3b7   : > { %v5937_v4 = vpop.eup %5936  ;;  %v5018_v45 = vmul.f32 %v5935_v15, %v4708_v1  ;;  %v4862_v49 = vsub.f32 0.0, %v9697_v2  ;;  %v5211_v15 = vld [vmem:[%s6609_s28 + $0x18] sm:$0xff] }
 0x3b8   : > { %v4902_v20 = vmul.f32 1.442695, %v4863_v38  ;;  %v5939_v47 = vpop.eup %5938  ;;  %v5145_v5 = vadd.f32 1.0, %v5937_v4  ;;  %v5051_v35 = vsub.f32 0.0, %v5019_v7  ;;  %v5210_v4 = vld [vmem:[%s6609_s28 + $0x10] sm:$0xff] }
 0x3b9   : > { %v5144_v21 = vadd.f32 1.0, %v5939_v47  ;;  %v5050_v40 = vsub.f32 0.0, %v5018_v45  ;;  %v4900_v58 = vmul.f32 1.442695, %v4862_v49 }
 0x3ba   : > { %v5941_v60 = vpop.eup %5940  ;;  %5944 = vpow2.f32 %v4902_v20  ;;  %v5086_v10 = vmul.f32 1.442695, %v5051_v35 }
 0x3bb   : > { %v5943_v34 = vpop.eup %5942  ;;  %5946 = vrcp.f32 %v5145_v5  ;;  %v4957_v56 = vadd.f32 1.0, %v5941_v60  ;;  %v5084_v18 = vmul.f32 1.442695, %v5050_v40 }
 0x3bc   : > { %5948 = vrcp.f32 %v5144_v21  ;;  %v4956_v31 = vadd.f32 1.0, %v5943_v34 }
 0x3bd   : > { %5950 = vpow2.f32 %v5086_v10 }
 0x3be   : > { %5952 = vpow2.f32 %v5084_v18  ;;  %v5670_v17 = vpop.f32.mrb[8].mxu1 }
 0x3bf   : > { %5954 = vrcp.f32 %v4957_v56  ;;  %v9702_v57 = vadd.f32 %v5670_v17, %v9679_v50  ;;  %v4737_v0 = vpop.f32.mrb[9].mxu1 }
 0x3c0   : > { %5956 = vrcp.f32 %v4956_v31  ;;  %v9705_v53 = vadd.f32 %v9679_v50, %v4737_v0 }
 0x3c1   : > { %5958 = vpow2.f32 %v4900_v58  ;;  %v4865_v55 = vsub.f32 0.0, %v9702_v57 }
 0x3c2   : > { %v4864_v23 = vsub.f32 0.0, %v9705_v53 }
 0x3c3   : > { %v4906_v28 = vmul.f32 1.442695, %v4865_v55 }
 0x3c4   : > { %v5945_v29 = vpop.eup %5944  ;;  %v4904_v1 = vmul.f32 1.442695, %v4864_v23 }
 0x3c5   : > { %v5947_v19 = vpop.eup %5946  ;;  %v4959_v37 = vadd.f32 1.0, %v5945_v29  ;;  %5960 = vpow2.f32 %v4906_v28 }
 0x3c6   : > { %v5949_v13 = vpop.eup %5948  ;;  %v5241_v30 = vmul.f32 %v5947_v19, %v5209_v32  ;;  %5962 = vpow2.f32 %v4904_v1 }
 0x3c7   : > { %v5951_v61 = vpop.eup %5950  ;;  %v5240_v41 = vmul.f32 %v5949_v13, %v5208_v9  ;;  %5964 = vrcp.f32 %v4959_v37 }
 0x3c8   : > { %v5953_v44 = vpop.eup %5952  ;;  %5273 = vst.msk [vmem:[%s9713_s18 + $0x8] sm:$0xff] %vm218_vm0, %v5241_v30  ;;  %v5147_v54 = vadd.f32 1.0, %v5951_v61 }
 0x3c9   : > { %v5955_v22 = vpop.eup %5954  ;;  %5272 = vst.msk [vmem:[%s9713_s18] sm:$0xff] %vm218_vm0, %v5240_v41  ;;  %v5146_v43 = vadd.f32 1.0, %v5953_v44 }
 0x3ca   : > { %v5957_v3 = vpop.eup %5956  ;;  %5966 = vrcp.f32 %v5147_v54  ;;  %v5021_v25 = vmul.f32 %v5955_v22, %v9686_v11 }
 0x3cb   : > { %v5959_v63 = vpop.eup %5958  ;;  %5968 = vrcp.f32 %v5146_v43  ;;  %v5020_v46 = vmul.f32 %v5957_v3, %v9689_v14  ;;  %v5673_v24 = vpop.f32.mrb[10].mxu1 }
 0x3cc   : > { %v5053_v33 = vsub.f32 0.0, %v5021_v25  ;;  %v4958_v48 = vadd.f32 1.0, %v5959_v63  ;;  %v9722_v26 = vadd.f32 %v5673_v24, %v9679_v50  ;;  %v4747_v8 = vpop.f32.mrb[11].mxu1 }
 0x3cd   : > { %v5052_v39 = vsub.f32 0.0, %v5020_v46  ;;  %v9725_v42 = vadd.f32 %v9679_v50, %v4747_v8  ;;  %v5213_v46 = vld [vmem:[%s6609_s28 + $0x28] sm:$0xff] }
 0x3ce   : > { %v5090_v62 = vmul.f32 1.442695, %v5053_v33  ;;  %5970 = vrcp.f32 %v4958_v48  ;;  %v4867_v11 = vsub.f32 0.0, %v9722_v26  ;;  %v5212_v33 = vld [vmem:[%s6609_s28 + $0x20] sm:$0xff] }
 0x3cf   : > { %v5961_v51 = vpop.eup %5960  ;;  %v5088_v27 = vmul.f32 1.442695, %v5052_v39  ;;  %v4866_v14 = vsub.f32 0.0, %v9725_v42 }
 0x3d0   : > { %v5963_v36 = vpop.eup %5962  ;;  %5972 = vpow2.f32 %v5090_v62  ;;  %v4961_v12 = vadd.f32 1.0, %v5961_v51  ;;  %v4910_v6 = vmul.f32 1.442695, %v4867_v11 }
 0x3d1   : > { %v5965_v59 = vpop.eup %5964  ;;  %5974 = vpow2.f32 %v5088_v27  ;;  %v4960_v52 = vadd.f32 1.0, %v5963_v36  ;;  %v4908_v38 = vmul.f32 1.442695, %v4866_v14 }
 0x3d2   : > { %v5023_v7 = vmul.f32 %v5965_v59, %v9694_v16  ;;  %5976 = vrcp.f32 %v4961_v12 }
 0x3d3   : > { %5978 = vrcp.f32 %v4960_v52 }
 0x3d4   : > { %v5967_v45 = vpop.eup %5966  ;;  %v5055_v20 = vsub.f32 0.0, %v5023_v7  ;;  %5980 = vpow2.f32 %v4910_v6 }
 0x3d5   : > { %v5969_v47 = vpop.eup %5968  ;;  %v5243_v5 = vmul.f32 %v5967_v45, %v5211_v15  ;;  %5982 = vpow2.f32 %v4908_v38  ;;  %v5215_v15 = vld [vmem:[%s6609_s28 + $0x38] sm:$0xff] }
 0x3d6   : > { %v5242_v35 = vmul.f32 %v5969_v47, %v5210_v4  ;;  %v5094_v49 = vmul.f32 1.442695, %v5055_v20  ;;  %v5676_v60 = vpop.f32.mrb[12].mxu1 }
 0x3d7   : > { %5275 = vst.msk [vmem:[%s9713_s18 + $0x18] sm:$0xff] %vm218_vm0, %v5243_v5  ;;  %v9735_v21 = vadd.f32 %v5676_v60, %v9679_v50  ;;  %v4757_v40 = vpop.f32.mrb[13].mxu1 }
 0x3d8   : > { %v5971_v16 = vpop.eup %5970  ;;  %5274 = vst.msk [vmem:[%s9713_s18 + $0x10] sm:$0xff] %vm218_vm0, %v5242_v35  ;;  %5984 = vpow2.f32 %v5094_v49  ;;  %v9742_v18 = vadd.f32 %v9679_v50, %v4757_v40 }
 0x3d9   : > { %v5022_v34 = vmul.f32 %v5971_v16, %v9697_v2  ;;  %v4869_v10 = vsub.f32 0.0, %v9735_v21 }
 0x3da   : > { %v5973_v56 = vpop.eup %5972  ;;  %v4868_v1 = vsub.f32 0.0, %v9742_v18 }
 0x3db   : > { %v5975_v31 = vpop.eup %5974  ;;  %v5149_v58 = vadd.f32 1.0, %v5973_v56  ;;  %v5054_v17 = vsub.f32 0.0, %v5022_v34  ;;  %v4914_v23 = vmul.f32 1.442695, %v4869_v10 }
 0x3dc   : > { %v5977_v0 = vpop.eup %5976  ;;  %v5148_v55 = vadd.f32 1.0, %v5975_v31  ;;  %v4912_v22 = vmul.f32 1.442695, %v4868_v1 }
 0x3dd   : > { %v5979_v32 = vpop.eup %5978  ;;  %5986 = vrcp.f32 %v5149_v58  ;;  %v5092_v28 = vmul.f32 1.442695, %v5054_v17  ;;  %v5025_v29 = vmul.f32 %v5977_v0, %v9702_v57 }
 0x3de   : > { %v5981_v9 = vpop.eup %5980  ;;  %5988 = vrcp.f32 %v5148_v55  ;;  %v5024_v2 = vmul.f32 %v5979_v32, %v9705_v53  ;;  %v5214_v32 = vld [vmem:[%s6609_s28 + $0x30] sm:$0xff] }
 0x3df   : > { %v5983_v19 = vpop.eup %5982  ;;  %5990 = vpow2.f32 %v5092_v28  ;;  %v5057_v37 = vsub.f32 0.0, %v5025_v29  ;;  %v4963_v13 = vadd.f32 1.0, %v5981_v9 }
 0x3e0   : > { %v5056_v30 = vsub.f32 0.0, %v5024_v2  ;;  %v4962_v61 = vadd.f32 1.0, %v5983_v19  ;;  %5992 = vpow2.f32 %v4914_v23  ;;  %v5217_v19 = vld [vmem:[%s6609_s28 + $0x48] sm:$0xff] }
 0x3e1   : > { %v5098_v41 = vmul.f32 1.442695, %v5057_v37  ;;  %5994 = vrcp.f32 %v4963_v13  ;;  %v5679_v44 = vpop.f32.mrb[14].mxu1 }
 0x3e2   : > { %v5985_v54 = vpop.eup %5984  ;;  %v5096_v57 = vmul.f32 1.442695, %v5056_v30  ;;  %5996 = vrcp.f32 %v4962_v61  ;;  %v9748_v53 = vadd.f32 %v5679_v44, %v9679_v50  ;;  %v4767_v43 = vpop.f32.mrb[15].mxu1  ;;  %v5216_v30 = vld [vmem:[%s6609_s28 + $0x40] sm:$0xff] }
 0x3e3   : > { %v5151_v3 = vadd.f32 1.0, %v5985_v54  ;;  %5998 = vpow2.f32 %v5098_v41  ;;  %v9751_v25 = vadd.f32 %v9679_v50, %v4767_v43 }
 0x3e4   : > { %6000 = vpow2.f32 %v5096_v57  ;;  %v4871_v63 = vsub.f32 0.0, %v9748_v53 }
 0x3e5   : > { %6002 = vrcp.f32 %v5151_v3  ;;  %v4870_v24 = vsub.f32 0.0, %v9751_v25 }
 0x3e6   : > { %6004 = vpow2.f32 %v4912_v22  ;;  %v4918_v48 = vmul.f32 1.442695, %v4871_v63 }
 0x3e7   : > { %v5987_v8 = vpop.eup %5986  ;;  %v4916_v39 = vmul.f32 1.442695, %v4870_v24 }
 0x3e8   : > { %v5989_v62 = vpop.eup %5988  ;;  %v5245_v11 = vmul.f32 %v5987_v8, %v5213_v46  ;;  %6006 = vpow2.f32 %v4918_v48 }
 0x3e9   : > { %v5991_v51 = vpop.eup %5990  ;;  %v5244_v27 = vmul.f32 %v5989_v62, %v5212_v33  ;;  %6008 = vpow2.f32 %v4916_v39 }
 0x3ea   : > { %v5993_v14 = vpop.eup %5992  ;;  %5277 = vst.msk [vmem:[%s9713_s18 + $0x28] sm:$0xff] %vm218_vm0, %v5245_v11  ;;  %v5150_v36 = vadd.f32 1.0, %v5991_v51 }
 0x3eb   : > { %v5995_v12 = vpop.eup %5994  ;;  %5276 = vst.msk [vmem:[%s9713_s18 + $0x20] sm:$0xff] %vm218_vm0, %v5244_v27  ;;  %v4965_v6 = vadd.f32 1.0, %v5993_v14 }
 0x3ec   : > { %v5997_v59 = vpop.eup %5996  ;;  %6010 = vrcp.f32 %v5150_v36  ;;  %v5027_v52 = vmul.f32 %v5995_v12, %v9722_v26 }
 0x3ed   : > { %v5999_v38 = vpop.eup %5998  ;;  %v5026_v7 = vmul.f32 %v5997_v59, %v9725_v42  ;;  %6012 = vrcp.f32 %v4965_v6  ;;  %v5682_v4 = vpop.f32.mrb[16].mxu1 }
 0x3ee   : > { %v6001_v45 = vpop.eup %6000  ;;  %v5153_v20 = vadd.f32 1.0, %v5999_v38  ;;  %v5059_v47 = vsub.f32 0.0, %v5027_v52  ;;  %v9765_v5 = vadd.f32 %v5682_v4, %v9679_v50  ;;  %v4777_v35 = vpop.f32.mrb[17].mxu1 }
 0x3ef   : > { %v6003_v49 = vpop.eup %6002  ;;  %v5152_v60 = vadd.f32 1.0, %v6001_v45  ;;  %v5058_v40 = vsub.f32 0.0, %v5026_v7  ;;  %v9768_v16 = vadd.f32 %v9679_v50, %v4777_v35 }
 0x3f0   : > { %v6005_v26 = vpop.eup %6004  ;;  %v5247_v34 = vmul.f32 %v6003_v49, %v5215_v15  ;;  %6014 = vrcp.f32 %v5153_v20  ;;  %v5102_v42 = vmul.f32 1.442695, %v5059_v47  ;;  %v4873_v10 = vsub.f32 0.0, %v9765_v5  ;;  %v5219_v49 = vld [vmem:[%s6609_s28 + $0x58] sm:$0xff] }
 0x3f1   : > { %6016 = vrcp.f32 %v5152_v60  ;;  %v5100_v56 = vmul.f32 1.442695, %v5058_v40  ;;  %v4964_v31 = vadd.f32 1.0, %v6005_v26  ;;  %v4872_v58 = vsub.f32 0.0, %v9768_v16  ;;  %v5218_v26 = vld [vmem:[%s6609_s28 + $0x50] sm:$0xff] }
 0x3f2   : > { %v6007_v17 = vpop.eup %6006  ;;  %5279 = vst.msk [vmem:[%s9713_s18 + $0x38] sm:$0xff] %vm218_vm0, %v5247_v34  ;;  %6018 = vpow2.f32 %v5102_v42  ;;  %v4922_v23 = vmul.f32 1.442695, %v4873_v10 }
 0x3f3   : > { %v6009_v0 = vpop.eup %6008  ;;  %6020 = vpow2.f32 %v5100_v56  ;;  %v4967_v55 = vadd.f32 1.0, %v6007_v17  ;;  %v4920_v29 = vmul.f32 1.442695, %v4872_v58 }
 0x3f4   : > { %6022 = vrcp.f32 %v4964_v31  ;;  %v4966_v28 = vadd.f32 1.0, %v6009_v0 }
 0x3f5   : > { %6024 = vrcp.f32 %v4967_v55 }
 0x3f6   : > { %v6011_v9 = vpop.eup %6010  ;;  %6026 = vrcp.f32 %v4966_v28 }
 0x3f7   : > { %v6013_v2 = vpop.eup %6012  ;;  %v5246_v1 = vmul.f32 %v6011_v9, %v5214_v32  ;;  %6028 = vpow2.f32 %v4922_v23 }
 0x3f8   : > { %v5029_v37 = vmul.f32 %v6013_v2, %v9735_v21  ;;  %6030 = vpow2.f32 %v4920_v29  ;;  %v5685_v13 = vpop.f32.mrb[18].mxu1 }
 0x3f9   : > { %5278 = vst.msk [vmem:[%s9713_s18 + $0x30] sm:$0xff] %vm218_vm0, %v5246_v1  ;;  %v9781_v61 = vadd.f32 %v5685_v13, %v9679_v50  ;;  %v4787_v41 = vpop.f32.mrb[19].mxu1 }
 0x3fa   : > { %v6015_v44 = vpop.eup %6014  ;;  %v5061_v54 = vsub.f32 0.0, %v5029_v37  ;;  %v9784_v57 = vadd.f32 %v9679_v50, %v4787_v41 }
 0x3fb   : > { %v6017_v22 = vpop.eup %6016  ;;  %v5249_v43 = vmul.f32 %v6015_v44, %v5217_v19  ;;  %v4875_v21 = vsub.f32 0.0, %v9781_v61 }
 0x3fc   : > { %v6019_v3 = vpop.eup %6018  ;;  %v5248_v63 = vmul.f32 %v6017_v22, %v5216_v30  ;;  %v5106_v46 = vmul.f32 1.442695, %v5061_v54  ;;  %v4874_v24 = vsub.f32 0.0, %v9784_v57 }
 0x3fd   : > { %v6021_v33 = vpop.eup %6020  ;;  %5281 = vst.msk [vmem:[%s9713_s18 + $0x48] sm:$0xff] %vm218_vm0, %v5249_v43  ;;  %v5155_v48 = vadd.f32 1.0, %v6019_v3  ;;  %v4926_v8 = vmul.f32 1.442695, %v4875_v21 }
 0x3fe   : > { %v6023_v39 = vpop.eup %6022  ;;  %5280 = vst.msk [vmem:[%s9713_s18 + $0x40] sm:$0xff] %vm218_vm0, %v5248_v63  ;;  %v5154_v62 = vadd.f32 1.0, %v6021_v33  ;;  %6032 = vpow2.f32 %v5106_v46  ;;  %v4924_v11 = vmul.f32 1.442695, %v4874_v24 }
 0x3ff   : > { %v6025_v51 = vpop.eup %6024  ;;  %6034 = vrcp.f32 %v5155_v48  ;;  %v5028_v27 = vmul.f32 %v6023_v39, %v9742_v18 }
 0x400   : > { %v6027_v14 = vpop.eup %6026  ;;  %6036 = vrcp.f32 %v5154_v62  ;;  %v5031_v36 = vmul.f32 %v6025_v51, %v9748_v53 }
 0x401   : > { %v6029_v12 = vpop.eup %6028  ;;  %v5060_v6 = vsub.f32 0.0, %v5028_v27  ;;  %v5030_v59 = vmul.f32 %v6027_v14, %v9751_v25  ;;  %6038 = vpow2.f32 %v4926_v8 }
 0x402   : > { %v6031_v52 = vpop.eup %6030  ;;  %v5063_v38 = vsub.f32 0.0, %v5031_v36  ;;  %v4969_v15 = vadd.f32 1.0, %v6029_v12  ;;  %6040 = vpow2.f32 %v4924_v11 }
 0x403   : > { %v5104_v7 = vmul.f32 1.442695, %v5060_v6  ;;  %v5062_v4 = vsub.f32 0.0, %v5030_v59  ;;  %v4968_v18 = vadd.f32 1.0, %v6031_v52  ;;  %v5220_v52 = vld [vmem:[%s6609_s28 + $0x60] sm:$0xff] }
 0x404   : > { %v5110_v45 = vmul.f32 1.442695, %v5063_v38  ;;  %6042 = vrcp.f32 %v4969_v15  ;;  %v5688_v20 = vpop.f32.mrb[20].mxu1 }
 0x405   : > { %6044 = vpow2.f32 %v5104_v7  ;;  %v5108_v47 = vmul.f32 1.442695, %v5062_v4  ;;  %v9796_v53 = vadd.f32 %v5688_v20, %v9679_v50  ;;  %v4797_v35 = vpop.f32.mrb[21].mxu1  ;;  %v5223_v4 = vld [vmem:[%s6609_s28 + $0x78] sm:$0xff] }
 0x406   : > { %6046 = vpow2.f32 %v5110_v45  ;;  %v9799_v25 = vadd.f32 %v9679_v50, %v4797_v35 }
 0x407   : > { %6048 = vpow2.f32 %v5108_v47  ;;  %v4877_v60 = vsub.f32 0.0, %v9796_v53  ;;  %v5222_v47 = vld [vmem:[%s6609_s28 + $0x70] sm:$0xff] }
 0x408   : > { %v6033_v40 = vpop.eup %6032  ;;  %6050 = vrcp.f32 %v4968_v18  ;;  %v4876_v34 = vsub.f32 0.0, %v9799_v25 }
 0x409   : > { %v6035_v42 = vpop.eup %6034  ;;  %v5157_v10 = vadd.f32 1.0, %v6033_v40  ;;  %v4930_v56 = vmul.f32 1.442695, %v4877_v60 }
 0x40a   : > { %v6037_v31 = vpop.eup %6036  ;;  %v5251_v58 = vmul.f32 %v6035_v42, %v5219_v49  ;;  %v4928_v17 = vmul.f32 1.442695, %v4876_v34 }
 0x40b   : > { %v6039_v0 = vpop.eup %6038  ;;  %v5250_v55 = vmul.f32 %v6037_v31, %v5218_v26  ;;  %6052 = vrcp.f32 %v5157_v10 }
 0x40c   : > { %v6041_v23 = vpop.eup %6040  ;;  %5283 = vst.msk [vmem:[%s9713_s18 + $0x58] sm:$0xff] %vm218_vm0, %v5251_v58  ;;  %v4971_v32 = vadd.f32 1.0, %v6039_v0  ;;  %6054 = vpow2.f32 %v4930_v56 }
 0x40d   : > { %5282 = vst.msk [vmem:[%s9713_s18 + $0x50] sm:$0xff] %vm218_vm0, %v5250_v55  ;;  %v4970_v28 = vadd.f32 1.0, %v6041_v23  ;;  %6056 = vpow2.f32 %v4928_v17 }
 0x40e   : > { %v6043_v29 = vpop.eup %6042  ;;  %6058 = vrcp.f32 %v4971_v32 }
 0x40f   : > { %v6045_v9 = vpop.eup %6044  ;;  %v5033_v2 = vmul.f32 %v6043_v29, %v9765_v5  ;;  %6060 = vrcp.f32 %v4970_v28  ;;  %v5691_v1 = vpop.f32.mrb[22].mxu1  ;;  %v5221_v5 = vld [vmem:[%s6609_s28 + $0x68] sm:$0xff] }
 0x410   : > { %v6047_v19 = vpop.eup %6046  ;;  %v5156_v37 = vadd.f32 1.0, %v6045_v9  ;;  %v9811_v13 = vadd.f32 %v5691_v1, %v9679_v50  ;;  %v4807_v30 = vpop.f32.mrb[23].mxu1 }
 0x411   : > { %v6049_v41 = vpop.eup %6048  ;;  %v5159_v44 = vadd.f32 1.0, %v6047_v19  ;;  %v5065_v54 = vsub.f32 0.0, %v5033_v2  ;;  %v9814_v22 = vadd.f32 %v9679_v50, %v4807_v30 }
 0x412   : > { %v6051_v43 = vpop.eup %6050  ;;  %6062 = vrcp.f32 %v5156_v37  ;;  %v5158_v21 = vadd.f32 1.0, %v6049_v41  ;;  %v4879_v3 = vsub.f32 0.0, %v9811_v13 }
 0x413   : > { %6064 = vrcp.f32 %v5159_v44  ;;  %v5114_v63 = vmul.f32 1.442695, %v5065_v54  ;;  %v5032_v46 = vmul.f32 %v6051_v43, %v9768_v16  ;;  %v4878_v24 = vsub.f32 0.0, %v9814_v22 }
 0x414   : > { %6066 = vrcp.f32 %v5158_v21  ;;  %v4934_v33 = vmul.f32 1.442695, %v4879_v3 }
 0x415   : > { %v6053_v48 = vpop.eup %6052  ;;  %6068 = vpow2.f32 %v5114_v63  ;;  %v5064_v8 = vsub.f32 0.0, %v5032_v46  ;;  %v4932_v39 = vmul.f32 1.442695, %v4878_v24  ;;  %v5225_v46 = vld [vmem:[%s6609_s28 + $0x88] sm:$0xff] }
 0x416   : > { %v6055_v62 = vpop.eup %6054  ;;  %v5253_v11 = vmul.f32 %v6053_v48, %v5221_v5  ;;  %6070 = vpow2.f32 %v4934_v33 }
 0x417   : > { %v6057_v51 = vpop.eup %6056  ;;  %v5112_v27 = vmul.f32 1.442695, %v5064_v8  ;;  %v4973_v14 = vadd.f32 1.0, %v6055_v62  ;;  %6072 = vpow2.f32 %v4932_v39 }
 0x418   : > { %v6059_v36 = vpop.eup %6058  ;;  %5285 = vst.msk [vmem:[%s9713_s18 + $0x68] sm:$0xff] %vm218_vm0, %v5253_v11  ;;  %v4972_v16 = vadd.f32 1.0, %v6057_v51 }
 0x419   : > { %v6061_v12 = vpop.eup %6060  ;;  %6074 = vpow2.f32 %v5112_v27  ;;  %v5035_v6 = vmul.f32 %v6059_v36, %v9781_v61  ;;  %v5694_v59 = vpop.f32.mrb[24].mxu1  ;;  %v5224_v36 = vld [vmem:[%s6609_s28 + $0x80] sm:$0xff] }
 0x41a   : > { %v5034_v38 = vmul.f32 %v6061_v12, %v9784_v57  ;;  %6076 = vrcp.f32 %v4973_v14  ;;  %v9826_v15 = vadd.f32 %v5694_v59, %v9679_v50  ;;  %v4817_v7 = vpop.f32.mrb[25].mxu1 }
 0x41b   : > { %v5067_v45 = vsub.f32 0.0, %v5035_v6  ;;  %6078 = vrcp.f32 %v4972_v16  ;;  %v9830_v18 = vadd.f32 %v9679_v50, %v4817_v7 }
 0x41c   : > { %v6063_v20 = vpop.eup %6062  ;;  %v5066_v61 = vsub.f32 0.0, %v5034_v38  ;;  %v4881_v35 = vsub.f32 0.0, %v9826_v15 }
 0x41d   : > { %v6065_v49 = vpop.eup %6064  ;;  %v5252_v57 = vmul.f32 %v6063_v20, %v5220_v52  ;;  %v5118_v60 = vmul.f32 1.442695, %v5067_v45  ;;  %v4880_v40 = vsub.f32 0.0, %v9830_v18 }
 0x41e   : > { %v6067_v26 = vpop.eup %6066  ;;  %v5255_v34 = vmul.f32 %v6065_v49, %v5223_v4  ;;  %v5116_v42 = vmul.f32 1.442695, %v5066_v61  ;;  %v4938_v10 = vmul.f32 1.442695, %v4881_v35  ;;  %v5227_v49 = vld [vmem:[%s6609_s28 + $0x98] sm:$0xff] }
 0x41f   : > { %v6069_v56 = vpop.eup %6068  ;;  %5284 = vst.msk [vmem:[%s9713_s18 + $0x60] sm:$0xff] %vm218_vm0, %v5252_v57  ;;  %v5254_v31 = vmul.f32 %v6067_v26, %v5222_v47  ;;  %6080 = vpow2.f32 %v5118_v60  ;;  %v4936_v23 = vmul.f32 1.442695, %v4880_v40  ;;  %v5226_v40 = vld [vmem:[%s6609_s28 + $0x90] sm:$0xff] }
 0x420   : > { %v6071_v58 = vpop.eup %6070  ;;  %5287 = vst.msk [vmem:[%s9713_s18 + $0x78] sm:$0xff] %vm218_vm0, %v5255_v34  ;;  %v5161_v17 = vadd.f32 1.0, %v6069_v56  ;;  %6082 = vpow2.f32 %v5116_v42 }
 0x421   : > { %v6073_v0 = vpop.eup %6072  ;;  %5286 = vst.msk [vmem:[%s9713_s18 + $0x70] sm:$0xff] %vm218_vm0, %v5254_v31  ;;  %v4975_v55 = vadd.f32 1.0, %v6071_v58  ;;  %6084 = vpow2.f32 %v4938_v10 }
 0x422   : > { %6086 = vrcp.f32 %v5161_v17  ;;  %v4974_v32 = vadd.f32 1.0, %v6073_v0 }
 0x423   : > { %v6075_v28 = vpop.eup %6074  ;;  %6088 = vrcp.f32 %v4975_v55 }
 0x424   : > { %v6077_v29 = vpop.eup %6076  ;;  %v5160_v9 = vadd.f32 1.0, %v6075_v28  ;;  %6090 = vrcp.f32 %v4974_v32  ;;  %v5697_v2 = vpop.f32.mrb[26].mxu1 }
 0x425   : > { %v6079_v1 = vpop.eup %6078  ;;  %v5037_v19 = vmul.f32 %v6077_v29, %v9796_v53  ;;  %6092 = vpow2.f32 %v4936_v23  ;;  %v9843_v37 = vadd.f32 %v5697_v2, %v9679_v50  ;;  %v4827_v30 = vpop.f32.mrb[27].mxu1 }
 0x426   : > { %6094 = vrcp.f32 %v5160_v9  ;;  %v5036_v41 = vmul.f32 %v6079_v1, %v9799_v25  ;;  %v9847_v44 = vadd.f32 %v9679_v50, %v4827_v30 }
 0x427   : > { %v5069_v54 = vsub.f32 0.0, %v5037_v19  ;;  %v4883_v21 = vsub.f32 0.0, %v9843_v37 }
 0x428   : > { %v5068_v43 = vsub.f32 0.0, %v5036_v41  ;;  %v4882_v63 = vsub.f32 0.0, %v9847_v44 }
 0x429   : > { %v6081_v3 = vpop.eup %6080  ;;  %v5122_v5 = vmul.f32 1.442695, %v5069_v54  ;;  %v4942_v62 = vmul.f32 1.442695, %v4883_v21 }
 0x42a   : > { %v6083_v53 = vpop.eup %6082  ;;  %v5163_v24 = vadd.f32 1.0, %v6081_v3  ;;  %v5120_v33 = vmul.f32 1.442695, %v5068_v43  ;;  %v4940_v27 = vmul.f32 1.442695, %v4882_v63 }
 0x42b   : > { %v6085_v48 = vpop.eup %6084  ;;  %v5162_v8 = vadd.f32 1.0, %v6083_v53  ;;  %6096 = vpow2.f32 %v5122_v5 }
 0x42c   : > { %v6087_v25 = vpop.eup %6086  ;;  %6098 = vrcp.f32 %v5163_v24  ;;  %v4977_v39 = vadd.f32 1.0, %v6085_v48  ;;  %v5229_v24 = vld [vmem:[%s6609_s28 + $0xa8] sm:$0xff] }
 0x42d   : > { %v6089_v11 = vpop.eup %6088  ;;  %v5257_v51 = vmul.f32 %v6087_v25, %v5225_v46  ;;  %6100 = vrcp.f32 %v5162_v8 }
 0x42e   : > { %v6091_v14 = vpop.eup %6090  ;;  %6102 = vpow2.f32 %v5120_v33  ;;  %v5039_v16 = vmul.f32 %v6089_v11, %v9811_v13  ;;  %v5228_v11 = vld [vmem:[%s6609_s28 + $0xa0] sm:$0xff] }
 0x42f   : > { %v6093_v12 = vpop.eup %6092  ;;  %5289 = vst.msk [vmem:[%s9713_s18 + $0x88] sm:$0xff] %vm218_vm0, %v5257_v51  ;;  %v5038_v6 = vmul.f32 %v6091_v14, %v9814_v22  ;;  %6104 = vrcp.f32 %v4977_v39 }
 0x430   : > { %v6095_v59 = vpop.eup %6094  ;;  %v5071_v52 = vsub.f32 0.0, %v5039_v16  ;;  %v4976_v38 = vadd.f32 1.0, %v6093_v12  ;;  %6106 = vpow2.f32 %v4942_v62  ;;  %v5700_v7 = vpop.f32.mrb[28].mxu1 }
 0x431   : > { %v5256_v4 = vmul.f32 %v6095_v59, %v5224_v36  ;;  %v5070_v45 = vsub.f32 0.0, %v5038_v6  ;;  %6108 = vpow2.f32 %v4940_v27  ;;  %v9858_v20 = vadd.f32 %v5700_v7, %v9679_v50  ;;  %v4837_v13 = vpop.f32.mrb[29].mxu1  ;;  %v5231_v59 = vld [vmem:[%s6609_s28 + $0xb8] sm:$0xff]  ;;  %v5230_v7 = vld [vmem:[%s6609_s28 + $0xb0] sm:$0xff] }
 0x432   : > { %v5126_v47 = vmul.f32 1.442695, %v5071_v52  ;;  %6110 = vrcp.f32 %v4976_v38  ;;  %v9861_v61 = vadd.f32 %v9679_v50, %v4837_v13 }
 0x433   : > { %5288 = vst.msk [vmem:[%s9713_s18 + $0x80] sm:$0xff] %vm218_vm0, %v5256_v4  ;;  %v5124_v22 = vmul.f32 1.442695, %v5070_v45  ;;  %v4885_v35 = vsub.f32 0.0, %v9858_v20 }
 0x434   : > { %6112 = vpow2.f32 %v5126_v47  ;;  %v4884_v57 = vsub.f32 0.0, %v9861_v61 }
 0x435   : > { %v6097_v60 = vpop.eup %6096  ;;  %6114 = vpow2.f32 %v5124_v22  ;;  %v4946_v26 = vmul.f32 1.442695, %v4885_v35 }
 0x436   : > { %v6099_v34 = vpop.eup %6098  ;;  %v5165_v42 = vadd.f32 1.0, %v6097_v60  ;;  %v4944_v10 = vmul.f32 1.442695, %v4884_v57 }
 0x437   : > { %v6101_v56 = vpop.eup %6100  ;;  %v5259_v31 = vmul.f32 %v6099_v34, %v5227_v49  ;;  %6116 = vpow2.f32 %v4946_v26 }
 0x438   : > { %v6103_v58 = vpop.eup %6102  ;;  %v5258_v17 = vmul.f32 %v6101_v56, %v5226_v40  ;;  %6118 = vrcp.f32 %v5165_v42 }
 0x439   : > { %v6105_v0 = vpop.eup %6104  ;;  %5291 = vst.msk [vmem:[%s9713_s18 + $0x98] sm:$0xff] %vm218_vm0, %v5259_v31  ;;  %v5164_v55 = vadd.f32 1.0, %v6103_v58  ;;  %6120 = vpow2.f32 %v4944_v10 }
 0x43a   : > { %v6107_v23 = vpop.eup %6106  ;;  %5290 = vst.msk [vmem:[%s9713_s18 + $0x90] sm:$0xff] %vm218_vm0, %v5258_v17  ;;  %v5041_v32 = vmul.f32 %v6105_v0, %v9826_v15  ;;  %v5703_v9 = vpop.f32.mrb[30].mxu1 }
 0x43b   : > { %v6109_v28 = vpop.eup %6108  ;;  %6122 = vrcp.f32 %v5164_v55  ;;  %v4979_v29 = vadd.f32 1.0, %v6107_v23  ;;  %v9875_v30 = vadd.f32 %v5703_v9, %v9679_v50  ;;  %v4847_v41 = vpop.f32.mrb[31].mxu1  ;;  %v5233_v23 = vld [vmem:[%s6609_s28 + $0xc8] sm:$0xff]  ;;  %v5232_v9 = vld [vmem:[%s6609_s28 + $0xc0] sm:$0xff] }
 0x43c   : > { %v6111_v2 = vpop.eup %6110  ;;  %v5073_v1 = vsub.f32 0.0, %v5041_v32  ;;  %v4978_v19 = vadd.f32 1.0, %v6109_v28  ;;  %v9879_v43 = vadd.f32 %v9679_v50, %v4847_v41 }
 0x43d   : > { %v5040_v54 = vmul.f32 %v6111_v2, %v9830_v18  ;;  %6124 = vrcp.f32 %v4979_v29  ;;  %v4887_v3 = vsub.f32 0.0, %v9875_v30 }
 0x43e   : > { %v6113_v21 = vpop.eup %6112  ;;  %v5130_v15 = vmul.f32 1.442695, %v5073_v1  ;;  %6126 = vrcp.f32 %v4978_v19  ;;  %v4886_v46 = vsub.f32 0.0, %v9879_v43 }
 0x43f   : > { %v6115_v5 = vpop.eup %6114  ;;  %v5167_v63 = vadd.f32 1.0, %v6113_v21  ;;  %v5072_v53 = vsub.f32 0.0, %v5040_v54  ;;  %v4950_v50 = vmul.f32 1.442695, %v4887_v3 }
 0x440   : > { %v5166_v33 = vadd.f32 1.0, %v6115_v5  ;;  %6128 = vpow2.f32 %v5130_v15  ;;  %v4948_v51 = vmul.f32 1.442695, %v4886_v46 }
 0x441   : > { %v6117_v18 = vpop.eup %6116  ;;  %6130 = vrcp.f32 %v5167_v63  ;;  %v5128_v48 = vmul.f32 1.442695, %v5072_v53 }
 0x442   : > { %v6119_v8 = vpop.eup %6118  ;;  %6132 = vrcp.f32 %v5166_v33  ;;  %v4981_v25 = vadd.f32 1.0, %v6117_v18 }
 0x443   : > { %v6121_v39 = vpop.eup %6120  ;;  %v5261_v62 = vmul.f32 %v6119_v8, %v5229_v24  ;;  %6134 = vpow2.f32 %v5128_v48  ;;  %v5235_v48 = vld [vmem:[%s6609_s28 + $0xd8] sm:$0xff]  ;;  %v5234_v8 = vld [vmem:[%s6609_s28 + $0xd0] sm:$0xff] }
 0x444   : > { %6136 = vrcp.f32 %v4981_v25  ;;  %v4980_v27 = vadd.f32 1.0, %v6121_v39 }
 0x445   : > { %v6123_v14 = vpop.eup %6122  ;;  %5293 = vst.msk [vmem:[%s9713_s18 + $0xa8] sm:$0xff] %vm218_vm0, %v5261_v62  ;;  %6138 = vpow2.f32 %v4950_v50  ;;  %v5237_v62 = vld [vmem:[%s6609_s28 + $0xe8] sm:$0xff] }
 0x446   : > { %v5260_v36 = vmul.f32 %v6123_v14, %v5228_v11  ;;  %6140 = vrcp.f32 %v4980_v27 }
 0x447   : > { %v6125_v16 = vpop.eup %6124  ;;  %6142 = vpow2.f32 %v4948_v51  ;;  %v5236_v51 = vld [vmem:[%s6609_s28 + $0xe0] sm:$0xff] }
 0x448   : > { %v6127_v12 = vpop.eup %6126  ;;  %5292 = vst.msk [vmem:[%s9713_s18 + $0xa0] sm:$0xff] %vm218_vm0, %v5260_v36  ;;  %v5043_v6 = vmul.f32 %v6125_v16, %v9843_v37 }
 0x449   : > { %v5042_v52 = vmul.f32 %v6127_v12, %v9847_v44 }
 0x44a   : > { %v6129_v38 = vpop.eup %6128  ;;  %v5075_v4 = vsub.f32 0.0, %v5043_v6 }
 0x44b   : > { %v6131_v45 = vpop.eup %6130  ;;  %v5169_v13 = vadd.f32 1.0, %v6129_v38  ;;  %v5074_v47 = vsub.f32 0.0, %v5042_v52  ;;  %v5239_v52 = vld [vmem:[%s6609_s28 + $0xf8] sm:$0xff] }
 0x44c   : > { %v6133_v22 = vpop.eup %6132  ;;  %v5263_v35 = vmul.f32 %v6131_v45, %v5231_v59  ;;  %v5134_v49 = vmul.f32 1.442695, %v5075_v4 }
 0x44d   : > { %v6135_v57 = vpop.eup %6134  ;;  %v5262_v60 = vmul.f32 %v6133_v22, %v5230_v7  ;;  %6144 = vrcp.f32 %v5169_v13  ;;  %v5132_v40 = vmul.f32 1.442695, %v5074_v47  ;;  %v5238_v7 = vld [vmem:[%s6609_s28 + $0xf0] sm:$0xff] }
 0x44e   : > { %v6137_v26 = vpop.eup %6136  ;;  %5295 = vst.msk [vmem:[%s9713_s18 + $0xb8] sm:$0xff] %vm218_vm0, %v5263_v35  ;;  %v5168_v37 = vadd.f32 1.0, %v6135_v57  ;;  %6146 = vpow2.f32 %v5134_v49 }
 0x44f   : > { %v6139_v44 = vpop.eup %6138  ;;  %5294 = vst.msk [vmem:[%s9713_s18 + $0xb0] sm:$0xff] %vm218_vm0, %v5262_v60  ;;  %6148 = vpow2.f32 %v5132_v40  ;;  %v5045_v34 = vmul.f32 %v6137_v26, %v9858_v20 }
 0x450   : > { %v6141_v42 = vpop.eup %6140  ;;  %6150 = vrcp.f32 %v5168_v37  ;;  %v4983_v10 = vadd.f32 1.0, %v6139_v44 }
 0x451   : > { %v6143_v56 = vpop.eup %6142  ;;  %v5077_v31 = vsub.f32 0.0, %v5045_v34  ;;  %v5044_v58 = vmul.f32 %v6141_v42, %v9861_v61 }
 0x452   : > { %6152 = vrcp.f32 %v4983_v10  ;;  %v4982_v17 = vadd.f32 1.0, %v6143_v56 }
 0x453   : > { %v5138_v0 = vmul.f32 1.442695, %v5077_v31  ;;  %v5076_v55 = vsub.f32 0.0, %v5044_v58 }
 0x454   : > { %6154 = vrcp.f32 %v4982_v17 }
 0x455   : > { %6156 = vpow2.f32 %v5138_v0  ;;  %v5136_v32 = vmul.f32 1.442695, %v5076_v55 }
 0x457   : > { %v6145_v28 = vpop.eup %6144  ;;  %6158 = vpow2.f32 %v5136_v32 }
 0x458   : > { %v6147_v20 = vpop.eup %6146  ;;  %v5265_v29 = vmul.f32 %v6145_v28, %v5233_v23 }
 0x459   : > { %v6149_v2 = vpop.eup %6148  ;;  %v5171_v1 = vadd.f32 1.0, %v6147_v20 }
 0x45a   : > { %v6151_v19 = vpop.eup %6150  ;;  %5297 = vst.msk [vmem:[%s9713_s18 + $0xc8] sm:$0xff] %vm218_vm0, %v5265_v29  ;;  %v5170_v61 = vadd.f32 1.0, %v6149_v2 }
 0x45b   : > { %v5264_v41 = vmul.f32 %v6151_v19, %v5232_v9  ;;  %6160 = vrcp.f32 %v5171_v1 }
 0x45c   : > { %v6153_v54 = vpop.eup %6152  ;;  %6162 = vrcp.f32 %v5170_v61 }
 0x45d   : > { %5296 = vst.msk [vmem:[%s9713_s18 + $0xc0] sm:$0xff] %vm218_vm0, %v5264_v41  ;;  %v5047_v21 = vmul.f32 %v6153_v54, %v9875_v30 }
 0x45e   : > { %v6155_v15 = vpop.eup %6154 }
 0x45f   : > { %v6157_v3 = vpop.eup %6156  ;;  %v5079_v5 = vsub.f32 0.0, %v5047_v21  ;;  %v5046_v63 = vmul.f32 %v6155_v15, %v9879_v43 }
 0x460   : > { %v5173_v53 = vadd.f32 1.0, %v6157_v3 }
 0x461   : > { %v6159_v46 = vpop.eup %6158  ;;  %v5142_v24 = vmul.f32 1.442695, %v5079_v5  ;;  %v5078_v33 = vsub.f32 0.0, %v5046_v63 }
 0x462   : > { %6164 = vrcp.f32 %v5173_v53  ;;  %v5172_v18 = vadd.f32 1.0, %v6159_v46 }
 0x463   : > { %6166 = vpow2.f32 %v5142_v24  ;;  %v5140_v50 = vmul.f32 1.442695, %v5078_v33 }
 0x464   : > { %6168 = vrcp.f32 %v5172_v18 }
 0x465   : > { %v6161_v30 = vpop.eup %6160  ;;  %6170 = vpow2.f32 %v5140_v50 }
 0x466   : > { %v6163_v25 = vpop.eup %6162  ;;  %v5267_v43 = vmul.f32 %v6161_v30, %v5235_v48 }
 0x467   : > { %v5266_v39 = vmul.f32 %v6163_v25, %v5234_v8 }
 0x468   : > { %5299 = vst.msk [vmem:[%s9713_s18 + $0xd8] sm:$0xff] %vm218_vm0, %v5267_v43 }
 0x469   : > { %5298 = vst.msk [vmem:[%s9713_s18 + $0xd0] sm:$0xff] %vm218_vm0, %v5266_v39 }
 0x46c   : > { %v6165_v11 = vpop.eup %6164 }
 0x46d   : > { %v6167_v27 = vpop.eup %6166  ;;  %v5269_v14 = vmul.f32 %v6165_v11, %v5237_v62 }
 0x46e   : > { %v6169_v36 = vpop.eup %6168  ;;  %v5175_v16 = vadd.f32 1.0, %v6167_v27 }
 0x46f   : > { %v6171_v12 = vpop.eup %6170  ;;  %5301 = vst.msk [vmem:[%s9713_s18 + $0xe8] sm:$0xff] %vm218_vm0, %v5269_v14  ;;  %v5268_v6 = vmul.f32 %v6169_v36, %v5236_v51 }
 0x470   : > { %6172 = vrcp.f32 %v5175_v16  ;;  %v5174_v59 = vadd.f32 1.0, %v6171_v12 }
 0x471   : > { %5300 = vst.msk [vmem:[%s9713_s18 + $0xe0] sm:$0xff] %vm218_vm0, %v5268_v6 }
 0x472   : > { %6174 = vrcp.f32 %v5174_v59 }
 0x47a   : > { %v6173_v38 = vpop.eup %6172 }
 0x47b   : > { %v5271_v4 = vmul.f32 %v6173_v38, %v5239_v52 }
 0x47c   : > { %v6175_v45 = vpop.eup %6174 }
 0x47d   : > { %5303 = vst.msk [vmem:[%s9713_s18 + $0xf8] sm:$0xff] %vm218_vm0, %v5271_v4  ;;  %v5270_v13 = vmul.f32 %v6175_v45, %v5238_v7 }
 0x47f   : > { %5302 = vst.msk [vmem:[%s9713_s18 + $0xf0] sm:$0xff] %vm218_vm0, %v5270_v13 }
 0x480   : > { %6334 = shalt.err (!%p6331_p1)
}
 0x481   : > { %s6335_s10 = scalar_lea.hbm %s9926_s27, 4096  ;;  %s6339_s26 = scalar_lea.hbm %s9979_s3, 8192 }
 0x482   : > { %p6336_p13 = scmp.ne.s32.totalorder %s9926_s27, %s6335_s10  ;;  %p6340_p4 = scmp.lt.u32.totalorder %s9926_s27, %s9979_s3 }
 0x483   : > { %p6341_p5 = scmp.lt.u32.totalorder %s6339_s26, %s6335_s10  ;;  %p6343_p11 = scmp.lt.u32.totalorder %s6335_s10, %s9926_s27 }
 0x484   : > { %p6337_p6 = pnand %p6336_p13, %p10283_p0 }
 0x485   : > { %p6342_p8 = por %p6341_p5, %p6340_p4 }
 0x486   : > { %p6338_p10 = pneg %p6337_p6 }
 0x487   : > { %p6344_p2 = por %p6343_p11, %p6342_p8 }
 0x489   : > { %p6345_p3 = pnand %p6344_p2, %p6338_p10 }
 0x48b   : > { %6348 = shalt.err (!%p6345_p3)
}
 0x48c   : > { %s6400_s28 = smov 128   ;;  %s6401_s18 = smov 8  }
 0x48d   : > { %5730 = dma.vmem_to_hbm [thread:$0]  (%p10283_p0), %s9928_s7, 4096, %s9926_s27, %s5305_s16, %s6400_s28, %s6400_s28, %s6401_s18  }
 0x48e PF: > { %s5333_s20 = sand.u32 1, %s6379_s12   ;;  %p10284_p7 = scmp.ne.s32.totalorder %s10079_s19, 0 }
 0x48f   : > { %p10285_p9 = scmp.ge.s32.totalorder %s6391_s15, 2  ;;  %s5334_s8 = scalar_lea.sflag [#allocation8], %s5333_s20 }
 0x491   : > { %p5744_p12 = pnand %p10285_p9, %p10284_p7 }
 0x493   : > { %6374 = dma.done.wait (!%p5744_p12), %s5334_s8, 4096  }
 0x494   : > { %6376 = vsyncadd (!%p5744_p12), %s5334_s8, 4294963200  ;;  %p17_p1 = scmp.ge.s32.totalorder %s6538_s23, 4   ;;  %s10286_s12 = smov %s6383_s13 }
 0x495   : > { %s10287_s13 = smov %s6387_s14  ;;  %s10288_s14 = smov %s6554_s9 }
 0x496   : > { %s10289_s15 = smov %s6538_s23  ;;  %19 = sbr.rel (!%p17_p1) target bundleno = 6 (0x6), region = 104 }
 0x49d   :  { %5339 = vsyncpa [#allocation7], 1 }
 0x49e   :  { %5341 = vsyncpa [#allocation7 + $0x1], 1 }
 0x49f   :  { %5342 = vsyncpa [#allocation10], 1 }
 0x4a0   :  { %5343 = vsyncpa [#allocation8], 1 }
 0x4a1   :  { %5345 = vsyncpa [#allocation8 + $0x1], 1 }

</bundles_post_ra>
